<compile_context>
chip_gen: v7x
topology: tpu7x:2x2x1
jax: 0.10.0
libtpu: 0.0.40
codegen_flags: <defaults>
</compile_context>

<pallas_src>
import functools

import jax
import jax.numpy as jnp
from jax.experimental import pallas as pl
from jax.experimental.pallas import tpu as pltpu

LANE = 128


# ----------------------------- small helpers -----------------------------

def _rup(x, m):
    return ((x + m - 1) // m) * m


def _pick_tile(dim_pad, unit, cap):
    """Largest multiple of `unit` that divides dim_pad and is <= cap."""
    g = dim_pad // unit
    best = 1
    for m in range(1, g + 1):
        if g % m == 0 and m * unit <= cap:
            best = m
    return best * unit


def _pad_m(m):
    return _rup(m, 256) if m >= 256 else _rup(m, 8)


def _unflatten(x_pad, n, h, w, c):
    return x_pad[:n * h * w, :c].reshape(n, h, w, c)


# ----------------------------- Pallas kernels -----------------------------

def _conv_gemm_stats_kernel(x_ref, w_ref, o_ref, s_ref, q_ref):
    """Tiled GEMM (bf16 in, f32 accumulate in resident o_ref) with BatchNorm
    sum / sum-of-squares statistics fused into the last-K-step epilogue."""
    k = pl.program_id(2)

    @pl.when(k == 0)
    def _():
        o_ref[...] = jnp.zeros_like(o_ref)

    o_ref[...] += jnp.dot(x_ref[...], w_ref[...],
                          preferred_element_type=jnp.float32)

    @pl.when(k == pl.num_programs(2) - 1)
    def _():
        acc = o_ref[...]
        s = jnp.sum(acc, axis=0, keepdims=True)          # (1, tn)
        q = jnp.sum(acc * acc, axis=0, keepdims=True)    # (1, tn)
        s_ref[...] = jnp.broadcast_to(s, s_ref.shape)
        q_ref[...] = jnp.broadcast_to(q, q_ref.shape)


def _bn_apply_kernel(x_ref, s_ref, b_ref, o_ref, *, relu):
    v = x_ref[...] * s_ref[...] + b_ref[...]
    if relu:
        v = jnp.maximum(v, 0.0)
    o_ref[...] = v


def _bn_apply_res_kernel(x_ref, s_ref, b_ref, r_ref, rs_ref, rb_ref, o_ref, *, relu):
    v = (x_ref[...] * s_ref[...] + b_ref[...]
         + r_ref[...] * rs_ref[...] + rb_ref[...])
    if relu:
        v = jnp.maximum(v, 0.0)
    o_ref[...] = v


def _maxpool_kernel(p_ref, o_ref):
    # p_ref: (9, tm, tn) -> elementwise max over the 9 pooling taps
    o_ref[...] = jnp.max(p_ref[...], axis=0)


def _avgpool_kernel(x_ref, o_ref):
    # x_ref: (N, H*W, C) -> mean over spatial
    o_ref[...] = jnp.mean(x_ref[...], axis=1)


def _fc_kernel(x_ref, w_ref, b_ref, o_ref):
    o_ref[...] = (jnp.dot(x_ref[...], w_ref[...],
                          preferred_element_type=jnp.float32) + b_ref[...])


# ----------------------------- pallas_call wrappers -----------------------------

def _full_call(kernel, out_shape, *args):
    """Single-step pallas_call with full-array blocks (tiny tensors only)."""
    in_specs = [pl.BlockSpec(a.shape, lambda i, nd=a.ndim: (0,) * nd) for a in args]
    out_spec = pl.BlockSpec(out_shape.shape,
                            lambda i, nd=len(out_shape.shape): (0,) * nd)
    return pl.pallas_call(kernel, grid=(1,), in_specs=in_specs,
                          out_specs=out_spec, out_shape=out_shape)(*args)


def _gemm_stats(cols_bf16, wmat_bf16):
    mpad, kpad = cols_bf16.shape
    _, npad = wmat_bf16.shape
    tm = min(256, mpad)                       # mpad is mult. of 256 or < 256 (mult. of 8)
    tk = _pick_tile(kpad, LANE, 1024)
    tn = _pick_tile(npad, LANE, 512)          # lane-dense, fewer A re-reads when cout=512
    gm, gn, gk = mpad // tm, npad // tn, kpad // tk
    out, s, q = pl.pallas_call(
        _conv_gemm_stats_kernel,
        grid=(gm, gn, gk),
        in_specs=[pl.BlockSpec((tm, tk), lambda i, j, k: (i, k)),
                  pl.BlockSpec((tk, tn), lambda i, j, k: (k, j))],
        out_specs=(pl.BlockSpec((tm, tn), lambda i, j, k: (i, j)),
                   pl.BlockSpec((8, tn), lambda i, j, k: (i, j)),
                   pl.BlockSpec((8, tn), lambda i, j, k: (i, j))),
        out_shape=(jax.ShapeDtypeStruct((mpad, npad), jnp.float32),
                   jax.ShapeDtypeStruct((gm * 8, npad), jnp.float32),
                   jax.ShapeDtypeStruct((gm * 8, npad), jnp.float32)),
        compiler_params=pltpu.CompilerParams(
            dimension_semantics=("parallel", "parallel", "arbitrary")),
    )(cols_bf16, wmat_bf16)
    ssum = jnp.sum(s.reshape(gm, 8, npad)[:, 0, :], axis=0)
    qsum = jnp.sum(q.reshape(gm, 8, npad)[:, 0, :], axis=0)
    return out, ssum, qsum


def _bn_apply(x, scale, bias, *, relu, residual=None, rscale=None, rbias=None):
    mpad, npad = x.shape
    tm = _pick_tile(mpad, 8, 512)
    tn = _pick_tile(npad, LANE, 512)
    full = pl.BlockSpec((tm, tn), lambda i, j: (i, j))
    vec = pl.BlockSpec((1, tn), lambda i, j: (0, j))
    if residual is None:
        kernel = functools.partial(_bn_apply_kernel, relu=relu)
        args, in_specs = (x, scale, bias), [full, vec, vec]
    else:
        kernel = functools.partial(_bn_apply_res_kernel, relu=relu)
        args = (x, scale, bias, residual, rscale, rbias)
        in_specs = [full, vec, vec, full, vec, vec]
    return pl.pallas_call(
        kernel, grid=(mpad // tm, npad // tn),
        in_specs=in_specs, out_specs=full,
        out_shape=jax.ShapeDtypeStruct((mpad, npad), jnp.float32),
        compiler_params=pltpu.CompilerParams(
            dimension_semantics=("parallel", "parallel")),
    )(*args)


# ----------------------------- conv / bn / pool glue -----------------------------

def _im2col(x_nhwc, kh, kw, stride, pad, mpad, kpad):
    """NHWC -> (Mpad, Kpad) bf16 patch matrix (tap-major, channel-minor)."""
    n, h, w, c = x_nhwc.shape
    ho = (h + 2 * pad - kh) // stride + 1
    wo = (w + 2 * pad - kw) // stride + 1
    xp = jnp.pad(x_nhwc, ((0, 0), (pad, pad), (pad, pad), (0, 0)))
    taps = [xp[:, i:i + stride * ho:stride, j:j + stride * wo:stride, :]
            for i in range(kh) for j in range(kw)]
    patches = jnp.stack(taps, axis=3).reshape(n * ho * wo, kh * kw * c)
    cols = jnp.pad(patches, ((0, mpad - n * ho * wo), (0, kpad - kh * kw * c)))
    return cols.astype(jnp.bfloat16), (n, ho, wo)


def _conv_gemm(x_nhwc, wmat_bf16, kh, kw, stride, pad):
    """Conv2d (no bias) as a tiled bf16 Pallas GEMM with fused BN statistics."""
    # TODO(synk): im2col patch extraction is XLA glue (kh*kw HBM expansion for
    # 3x3/7x7 convs); an implicit-im2col Pallas pipeline would remove that traffic.
    n, h, w, _ = x_nhwc.shape
    kpad, npad = wmat_bf16.shape
    ho = (h + 2 * pad - kh) // stride + 1
    wo = (w + 2 * pad - kw) // stride + 1
    m = n * ho * wo
    mpad = _pad_m(m)
    cols, _ = _im2col(x_nhwc, kh, kw, stride, pad, mpad, kpad)
    out, ssum, qsum = _gemm_stats(cols, wmat_bf16)
    return out, ssum, qsum, (n, ho, wo), m


def _bn_coeffs(ssum, qsum, gamma_pad, beta_pad, m_real, eps=1e-5):
    """BatchNorm2d training-mode (biased) batch statistics -> scale/bias."""
    mean = ssum / m_real
    var = jnp.maximum(qsum / m_real - mean * mean, 0.0)
    scale = gamma_pad * jax.lax.rsqrt(var + eps)
    bias = beta_pad - mean * scale
    return scale.reshape(1, -1), bias.reshape(1, -1)


def _maxpool_3x3_s2_p1(x_nhwc):
    # TODO(synk): the 9 taps are still stacked in XLA glue (9x expansion, stem
    # pool only); an implicit-tap Pallas pipeline would remove that HBM traffic.
    n, h, w, c = x_nhwc.shape
    ho = (h + 2 - 3) // 2 + 1
    wo = (w + 2 - 3) // 2 + 1
    cpad = _rup(c, LANE)
    xp = jnp.pad(x_nhwc, ((0, 0), (0, 0), (0, 0), (0, cpad - c)))
    xp = jnp.pad(xp, ((0, 0), (1, 1), (1, 1), (0, 0)), constant_values=-jnp.inf)
    taps = [xp[:, i:i + 2 * ho:2, j:j + 2 * wo:2, :]
            for i in range(3) for j in range(3)]
    m = n * ho * wo
    mpad = _pad_m(m)
    p = jnp.stack(taps, axis=0).reshape(9, m, cpad)
    p = jnp.pad(p, ((0, 0), (0, mpad - m), (0, 0)))
    tm = min(256, mpad)
    tn = _pick_tile(cpad, LANE, 512)
    out = pl.pallas_call(
        _maxpool_kernel, grid=(mpad // tm, cpad // tn),
        in_specs=[pl.BlockSpec((9, tm, tn), lambda i, j: (0, i, j))],
        out_specs=pl.BlockSpec((tm, tn), lambda i, j: (i, j)),
        out_shape=jax.ShapeDtypeStruct((mpad, cpad), jnp.float32),
        compiler_params=pltpu.CompilerParams(
            dimension_semantics=("parallel", "parallel")),
    )(p)
    return out[:m, :c].reshape(n, ho, wo, c)


# ----------------------------- ResNet structure -----------------------------

def _basic_block(x_nhwc, p, planes, stride):
    n0, h0, w0, c0 = x_nhwc.shape
    # conv1 -> bn1 -> relu
    o1, s1, q1, (n, ho, wo), m1 = _conv_gemm(x_nhwc, p['conv1_w'], 3, 3, stride, 1)
    sc1, b1 = _bn_coeffs(s1, q1, p['bn1_g'], p['bn1_b'], m1)
    a1 = _bn_apply(o1, sc1, b1, relu=True)
    a1_nhwc = _unflatten(a1, n, ho, wo, planes)
    # conv2 -> bn2 (+ residual incl. downsample BN) -> relu, one fused kernel
    o2, s2, q2, _, m2 = _conv_gemm(a1_nhwc, p['conv2_w'], 3, 3, 1, 1)
    sc2, b2 = _bn_coeffs(s2, q2, p['bn2_g'], p['bn2_b'], m2)
    mpad, npad = o2.shape
    if 'ds_w' in p:
        od, sd, qd, _, md = _conv_gemm(x_nhwc, p['ds_w'], 1, 1, stride, 0)
        scd, bd = _bn_coeffs(sd, qd, p['ds_g'], p['ds_b'], md)
        r, rs, rb = od, scd, bd
    else:
        ident = x_nhwc.reshape(n0 * h0 * w0, c0)
        r = jnp.pad(ident, ((0, mpad - n0 * h0 * w0), (0, npad - c0)))
        rs = jnp.ones((1, npad), jnp.float32)
        rb = jnp.zeros((1, npad), jnp.float32)
    out = _bn_apply(o2, sc2, b2, relu=True, residual=r, rscale=rs, rbias=rb)
    return _unflatten(out, n, ho, wo, planes)


def resnet_forward(x_nchw, params, *, num_classes=10):
    x = jnp.transpose(x_nchw, (0, 2, 3, 1)).astype(jnp.float32)   # NCHW -> NHWC
    # stem: conv7x7/s2 -> BN -> ReLU -> maxpool3x3/s2
    o, s, q, (n, ho, wo), m = _conv_gemm(x, params['conv1_w'], 7, 7, 2, 3)
    sc, b = _bn_coeffs(s, q, params['bn1_g'], params['bn1_b'], m)
    a = _bn_apply(o, sc, b, relu=True)
    x = _unflatten(a, n, ho, wo, 64)
    x = _maxpool_3x3_s2_p1(x)
    # residual stages
    planes_list = (64, 128, 256, 512)
    for li, layer in enumerate(params['layers']):
        for bi, blk in enumerate(layer):
            stride = 2 if (li > 0 and bi == 0) else 1
            x = _basic_block(x, blk, planes_list[li], stride)
    # adaptive avgpool(1,1) + flatten + fc
    nb, hf, wf, c = x.shape
    pooled = _full_call(_avgpool_kernel,
                        jax.ShapeDtypeStruct((nb, c), jnp.float32),
                        x.reshape(nb, hf * wf, c))
    nbp = _rup(nb, 8)
    xin = jnp.pad(pooled, ((0, nbp - nb), (0, 0))).astype(jnp.bfloat16)
    ncp = params['fc_w'].shape[1]
    logits = _full_call(_fc_kernel,
                        jax.ShapeDtypeStruct((nbp, ncp), jnp.float32),
                        xin, params['fc_w'], params['fc_b'])
    return logits[:nb, :num_classes]


# ----------------------------- parameter init / prep -----------------------------

def _kaiming_conv(key, cout, cin, kh, kw):
    # kaiming_normal_ mode='fan_out', nonlinearity='relu'
    fan_out = cout * kh * kw
    std = (2.0 / fan_out) ** 0.5
    return jax.random.normal(key, (cout, cin, kh, kw), jnp.float32) * std


def _prep_conv(w_oihw):
    """OIHW f32 -> pre-transposed, 128-padded, bf16 (Kpad, Cout_pad) GEMM weight."""
    cout, cin, kh, kw = w_oihw.shape
    k = kh * kw * cin
    kpad, npad = _rup(k, LANE), _rup(cout, LANE)
    wm = jnp.transpose(w_oihw, (2, 3, 1, 0)).reshape(k, cout)
    wm = jnp.pad(wm, ((0, kpad - k), (0, npad - cout)))
    return wm.astype(jnp.bfloat16)


def _prep_bn(c):
    npad = _rup(c, LANE)
    gamma = jnp.pad(jnp.ones((c,), jnp.float32), (0, npad - c))
    beta = jnp.zeros((npad,), jnp.float32)
    return gamma, beta


def init_params(key, layers=(1, 1, 1, 1), num_classes=10):
    keys = iter(jax.random.split(key, 64))
    params = {'conv1_w': _prep_conv(_kaiming_conv(next(keys), 64, 3, 7, 7))}
    params['bn1_g'], params['bn1_b'] = _prep_bn(64)
    inplanes = 64
    layer_params = []
    for li, (planes, blocks) in enumerate(zip((64, 128, 256, 512), layers)):
        stage_stride = 1 if li == 0 else 2
        blk_list = []
        for bi in range(blocks):
            s = stage_stride if bi == 0 else 1
            p = {
                'conv1_w': _prep_conv(_kaiming_conv(next(keys), planes, inplanes, 3, 3)),
                'conv2_w': _prep_conv(_kaiming_conv(next(keys), planes, planes, 3, 3)),
            }
            p['bn1_g'], p['bn1_b'] = _prep_bn(planes)
            p['bn2_g'], p['bn2_b'] = _prep_bn(planes)
            if s != 1 or inplanes != planes:
                p['ds_w'] = _prep_conv(_kaiming_conv(next(keys), planes, inplanes, 1, 1))
                p['ds_g'], p['ds_b'] = _prep_bn(planes)
            inplanes = planes
            blk_list.append(p)
        layer_params.append(blk_list)
    params['layers'] = layer_params
    # nn.Linear default init: U(-1/sqrt(fan_in), 1/sqrt(fan_in)); pad classes to 128 lanes
    kw_, kb_ = jax.random.split(next(keys))
    bound = 1.0 / (512 ** 0.5)
    ncp = _rup(num_classes, LANE)
    fcw = jax.random.uniform(kw_, (512, num_classes), jnp.float32, -bound, bound)
    fcb = jax.random.uniform(kb_, (num_classes,), jnp.float32, -bound, bound)
    params['fc_w'] = jnp.pad(fcw, ((0, 0), (0, ncp - num_classes))).astype(jnp.bfloat16)
    params['fc_b'] = jnp.pad(fcb, (0, ncp - num_classes)).reshape(1, ncp)
    return params


# ----------------------------- main -----------------------------

if __name__ == "__main__":
    key = jax.random.PRNGKey(0)
    pkey, xkey = jax.random.split(key)

    # ResNet(BasicBlock, [1,1,1,1], num_classes=10) on a small 32x32 input.
    params = init_params(pkey, layers=(1, 1, 1, 1), num_classes=10)
    x = jax.random.normal(xkey, (2, 3, 32, 32), jnp.float32)  # NCHW like PyTorch

    fwd = jax.jit(functools.partial(resnet_forward, num_classes=10))
    out = jax.block_until_ready(fwd(x, params))

    assert out.shape == (2, 10), out.shape
    assert bool(jnp.all(jnp.isfinite(out)))
    print("KERNEL_OK")
</pallas_src>

<mosaic_0001>
module attributes {stable_mosaic.version = 11 : i64} {
  func.func @_conv_gemm_stats_kernel(%arg0: i32, %arg1: i32, %arg2: i32, %arg3: memref<256x256xbf16, #tpu.memory_space<vmem>>, %arg4: memref<256x128xbf16, #tpu.memory_space<vmem>>, %arg5: memref<256x128xf32, #tpu.memory_space<vmem>>, %arg6: memref<8x128xf32, #tpu.memory_space<vmem>>, %arg7: memref<8x128xf32, #tpu.memory_space<vmem>>) attributes {dimension_semantics = [#tpu.dimension_semantics<parallel>, #tpu.dimension_semantics<parallel>, #tpu.dimension_semantics<arbitrary>], iteration_bounds = array<i64: 2, 1, 1>, scalar_prefetch = 0 : i64, scratch_operands = 0 : i64, tpu.core_type = #tpu.core_type<tc>, window_params = [{transform_indices = @transform_0, window_bounds = array<i64: 256, 256>}, {transform_indices = @transform_1, window_bounds = array<i64: 256, 128>}, {transform_indices = @transform_2, window_bounds = array<i64: 256, 128>}, {transform_indices = @transform_3, window_bounds = array<i64: 8, 128>}, {transform_indices = @transform_4, window_bounds = array<i64: 8, 128>}]} {
    %c0_i32 = arith.constant 0 : i32
    %0 = arith.cmpi eq, %arg2, %c0_i32 : i32
    %1 = arith.extui %0 : i1 to i32
    %c0_i32_0 = arith.constant 0 : i32
    %2 = arith.cmpi ne, %1, %c0_i32_0 : i32
    scf.if %2 {
      %cst_10 = arith.constant 0.000000e+00 : f32
      %12 = vector.broadcast %cst_10 : f32 to vector<256x128xf32>
      %c0_11 = arith.constant 0 : index
      %c0_12 = arith.constant 0 : index
      %13 = vector.load %arg5[%c0_11, %c0_12] : memref<256x128xf32, #tpu.memory_space<vmem>>, vector<256x128xf32>
      tpu.vector_store %arg5[%c0_11, %c0_12], %12 {strides = array<i32>} : memref<256x128xf32, #tpu.memory_space<vmem>>, vector<256x128xf32>,
    } else {
    }
    %c0 = arith.constant 0 : index
    %c0_1 = arith.constant 0 : index
    %3 = vector.load %arg5[%c0, %c0_1] : memref<256x128xf32, #tpu.memory_space<vmem>>, vector<256x128xf32>
    %c0_2 = arith.constant 0 : index
    %c0_3 = arith.constant 0 : index
    %4 = vector.load %arg3[%c0_2, %c0_3] : memref<256x256xbf16, #tpu.memory_space<vmem>>, vector<256x256xbf16>
    %c0_4 = arith.constant 0 : index
    %c0_5 = arith.constant 0 : index
    %5 = vector.load %arg4[%c0_4, %c0_5] : memref<256x128xbf16, #tpu.memory_space<vmem>>, vector<256x128xbf16>
    %cst = arith.constant dense<0.000000e+00> : vector<256x128xf32>
    %6 = tpu.matmul %4, %5, %cst {dimension_numbers = #tpu.dot_dimension_numbers<[1], [0], [0], [1], [0, 0, 1, 1], [], []>} : vector<256x256xbf16>, vector<256x128xbf16>, vector<256x128xf32> -> vector<256x128xf32>
    %7 = arith.addf %3, %6 : vector<256x128xf32>
    %c0_6 = arith.constant 0 : index
    %c0_7 = arith.constant 0 : index
    %8 = vector.load %arg5[%c0_6, %c0_7] : memref<256x128xf32, #tpu.memory_space<vmem>>, vector<256x128xf32>
    tpu.vector_store %arg5[%c0_6, %c0_7], %7 {strides = array<i32>} : memref<256x128xf32, #tpu.memory_space<vmem>>, vector<256x128xf32>,
    %c0_i32_8 = arith.constant 0 : i32
    %9 = arith.cmpi eq, %arg2, %c0_i32_8 : i32
    %10 = arith.extui %9 : i1 to i32
    %c0_i32_9 = arith.constant 0 : i32
    %11 = arith.cmpi ne, %10, %c0_i32_9 : i32
    scf.if %11 {
      %c0_10 = arith.constant 0 : index
      %c0_11 = arith.constant 0 : index
      %12 = vector.load %arg5[%c0_10, %c0_11] : memref<256x128xf32, #tpu.memory_space<vmem>>, vector<256x128xf32>
      %cst_12 = arith.constant dense<0.000000e+00> : vector<128xf32>
      %13 = vector.multi_reduction <add>, %12, %cst_12 [0] : vector<256x128xf32> to vector<128xf32>
      %14 = vector.shape_cast %13 : vector<128xf32> to vector<1x128xf32>
      %15 = arith.mulf %12, %12 : vector<256x128xf32>
      %cst_13 = arith.constant dense<0.000000e+00> : vector<128xf32>
      %16 = vector.multi_reduction <add>, %15, %cst_13 [0] : vector<256x128xf32> to vector<128xf32>
      %17 = vector.shape_cast %16 : vector<128xf32> to vector<1x128xf32>
      %18 = vector.shape_cast %14 : vector<1x128xf32> to vector<1x128xf32>
      %19 = vector.broadcast %18 : vector<1x128xf32> to vector<8x128xf32>
      %c0_14 = arith.constant 0 : index
      %c0_15 = arith.constant 0 : index
      %20 = vector.load %arg6[%c0_14, %c0_15] : memref<8x128xf32, #tpu.memory_space<vmem>>, vector<8x128xf32>
      tpu.vector_store %arg6[%c0_14, %c0_15], %19 {strides = array<i32>} : memref<8x128xf32, #tpu.memory_space<vmem>>, vector<8x128xf32>,
      %21 = vector.shape_cast %17 : vector<1x128xf32> to vector<1x128xf32>
      %22 = vector.broadcast %21 : vector<1x128xf32> to vector<8x128xf32>
      %c0_16 = arith.constant 0 : index
      %c0_17 = arith.constant 0 : index
      %23 = vector.load %arg7[%c0_16, %c0_17] : memref<8x128xf32, #tpu.memory_space<vmem>>, vector<8x128xf32>
      tpu.vector_store %arg7[%c0_16, %c0_17], %22 {strides = array<i32>} : memref<8x128xf32, #tpu.memory_space<vmem>>, vector<8x128xf32>,
    } else {
    }
    return
  }
  func.func @transform_0(%arg0: i32, %arg1: i32, %arg2: i32) -> (i32, i32) {
    %c0_i32 = arith.constant 0 : i32
    return %arg0, %arg2 : i32, i32
  }
  func.func @transform_1(%arg0: i32, %arg1: i32, %arg2: i32) -> (i32, i32) {
    %c0_i32 = arith.constant 0 : i32
    return %arg2, %arg1 : i32, i32
  }
  func.func @transform_2(%arg0: i32, %arg1: i32, %arg2: i32) -> (i32, i32) {
    %c0_i32 = arith.constant 0 : i32
    return %arg0, %arg1 : i32, i32
  }
  func.func @transform_3(%arg0: i32, %arg1: i32, %arg2: i32) -> (i32, i32) {
    %c0_i32 = arith.constant 0 : i32
    return %arg0, %arg1 : i32, i32
  }
  func.func @transform_4(%arg0: i32, %arg1: i32, %arg2: i32) -> (i32, i32) {
    %c0_i32 = arith.constant 0 : i32
    return %arg0, %arg1 : i32, i32
  }
}

module attributes {stable_mosaic.version = 11 : i64} {
  func.func @_bn_apply_kernel(%arg0: i32, %arg1: i32, %arg2: memref<512x128xf32, #tpu.memory_space<vmem>>, %arg3: memref<1x128xf32, #tpu.memory_space<vmem>>, %arg4: memref<1x128xf32, #tpu.memory_space<vmem>>, %arg5: memref<512x128xf32, #tpu.memory_space<vmem>>) attributes {dimension_semantics = [#tpu.dimension_semantics<parallel>, #tpu.dimension_semantics<parallel>], iteration_bounds = array<i64: 1, 1>, scalar_prefetch = 0 : i64, scratch_operands = 0 : i64, tpu.core_type = #tpu.core_type<tc>, window_params = [{transform_indices = @transform_0, window_bounds = array<i64: 512, 128>}, {transform_indices = @transform_1, window_bounds = array<i64: 1, 128>}, {transform_indices = @transform_2, window_bounds = array<i64: 1, 128>}, {transform_indices = @transform_3, window_bounds = array<i64: 512, 128>}]} {
    %c0 = arith.constant 0 : index
    %c0_0 = arith.constant 0 : index
    %0 = vector.load %arg2[%c0, %c0_0] : memref<512x128xf32, #tpu.memory_space<vmem>>, vector<512x128xf32>
    %c0_1 = arith.constant 0 : index
    %c0_2 = arith.constant 0 : index
    %1 = vector.load %arg3[%c0_1, %c0_2] : memref<1x128xf32, #tpu.memory_space<vmem>>, vector<1x128xf32>
    %2 = vector.broadcast %1 : vector<1x128xf32> to vector<512x128xf32>
    %3 = arith.mulf %0, %2 : vector<512x128xf32>
    %c0_3 = arith.constant 0 : index
    %c0_4 = arith.constant 0 : index
    %4 = vector.load %arg4[%c0_3, %c0_4] : memref<1x128xf32, #tpu.memory_space<vmem>>, vector<1x128xf32>
    %5 = vector.broadcast %4 : vector<1x128xf32> to vector<512x128xf32>
    %6 = arith.addf %3, %5 : vector<512x128xf32>
    %cst = arith.constant 0.000000e+00 : f32
    %7 = vector.broadcast %cst : f32 to vector<512x128xf32>
    %8 = arith.maximumf %6, %7 : vector<512x128xf32>
    %c0_5 = arith.constant 0 : index
    %c0_6 = arith.constant 0 : index
    %9 = vector.load %arg5[%c0_5, %c0_6] : memref<512x128xf32, #tpu.memory_space<vmem>>, vector<512x128xf32>
    tpu.vector_store %arg5[%c0_5, %c0_6], %8 {strides = array<i32>} : memref<512x128xf32, #tpu.memory_space<vmem>>, vector<512x128xf32>,
    return
  }
  func.func @transform_0(%arg0: i32, %arg1: i32) -> (i32, i32) {
    %c0_i32 = arith.constant 0 : i32
    return %arg0, %arg1 : i32, i32
  }
  func.func @transform_1(%arg0: i32, %arg1: i32) -> (i32, i32) {
    %c0_i32 = arith.constant 0 : i32
    %c0_i32_0 = arith.constant 0 : i32
    return %c0_i32, %arg1 : i32, i32
  }
  func.func @transform_2(%arg0: i32, %arg1: i32) -> (i32, i32) {
    %c0_i32 = arith.constant 0 : i32
    %c0_i32_0 = arith.constant 0 : i32
    return %c0_i32, %arg1 : i32, i32
  }
  func.func @transform_3(%arg0: i32, %arg1: i32) -> (i32, i32) {
    %c0_i32 = arith.constant 0 : i32
    return %arg0, %arg1 : i32, i32
  }
}

module attributes {stable_mosaic.version = 11 : i64} {
  func.func @_maxpool_kernel(%arg0: i32, %arg1: i32, %arg2: memref<9x128x128xf32, #tpu.memory_space<vmem>>, %arg3: memref<128x128xf32, #tpu.memory_space<vmem>>) attributes {dimension_semantics = [#tpu.dimension_semantics<parallel>, #tpu.dimension_semantics<parallel>], iteration_bounds = array<i64: 1, 1>, scalar_prefetch = 0 : i64, scratch_operands = 0 : i64, tpu.core_type = #tpu.core_type<tc>, window_params = [{transform_indices = @transform_0, window_bounds = array<i64: 9, 128, 128>}, {transform_indices = @transform_1, window_bounds = array<i64: 128, 128>}]} {
    %c0 = arith.constant 0 : index
    %c0_0 = arith.constant 0 : index
    %c0_1 = arith.constant 0 : index
    %0 = vector.load %arg2[%c0, %c0_0, %c0_1] : memref<9x128x128xf32, #tpu.memory_space<vmem>>, vector<9x128x128xf32>
    %cst = arith.constant dense<0xFF800000> : vector<128x128xf32>
    %1 = vector.multi_reduction <maximumf>, %0, %cst [0] : vector<9x128x128xf32> to vector<128x128xf32>
    %c0_2 = arith.constant 0 : index
    %c0_3 = arith.constant 0 : index
    %2 = vector.load %arg3[%c0_2, %c0_3] : memref<128x128xf32, #tpu.memory_space<vmem>>, vector<128x128xf32>
    tpu.vector_store %arg3[%c0_2, %c0_3], %1 {strides = array<i32>} : memref<128x128xf32, #tpu.memory_space<vmem>>, vector<128x128xf32>,
    return
  }
  func.func @transform_0(%arg0: i32, %arg1: i32) -> (i32, i32, i32) {
    %c0_i32 = arith.constant 0 : i32
    %c0_i32_0 = arith.constant 0 : i32
    return %c0_i32, %arg0, %arg1 : i32, i32, i32
  }
  func.func @transform_1(%arg0: i32, %arg1: i32) -> (i32, i32) {
    %c0_i32 = arith.constant 0 : i32
    return %arg0, %arg1 : i32, i32
  }
}

module attributes {stable_mosaic.version = 11 : i64} {
  func.func @_conv_gemm_stats_kernel(%arg0: i32, %arg1: i32, %arg2: i32, %arg3: memref<128x640xbf16, #tpu.memory_space<vmem>>, %arg4: memref<640x128xbf16, #tpu.memory_space<vmem>>, %arg5: memref<128x128xf32, #tpu.memory_space<vmem>>, %arg6: memref<8x128xf32, #tpu.memory_space<vmem>>, %arg7: memref<8x128xf32, #tpu.memory_space<vmem>>) attributes {dimension_semantics = [#tpu.dimension_semantics<parallel>, #tpu.dimension_semantics<parallel>, #tpu.dimension_semantics<arbitrary>], iteration_bounds = array<i64: 1, 1, 1>, scalar_prefetch = 0 : i64, scratch_operands = 0 : i64, tpu.core_type = #tpu.core_type<tc>, window_params = [{transform_indices = @transform_0, window_bounds = array<i64: 128, 640>}, {transform_indices = @transform_1, window_bounds = array<i64: 640, 128>}, {transform_indices = @transform_2, window_bounds = array<i64: 128, 128>}, {transform_indices = @transform_3, window_bounds = array<i64: 8, 128>}, {transform_indices = @transform_4, window_bounds = array<i64: 8, 128>}]} {
    %c0_i32 = arith.constant 0 : i32
    %0 = arith.cmpi eq, %arg2, %c0_i32 : i32
    %1 = arith.extui %0 : i1 to i32
    %c0_i32_0 = arith.constant 0 : i32
    %2 = arith.cmpi ne, %1, %c0_i32_0 : i32
    scf.if %2 {
      %cst_10 = arith.constant 0.000000e+00 : f32
      %12 = vector.broadcast %cst_10 : f32 to vector<128x128xf32>
      %c0_11 = arith.constant 0 : index
      %c0_12 = arith.constant 0 : index
      %13 = vector.load %arg5[%c0_11, %c0_12] : memref<128x128xf32, #tpu.memory_space<vmem>>, vector<128x128xf32>
      tpu.vector_store %arg5[%c0_11, %c0_12], %12 {strides = array<i32>} : memref<128x128xf32, #tpu.memory_space<vmem>>, vector<128x128xf32>,
    } else {
    }
    %c0 = arith.constant 0 : index
    %c0_1 = arith.constant 0 : index
    %3 = vector.load %arg5[%c0, %c0_1] : memref<128x128xf32, #tpu.memory_space<vmem>>, vector<128x128xf32>
    %c0_2 = arith.constant 0 : index
    %c0_3 = arith.constant 0 : index
    %4 = vector.load %arg3[%c0_2, %c0_3] : memref<128x640xbf16, #tpu.memory_space<vmem>>, vector<128x640xbf16>
    %c0_4 = arith.constant 0 : index
    %c0_5 = arith.constant 0 : index
    %5 = vector.load %arg4[%c0_4, %c0_5] : memref<640x128xbf16, #tpu.memory_space<vmem>>, vector<640x128xbf16>
    %cst = arith.constant dense<0.000000e+00> : vector<128x128xf32>
    %6 = tpu.matmul %4, %5, %cst {dimension_numbers = #tpu.dot_dimension_numbers<[1], [0], [0], [1], [0, 0, 1, 1], [], []>} : vector<128x640xbf16>, vector<640x128xbf16>, vector<128x128xf32> -> vector<128x128xf32>
    %7 = arith.addf %3, %6 : vector<128x128xf32>
    %c0_6 = arith.constant 0 : index
    %c0_7 = arith.constant 0 : index
    %8 = vector.load %arg5[%c0_6, %c0_7] : memref<128x128xf32, #tpu.memory_space<vmem>>, vector<128x128xf32>
    tpu.vector_store %arg5[%c0_6, %c0_7], %7 {strides = array<i32>} : memref<128x128xf32, #tpu.memory_space<vmem>>, vector<128x128xf32>,
    %c0_i32_8 = arith.constant 0 : i32
    %9 = arith.cmpi eq, %arg2, %c0_i32_8 : i32
    %10 = arith.extui %9 : i1 to i32
    %c0_i32_9 = arith.constant 0 : i32
    %11 = arith.cmpi ne, %10, %c0_i32_9 : i32
    scf.if %11 {
      %c0_10 = arith.constant 0 : index
      %c0_11 = arith.constant 0 : index
      %12 = vector.load %arg5[%c0_10, %c0_11] : memref<128x128xf32, #tpu.memory_space<vmem>>, vector<128x128xf32>
      %cst_12 = arith.constant dense<0.000000e+00> : vector<128xf32>
      %13 = vector.multi_reduction <add>, %12, %cst_12 [0] : vector<128x128xf32> to vector<128xf32>
      %14 = vector.shape_cast %13 : vector<128xf32> to vector<1x128xf32>
      %15 = arith.mulf %12, %12 : vector<128x128xf32>
      %cst_13 = arith.constant dense<0.000000e+00> : vector<128xf32>
      %16 = vector.multi_reduction <add>, %15, %cst_13 [0] : vector<128x128xf32> to vector<128xf32>
      %17 = vector.shape_cast %16 : vector<128xf32> to vector<1x128xf32>
      %18 = vector.shape_cast %14 : vector<1x128xf32> to vector<1x128xf32>
      %19 = vector.broadcast %18 : vector<1x128xf32> to vector<8x128xf32>
      %c0_14 = arith.constant 0 : index
      %c0_15 = arith.constant 0 : index
      %20 = vector.load %arg6[%c0_14, %c0_15] : memref<8x128xf32, #tpu.memory_space<vmem>>, vector<8x128xf32>
      tpu.vector_store %arg6[%c0_14, %c0_15], %19 {strides = array<i32>} : memref<8x128xf32, #tpu.memory_space<vmem>>, vector<8x128xf32>,
      %21 = vector.shape_cast %17 : vector<1x128xf32> to vector<1x128xf32>
      %22 = vector.broadcast %21 : vector<1x128xf32> to vector<8x128xf32>
      %c0_16 = arith.constant 0 : index
      %c0_17 = arith.constant 0 : index
      %23 = vector.load %arg7[%c0_16, %c0_17] : memref<8x128xf32, #tpu.memory_space<vmem>>, vector<8x128xf32>
      tpu.vector_store %arg7[%c0_16, %c0_17], %22 {strides = array<i32>} : memref<8x128xf32, #tpu.memory_space<vmem>>, vector<8x128xf32>,
    } else {
    }
    return
  }
  func.func @transform_0(%arg0: i32, %arg1: i32, %arg2: i32) -> (i32, i32) {
    %c0_i32 = arith.constant 0 : i32
    return %arg0, %arg2 : i32, i32
  }
  func.func @transform_1(%arg0: i32, %arg1: i32, %arg2: i32) -> (i32, i32) {
    %c0_i32 = arith.constant 0 : i32
    return %arg2, %arg1 : i32, i32
  }
  func.func @transform_2(%arg0: i32, %arg1: i32, %arg2: i32) -> (i32, i32) {
    %c0_i32 = arith.constant 0 : i32
    return %arg0, %arg1 : i32, i32
  }
  func.func @transform_3(%arg0: i32, %arg1: i32, %arg2: i32) -> (i32, i32) {
    %c0_i32 = arith.constant 0 : i32
    return %arg0, %arg1 : i32, i32
  }
  func.func @transform_4(%arg0: i32, %arg1: i32, %arg2: i32) -> (i32, i32) {
    %c0_i32 = arith.constant 0 : i32
    return %arg0, %arg1 : i32, i32
  }
}

module attributes {stable_mosaic.version = 11 : i64} {
  func.func @_bn_apply_kernel(%arg0: i32, %arg1: i32, %arg2: memref<128x128xf32, #tpu.memory_space<vmem>>, %arg3: memref<1x128xf32, #tpu.memory_space<vmem>>, %arg4: memref<1x128xf32, #tpu.memory_space<vmem>>, %arg5: memref<128x128xf32, #tpu.memory_space<vmem>>) attributes {dimension_semantics = [#tpu.dimension_semantics<parallel>, #tpu.dimension_semantics<parallel>], iteration_bounds = array<i64: 1, 1>, scalar_prefetch = 0 : i64, scratch_operands = 0 : i64, tpu.core_type = #tpu.core_type<tc>, window_params = [{transform_indices = @transform_0, window_bounds = array<i64: 128, 128>}, {transform_indices = @transform_1, window_bounds = array<i64: 1, 128>}, {transform_indices = @transform_2, window_bounds = array<i64: 1, 128>}, {transform_indices = @transform_3, window_bounds = array<i64: 128, 128>}]} {
    %c0 = arith.constant 0 : index
    %c0_0 = arith.constant 0 : index
    %0 = vector.load %arg2[%c0, %c0_0] : memref<128x128xf32, #tpu.memory_space<vmem>>, vector<128x128xf32>
    %c0_1 = arith.constant 0 : index
    %c0_2 = arith.constant 0 : index
    %1 = vector.load %arg3[%c0_1, %c0_2] : memref<1x128xf32, #tpu.memory_space<vmem>>, vector<1x128xf32>
    %2 = vector.broadcast %1 : vector<1x128xf32> to vector<128x128xf32>
    %3 = arith.mulf %0, %2 : vector<128x128xf32>
    %c0_3 = arith.constant 0 : index
    %c0_4 = arith.constant 0 : index
    %4 = vector.load %arg4[%c0_3, %c0_4] : memref<1x128xf32, #tpu.memory_space<vmem>>, vector<1x128xf32>
    %5 = vector.broadcast %4 : vector<1x128xf32> to vector<128x128xf32>
    %6 = arith.addf %3, %5 : vector<128x128xf32>
    %cst = arith.constant 0.000000e+00 : f32
    %7 = vector.broadcast %cst : f32 to vector<128x128xf32>
    %8 = arith.maximumf %6, %7 : vector<128x128xf32>
    %c0_5 = arith.constant 0 : index
    %c0_6 = arith.constant 0 : index
    %9 = vector.load %arg5[%c0_5, %c0_6] : memref<128x128xf32, #tpu.memory_space<vmem>>, vector<128x128xf32>
    tpu.vector_store %arg5[%c0_5, %c0_6], %8 {strides = array<i32>} : memref<128x128xf32, #tpu.memory_space<vmem>>, vector<128x128xf32>,
    return
  }
  func.func @transform_0(%arg0: i32, %arg1: i32) -> (i32, i32) {
    %c0_i32 = arith.constant 0 : i32
    return %arg0, %arg1 : i32, i32
  }
  func.func @transform_1(%arg0: i32, %arg1: i32) -> (i32, i32) {
    %c0_i32 = arith.constant 0 : i32
    %c0_i32_0 = arith.constant 0 : i32
    return %c0_i32, %arg1 : i32, i32
  }
  func.func @transform_2(%arg0: i32, %arg1: i32) -> (i32, i32) {
    %c0_i32 = arith.constant 0 : i32
    %c0_i32_0 = arith.constant 0 : i32
    return %c0_i32, %arg1 : i32, i32
  }
  func.func @transform_3(%arg0: i32, %arg1: i32) -> (i32, i32) {
    %c0_i32 = arith.constant 0 : i32
    return %arg0, %arg1 : i32, i32
  }
}

module attributes {stable_mosaic.version = 11 : i64} {
  func.func @_bn_apply_res_kernel(%arg0: i32, %arg1: i32, %arg2: memref<128x128xf32, #tpu.memory_space<vmem>>, %arg3: memref<1x128xf32, #tpu.memory_space<vmem>>, %arg4: memref<1x128xf32, #tpu.memory_space<vmem>>, %arg5: memref<128x128xf32, #tpu.memory_space<vmem>>, %arg6: memref<1x128xf32, #tpu.memory_space<vmem>>, %arg7: memref<1x128xf32, #tpu.memory_space<vmem>>, %arg8: memref<128x128xf32, #tpu.memory_space<vmem>>) attributes {dimension_semantics = [#tpu.dimension_semantics<parallel>, #tpu.dimension_semantics<parallel>], iteration_bounds = array<i64: 1, 1>, scalar_prefetch = 0 : i64, scratch_operands = 0 : i64, tpu.core_type = #tpu.core_type<tc>, window_params = [{transform_indices = @transform_0, window_bounds = array<i64: 128, 128>}, {transform_indices = @transform_1, window_bounds = array<i64: 1, 128>}, {transform_indices = @transform_2, window_bounds = array<i64: 1, 128>}, {transform_indices = @transform_3, window_bounds = array<i64: 128, 128>}, {transform_indices = @transform_4, window_bounds = array<i64: 1, 128>}, {transform_indices = @transform_5, window_bounds = array<i64: 1, 128>}, {transform_indices = @transform_6, window_bounds = array<i64: 128, 128>}]} {
    %c0 = arith.constant 0 : index
    %c0_0 = arith.constant 0 : index
    %0 = vector.load %arg2[%c0, %c0_0] : memref<128x128xf32, #tpu.memory_space<vmem>>, vector<128x128xf32>
    %c0_1 = arith.constant 0 : index
    %c0_2 = arith.constant 0 : index
    %1 = vector.load %arg3[%c0_1, %c0_2] : memref<1x128xf32, #tpu.memory_space<vmem>>, vector<1x128xf32>
    %2 = vector.broadcast %1 : vector<1x128xf32> to vector<128x128xf32>
    %3 = arith.mulf %0, %2 : vector<128x128xf32>
    %c0_3 = arith.constant 0 : index
    %c0_4 = arith.constant 0 : index
    %4 = vector.load %arg4[%c0_3, %c0_4] : memref<1x128xf32, #tpu.memory_space<vmem>>, vector<1x128xf32>
    %5 = vector.broadcast %4 : vector<1x128xf32> to vector<128x128xf32>
    %6 = arith.addf %3, %5 : vector<128x128xf32>
    %c0_5 = arith.constant 0 : index
    %c0_6 = arith.constant 0 : index
    %7 = vector.load %arg5[%c0_5, %c0_6] : memref<128x128xf32, #tpu.memory_space<vmem>>, vector<128x128xf32>
    %c0_7 = arith.constant 0 : index
    %c0_8 = arith.constant 0 : index
    %8 = vector.load %arg6[%c0_7, %c0_8] : memref<1x128xf32, #tpu.memory_space<vmem>>, vector<1x128xf32>
    %9 = vector.broadcast %8 : vector<1x128xf32> to vector<128x128xf32>
    %10 = arith.mulf %7, %9 : vector<128x128xf32>
    %11 = arith.addf %6, %10 : vector<128x128xf32>
    %c0_9 = arith.constant 0 : index
    %c0_10 = arith.constant 0 : index
    %12 = vector.load %arg7[%c0_9, %c0_10] : memref<1x128xf32, #tpu.memory_space<vmem>>, vector<1x128xf32>
    %13 = vector.broadcast %12 : vector<1x128xf32> to vector<128x128xf32>
    %14 = arith.addf %11, %13 : vector<128x128xf32>
    %cst = arith.constant 0.000000e+00 : f32
    %15 = vector.broadcast %cst : f32 to vector<128x128xf32>
    %16 = arith.maximumf %14, %15 : vector<128x128xf32>
    %c0_11 = arith.constant 0 : index
    %c0_12 = arith.constant 0 : index
    %17 = vector.load %arg8[%c0_11, %c0_12] : memref<128x128xf32, #tpu.memory_space<vmem>>, vector<128x128xf32>
    tpu.vector_store %arg8[%c0_11, %c0_12], %16 {strides = array<i32>} : memref<128x128xf32, #tpu.memory_space<vmem>>, vector<128x128xf32>,
    return
  }
  func.func @transform_0(%arg0: i32, %arg1: i32) -> (i32, i32) {
    %c0_i32 = arith.constant 0 : i32
    return %arg0, %arg1 : i32, i32
  }
  func.func @transform_1(%arg0: i32, %arg1: i32) -> (i32, i32) {
    %c0_i32 = arith.constant 0 : i32
    %c0_i32_0 = arith.constant 0 : i32
    return %c0_i32, %arg1 : i32, i32
  }
  func.func @transform_2(%arg0: i32, %arg1: i32) -> (i32, i32) {
    %c0_i32 = arith.constant 0 : i32
    %c0_i32_0 = arith.constant 0 : i32
    return %c0_i32, %arg1 : i32, i32
  }
  func.func @transform_3(%arg0: i32, %arg1: i32) -> (i32, i32) {
    %c0_i32 = arith.constant 0 : i32
    return %arg0, %arg1 : i32, i32
  }
  func.func @transform_4(%arg0: i32, %arg1: i32) -> (i32, i32) {
    %c0_i32 = arith.constant 0 : i32
    %c0_i32_0 = arith.constant 0 : i32
    return %c0_i32, %arg1 : i32, i32
  }
  func.func @transform_5(%arg0: i32, %arg1: i32) -> (i32, i32) {
    %c0_i32 = arith.constant 0 : i32
    %c0_i32_0 = arith.constant 0 : i32
    return %c0_i32, %arg1 : i32, i32
  }
  func.func @transform_6(%arg0: i32, %arg1: i32) -> (i32, i32) {
    %c0_i32 = arith.constant 0 : i32
    return %arg0, %arg1 : i32, i32
  }
}

module attributes {stable_mosaic.version = 11 : i64} {
  func.func @_conv_gemm_stats_kernel(%arg0: i32, %arg1: i32, %arg2: i32, %arg3: memref<32x128xbf16, #tpu.memory_space<vmem>>, %arg4: memref<128x128xbf16, #tpu.memory_space<vmem>>, %arg5: memref<32x128xf32, #tpu.memory_space<vmem>>, %arg6: memref<8x128xf32, #tpu.memory_space<vmem>>, %arg7: memref<8x128xf32, #tpu.memory_space<vmem>>) attributes {dimension_semantics = [#tpu.dimension_semantics<parallel>, #tpu.dimension_semantics<parallel>, #tpu.dimension_semantics<arbitrary>], iteration_bounds = array<i64: 1, 1, 1>, scalar_prefetch = 0 : i64, scratch_operands = 0 : i64, tpu.core_type = #tpu.core_type<tc>, window_params = [{transform_indices = @transform_0, window_bounds = array<i64: 32, 128>}, {transform_indices = @transform_1, window_bounds = array<i64: 128, 128>}, {transform_indices = @transform_2, window_bounds = array<i64: 32, 128>}, {transform_indices = @transform_3, window_bounds = array<i64: 8, 128>}, {transform_indices = @transform_4, window_bounds = array<i64: 8, 128>}]} {
    %c0_i32 = arith.constant 0 : i32
    %0 = arith.cmpi eq, %arg2, %c0_i32 : i32
    %1 = arith.extui %0 : i1 to i32
    %c0_i32_0 = arith.constant 0 : i32
    %2 = arith.cmpi ne, %1, %c0_i32_0 : i32
    scf.if %2 {
      %cst_10 = arith.constant 0.000000e+00 : f32
      %12 = vector.broadcast %cst_10 : f32 to vector<32x128xf32>
      %c0_11 = arith.constant 0 : index
      %c0_12 = arith.constant 0 : index
      %13 = vector.load %arg5[%c0_11, %c0_12] : memref<32x128xf32, #tpu.memory_space<vmem>>, vector<32x128xf32>
      tpu.vector_store %arg5[%c0_11, %c0_12], %12 {strides = array<i32>} : memref<32x128xf32, #tpu.memory_space<vmem>>, vector<32x128xf32>,
    } else {
    }
    %c0 = arith.constant 0 : index
    %c0_1 = arith.constant 0 : index
    %3 = vector.load %arg5[%c0, %c0_1] : memref<32x128xf32, #tpu.memory_space<vmem>>, vector<32x128xf32>
    %c0_2 = arith.constant 0 : index
    %c0_3 = arith.constant 0 : index
    %4 = vector.load %arg3[%c0_2, %c0_3] : memref<32x128xbf16, #tpu.memory_space<vmem>>, vector<32x128xbf16>
    %c0_4 = arith.constant 0 : index
    %c0_5 = arith.constant 0 : index
    %5 = vector.load %arg4[%c0_4, %c0_5] : memref<128x128xbf16, #tpu.memory_space<vmem>>, vector<128x128xbf16>
    %cst = arith.constant dense<0.000000e+00> : vector<32x128xf32>
    %6 = tpu.matmul %4, %5, %cst {dimension_numbers = #tpu.dot_dimension_numbers<[1], [0], [0], [1], [0, 0, 1, 1], [], []>} : vector<32x128xbf16>, vector<128x128xbf16>, vector<32x128xf32> -> vector<32x128xf32>
    %7 = arith.addf %3, %6 : vector<32x128xf32>
    %c0_6 = arith.constant 0 : index
    %c0_7 = arith.constant 0 : index
    %8 = vector.load %arg5[%c0_6, %c0_7] : memref<32x128xf32, #tpu.memory_space<vmem>>, vector<32x128xf32>
    tpu.vector_store %arg5[%c0_6, %c0_7], %7 {strides = array<i32>} : memref<32x128xf32, #tpu.memory_space<vmem>>, vector<32x128xf32>,
    %c0_i32_8 = arith.constant 0 : i32
    %9 = arith.cmpi eq, %arg2, %c0_i32_8 : i32
    %10 = arith.extui %9 : i1 to i32
    %c0_i32_9 = arith.constant 0 : i32
    %11 = arith.cmpi ne, %10, %c0_i32_9 : i32
    scf.if %11 {
      %c0_10 = arith.constant 0 : index
      %c0_11 = arith.constant 0 : index
      %12 = vector.load %arg5[%c0_10, %c0_11] : memref<32x128xf32, #tpu.memory_space<vmem>>, vector<32x128xf32>
      %cst_12 = arith.constant dense<0.000000e+00> : vector<128xf32>
      %13 = vector.multi_reduction <add>, %12, %cst_12 [0] : vector<32x128xf32> to vector<128xf32>
      %14 = vector.shape_cast %13 : vector<128xf32> to vector<1x128xf32>
      %15 = arith.mulf %12, %12 : vector<32x128xf32>
      %cst_13 = arith.constant dense<0.000000e+00> : vector<128xf32>
      %16 = vector.multi_reduction <add>, %15, %cst_13 [0] : vector<32x128xf32> to vector<128xf32>
      %17 = vector.shape_cast %16 : vector<128xf32> to vector<1x128xf32>
      %18 = vector.shape_cast %14 : vector<1x128xf32> to vector<1x128xf32>
      %19 = vector.broadcast %18 : vector<1x128xf32> to vector<8x128xf32>
      %c0_14 = arith.constant 0 : index
      %c0_15 = arith.constant 0 : index
      %20 = vector.load %arg6[%c0_14, %c0_15] : memref<8x128xf32, #tpu.memory_space<vmem>>, vector<8x128xf32>
      tpu.vector_store %arg6[%c0_14, %c0_15], %19 {strides = array<i32>} : memref<8x128xf32, #tpu.memory_space<vmem>>, vector<8x128xf32>,
      %21 = vector.shape_cast %17 : vector<1x128xf32> to vector<1x128xf32>
      %22 = vector.broadcast %21 : vector<1x128xf32> to vector<8x128xf32>
      %c0_16 = arith.constant 0 : index
      %c0_17 = arith.constant 0 : index
      %23 = vector.load %arg7[%c0_16, %c0_17] : memref<8x128xf32, #tpu.memory_space<vmem>>, vector<8x128xf32>
      tpu.vector_store %arg7[%c0_16, %c0_17], %22 {strides = array<i32>} : memref<8x128xf32, #tpu.memory_space<vmem>>, vector<8x128xf32>,
    } else {
    }
    return
  }
  func.func @transform_0(%arg0: i32, %arg1: i32, %arg2: i32) -> (i32, i32) {
    %c0_i32 = arith.constant 0 : i32
    return %arg0, %arg2 : i32, i32
  }
  func.func @transform_1(%arg0: i32, %arg1: i32, %arg2: i32) -> (i32, i32) {
    %c0_i32 = arith.constant 0 : i32
    return %arg2, %arg1 : i32, i32
  }
  func.func @transform_2(%arg0: i32, %arg1: i32, %arg2: i32) -> (i32, i32) {
    %c0_i32 = arith.constant 0 : i32
    return %arg0, %arg1 : i32, i32
  }
  func.func @transform_3(%arg0: i32, %arg1: i32, %arg2: i32) -> (i32, i32) {
    %c0_i32 = arith.constant 0 : i32
    return %arg0, %arg1 : i32, i32
  }
  func.func @transform_4(%arg0: i32, %arg1: i32, %arg2: i32) -> (i32, i32) {
    %c0_i32 = arith.constant 0 : i32
    return %arg0, %arg1 : i32, i32
  }
}

module attributes {stable_mosaic.version = 11 : i64} {
  func.func @_conv_gemm_stats_kernel(%arg0: i32, %arg1: i32, %arg2: i32, %arg3: memref<32x640xbf16, #tpu.memory_space<vmem>>, %arg4: memref<640x128xbf16, #tpu.memory_space<vmem>>, %arg5: memref<32x128xf32, #tpu.memory_space<vmem>>, %arg6: memref<8x128xf32, #tpu.memory_space<vmem>>, %arg7: memref<8x128xf32, #tpu.memory_space<vmem>>) attributes {dimension_semantics = [#tpu.dimension_semantics<parallel>, #tpu.dimension_semantics<parallel>, #tpu.dimension_semantics<arbitrary>], iteration_bounds = array<i64: 1, 1, 1>, scalar_prefetch = 0 : i64, scratch_operands = 0 : i64, tpu.core_type = #tpu.core_type<tc>, window_params = [{transform_indices = @transform_0, window_bounds = array<i64: 32, 640>}, {transform_indices = @transform_1, window_bounds = array<i64: 640, 128>}, {transform_indices = @transform_2, window_bounds = array<i64: 32, 128>}, {transform_indices = @transform_3, window_bounds = array<i64: 8, 128>}, {transform_indices = @transform_4, window_bounds = array<i64: 8, 128>}]} {
    %c0_i32 = arith.constant 0 : i32
    %0 = arith.cmpi eq, %arg2, %c0_i32 : i32
    %1 = arith.extui %0 : i1 to i32
    %c0_i32_0 = arith.constant 0 : i32
    %2 = arith.cmpi ne, %1, %c0_i32_0 : i32
    scf.if %2 {
      %cst_10 = arith.constant 0.000000e+00 : f32
      %12 = vector.broadcast %cst_10 : f32 to vector<32x128xf32>
      %c0_11 = arith.constant 0 : index
      %c0_12 = arith.constant 0 : index
      %13 = vector.load %arg5[%c0_11, %c0_12] : memref<32x128xf32, #tpu.memory_space<vmem>>, vector<32x128xf32>
      tpu.vector_store %arg5[%c0_11, %c0_12], %12 {strides = array<i32>} : memref<32x128xf32, #tpu.memory_space<vmem>>, vector<32x128xf32>,
    } else {
    }
    %c0 = arith.constant 0 : index
    %c0_1 = arith.constant 0 : index
    %3 = vector.load %arg5[%c0, %c0_1] : memref<32x128xf32, #tpu.memory_space<vmem>>, vector<32x128xf32>
    %c0_2 = arith.constant 0 : index
    %c0_3 = arith.constant 0 : index
    %4 = vector.load %arg3[%c0_2, %c0_3] : memref<32x640xbf16, #tpu.memory_space<vmem>>, vector<32x640xbf16>
    %c0_4 = arith.constant 0 : index
    %c0_5 = arith.constant 0 : index
    %5 = vector.load %arg4[%c0_4, %c0_5] : memref<640x128xbf16, #tpu.memory_space<vmem>>, vector<640x128xbf16>
    %cst = arith.constant dense<0.000000e+00> : vector<32x128xf32>
    %6 = tpu.matmul %4, %5, %cst {dimension_numbers = #tpu.dot_dimension_numbers<[1], [0], [0], [1], [0, 0, 1, 1], [], []>} : vector<32x640xbf16>, vector<640x128xbf16>, vector<32x128xf32> -> vector<32x128xf32>
    %7 = arith.addf %3, %6 : vector<32x128xf32>
    %c0_6 = arith.constant 0 : index
    %c0_7 = arith.constant 0 : index
    %8 = vector.load %arg5[%c0_6, %c0_7] : memref<32x128xf32, #tpu.memory_space<vmem>>, vector<32x128xf32>
    tpu.vector_store %arg5[%c0_6, %c0_7], %7 {strides = array<i32>} : memref<32x128xf32, #tpu.memory_space<vmem>>, vector<32x128xf32>,
    %c0_i32_8 = arith.constant 0 : i32
    %9 = arith.cmpi eq, %arg2, %c0_i32_8 : i32
    %10 = arith.extui %9 : i1 to i32
    %c0_i32_9 = arith.constant 0 : i32
    %11 = arith.cmpi ne, %10, %c0_i32_9 : i32
    scf.if %11 {
      %c0_10 = arith.constant 0 : index
      %c0_11 = arith.constant 0 : index
      %12 = vector.load %arg5[%c0_10, %c0_11] : memref<32x128xf32, #tpu.memory_space<vmem>>, vector<32x128xf32>
      %cst_12 = arith.constant dense<0.000000e+00> : vector<128xf32>
      %13 = vector.multi_reduction <add>, %12, %cst_12 [0] : vector<32x128xf32> to vector<128xf32>
      %14 = vector.shape_cast %13 : vector<128xf32> to vector<1x128xf32>
      %15 = arith.mulf %12, %12 : vector<32x128xf32>
      %cst_13 = arith.constant dense<0.000000e+00> : vector<128xf32>
      %16 = vector.multi_reduction <add>, %15, %cst_13 [0] : vector<32x128xf32> to vector<128xf32>
      %17 = vector.shape_cast %16 : vector<128xf32> to vector<1x128xf32>
      %18 = vector.shape_cast %14 : vector<1x128xf32> to vector<1x128xf32>
      %19 = vector.broadcast %18 : vector<1x128xf32> to vector<8x128xf32>
      %c0_14 = arith.constant 0 : index
      %c0_15 = arith.constant 0 : index
      %20 = vector.load %arg6[%c0_14, %c0_15] : memref<8x128xf32, #tpu.memory_space<vmem>>, vector<8x128xf32>
      tpu.vector_store %arg6[%c0_14, %c0_15], %19 {strides = array<i32>} : memref<8x128xf32, #tpu.memory_space<vmem>>, vector<8x128xf32>,
      %21 = vector.shape_cast %17 : vector<1x128xf32> to vector<1x128xf32>
      %22 = vector.broadcast %21 : vector<1x128xf32> to vector<8x128xf32>
      %c0_16 = arith.constant 0 : index
      %c0_17 = arith.constant 0 : index
      %23 = vector.load %arg7[%c0_16, %c0_17] : memref<8x128xf32, #tpu.memory_space<vmem>>, vector<8x128xf32>
      tpu.vector_store %arg7[%c0_16, %c0_17], %22 {strides = array<i32>} : memref<8x128xf32, #tpu.memory_space<vmem>>, vector<8x128xf32>,
    } else {
    }
    return
  }
  func.func @transform_0(%arg0: i32, %arg1: i32, %arg2: i32) -> (i32, i32) {
    %c0_i32 = arith.constant 0 : i32
    return %arg0, %arg2 : i32, i32
  }
  func.func @transform_1(%arg0: i32, %arg1: i32, %arg2: i32) -> (i32, i32) {
    %c0_i32 = arith.constant 0 : i32
    return %arg2, %arg1 : i32, i32
  }
  func.func @transform_2(%arg0: i32, %arg1: i32, %arg2: i32) -> (i32, i32) {
    %c0_i32 = arith.constant 0 : i32
    return %arg0, %arg1 : i32, i32
  }
  func.func @transform_3(%arg0: i32, %arg1: i32, %arg2: i32) -> (i32, i32) {
    %c0_i32 = arith.constant 0 : i32
    return %arg0, %arg1 : i32, i32
  }
  func.func @transform_4(%arg0: i32, %arg1: i32, %arg2: i32) -> (i32, i32) {
    %c0_i32 = arith.constant 0 : i32
    return %arg0, %arg1 : i32, i32
  }
}

module attributes {stable_mosaic.version = 11 : i64} {
  func.func @_bn_apply_kernel(%arg0: i32, %arg1: i32, %arg2: memref<32x128xf32, #tpu.memory_space<vmem>>, %arg3: memref<1x128xf32, #tpu.memory_space<vmem>>, %arg4: memref<1x128xf32, #tpu.memory_space<vmem>>, %arg5: memref<32x128xf32, #tpu.memory_space<vmem>>) attributes {dimension_semantics = [#tpu.dimension_semantics<parallel>, #tpu.dimension_semantics<parallel>], iteration_bounds = array<i64: 1, 1>, scalar_prefetch = 0 : i64, scratch_operands = 0 : i64, tpu.core_type = #tpu.core_type<tc>, window_params = [{transform_indices = @transform_0, window_bounds = array<i64: 32, 128>}, {transform_indices = @transform_1, window_bounds = array<i64: 1, 128>}, {transform_indices = @transform_2, window_bounds = array<i64: 1, 128>}, {transform_indices = @transform_3, window_bounds = array<i64: 32, 128>}]} {
    %c0 = arith.constant 0 : index
    %c0_0 = arith.constant 0 : index
    %0 = vector.load %arg2[%c0, %c0_0] : memref<32x128xf32, #tpu.memory_space<vmem>>, vector<32x128xf32>
    %c0_1 = arith.constant 0 : index
    %c0_2 = arith.constant 0 : index
    %1 = vector.load %arg3[%c0_1, %c0_2] : memref<1x128xf32, #tpu.memory_space<vmem>>, vector<1x128xf32>
    %2 = vector.broadcast %1 : vector<1x128xf32> to vector<32x128xf32>
    %3 = arith.mulf %0, %2 : vector<32x128xf32>
    %c0_3 = arith.constant 0 : index
    %c0_4 = arith.constant 0 : index
    %4 = vector.load %arg4[%c0_3, %c0_4] : memref<1x128xf32, #tpu.memory_space<vmem>>, vector<1x128xf32>
    %5 = vector.broadcast %4 : vector<1x128xf32> to vector<32x128xf32>
    %6 = arith.addf %3, %5 : vector<32x128xf32>
    %cst = arith.constant 0.000000e+00 : f32
    %7 = vector.broadcast %cst : f32 to vector<32x128xf32>
    %8 = arith.maximumf %6, %7 : vector<32x128xf32>
    %c0_5 = arith.constant 0 : index
    %c0_6 = arith.constant 0 : index
    %9 = vector.load %arg5[%c0_5, %c0_6] : memref<32x128xf32, #tpu.memory_space<vmem>>, vector<32x128xf32>
    tpu.vector_store %arg5[%c0_5, %c0_6], %8 {strides = array<i32>} : memref<32x128xf32, #tpu.memory_space<vmem>>, vector<32x128xf32>,
    return
  }
  func.func @transform_0(%arg0: i32, %arg1: i32) -> (i32, i32) {
    %c0_i32 = arith.constant 0 : i32
    return %arg0, %arg1 : i32, i32
  }
  func.func @transform_1(%arg0: i32, %arg1: i32) -> (i32, i32) {
    %c0_i32 = arith.constant 0 : i32
    %c0_i32_0 = arith.constant 0 : i32
    return %c0_i32, %arg1 : i32, i32
  }
  func.func @transform_2(%arg0: i32, %arg1: i32) -> (i32, i32) {
    %c0_i32 = arith.constant 0 : i32
    %c0_i32_0 = arith.constant 0 : i32
    return %c0_i32, %arg1 : i32, i32
  }
  func.func @transform_3(%arg0: i32, %arg1: i32) -> (i32, i32) {
    %c0_i32 = arith.constant 0 : i32
    return %arg0, %arg1 : i32, i32
  }
}

module attributes {stable_mosaic.version = 11 : i64} {
  func.func @_conv_gemm_stats_kernel(%arg0: i32, %arg1: i32, %arg2: i32, %arg3: memref<32x384xbf16, #tpu.memory_space<vmem>>, %arg4: memref<384x128xbf16, #tpu.memory_space<vmem>>, %arg5: memref<32x128xf32, #tpu.memory_space<vmem>>, %arg6: memref<8x128xf32, #tpu.memory_space<vmem>>, %arg7: memref<8x128xf32, #tpu.memory_space<vmem>>) attributes {dimension_semantics = [#tpu.dimension_semantics<parallel>, #tpu.dimension_semantics<parallel>, #tpu.dimension_semantics<arbitrary>], iteration_bounds = array<i64: 1, 1, 3>, scalar_prefetch = 0 : i64, scratch_operands = 0 : i64, tpu.core_type = #tpu.core_type<tc>, window_params = [{transform_indices = @transform_0, window_bounds = array<i64: 32, 384>}, {transform_indices = @transform_1, window_bounds = array<i64: 384, 128>}, {transform_indices = @transform_2, window_bounds = array<i64: 32, 128>}, {transform_indices = @transform_3, window_bounds = array<i64: 8, 128>}, {transform_indices = @transform_4, window_bounds = array<i64: 8, 128>}]} {
    %c0_i32 = arith.constant 0 : i32
    %0 = arith.cmpi eq, %arg2, %c0_i32 : i32
    %1 = arith.extui %0 : i1 to i32
    %c0_i32_0 = arith.constant 0 : i32
    %2 = arith.cmpi ne, %1, %c0_i32_0 : i32
    scf.if %2 {
      %cst_9 = arith.constant 0.000000e+00 : f32
      %12 = vector.broadcast %cst_9 : f32 to vector<32x128xf32>
      %c0_10 = arith.constant 0 : index
      %c0_11 = arith.constant 0 : index
      %13 = vector.load %arg5[%c0_10, %c0_11] : memref<32x128xf32, #tpu.memory_space<vmem>>, vector<32x128xf32>
      tpu.vector_store %arg5[%c0_10, %c0_11], %12 {strides = array<i32>} : memref<32x128xf32, #tpu.memory_space<vmem>>, vector<32x128xf32>,
    } else {
    }
    %c0 = arith.constant 0 : index
    %c0_1 = arith.constant 0 : index
    %3 = vector.load %arg5[%c0, %c0_1] : memref<32x128xf32, #tpu.memory_space<vmem>>, vector<32x128xf32>
    %c0_2 = arith.constant 0 : index
    %c0_3 = arith.constant 0 : index
    %4 = vector.load %arg3[%c0_2, %c0_3] : memref<32x384xbf16, #tpu.memory_space<vmem>>, vector<32x384xbf16>
    %c0_4 = arith.constant 0 : index
    %c0_5 = arith.constant 0 : index
    %5 = vector.load %arg4[%c0_4, %c0_5] : memref<384x128xbf16, #tpu.memory_space<vmem>>, vector<384x128xbf16>
    %cst = arith.constant dense<0.000000e+00> : vector<32x128xf32>
    %6 = tpu.matmul %4, %5, %cst {dimension_numbers = #tpu.dot_dimension_numbers<[1], [0], [0], [1], [0, 0, 1, 1], [], []>} : vector<32x384xbf16>, vector<384x128xbf16>, vector<32x128xf32> -> vector<32x128xf32>
    %7 = arith.addf %3, %6 : vector<32x128xf32>
    %c0_6 = arith.constant 0 : index
    %c0_7 = arith.constant 0 : index
    %8 = vector.load %arg5[%c0_6, %c0_7] : memref<32x128xf32, #tpu.memory_space<vmem>>, vector<32x128xf32>
    tpu.vector_store %arg5[%c0_6, %c0_7], %7 {strides = array<i32>} : memref<32x128xf32, #tpu.memory_space<vmem>>, vector<32x128xf32>,
    %c2_i32 = arith.constant 2 : i32
    %9 = arith.cmpi eq, %arg2, %c2_i32 : i32
    %10 = arith.extui %9 : i1 to i32
    %c0_i32_8 = arith.constant 0 : i32
    %11 = arith.cmpi ne, %10, %c0_i32_8 : i32
    scf.if %11 {
      %c0_9 = arith.constant 0 : index
      %c0_10 = arith.constant 0 : index
      %12 = vector.load %arg5[%c0_9, %c0_10] : memref<32x128xf32, #tpu.memory_space<vmem>>, vector<32x128xf32>
      %cst_11 = arith.constant dense<0.000000e+00> : vector<128xf32>
      %13 = vector.multi_reduction <add>, %12, %cst_11 [0] : vector<32x128xf32> to vector<128xf32>
      %14 = vector.shape_cast %13 : vector<128xf32> to vector<1x128xf32>
      %15 = arith.mulf %12, %12 : vector<32x128xf32>
      %cst_12 = arith.constant dense<0.000000e+00> : vector<128xf32>
      %16 = vector.multi_reduction <add>, %15, %cst_12 [0] : vector<32x128xf32> to vector<128xf32>
      %17 = vector.shape_cast %16 : vector<128xf32> to vector<1x128xf32>
      %18 = vector.shape_cast %14 : vector<1x128xf32> to vector<1x128xf32>
      %19 = vector.broadcast %18 : vector<1x128xf32> to vector<8x128xf32>
      %c0_13 = arith.constant 0 : index
      %c0_14 = arith.constant 0 : index
      %20 = vector.load %arg6[%c0_13, %c0_14] : memref<8x128xf32, #tpu.memory_space<vmem>>, vector<8x128xf32>
      tpu.vector_store %arg6[%c0_13, %c0_14], %19 {strides = array<i32>} : memref<8x128xf32, #tpu.memory_space<vmem>>, vector<8x128xf32>,
      %21 = vector.shape_cast %17 : vector<1x128xf32> to vector<1x128xf32>
      %22 = vector.broadcast %21 : vector<1x128xf32> to vector<8x128xf32>
      %c0_15 = arith.constant 0 : index
      %c0_16 = arith.constant 0 : index
      %23 = vector.load %arg7[%c0_15, %c0_16] : memref<8x128xf32, #tpu.memory_space<vmem>>, vector<8x128xf32>
      tpu.vector_store %arg7[%c0_15, %c0_16], %22 {strides = array<i32>} : memref<8x128xf32, #tpu.memory_space<vmem>>, vector<8x128xf32>,
    } else {
    }
    return
  }
  func.func @transform_0(%arg0: i32, %arg1: i32, %arg2: i32) -> (i32, i32) {
    %c0_i32 = arith.constant 0 : i32
    return %arg0, %arg2 : i32, i32
  }
  func.func @transform_1(%arg0: i32, %arg1: i32, %arg2: i32) -> (i32, i32) {
    %c0_i32 = arith.constant 0 : i32
    return %arg2, %arg1 : i32, i32
  }
  func.func @transform_2(%arg0: i32, %arg1: i32, %arg2: i32) -> (i32, i32) {
    %c0_i32 = arith.constant 0 : i32
    return %arg0, %arg1 : i32, i32
  }
  func.func @transform_3(%arg0: i32, %arg1: i32, %arg2: i32) -> (i32, i32) {
    %c0_i32 = arith.constant 0 : i32
    return %arg0, %arg1 : i32, i32
  }
  func.func @transform_4(%arg0: i32, %arg1: i32, %arg2: i32) -> (i32, i32) {
    %c0_i32 = arith.constant 0 : i32
    return %arg0, %arg1 : i32, i32
  }
}

module attributes {stable_mosaic.version = 11 : i64} {
  func.func @_bn_apply_res_kernel(%arg0: i32, %arg1: i32, %arg2: memref<32x128xf32, #tpu.memory_space<vmem>>, %arg3: memref<1x128xf32, #tpu.memory_space<vmem>>, %arg4: memref<1x128xf32, #tpu.memory_space<vmem>>, %arg5: memref<32x128xf32, #tpu.memory_space<vmem>>, %arg6: memref<1x128xf32, #tpu.memory_space<vmem>>, %arg7: memref<1x128xf32, #tpu.memory_space<vmem>>, %arg8: memref<32x128xf32, #tpu.memory_space<vmem>>) attributes {dimension_semantics = [#tpu.dimension_semantics<parallel>, #tpu.dimension_semantics<parallel>], iteration_bounds = array<i64: 1, 1>, scalar_prefetch = 0 : i64, scratch_operands = 0 : i64, tpu.core_type = #tpu.core_type<tc>, window_params = [{transform_indices = @transform_0, window_bounds = array<i64: 32, 128>}, {transform_indices = @transform_1, window_bounds = array<i64: 1, 128>}, {transform_indices = @transform_2, window_bounds = array<i64: 1, 128>}, {transform_indices = @transform_3, window_bounds = array<i64: 32, 128>}, {transform_indices = @transform_4, window_bounds = array<i64: 1, 128>}, {transform_indices = @transform_5, window_bounds = array<i64: 1, 128>}, {transform_indices = @transform_6, window_bounds = array<i64: 32, 128>}]} {
    %c0 = arith.constant 0 : index
    %c0_0 = arith.constant 0 : index
    %0 = vector.load %arg2[%c0, %c0_0] : memref<32x128xf32, #tpu.memory_space<vmem>>, vector<32x128xf32>
    %c0_1 = arith.constant 0 : index
    %c0_2 = arith.constant 0 : index
    %1 = vector.load %arg3[%c0_1, %c0_2] : memref<1x128xf32, #tpu.memory_space<vmem>>, vector<1x128xf32>
    %2 = vector.broadcast %1 : vector<1x128xf32> to vector<32x128xf32>
    %3 = arith.mulf %0, %2 : vector<32x128xf32>
    %c0_3 = arith.constant 0 : index
    %c0_4 = arith.constant 0 : index
    %4 = vector.load %arg4[%c0_3, %c0_4] : memref<1x128xf32, #tpu.memory_space<vmem>>, vector<1x128xf32>
    %5 = vector.broadcast %4 : vector<1x128xf32> to vector<32x128xf32>
    %6 = arith.addf %3, %5 : vector<32x128xf32>
    %c0_5 = arith.constant 0 : index
    %c0_6 = arith.constant 0 : index
    %7 = vector.load %arg5[%c0_5, %c0_6] : memref<32x128xf32, #tpu.memory_space<vmem>>, vector<32x128xf32>
    %c0_7 = arith.constant 0 : index
    %c0_8 = arith.constant 0 : index
    %8 = vector.load %arg6[%c0_7, %c0_8] : memref<1x128xf32, #tpu.memory_space<vmem>>, vector<1x128xf32>
    %9 = vector.broadcast %8 : vector<1x128xf32> to vector<32x128xf32>
    %10 = arith.mulf %7, %9 : vector<32x128xf32>
    %11 = arith.addf %6, %10 : vector<32x128xf32>
    %c0_9 = arith.constant 0 : index
    %c0_10 = arith.constant 0 : index
    %12 = vector.load %arg7[%c0_9, %c0_10] : memref<1x128xf32, #tpu.memory_space<vmem>>, vector<1x128xf32>
    %13 = vector.broadcast %12 : vector<1x128xf32> to vector<32x128xf32>
    %14 = arith.addf %11, %13 : vector<32x128xf32>
    %cst = arith.constant 0.000000e+00 : f32
    %15 = vector.broadcast %cst : f32 to vector<32x128xf32>
    %16 = arith.maximumf %14, %15 : vector<32x128xf32>
    %c0_11 = arith.constant 0 : index
    %c0_12 = arith.constant 0 : index
    %17 = vector.load %arg8[%c0_11, %c0_12] : memref<32x128xf32, #tpu.memory_space<vmem>>, vector<32x128xf32>
    tpu.vector_store %arg8[%c0_11, %c0_12], %16 {strides = array<i32>} : memref<32x128xf32, #tpu.memory_space<vmem>>, vector<32x128xf32>,
    return
  }
  func.func @transform_0(%arg0: i32, %arg1: i32) -> (i32, i32) {
    %c0_i32 = arith.constant 0 : i32
    return %arg0, %arg1 : i32, i32
  }
  func.func @transform_1(%arg0: i32, %arg1: i32) -> (i32, i32) {
    %c0_i32 = arith.constant 0 : i32
    %c0_i32_0 = arith.constant 0 : i32
    return %c0_i32, %arg1 : i32, i32
  }
  func.func @transform_2(%arg0: i32, %arg1: i32) -> (i32, i32) {
    %c0_i32 = arith.constant 0 : i32
    %c0_i32_0 = arith.constant 0 : i32
    return %c0_i32, %arg1 : i32, i32
  }
  func.func @transform_3(%arg0: i32, %arg1: i32) -> (i32, i32) {
    %c0_i32 = arith.constant 0 : i32
    return %arg0, %arg1 : i32, i32
  }
  func.func @transform_4(%arg0: i32, %arg1: i32) -> (i32, i32) {
    %c0_i32 = arith.constant 0 : i32
    %c0_i32_0 = arith.constant 0 : i32
    return %c0_i32, %arg1 : i32, i32
  }
  func.func @transform_5(%arg0: i32, %arg1: i32) -> (i32, i32) {
    %c0_i32 = arith.constant 0 : i32
    %c0_i32_0 = arith.constant 0 : i32
    return %c0_i32, %arg1 : i32, i32
  }
  func.func @transform_6(%arg0: i32, %arg1: i32) -> (i32, i32) {
    %c0_i32 = arith.constant 0 : i32
    return %arg0, %arg1 : i32, i32
  }
}

module attributes {stable_mosaic.version = 11 : i64} {
  func.func @_conv_gemm_stats_kernel(%arg0: i32, %arg1: i32, %arg2: i32, %arg3: memref<8x128xbf16, #tpu.memory_space<vmem>>, %arg4: memref<128x256xbf16, #tpu.memory_space<vmem>>, %arg5: memref<8x256xf32, #tpu.memory_space<vmem>>, %arg6: memref<8x256xf32, #tpu.memory_space<vmem>>, %arg7: memref<8x256xf32, #tpu.memory_space<vmem>>) attributes {dimension_semantics = [#tpu.dimension_semantics<parallel>, #tpu.dimension_semantics<parallel>, #tpu.dimension_semantics<arbitrary>], iteration_bounds = array<i64: 1, 1, 1>, scalar_prefetch = 0 : i64, scratch_operands = 0 : i64, tpu.core_type = #tpu.core_type<tc>, window_params = [{transform_indices = @transform_0, window_bounds = array<i64: 8, 128>}, {transform_indices = @transform_1, window_bounds = array<i64: 128, 256>}, {transform_indices = @transform_2, window_bounds = array<i64: 8, 256>}, {transform_indices = @transform_3, window_bounds = array<i64: 8, 256>}, {transform_indices = @transform_4, window_bounds = array<i64: 8, 256>}]} {
    %c0_i32 = arith.constant 0 : i32
    %0 = arith.cmpi eq, %arg2, %c0_i32 : i32
    %1 = arith.extui %0 : i1 to i32
    %c0_i32_0 = arith.constant 0 : i32
    %2 = arith.cmpi ne, %1, %c0_i32_0 : i32
    scf.if %2 {
      %cst_10 = arith.constant 0.000000e+00 : f32
      %12 = vector.broadcast %cst_10 : f32 to vector<8x256xf32>
      %c0_11 = arith.constant 0 : index
      %c0_12 = arith.constant 0 : index
      %13 = vector.load %arg5[%c0_11, %c0_12] : memref<8x256xf32, #tpu.memory_space<vmem>>, vector<8x256xf32>
      tpu.vector_store %arg5[%c0_11, %c0_12], %12 {strides = array<i32>} : memref<8x256xf32, #tpu.memory_space<vmem>>, vector<8x256xf32>,
    } else {
    }
    %c0 = arith.constant 0 : index
    %c0_1 = arith.constant 0 : index
    %3 = vector.load %arg5[%c0, %c0_1] : memref<8x256xf32, #tpu.memory_space<vmem>>, vector<8x256xf32>
    %c0_2 = arith.constant 0 : index
    %c0_3 = arith.constant 0 : index
    %4 = vector.load %arg3[%c0_2, %c0_3] : memref<8x128xbf16, #tpu.memory_space<vmem>>, vector<8x128xbf16>
    %c0_4 = arith.constant 0 : index
    %c0_5 = arith.constant 0 : index
    %5 = vector.load %arg4[%c0_4, %c0_5] : memref<128x256xbf16, #tpu.memory_space<vmem>>, vector<128x256xbf16>
    %cst = arith.constant dense<0.000000e+00> : vector<8x256xf32>
    %6 = tpu.matmul %4, %5, %cst {dimension_numbers = #tpu.dot_dimension_numbers<[1], [0], [0], [1], [0, 0, 1, 1], [], []>} : vector<8x128xbf16>, vector<128x256xbf16>, vector<8x256xf32> -> vector<8x256xf32>
    %7 = arith.addf %3, %6 : vector<8x256xf32>
    %c0_6 = arith.constant 0 : index
    %c0_7 = arith.constant 0 : index
    %8 = vector.load %arg5[%c0_6, %c0_7] : memref<8x256xf32, #tpu.memory_space<vmem>>, vector<8x256xf32>
    tpu.vector_store %arg5[%c0_6, %c0_7], %7 {strides = array<i32>} : memref<8x256xf32, #tpu.memory_space<vmem>>, vector<8x256xf32>,
    %c0_i32_8 = arith.constant 0 : i32
    %9 = arith.cmpi eq, %arg2, %c0_i32_8 : i32
    %10 = arith.extui %9 : i1 to i32
    %c0_i32_9 = arith.constant 0 : i32
    %11 = arith.cmpi ne, %10, %c0_i32_9 : i32
    scf.if %11 {
      %c0_10 = arith.constant 0 : index
      %c0_11 = arith.constant 0 : index
      %12 = vector.load %arg5[%c0_10, %c0_11] : memref<8x256xf32, #tpu.memory_space<vmem>>, vector<8x256xf32>
      %cst_12 = arith.constant dense<0.000000e+00> : vector<256xf32>
      %13 = vector.multi_reduction <add>, %12, %cst_12 [0] : vector<8x256xf32> to vector<256xf32>
      %14 = vector.shape_cast %13 : vector<256xf32> to vector<1x256xf32>
      %15 = arith.mulf %12, %12 : vector<8x256xf32>
      %cst_13 = arith.constant dense<0.000000e+00> : vector<256xf32>
      %16 = vector.multi_reduction <add>, %15, %cst_13 [0] : vector<8x256xf32> to vector<256xf32>
      %17 = vector.shape_cast %16 : vector<256xf32> to vector<1x256xf32>
      %18 = vector.shape_cast %14 : vector<1x256xf32> to vector<1x256xf32>
      %19 = vector.broadcast %18 : vector<1x256xf32> to vector<8x256xf32>
      %c0_14 = arith.constant 0 : index
      %c0_15 = arith.constant 0 : index
      %20 = vector.load %arg6[%c0_14, %c0_15] : memref<8x256xf32, #tpu.memory_space<vmem>>, vector<8x256xf32>
      tpu.vector_store %arg6[%c0_14, %c0_15], %19 {strides = array<i32>} : memref<8x256xf32, #tpu.memory_space<vmem>>, vector<8x256xf32>,
      %21 = vector.shape_cast %17 : vector<1x256xf32> to vector<1x256xf32>
      %22 = vector.broadcast %21 : vector<1x256xf32> to vector<8x256xf32>
      %c0_16 = arith.constant 0 : index
      %c0_17 = arith.constant 0 : index
      %23 = vector.load %arg7[%c0_16, %c0_17] : memref<8x256xf32, #tpu.memory_space<vmem>>, vector<8x256xf32>
      tpu.vector_store %arg7[%c0_16, %c0_17], %22 {strides = array<i32>} : memref<8x256xf32, #tpu.memory_space<vmem>>, vector<8x256xf32>,
    } else {
    }
    return
  }
  func.func @transform_0(%arg0: i32, %arg1: i32, %arg2: i32) -> (i32, i32) {
    %c0_i32 = arith.constant 0 : i32
    return %arg0, %arg2 : i32, i32
  }
  func.func @transform_1(%arg0: i32, %arg1: i32, %arg2: i32) -> (i32, i32) {
    %c0_i32 = arith.constant 0 : i32
    return %arg2, %arg1 : i32, i32
  }
  func.func @transform_2(%arg0: i32, %arg1: i32, %arg2: i32) -> (i32, i32) {
    %c0_i32 = arith.constant 0 : i32
    return %arg0, %arg1 : i32, i32
  }
  func.func @transform_3(%arg0: i32, %arg1: i32, %arg2: i32) -> (i32, i32) {
    %c0_i32 = arith.constant 0 : i32
    return %arg0, %arg1 : i32, i32
  }
  func.func @transform_4(%arg0: i32, %arg1: i32, %arg2: i32) -> (i32, i32) {
    %c0_i32 = arith.constant 0 : i32
    return %arg0, %arg1 : i32, i32
  }
}

module attributes {stable_mosaic.version = 11 : i64} {
  func.func @_conv_gemm_stats_kernel(%arg0: i32, %arg1: i32, %arg2: i32, %arg3: memref<8x384xbf16, #tpu.memory_space<vmem>>, %arg4: memref<384x256xbf16, #tpu.memory_space<vmem>>, %arg5: memref<8x256xf32, #tpu.memory_space<vmem>>, %arg6: memref<8x256xf32, #tpu.memory_space<vmem>>, %arg7: memref<8x256xf32, #tpu.memory_space<vmem>>) attributes {dimension_semantics = [#tpu.dimension_semantics<parallel>, #tpu.dimension_semantics<parallel>, #tpu.dimension_semantics<arbitrary>], iteration_bounds = array<i64: 1, 1, 3>, scalar_prefetch = 0 : i64, scratch_operands = 0 : i64, tpu.core_type = #tpu.core_type<tc>, window_params = [{transform_indices = @transform_0, window_bounds = array<i64: 8, 384>}, {transform_indices = @transform_1, window_bounds = array<i64: 384, 256>}, {transform_indices = @transform_2, window_bounds = array<i64: 8, 256>}, {transform_indices = @transform_3, window_bounds = array<i64: 8, 256>}, {transform_indices = @transform_4, window_bounds = array<i64: 8, 256>}]} {
    %c0_i32 = arith.constant 0 : i32
    %0 = arith.cmpi eq, %arg2, %c0_i32 : i32
    %1 = arith.extui %0 : i1 to i32
    %c0_i32_0 = arith.constant 0 : i32
    %2 = arith.cmpi ne, %1, %c0_i32_0 : i32
    scf.if %2 {
      %cst_9 = arith.constant 0.000000e+00 : f32
      %12 = vector.broadcast %cst_9 : f32 to vector<8x256xf32>
      %c0_10 = arith.constant 0 : index
      %c0_11 = arith.constant 0 : index
      %13 = vector.load %arg5[%c0_10, %c0_11] : memref<8x256xf32, #tpu.memory_space<vmem>>, vector<8x256xf32>
      tpu.vector_store %arg5[%c0_10, %c0_11], %12 {strides = array<i32>} : memref<8x256xf32, #tpu.memory_space<vmem>>, vector<8x256xf32>,
    } else {
    }
    %c0 = arith.constant 0 : index
    %c0_1 = arith.constant 0 : index
    %3 = vector.load %arg5[%c0, %c0_1] : memref<8x256xf32, #tpu.memory_space<vmem>>, vector<8x256xf32>
    %c0_2 = arith.constant 0 : index
    %c0_3 = arith.constant 0 : index
    %4 = vector.load %arg3[%c0_2, %c0_3] : memref<8x384xbf16, #tpu.memory_space<vmem>>, vector<8x384xbf16>
    %c0_4 = arith.constant 0 : index
    %c0_5 = arith.constant 0 : index
    %5 = vector.load %arg4[%c0_4, %c0_5] : memref<384x256xbf16, #tpu.memory_space<vmem>>, vector<384x256xbf16>
    %cst = arith.constant dense<0.000000e+00> : vector<8x256xf32>
    %6 = tpu.matmul %4, %5, %cst {dimension_numbers = #tpu.dot_dimension_numbers<[1], [0], [0], [1], [0, 0, 1, 1], [], []>} : vector<8x384xbf16>, vector<384x256xbf16>, vector<8x256xf32> -> vector<8x256xf32>
    %7 = arith.addf %3, %6 : vector<8x256xf32>
    %c0_6 = arith.constant 0 : index
    %c0_7 = arith.constant 0 : index
    %8 = vector.load %arg5[%c0_6, %c0_7] : memref<8x256xf32, #tpu.memory_space<vmem>>, vector<8x256xf32>
    tpu.vector_store %arg5[%c0_6, %c0_7], %7 {strides = array<i32>} : memref<8x256xf32, #tpu.memory_space<vmem>>, vector<8x256xf32>,
    %c2_i32 = arith.constant 2 : i32
    %9 = arith.cmpi eq, %arg2, %c2_i32 : i32
    %10 = arith.extui %9 : i1 to i32
    %c0_i32_8 = arith.constant 0 : i32
    %11 = arith.cmpi ne, %10, %c0_i32_8 : i32
    scf.if %11 {
      %c0_9 = arith.constant 0 : index
      %c0_10 = arith.constant 0 : index
      %12 = vector.load %arg5[%c0_9, %c0_10] : memref<8x256xf32, #tpu.memory_space<vmem>>, vector<8x256xf32>
      %cst_11 = arith.constant dense<0.000000e+00> : vector<256xf32>
      %13 = vector.multi_reduction <add>, %12, %cst_11 [0] : vector<8x256xf32> to vector<256xf32>
      %14 = vector.shape_cast %13 : vector<256xf32> to vector<1x256xf32>
      %15 = arith.mulf %12, %12 : vector<8x256xf32>
      %cst_12 = arith.constant dense<0.000000e+00> : vector<256xf32>
      %16 = vector.multi_reduction <add>, %15, %cst_12 [0] : vector<8x256xf32> to vector<256xf32>
      %17 = vector.shape_cast %16 : vector<256xf32> to vector<1x256xf32>
      %18 = vector.shape_cast %14 : vector<1x256xf32> to vector<1x256xf32>
      %19 = vector.broadcast %18 : vector<1x256xf32> to vector<8x256xf32>
      %c0_13 = arith.constant 0 : index
      %c0_14 = arith.constant 0 : index
      %20 = vector.load %arg6[%c0_13, %c0_14] : memref<8x256xf32, #tpu.memory_space<vmem>>, vector<8x256xf32>
      tpu.vector_store %arg6[%c0_13, %c0_14], %19 {strides = array<i32>} : memref<8x256xf32, #tpu.memory_space<vmem>>, vector<8x256xf32>,
      %21 = vector.shape_cast %17 : vector<1x256xf32> to vector<1x256xf32>
      %22 = vector.broadcast %21 : vector<1x256xf32> to vector<8x256xf32>
      %c0_15 = arith.constant 0 : index
      %c0_16 = arith.constant 0 : index
      %23 = vector.load %arg7[%c0_15, %c0_16] : memref<8x256xf32, #tpu.memory_space<vmem>>, vector<8x256xf32>
      tpu.vector_store %arg7[%c0_15, %c0_16], %22 {strides = array<i32>} : memref<8x256xf32, #tpu.memory_space<vmem>>, vector<8x256xf32>,
    } else {
    }
    return
  }
  func.func @transform_0(%arg0: i32, %arg1: i32, %arg2: i32) -> (i32, i32) {
    %c0_i32 = arith.constant 0 : i32
    return %arg0, %arg2 : i32, i32
  }
  func.func @transform_1(%arg0: i32, %arg1: i32, %arg2: i32) -> (i32, i32) {
    %c0_i32 = arith.constant 0 : i32
    return %arg2, %arg1 : i32, i32
  }
  func.func @transform_2(%arg0: i32, %arg1: i32, %arg2: i32) -> (i32, i32) {
    %c0_i32 = arith.constant 0 : i32
    return %arg0, %arg1 : i32, i32
  }
  func.func @transform_3(%arg0: i32, %arg1: i32, %arg2: i32) -> (i32, i32) {
    %c0_i32 = arith.constant 0 : i32
    return %arg0, %arg1 : i32, i32
  }
  func.func @transform_4(%arg0: i32, %arg1: i32, %arg2: i32) -> (i32, i32) {
    %c0_i32 = arith.constant 0 : i32
    return %arg0, %arg1 : i32, i32
  }
}

module attributes {stable_mosaic.version = 11 : i64} {
  func.func @_bn_apply_kernel(%arg0: i32, %arg1: i32, %arg2: memref<8x256xf32, #tpu.memory_space<vmem>>, %arg3: memref<1x256xf32, #tpu.memory_space<vmem>>, %arg4: memref<1x256xf32, #tpu.memory_space<vmem>>, %arg5: memref<8x256xf32, #tpu.memory_space<vmem>>) attributes {dimension_semantics = [#tpu.dimension_semantics<parallel>, #tpu.dimension_semantics<parallel>], iteration_bounds = array<i64: 1, 1>, scalar_prefetch = 0 : i64, scratch_operands = 0 : i64, tpu.core_type = #tpu.core_type<tc>, window_params = [{transform_indices = @transform_0, window_bounds = array<i64: 8, 256>}, {transform_indices = @transform_1, window_bounds = array<i64: 1, 256>}, {transform_indices = @transform_2, window_bounds = array<i64: 1, 256>}, {transform_indices = @transform_3, window_bounds = array<i64: 8, 256>}]} {
    %c0 = arith.constant 0 : index
    %c0_0 = arith.constant 0 : index
    %0 = vector.load %arg2[%c0, %c0_0] : memref<8x256xf32, #tpu.memory_space<vmem>>, vector<8x256xf32>
    %c0_1 = arith.constant 0 : index
    %c0_2 = arith.constant 0 : index
    %1 = vector.load %arg3[%c0_1, %c0_2] : memref<1x256xf32, #tpu.memory_space<vmem>>, vector<1x256xf32>
    %2 = vector.broadcast %1 : vector<1x256xf32> to vector<8x256xf32>
    %3 = arith.mulf %0, %2 : vector<8x256xf32>
    %c0_3 = arith.constant 0 : index
    %c0_4 = arith.constant 0 : index
    %4 = vector.load %arg4[%c0_3, %c0_4] : memref<1x256xf32, #tpu.memory_space<vmem>>, vector<1x256xf32>
    %5 = vector.broadcast %4 : vector<1x256xf32> to vector<8x256xf32>
    %6 = arith.addf %3, %5 : vector<8x256xf32>
    %cst = arith.constant 0.000000e+00 : f32
    %7 = vector.broadcast %cst : f32 to vector<8x256xf32>
    %8 = arith.maximumf %6, %7 : vector<8x256xf32>
    %c0_5 = arith.constant 0 : index
    %c0_6 = arith.constant 0 : index
    %9 = vector.load %arg5[%c0_5, %c0_6] : memref<8x256xf32, #tpu.memory_space<vmem>>, vector<8x256xf32>
    tpu.vector_store %arg5[%c0_5, %c0_6], %8 {strides = array<i32>} : memref<8x256xf32, #tpu.memory_space<vmem>>, vector<8x256xf32>,
    return
  }
  func.func @transform_0(%arg0: i32, %arg1: i32) -> (i32, i32) {
    %c0_i32 = arith.constant 0 : i32
    return %arg0, %arg1 : i32, i32
  }
  func.func @transform_1(%arg0: i32, %arg1: i32) -> (i32, i32) {
    %c0_i32 = arith.constant 0 : i32
    %c0_i32_0 = arith.constant 0 : i32
    return %c0_i32, %arg1 : i32, i32
  }
  func.func @transform_2(%arg0: i32, %arg1: i32) -> (i32, i32) {
    %c0_i32 = arith.constant 0 : i32
    %c0_i32_0 = arith.constant 0 : i32
    return %c0_i32, %arg1 : i32, i32
  }
  func.func @transform_3(%arg0: i32, %arg1: i32) -> (i32, i32) {
    %c0_i32 = arith.constant 0 : i32
    return %arg0, %arg1 : i32, i32
  }
}

module attributes {stable_mosaic.version = 11 : i64} {
  func.func @_bn_apply_res_kernel(%arg0: i32, %arg1: i32, %arg2: memref<8x256xf32, #tpu.memory_space<vmem>>, %arg3: memref<1x256xf32, #tpu.memory_space<vmem>>, %arg4: memref<1x256xf32, #tpu.memory_space<vmem>>, %arg5: memref<8x256xf32, #tpu.memory_space<vmem>>, %arg6: memref<1x256xf32, #tpu.memory_space<vmem>>, %arg7: memref<1x256xf32, #tpu.memory_space<vmem>>, %arg8: memref<8x256xf32, #tpu.memory_space<vmem>>) attributes {dimension_semantics = [#tpu.dimension_semantics<parallel>, #tpu.dimension_semantics<parallel>], iteration_bounds = array<i64: 1, 1>, scalar_prefetch = 0 : i64, scratch_operands = 0 : i64, tpu.core_type = #tpu.core_type<tc>, window_params = [{transform_indices = @transform_0, window_bounds = array<i64: 8, 256>}, {transform_indices = @transform_1, window_bounds = array<i64: 1, 256>}, {transform_indices = @transform_2, window_bounds = array<i64: 1, 256>}, {transform_indices = @transform_3, window_bounds = array<i64: 8, 256>}, {transform_indices = @transform_4, window_bounds = array<i64: 1, 256>}, {transform_indices = @transform_5, window_bounds = array<i64: 1, 256>}, {transform_indices = @transform_6, window_bounds = array<i64: 8, 256>}]} {
    %c0 = arith.constant 0 : index
    %c0_0 = arith.constant 0 : index
    %0 = vector.load %arg2[%c0, %c0_0] : memref<8x256xf32, #tpu.memory_space<vmem>>, vector<8x256xf32>
    %c0_1 = arith.constant 0 : index
    %c0_2 = arith.constant 0 : index
    %1 = vector.load %arg3[%c0_1, %c0_2] : memref<1x256xf32, #tpu.memory_space<vmem>>, vector<1x256xf32>
    %2 = vector.broadcast %1 : vector<1x256xf32> to vector<8x256xf32>
    %3 = arith.mulf %0, %2 : vector<8x256xf32>
    %c0_3 = arith.constant 0 : index
    %c0_4 = arith.constant 0 : index
    %4 = vector.load %arg4[%c0_3, %c0_4] : memref<1x256xf32, #tpu.memory_space<vmem>>, vector<1x256xf32>
    %5 = vector.broadcast %4 : vector<1x256xf32> to vector<8x256xf32>
    %6 = arith.addf %3, %5 : vector<8x256xf32>
    %c0_5 = arith.constant 0 : index
    %c0_6 = arith.constant 0 : index
    %7 = vector.load %arg5[%c0_5, %c0_6] : memref<8x256xf32, #tpu.memory_space<vmem>>, vector<8x256xf32>
    %c0_7 = arith.constant 0 : index
    %c0_8 = arith.constant 0 : index
    %8 = vector.load %arg6[%c0_7, %c0_8] : memref<1x256xf32, #tpu.memory_space<vmem>>, vector<1x256xf32>
    %9 = vector.broadcast %8 : vector<1x256xf32> to vector<8x256xf32>
    %10 = arith.mulf %7, %9 : vector<8x256xf32>
    %11 = arith.addf %6, %10 : vector<8x256xf32>
    %c0_9 = arith.constant 0 : index
    %c0_10 = arith.constant 0 : index
    %12 = vector.load %arg7[%c0_9, %c0_10] : memref<1x256xf32, #tpu.memory_space<vmem>>, vector<1x256xf32>
    %13 = vector.broadcast %12 : vector<1x256xf32> to vector<8x256xf32>
    %14 = arith.addf %11, %13 : vector<8x256xf32>
    %cst = arith.constant 0.000000e+00 : f32
    %15 = vector.broadcast %cst : f32 to vector<8x256xf32>
    %16 = arith.maximumf %14, %15 : vector<8x256xf32>
    %c0_11 = arith.constant 0 : index
    %c0_12 = arith.constant 0 : index
    %17 = vector.load %arg8[%c0_11, %c0_12] : memref<8x256xf32, #tpu.memory_space<vmem>>, vector<8x256xf32>
    tpu.vector_store %arg8[%c0_11, %c0_12], %16 {strides = array<i32>} : memref<8x256xf32, #tpu.memory_space<vmem>>, vector<8x256xf32>,
    return
  }
  func.func @transform_0(%arg0: i32, %arg1: i32) -> (i32, i32) {
    %c0_i32 = arith.constant 0 : i32
    return %arg0, %arg1 : i32, i32
  }
  func.func @transform_1(%arg0: i32, %arg1: i32) -> (i32, i32) {
    %c0_i32 = arith.constant 0 : i32
    %c0_i32_0 = arith.constant 0 : i32
    return %c0_i32, %arg1 : i32, i32
  }
  func.func @transform_2(%arg0: i32, %arg1: i32) -> (i32, i32) {
    %c0_i32 = arith.constant 0 : i32
    %c0_i32_0 = arith.constant 0 : i32
    return %c0_i32, %arg1 : i32, i32
  }
  func.func @transform_3(%arg0: i32, %arg1: i32) -> (i32, i32) {
    %c0_i32 = arith.constant 0 : i32
    return %arg0, %arg1 : i32, i32
  }
  func.func @transform_4(%arg0: i32, %arg1: i32) -> (i32, i32) {
    %c0_i32 = arith.constant 0 : i32
    %c0_i32_0 = arith.constant 0 : i32
    return %c0_i32, %arg1 : i32, i32
  }
  func.func @transform_5(%arg0: i32, %arg1: i32) -> (i32, i32) {
    %c0_i32 = arith.constant 0 : i32
    %c0_i32_0 = arith.constant 0 : i32
    return %c0_i32, %arg1 : i32, i32
  }
  func.func @transform_6(%arg0: i32, %arg1: i32) -> (i32, i32) {
    %c0_i32 = arith.constant 0 : i32
    return %arg0, %arg1 : i32, i32
  }
}

module attributes {stable_mosaic.version = 11 : i64} {
  func.func @_conv_gemm_stats_kernel(%arg0: i32, %arg1: i32, %arg2: i32, %arg3: memref<8x768xbf16, #tpu.memory_space<vmem>>, %arg4: memref<768x256xbf16, #tpu.memory_space<vmem>>, %arg5: memref<8x256xf32, #tpu.memory_space<vmem>>, %arg6: memref<8x256xf32, #tpu.memory_space<vmem>>, %arg7: memref<8x256xf32, #tpu.memory_space<vmem>>) attributes {dimension_semantics = [#tpu.dimension_semantics<parallel>, #tpu.dimension_semantics<parallel>, #tpu.dimension_semantics<arbitrary>], iteration_bounds = array<i64: 1, 1, 3>, scalar_prefetch = 0 : i64, scratch_operands = 0 : i64, tpu.core_type = #tpu.core_type<tc>, window_params = [{transform_indices = @transform_0, window_bounds = array<i64: 8, 768>}, {transform_indices = @transform_1, window_bounds = array<i64: 768, 256>}, {transform_indices = @transform_2, window_bounds = array<i64: 8, 256>}, {transform_indices = @transform_3, window_bounds = array<i64: 8, 256>}, {transform_indices = @transform_4, window_bounds = array<i64: 8, 256>}]} {
    %c0_i32 = arith.constant 0 : i32
    %0 = arith.cmpi eq, %arg2, %c0_i32 : i32
    %1 = arith.extui %0 : i1 to i32
    %c0_i32_0 = arith.constant 0 : i32
    %2 = arith.cmpi ne, %1, %c0_i32_0 : i32
    scf.if %2 {
      %cst_9 = arith.constant 0.000000e+00 : f32
      %12 = vector.broadcast %cst_9 : f32 to vector<8x256xf32>
      %c0_10 = arith.constant 0 : index
      %c0_11 = arith.constant 0 : index
      %13 = vector.load %arg5[%c0_10, %c0_11] : memref<8x256xf32, #tpu.memory_space<vmem>>, vector<8x256xf32>
      tpu.vector_store %arg5[%c0_10, %c0_11], %12 {strides = array<i32>} : memref<8x256xf32, #tpu.memory_space<vmem>>, vector<8x256xf32>,
    } else {
    }
    %c0 = arith.constant 0 : index
    %c0_1 = arith.constant 0 : index
    %3 = vector.load %arg5[%c0, %c0_1] : memref<8x256xf32, #tpu.memory_space<vmem>>, vector<8x256xf32>
    %c0_2 = arith.constant 0 : index
    %c0_3 = arith.constant 0 : index
    %4 = vector.load %arg3[%c0_2, %c0_3] : memref<8x768xbf16, #tpu.memory_space<vmem>>, vector<8x768xbf16>
    %c0_4 = arith.constant 0 : index
    %c0_5 = arith.constant 0 : index
    %5 = vector.load %arg4[%c0_4, %c0_5] : memref<768x256xbf16, #tpu.memory_space<vmem>>, vector<768x256xbf16>
    %cst = arith.constant dense<0.000000e+00> : vector<8x256xf32>
    %6 = tpu.matmul %4, %5, %cst {dimension_numbers = #tpu.dot_dimension_numbers<[1], [0], [0], [1], [0, 0, 1, 1], [], []>} : vector<8x768xbf16>, vector<768x256xbf16>, vector<8x256xf32> -> vector<8x256xf32>
    %7 = arith.addf %3, %6 : vector<8x256xf32>
    %c0_6 = arith.constant 0 : index
    %c0_7 = arith.constant 0 : index
    %8 = vector.load %arg5[%c0_6, %c0_7] : memref<8x256xf32, #tpu.memory_space<vmem>>, vector<8x256xf32>
    tpu.vector_store %arg5[%c0_6, %c0_7], %7 {strides = array<i32>} : memref<8x256xf32, #tpu.memory_space<vmem>>, vector<8x256xf32>,
    %c2_i32 = arith.constant 2 : i32
    %9 = arith.cmpi eq, %arg2, %c2_i32 : i32
    %10 = arith.extui %9 : i1 to i32
    %c0_i32_8 = arith.constant 0 : i32
    %11 = arith.cmpi ne, %10, %c0_i32_8 : i32
    scf.if %11 {
      %c0_9 = arith.constant 0 : index
      %c0_10 = arith.constant 0 : index
      %12 = vector.load %arg5[%c0_9, %c0_10] : memref<8x256xf32, #tpu.memory_space<vmem>>, vector<8x256xf32>
      %cst_11 = arith.constant dense<0.000000e+00> : vector<256xf32>
      %13 = vector.multi_reduction <add>, %12, %cst_11 [0] : vector<8x256xf32> to vector<256xf32>
      %14 = vector.shape_cast %13 : vector<256xf32> to vector<1x256xf32>
      %15 = arith.mulf %12, %12 : vector<8x256xf32>
      %cst_12 = arith.constant dense<0.000000e+00> : vector<256xf32>
      %16 = vector.multi_reduction <add>, %15, %cst_12 [0] : vector<8x256xf32> to vector<256xf32>
      %17 = vector.shape_cast %16 : vector<256xf32> to vector<1x256xf32>
      %18 = vector.shape_cast %14 : vector<1x256xf32> to vector<1x256xf32>
      %19 = vector.broadcast %18 : vector<1x256xf32> to vector<8x256xf32>
      %c0_13 = arith.constant 0 : index
      %c0_14 = arith.constant 0 : index
      %20 = vector.load %arg6[%c0_13, %c0_14] : memref<8x256xf32, #tpu.memory_space<vmem>>, vector<8x256xf32>
      tpu.vector_store %arg6[%c0_13, %c0_14], %19 {strides = array<i32>} : memref<8x256xf32, #tpu.memory_space<vmem>>, vector<8x256xf32>,
      %21 = vector.shape_cast %17 : vector<1x256xf32> to vector<1x256xf32>
      %22 = vector.broadcast %21 : vector<1x256xf32> to vector<8x256xf32>
      %c0_15 = arith.constant 0 : index
      %c0_16 = arith.constant 0 : index
      %23 = vector.load %arg7[%c0_15, %c0_16] : memref<8x256xf32, #tpu.memory_space<vmem>>, vector<8x256xf32>
      tpu.vector_store %arg7[%c0_15, %c0_16], %22 {strides = array<i32>} : memref<8x256xf32, #tpu.memory_space<vmem>>, vector<8x256xf32>,
    } else {
    }
    return
  }
  func.func @transform_0(%arg0: i32, %arg1: i32, %arg2: i32) -> (i32, i32) {
    %c0_i32 = arith.constant 0 : i32
    return %arg0, %arg2 : i32, i32
  }
  func.func @transform_1(%arg0: i32, %arg1: i32, %arg2: i32) -> (i32, i32) {
    %c0_i32 = arith.constant 0 : i32
    return %arg2, %arg1 : i32, i32
  }
  func.func @transform_2(%arg0: i32, %arg1: i32, %arg2: i32) -> (i32, i32) {
    %c0_i32 = arith.constant 0 : i32
    return %arg0, %arg1 : i32, i32
  }
  func.func @transform_3(%arg0: i32, %arg1: i32, %arg2: i32) -> (i32, i32) {
    %c0_i32 = arith.constant 0 : i32
    return %arg0, %arg1 : i32, i32
  }
  func.func @transform_4(%arg0: i32, %arg1: i32, %arg2: i32) -> (i32, i32) {
    %c0_i32 = arith.constant 0 : i32
    return %arg0, %arg1 : i32, i32
  }
}

module attributes {stable_mosaic.version = 11 : i64} {
  func.func @_conv_gemm_stats_kernel(%arg0: i32, %arg1: i32, %arg2: i32, %arg3: memref<8x256xbf16, #tpu.memory_space<vmem>>, %arg4: memref<256x512xbf16, #tpu.memory_space<vmem>>, %arg5: memref<8x512xf32, #tpu.memory_space<vmem>>, %arg6: memref<8x512xf32, #tpu.memory_space<vmem>>, %arg7: memref<8x512xf32, #tpu.memory_space<vmem>>) attributes {dimension_semantics = [#tpu.dimension_semantics<parallel>, #tpu.dimension_semantics<parallel>, #tpu.dimension_semantics<arbitrary>], iteration_bounds = array<i64: 1, 1, 1>, scalar_prefetch = 0 : i64, scratch_operands = 0 : i64, tpu.core_type = #tpu.core_type<tc>, window_params = [{transform_indices = @transform_0, window_bounds = array<i64: 8, 256>}, {transform_indices = @transform_1, window_bounds = array<i64: 256, 512>}, {transform_indices = @transform_2, window_bounds = array<i64: 8, 512>}, {transform_indices = @transform_3, window_bounds = array<i64: 8, 512>}, {transform_indices = @transform_4, window_bounds = array<i64: 8, 512>}]} {
    %c0_i32 = arith.constant 0 : i32
    %0 = arith.cmpi eq, %arg2, %c0_i32 : i32
    %1 = arith.extui %0 : i1 to i32
    %c0_i32_0 = arith.constant 0 : i32
    %2 = arith.cmpi ne, %1, %c0_i32_0 : i32
    scf.if %2 {
      %cst_10 = arith.constant 0.000000e+00 : f32
      %12 = vector.broadcast %cst_10 : f32 to vector<8x512xf32>
      %c0_11 = arith.constant 0 : index
      %c0_12 = arith.constant 0 : index
      %13 = vector.load %arg5[%c0_11, %c0_12] : memref<8x512xf32, #tpu.memory_space<vmem>>, vector<8x512xf32>
      tpu.vector_store %arg5[%c0_11, %c0_12], %12 {strides = array<i32>} : memref<8x512xf32, #tpu.memory_space<vmem>>, vector<8x512xf32>,
    } else {
    }
    %c0 = arith.constant 0 : index
    %c0_1 = arith.constant 0 : index
    %3 = vector.load %arg5[%c0, %c0_1] : memref<8x512xf32, #tpu.memory_space<vmem>>, vector<8x512xf32>
    %c0_2 = arith.constant 0 : index
    %c0_3 = arith.constant 0 : index
    %4 = vector.load %arg3[%c0_2, %c0_3] : memref<8x256xbf16, #tpu.memory_space<vmem>>, vector<8x256xbf16>
    %c0_4 = arith.constant 0 : index
    %c0_5 = arith.constant 0 : index
    %5 = vector.load %arg4[%c0_4, %c0_5] : memref<256x512xbf16, #tpu.memory_space<vmem>>, vector<256x512xbf16>
    %cst = arith.constant dense<0.000000e+00> : vector<8x512xf32>
    %6 = tpu.matmul %4, %5, %cst {dimension_numbers = #tpu.dot_dimension_numbers<[1], [0], [0], [1], [0, 0, 1, 1], [], []>} : vector<8x256xbf16>, vector<256x512xbf16>, vector<8x512xf32> -> vector<8x512xf32>
    %7 = arith.addf %3, %6 : vector<8x512xf32>
    %c0_6 = arith.constant 0 : index
    %c0_7 = arith.constant 0 : index
    %8 = vector.load %arg5[%c0_6, %c0_7] : memref<8x512xf32, #tpu.memory_space<vmem>>, vector<8x512xf32>
    tpu.vector_store %arg5[%c0_6, %c0_7], %7 {strides = array<i32>} : memref<8x512xf32, #tpu.memory_space<vmem>>, vector<8x512xf32>,
    %c0_i32_8 = arith.constant 0 : i32
    %9 = arith.cmpi eq, %arg2, %c0_i32_8 : i32
    %10 = arith.extui %9 : i1 to i32
    %c0_i32_9 = arith.constant 0 : i32
    %11 = arith.cmpi ne, %10, %c0_i32_9 : i32
    scf.if %11 {
      %c0_10 = arith.constant 0 : index
      %c0_11 = arith.constant 0 : index
      %12 = vector.load %arg5[%c0_10, %c0_11] : memref<8x512xf32, #tpu.memory_space<vmem>>, vector<8x512xf32>
      %cst_12 = arith.constant dense<0.000000e+00> : vector<512xf32>
      %13 = vector.multi_reduction <add>, %12, %cst_12 [0] : vector<8x512xf32> to vector<512xf32>
      %14 = vector.shape_cast %13 : vector<512xf32> to vector<1x512xf32>
      %15 = arith.mulf %12, %12 : vector<8x512xf32>
      %cst_13 = arith.constant dense<0.000000e+00> : vector<512xf32>
      %16 = vector.multi_reduction <add>, %15, %cst_13 [0] : vector<8x512xf32> to vector<512xf32>
      %17 = vector.shape_cast %16 : vector<512xf32> to vector<1x512xf32>
      %18 = vector.shape_cast %14 : vector<1x512xf32> to vector<1x512xf32>
      %19 = vector.broadcast %18 : vector<1x512xf32> to vector<8x512xf32>
      %c0_14 = arith.constant 0 : index
      %c0_15 = arith.constant 0 : index
      %20 = vector.load %arg6[%c0_14, %c0_15] : memref<8x512xf32, #tpu.memory_space<vmem>>, vector<8x512xf32>
      tpu.vector_store %arg6[%c0_14, %c0_15], %19 {strides = array<i32>} : memref<8x512xf32, #tpu.memory_space<vmem>>, vector<8x512xf32>,
      %21 = vector.shape_cast %17 : vector<1x512xf32> to vector<1x512xf32>
      %22 = vector.broadcast %21 : vector<1x512xf32> to vector<8x512xf32>
      %c0_16 = arith.constant 0 : index
      %c0_17 = arith.constant 0 : index
      %23 = vector.load %arg7[%c0_16, %c0_17] : memref<8x512xf32, #tpu.memory_space<vmem>>, vector<8x512xf32>
      tpu.vector_store %arg7[%c0_16, %c0_17], %22 {strides = array<i32>} : memref<8x512xf32, #tpu.memory_space<vmem>>, vector<8x512xf32>,
    } else {
    }
    return
  }
  func.func @transform_0(%arg0: i32, %arg1: i32, %arg2: i32) -> (i32, i32) {
    %c0_i32 = arith.constant 0 : i32
    return %arg0, %arg2 : i32, i32
  }
  func.func @transform_1(%arg0: i32, %arg1: i32, %arg2: i32) -> (i32, i32) {
    %c0_i32 = arith.constant 0 : i32
    return %arg2, %arg1 : i32, i32
  }
  func.func @transform_2(%arg0: i32, %arg1: i32, %arg2: i32) -> (i32, i32) {
    %c0_i32 = arith.constant 0 : i32
    return %arg0, %arg1 : i32, i32
  }
  func.func @transform_3(%arg0: i32, %arg1: i32, %arg2: i32) -> (i32, i32) {
    %c0_i32 = arith.constant 0 : i32
    return %arg0, %arg1 : i32, i32
  }
  func.func @transform_4(%arg0: i32, %arg1: i32, %arg2: i32) -> (i32, i32) {
    %c0_i32 = arith.constant 0 : i32
    return %arg0, %arg1 : i32, i32
  }
}

module attributes {stable_mosaic.version = 11 : i64} {
  func.func @_bn_apply_kernel(%arg0: i32, %arg1: i32, %arg2: memref<8x512xf32, #tpu.memory_space<vmem>>, %arg3: memref<1x512xf32, #tpu.memory_space<vmem>>, %arg4: memref<1x512xf32, #tpu.memory_space<vmem>>, %arg5: memref<8x512xf32, #tpu.memory_space<vmem>>) attributes {dimension_semantics = [#tpu.dimension_semantics<parallel>, #tpu.dimension_semantics<parallel>], iteration_bounds = array<i64: 1, 1>, scalar_prefetch = 0 : i64, scratch_operands = 0 : i64, tpu.core_type = #tpu.core_type<tc>, window_params = [{transform_indices = @transform_0, window_bounds = array<i64: 8, 512>}, {transform_indices = @transform_1, window_bounds = array<i64: 1, 512>}, {transform_indices = @transform_2, window_bounds = array<i64: 1, 512>}, {transform_indices = @transform_3, window_bounds = array<i64: 8, 512>}]} {
    %c0 = arith.constant 0 : index
    %c0_0 = arith.constant 0 : index
    %0 = vector.load %arg2[%c0, %c0_0] : memref<8x512xf32, #tpu.memory_space<vmem>>, vector<8x512xf32>
    %c0_1 = arith.constant 0 : index
    %c0_2 = arith.constant 0 : index
    %1 = vector.load %arg3[%c0_1, %c0_2] : memref<1x512xf32, #tpu.memory_space<vmem>>, vector<1x512xf32>
    %2 = vector.broadcast %1 : vector<1x512xf32> to vector<8x512xf32>
    %3 = arith.mulf %0, %2 : vector<8x512xf32>
    %c0_3 = arith.constant 0 : index
    %c0_4 = arith.constant 0 : index
    %4 = vector.load %arg4[%c0_3, %c0_4] : memref<1x512xf32, #tpu.memory_space<vmem>>, vector<1x512xf32>
    %5 = vector.broadcast %4 : vector<1x512xf32> to vector<8x512xf32>
    %6 = arith.addf %3, %5 : vector<8x512xf32>
    %cst = arith.constant 0.000000e+00 : f32
    %7 = vector.broadcast %cst : f32 to vector<8x512xf32>
    %8 = arith.maximumf %6, %7 : vector<8x512xf32>
    %c0_5 = arith.constant 0 : index
    %c0_6 = arith.constant 0 : index
    %9 = vector.load %arg5[%c0_5, %c0_6] : memref<8x512xf32, #tpu.memory_space<vmem>>, vector<8x512xf32>
    tpu.vector_store %arg5[%c0_5, %c0_6], %8 {strides = array<i32>} : memref<8x512xf32, #tpu.memory_space<vmem>>, vector<8x512xf32>,
    return
  }
  func.func @transform_0(%arg0: i32, %arg1: i32) -> (i32, i32) {
    %c0_i32 = arith.constant 0 : i32
    return %arg0, %arg1 : i32, i32
  }
  func.func @transform_1(%arg0: i32, %arg1: i32) -> (i32, i32) {
    %c0_i32 = arith.constant 0 : i32
    %c0_i32_0 = arith.constant 0 : i32
    return %c0_i32, %arg1 : i32, i32
  }
  func.func @transform_2(%arg0: i32, %arg1: i32) -> (i32, i32) {
    %c0_i32 = arith.constant 0 : i32
    %c0_i32_0 = arith.constant 0 : i32
    return %c0_i32, %arg1 : i32, i32
  }
  func.func @transform_3(%arg0: i32, %arg1: i32) -> (i32, i32) {
    %c0_i32 = arith.constant 0 : i32
    return %arg0, %arg1 : i32, i32
  }
}

module attributes {stable_mosaic.version = 11 : i64} {
  func.func @_conv_gemm_stats_kernel(%arg0: i32, %arg1: i32, %arg2: i32, %arg3: memref<8x768xbf16, #tpu.memory_space<vmem>>, %arg4: memref<768x512xbf16, #tpu.memory_space<vmem>>, %arg5: memref<8x512xf32, #tpu.memory_space<vmem>>, %arg6: memref<8x512xf32, #tpu.memory_space<vmem>>, %arg7: memref<8x512xf32, #tpu.memory_space<vmem>>) attributes {dimension_semantics = [#tpu.dimension_semantics<parallel>, #tpu.dimension_semantics<parallel>, #tpu.dimension_semantics<arbitrary>], iteration_bounds = array<i64: 1, 1, 3>, scalar_prefetch = 0 : i64, scratch_operands = 0 : i64, tpu.core_type = #tpu.core_type<tc>, window_params = [{transform_indices = @transform_0, window_bounds = array<i64: 8, 768>}, {transform_indices = @transform_1, window_bounds = array<i64: 768, 512>}, {transform_indices = @transform_2, window_bounds = array<i64: 8, 512>}, {transform_indices = @transform_3, window_bounds = array<i64: 8, 512>}, {transform_indices = @transform_4, window_bounds = array<i64: 8, 512>}]} {
    %c0_i32 = arith.constant 0 : i32
    %0 = arith.cmpi eq, %arg2, %c0_i32 : i32
    %1 = arith.extui %0 : i1 to i32
    %c0_i32_0 = arith.constant 0 : i32
    %2 = arith.cmpi ne, %1, %c0_i32_0 : i32
    scf.if %2 {
      %cst_9 = arith.constant 0.000000e+00 : f32
      %12 = vector.broadcast %cst_9 : f32 to vector<8x512xf32>
      %c0_10 = arith.constant 0 : index
      %c0_11 = arith.constant 0 : index
      %13 = vector.load %arg5[%c0_10, %c0_11] : memref<8x512xf32, #tpu.memory_space<vmem>>, vector<8x512xf32>
      tpu.vector_store %arg5[%c0_10, %c0_11], %12 {strides = array<i32>} : memref<8x512xf32, #tpu.memory_space<vmem>>, vector<8x512xf32>,
    } else {
    }
    %c0 = arith.constant 0 : index
    %c0_1 = arith.constant 0 : index
    %3 = vector.load %arg5[%c0, %c0_1] : memref<8x512xf32, #tpu.memory_space<vmem>>, vector<8x512xf32>
    %c0_2 = arith.constant 0 : index
    %c0_3 = arith.constant 0 : index
    %4 = vector.load %arg3[%c0_2, %c0_3] : memref<8x768xbf16, #tpu.memory_space<vmem>>, vector<8x768xbf16>
    %c0_4 = arith.constant 0 : index
    %c0_5 = arith.constant 0 : index
    %5 = vector.load %arg4[%c0_4, %c0_5] : memref<768x512xbf16, #tpu.memory_space<vmem>>, vector<768x512xbf16>
    %cst = arith.constant dense<0.000000e+00> : vector<8x512xf32>
    %6 = tpu.matmul %4, %5, %cst {dimension_numbers = #tpu.dot_dimension_numbers<[1], [0], [0], [1], [0, 0, 1, 1], [], []>} : vector<8x768xbf16>, vector<768x512xbf16>, vector<8x512xf32> -> vector<8x512xf32>
    %7 = arith.addf %3, %6 : vector<8x512xf32>
    %c0_6 = arith.constant 0 : index
    %c0_7 = arith.constant 0 : index
    %8 = vector.load %arg5[%c0_6, %c0_7] : memref<8x512xf32, #tpu.memory_space<vmem>>, vector<8x512xf32>
    tpu.vector_store %arg5[%c0_6, %c0_7], %7 {strides = array<i32>} : memref<8x512xf32, #tpu.memory_space<vmem>>, vector<8x512xf32>,
    %c2_i32 = arith.constant 2 : i32
    %9 = arith.cmpi eq, %arg2, %c2_i32 : i32
    %10 = arith.extui %9 : i1 to i32
    %c0_i32_8 = arith.constant 0 : i32
    %11 = arith.cmpi ne, %10, %c0_i32_8 : i32
    scf.if %11 {
      %c0_9 = arith.constant 0 : index
      %c0_10 = arith.constant 0 : index
      %12 = vector.load %arg5[%c0_9, %c0_10] : memref<8x512xf32, #tpu.memory_space<vmem>>, vector<8x512xf32>
      %cst_11 = arith.constant dense<0.000000e+00> : vector<512xf32>
      %13 = vector.multi_reduction <add>, %12, %cst_11 [0] : vector<8x512xf32> to vector<512xf32>
      %14 = vector.shape_cast %13 : vector<512xf32> to vector<1x512xf32>
      %15 = arith.mulf %12, %12 : vector<8x512xf32>
      %cst_12 = arith.constant dense<0.000000e+00> : vector<512xf32>
      %16 = vector.multi_reduction <add>, %15, %cst_12 [0] : vector<8x512xf32> to vector<512xf32>
      %17 = vector.shape_cast %16 : vector<512xf32> to vector<1x512xf32>
      %18 = vector.shape_cast %14 : vector<1x512xf32> to vector<1x512xf32>
      %19 = vector.broadcast %18 : vector<1x512xf32> to vector<8x512xf32>
      %c0_13 = arith.constant 0 : index
      %c0_14 = arith.constant 0 : index
      %20 = vector.load %arg6[%c0_13, %c0_14] : memref<8x512xf32, #tpu.memory_space<vmem>>, vector<8x512xf32>
      tpu.vector_store %arg6[%c0_13, %c0_14], %19 {strides = array<i32>} : memref<8x512xf32, #tpu.memory_space<vmem>>, vector<8x512xf32>,
      %21 = vector.shape_cast %17 : vector<1x512xf32> to vector<1x512xf32>
      %22 = vector.broadcast %21 : vector<1x512xf32> to vector<8x512xf32>
      %c0_15 = arith.constant 0 : index
      %c0_16 = arith.constant 0 : index
      %23 = vector.load %arg7[%c0_15, %c0_16] : memref<8x512xf32, #tpu.memory_space<vmem>>, vector<8x512xf32>
      tpu.vector_store %arg7[%c0_15, %c0_16], %22 {strides = array<i32>} : memref<8x512xf32, #tpu.memory_space<vmem>>, vector<8x512xf32>,
    } else {
    }
    return
  }
  func.func @transform_0(%arg0: i32, %arg1: i32, %arg2: i32) -> (i32, i32) {
    %c0_i32 = arith.constant 0 : i32
    return %arg0, %arg2 : i32, i32
  }
  func.func @transform_1(%arg0: i32, %arg1: i32, %arg2: i32) -> (i32, i32) {
    %c0_i32 = arith.constant 0 : i32
    return %arg2, %arg1 : i32, i32
  }
  func.func @transform_2(%arg0: i32, %arg1: i32, %arg2: i32) -> (i32, i32) {
    %c0_i32 = arith.constant 0 : i32
    return %arg0, %arg1 : i32, i32
  }
  func.func @transform_3(%arg0: i32, %arg1: i32, %arg2: i32) -> (i32, i32) {
    %c0_i32 = arith.constant 0 : i32
    return %arg0, %arg1 : i32, i32
  }
  func.func @transform_4(%arg0: i32, %arg1: i32, %arg2: i32) -> (i32, i32) {
    %c0_i32 = arith.constant 0 : i32
    return %arg0, %arg1 : i32, i32
  }
}

module attributes {stable_mosaic.version = 11 : i64} {
  func.func @_conv_gemm_stats_kernel(%arg0: i32, %arg1: i32, %arg2: i32, %arg3: memref<8x768xbf16, #tpu.memory_space<vmem>>, %arg4: memref<768x512xbf16, #tpu.memory_space<vmem>>, %arg5: memref<8x512xf32, #tpu.memory_space<vmem>>, %arg6: memref<8x512xf32, #tpu.memory_space<vmem>>, %arg7: memref<8x512xf32, #tpu.memory_space<vmem>>) attributes {dimension_semantics = [#tpu.dimension_semantics<parallel>, #tpu.dimension_semantics<parallel>, #tpu.dimension_semantics<arbitrary>], iteration_bounds = array<i64: 1, 1, 6>, scalar_prefetch = 0 : i64, scratch_operands = 0 : i64, tpu.core_type = #tpu.core_type<tc>, window_params = [{transform_indices = @transform_0, window_bounds = array<i64: 8, 768>}, {transform_indices = @transform_1, window_bounds = array<i64: 768, 512>}, {transform_indices = @transform_2, window_bounds = array<i64: 8, 512>}, {transform_indices = @transform_3, window_bounds = array<i64: 8, 512>}, {transform_indices = @transform_4, window_bounds = array<i64: 8, 512>}]} {
    %c0_i32 = arith.constant 0 : i32
    %0 = arith.cmpi eq, %arg2, %c0_i32 : i32
    %1 = arith.extui %0 : i1 to i32
    %c0_i32_0 = arith.constant 0 : i32
    %2 = arith.cmpi ne, %1, %c0_i32_0 : i32
    scf.if %2 {
      %cst_9 = arith.constant 0.000000e+00 : f32
      %12 = vector.broadcast %cst_9 : f32 to vector<8x512xf32>
      %c0_10 = arith.constant 0 : index
      %c0_11 = arith.constant 0 : index
      %13 = vector.load %arg5[%c0_10, %c0_11] : memref<8x512xf32, #tpu.memory_space<vmem>>, vector<8x512xf32>
      tpu.vector_store %arg5[%c0_10, %c0_11], %12 {strides = array<i32>} : memref<8x512xf32, #tpu.memory_space<vmem>>, vector<8x512xf32>,
    } else {
    }
    %c0 = arith.constant 0 : index
    %c0_1 = arith.constant 0 : index
    %3 = vector.load %arg5[%c0, %c0_1] : memref<8x512xf32, #tpu.memory_space<vmem>>, vector<8x512xf32>
    %c0_2 = arith.constant 0 : index
    %c0_3 = arith.constant 0 : index
    %4 = vector.load %arg3[%c0_2, %c0_3] : memref<8x768xbf16, #tpu.memory_space<vmem>>, vector<8x768xbf16>
    %c0_4 = arith.constant 0 : index
    %c0_5 = arith.constant 0 : index
    %5 = vector.load %arg4[%c0_4, %c0_5] : memref<768x512xbf16, #tpu.memory_space<vmem>>, vector<768x512xbf16>
    %cst = arith.constant dense<0.000000e+00> : vector<8x512xf32>
    %6 = tpu.matmul %4, %5, %cst {dimension_numbers = #tpu.dot_dimension_numbers<[1], [0], [0], [1], [0, 0, 1, 1], [], []>} : vector<8x768xbf16>, vector<768x512xbf16>, vector<8x512xf32> -> vector<8x512xf32>
    %7 = arith.addf %3, %6 : vector<8x512xf32>
    %c0_6 = arith.constant 0 : index
    %c0_7 = arith.constant 0 : index
    %8 = vector.load %arg5[%c0_6, %c0_7] : memref<8x512xf32, #tpu.memory_space<vmem>>, vector<8x512xf32>
    tpu.vector_store %arg5[%c0_6, %c0_7], %7 {strides = array<i32>} : memref<8x512xf32, #tpu.memory_space<vmem>>, vector<8x512xf32>,
    %c5_i32 = arith.constant 5 : i32
    %9 = arith.cmpi eq, %arg2, %c5_i32 : i32
    %10 = arith.extui %9 : i1 to i32
    %c0_i32_8 = arith.constant 0 : i32
    %11 = arith.cmpi ne, %10, %c0_i32_8 : i32
    scf.if %11 {
      %c0_9 = arith.constant 0 : index
      %c0_10 = arith.constant 0 : index
      %12 = vector.load %arg5[%c0_9, %c0_10] : memref<8x512xf32, #tpu.memory_space<vmem>>, vector<8x512xf32>
      %cst_11 = arith.constant dense<0.000000e+00> : vector<512xf32>
      %13 = vector.multi_reduction <add>, %12, %cst_11 [0] : vector<8x512xf32> to vector<512xf32>
      %14 = vector.shape_cast %13 : vector<512xf32> to vector<1x512xf32>
      %15 = arith.mulf %12, %12 : vector<8x512xf32>
      %cst_12 = arith.constant dense<0.000000e+00> : vector<512xf32>
      %16 = vector.multi_reduction <add>, %15, %cst_12 [0] : vector<8x512xf32> to vector<512xf32>
      %17 = vector.shape_cast %16 : vector<512xf32> to vector<1x512xf32>
      %18 = vector.shape_cast %14 : vector<1x512xf32> to vector<1x512xf32>
      %19 = vector.broadcast %18 : vector<1x512xf32> to vector<8x512xf32>
      %c0_13 = arith.constant 0 : index
      %c0_14 = arith.constant 0 : index
      %20 = vector.load %arg6[%c0_13, %c0_14] : memref<8x512xf32, #tpu.memory_space<vmem>>, vector<8x512xf32>
      tpu.vector_store %arg6[%c0_13, %c0_14], %19 {strides = array<i32>} : memref<8x512xf32, #tpu.memory_space<vmem>>, vector<8x512xf32>,
      %21 = vector.shape_cast %17 : vector<1x512xf32> to vector<1x512xf32>
      %22 = vector.broadcast %21 : vector<1x512xf32> to vector<8x512xf32>
      %c0_15 = arith.constant 0 : index
      %c0_16 = arith.constant 0 : index
      %23 = vector.load %arg7[%c0_15, %c0_16] : memref<8x512xf32, #tpu.memory_space<vmem>>, vector<8x512xf32>
      tpu.vector_store %arg7[%c0_15, %c0_16], %22 {strides = array<i32>} : memref<8x512xf32, #tpu.memory_space<vmem>>, vector<8x512xf32>,
    } else {
    }
    return
  }
  func.func @transform_0(%arg0: i32, %arg1: i32, %arg2: i32) -> (i32, i32) {
    %c0_i32 = arith.constant 0 : i32
    return %arg0, %arg2 : i32, i32
  }
  func.func @transform_1(%arg0: i32, %arg1: i32, %arg2: i32) -> (i32, i32) {
    %c0_i32 = arith.constant 0 : i32
    return %arg2, %arg1 : i32, i32
  }
  func.func @transform_2(%arg0: i32, %arg1: i32, %arg2: i32) -> (i32, i32) {
    %c0_i32 = arith.constant 0 : i32
    return %arg0, %arg1 : i32, i32
  }
  func.func @transform_3(%arg0: i32, %arg1: i32, %arg2: i32) -> (i32, i32) {
    %c0_i32 = arith.constant 0 : i32
    return %arg0, %arg1 : i32, i32
  }
  func.func @transform_4(%arg0: i32, %arg1: i32, %arg2: i32) -> (i32, i32) {
    %c0_i32 = arith.constant 0 : i32
    return %arg0, %arg1 : i32, i32
  }
}

module attributes {stable_mosaic.version = 11 : i64} {
  func.func @_bn_apply_res_kernel(%arg0: i32, %arg1: i32, %arg2: memref<8x512xf32, #tpu.memory_space<vmem>>, %arg3: memref<1x512xf32, #tpu.memory_space<vmem>>, %arg4: memref<1x512xf32, #tpu.memory_space<vmem>>, %arg5: memref<8x512xf32, #tpu.memory_space<vmem>>, %arg6: memref<1x512xf32, #tpu.memory_space<vmem>>, %arg7: memref<1x512xf32, #tpu.memory_space<vmem>>, %arg8: memref<8x512xf32, #tpu.memory_space<vmem>>) attributes {dimension_semantics = [#tpu.dimension_semantics<parallel>, #tpu.dimension_semantics<parallel>], iteration_bounds = array<i64: 1, 1>, scalar_prefetch = 0 : i64, scratch_operands = 0 : i64, tpu.core_type = #tpu.core_type<tc>, window_params = [{transform_indices = @transform_0, window_bounds = array<i64: 8, 512>}, {transform_indices = @transform_1, window_bounds = array<i64: 1, 512>}, {transform_indices = @transform_2, window_bounds = array<i64: 1, 512>}, {transform_indices = @transform_3, window_bounds = array<i64: 8, 512>}, {transform_indices = @transform_4, window_bounds = array<i64: 1, 512>}, {transform_indices = @transform_5, window_bounds = array<i64: 1, 512>}, {transform_indices = @transform_6, window_bounds = array<i64: 8, 512>}]} {
    %c0 = arith.constant 0 : index
    %c0_0 = arith.constant 0 : index
    %0 = vector.load %arg2[%c0, %c0_0] : memref<8x512xf32, #tpu.memory_space<vmem>>, vector<8x512xf32>
    %c0_1 = arith.constant 0 : index
    %c0_2 = arith.constant 0 : index
    %1 = vector.load %arg3[%c0_1, %c0_2] : memref<1x512xf32, #tpu.memory_space<vmem>>, vector<1x512xf32>
    %2 = vector.broadcast %1 : vector<1x512xf32> to vector<8x512xf32>
    %3 = arith.mulf %0, %2 : vector<8x512xf32>
    %c0_3 = arith.constant 0 : index
    %c0_4 = arith.constant 0 : index
    %4 = vector.load %arg4[%c0_3, %c0_4] : memref<1x512xf32, #tpu.memory_space<vmem>>, vector<1x512xf32>
    %5 = vector.broadcast %4 : vector<1x512xf32> to vector<8x512xf32>
    %6 = arith.addf %3, %5 : vector<8x512xf32>
    %c0_5 = arith.constant 0 : index
    %c0_6 = arith.constant 0 : index
    %7 = vector.load %arg5[%c0_5, %c0_6] : memref<8x512xf32, #tpu.memory_space<vmem>>, vector<8x512xf32>
    %c0_7 = arith.constant 0 : index
    %c0_8 = arith.constant 0 : index
    %8 = vector.load %arg6[%c0_7, %c0_8] : memref<1x512xf32, #tpu.memory_space<vmem>>, vector<1x512xf32>
    %9 = vector.broadcast %8 : vector<1x512xf32> to vector<8x512xf32>
    %10 = arith.mulf %7, %9 : vector<8x512xf32>
    %11 = arith.addf %6, %10 : vector<8x512xf32>
    %c0_9 = arith.constant 0 : index
    %c0_10 = arith.constant 0 : index
    %12 = vector.load %arg7[%c0_9, %c0_10] : memref<1x512xf32, #tpu.memory_space<vmem>>, vector<1x512xf32>
    %13 = vector.broadcast %12 : vector<1x512xf32> to vector<8x512xf32>
    %14 = arith.addf %11, %13 : vector<8x512xf32>
    %cst = arith.constant 0.000000e+00 : f32
    %15 = vector.broadcast %cst : f32 to vector<8x512xf32>
    %16 = arith.maximumf %14, %15 : vector<8x512xf32>
    %c0_11 = arith.constant 0 : index
    %c0_12 = arith.constant 0 : index
    %17 = vector.load %arg8[%c0_11, %c0_12] : memref<8x512xf32, #tpu.memory_space<vmem>>, vector<8x512xf32>
    tpu.vector_store %arg8[%c0_11, %c0_12], %16 {strides = array<i32>} : memref<8x512xf32, #tpu.memory_space<vmem>>, vector<8x512xf32>,
    return
  }
  func.func @transform_0(%arg0: i32, %arg1: i32) -> (i32, i32) {
    %c0_i32 = arith.constant 0 : i32
    return %arg0, %arg1 : i32, i32
  }
  func.func @transform_1(%arg0: i32, %arg1: i32) -> (i32, i32) {
    %c0_i32 = arith.constant 0 : i32
    %c0_i32_0 = arith.constant 0 : i32
    return %c0_i32, %arg1 : i32, i32
  }
  func.func @transform_2(%arg0: i32, %arg1: i32) -> (i32, i32) {
    %c0_i32 = arith.constant 0 : i32
    %c0_i32_0 = arith.constant 0 : i32
    return %c0_i32, %arg1 : i32, i32
  }
  func.func @transform_3(%arg0: i32, %arg1: i32) -> (i32, i32) {
    %c0_i32 = arith.constant 0 : i32
    return %arg0, %arg1 : i32, i32
  }
  func.func @transform_4(%arg0: i32, %arg1: i32) -> (i32, i32) {
    %c0_i32 = arith.constant 0 : i32
    %c0_i32_0 = arith.constant 0 : i32
    return %c0_i32, %arg1 : i32, i32
  }
  func.func @transform_5(%arg0: i32, %arg1: i32) -> (i32, i32) {
    %c0_i32 = arith.constant 0 : i32
    %c0_i32_0 = arith.constant 0 : i32
    return %c0_i32, %arg1 : i32, i32
  }
  func.func @transform_6(%arg0: i32, %arg1: i32) -> (i32, i32) {
    %c0_i32 = arith.constant 0 : i32
    return %arg0, %arg1 : i32, i32
  }
}

module attributes {stable_mosaic.version = 11 : i64} {
  func.func @_avgpool_kernel(%arg0: i32, %arg1: memref<2x1x512xf32, #tpu.memory_space<vmem>>, %arg2: memref<2x512xf32, #tpu.memory_space<vmem>>) attributes {dimension_semantics = [#tpu.dimension_semantics<arbitrary>], iteration_bounds = array<i64: 1>, scalar_prefetch = 0 : i64, scratch_operands = 0 : i64, tpu.core_type = #tpu.core_type<tc>, window_params = [{pipeline_mode = #tpu.pipeline_mode<synchronous>, transform_indices = @transform_0, window_bounds = array<i64: 2, 1, 512>}, {pipeline_mode = #tpu.pipeline_mode<synchronous>, transform_indices = @transform_1, window_bounds = array<i64: 2, 512>}]} {
    %c0 = arith.constant 0 : index
    %c0_0 = arith.constant 0 : index
    %c0_1 = arith.constant 0 : index
    %0 = vector.load %arg1[%c0, %c0_0, %c0_1] : memref<2x1x512xf32, #tpu.memory_space<vmem>>, vector<2x1x512xf32>
    %cst = arith.constant dense<0.000000e+00> : vector<2x512xf32>
    %1 = vector.multi_reduction <add>, %0, %cst [1] : vector<2x1x512xf32> to vector<2x512xf32>
    %cst_2 = arith.constant 1.000000e+00 : f32
    %2 = vector.broadcast %cst_2 : f32 to vector<2x512xf32>
    %3 = arith.divf %1, %2 : vector<2x512xf32>
    %c0_3 = arith.constant 0 : index
    %c0_4 = arith.constant 0 : index
    %4 = vector.load %arg2[%c0_3, %c0_4] : memref<2x512xf32, #tpu.memory_space<vmem>>, vector<2x512xf32>
    tpu.vector_store %arg2[%c0_3, %c0_4], %3 {strides = array<i32>} : memref<2x512xf32, #tpu.memory_space<vmem>>, vector<2x512xf32>,
    return
  }
  func.func @transform_0(%arg0: i32) -> (i32, i32, i32) {
    %c0_i32 = arith.constant 0 : i32
    %c0_i32_0 = arith.constant 0 : i32
    %c0_i32_1 = arith.constant 0 : i32
    %c0_i32_2 = arith.constant 0 : i32
    return %c0_i32, %c0_i32_0, %c0_i32_1 : i32, i32, i32
  }
  func.func @transform_1(%arg0: i32) -> (i32, i32) {
    %c0_i32 = arith.constant 0 : i32
    %c0_i32_0 = arith.constant 0 : i32
    %c0_i32_1 = arith.constant 0 : i32
    return %c0_i32, %c0_i32_0 : i32, i32
  }
}

module attributes {stable_mosaic.version = 11 : i64} {
  func.func @_fc_kernel(%arg0: i32, %arg1: memref<8x512xbf16, #tpu.memory_space<vmem>>, %arg2: memref<512x128xbf16, #tpu.memory_space<vmem>>, %arg3: memref<1x128xf32, #tpu.memory_space<vmem>>, %arg4: memref<8x128xf32, #tpu.memory_space<vmem>>) attributes {dimension_semantics = [#tpu.dimension_semantics<arbitrary>], iteration_bounds = array<i64: 1>, scalar_prefetch = 0 : i64, scratch_operands = 0 : i64, tpu.core_type = #tpu.core_type<tc>, window_params = [{pipeline_mode = #tpu.pipeline_mode<synchronous>, transform_indices = @transform_0, window_bounds = array<i64: 8, 512>}, {pipeline_mode = #tpu.pipeline_mode<synchronous>, transform_indices = @transform_1, window_bounds = array<i64: 512, 128>}, {pipeline_mode = #tpu.pipeline_mode<synchronous>, transform_indices = @transform_2, window_bounds = array<i64: 1, 128>}, {pipeline_mode = #tpu.pipeline_mode<synchronous>, transform_indices = @transform_3, window_bounds = array<i64: 8, 128>}]} {
    %c0 = arith.constant 0 : index
    %c0_0 = arith.constant 0 : index
    %0 = vector.load %arg1[%c0, %c0_0] : memref<8x512xbf16, #tpu.memory_space<vmem>>, vector<8x512xbf16>
    %c0_1 = arith.constant 0 : index
    %c0_2 = arith.constant 0 : index
    %1 = vector.load %arg2[%c0_1, %c0_2] : memref<512x128xbf16, #tpu.memory_space<vmem>>, vector<512x128xbf16>
    %cst = arith.constant dense<0.000000e+00> : vector<8x128xf32>
    %2 = tpu.matmul %0, %1, %cst {dimension_numbers = #tpu.dot_dimension_numbers<[1], [0], [0], [1], [0, 0, 1, 1], [], []>} : vector<8x512xbf16>, vector<512x128xbf16>, vector<8x128xf32> -> vector<8x128xf32>
    %c0_3 = arith.constant 0 : index
    %c0_4 = arith.constant 0 : index
    %3 = vector.load %arg3[%c0_3, %c0_4] : memref<1x128xf32, #tpu.memory_space<vmem>>, vector<1x128xf32>
    %4 = vector.broadcast %3 : vector<1x128xf32> to vector<8x128xf32>
    %5 = arith.addf %2, %4 : vector<8x128xf32>
    %c0_5 = arith.constant 0 : index
    %c0_6 = arith.constant 0 : index
    %6 = vector.load %arg4[%c0_5, %c0_6] : memref<8x128xf32, #tpu.memory_space<vmem>>, vector<8x128xf32>
    tpu.vector_store %arg4[%c0_5, %c0_6], %5 {strides = array<i32>} : memref<8x128xf32, #tpu.memory_space<vmem>>, vector<8x128xf32>,
    return
  }
  func.func @transform_0(%arg0: i32) -> (i32, i32) {
    %c0_i32 = arith.constant 0 : i32
    %c0_i32_0 = arith.constant 0 : i32
    %c0_i32_1 = arith.constant 0 : i32
    return %c0_i32, %c0_i32_0 : i32, i32
  }
  func.func @transform_1(%arg0: i32) -> (i32, i32) {
    %c0_i32 = arith.constant 0 : i32
    %c0_i32_0 = arith.constant 0 : i32
    %c0_i32_1 = arith.constant 0 : i32
    return %c0_i32, %c0_i32_0 : i32, i32
  }
  func.func @transform_2(%arg0: i32) -> (i32, i32) {
    %c0_i32 = arith.constant 0 : i32
    %c0_i32_0 = arith.constant 0 : i32
    %c0_i32_1 = arith.constant 0 : i32
    return %c0_i32, %c0_i32_0 : i32, i32
  }
  func.func @transform_3(%arg0: i32) -> (i32, i32) {
    %c0_i32 = arith.constant 0 : i32
    %c0_i32_0 = arith.constant 0 : i32
    %c0_i32_1 = arith.constant 0 : i32
    return %c0_i32, %c0_i32_0 : i32, i32
  }
}

</mosaic_0001>

<bundles_post_ra>
// kernel: resnet_forward.25
= control target key start
LH: loop header
LB: loop body
LE: loop exit
PB: predicated region body
PF: predicated region fallthrough
CT: control target
= control target key end

     0   :  { %s896_s0 = inlined_call_operand.vmem [shape: f32[512,128], index: 0, kind: input, shape index: {}]   ;;  %s897_s1 = inlined_call_operand.vmem [shape: f32[1,128], index: 1, kind: input, shape index: {}]   ;;  %s898_s2 = inlined_call_operand.vmem [shape: f32[1,128], index: 2, kind: input, shape index: {}]   ;;  %s899_s3 = inlined_call_operand.vmem [shape: f32[512,128], index: 3, kind: output, shape index: {}]  }
   0x1   :  { %v14_v0 = vld [vmem:[%s896_s0] sm:$0xff]  ;;  %v15_v4 = vld [vmem:[%s896_s0 + $0x8] sm:$0xff]  ;;  %v16_v5 = vld [vmem:[%s896_s0 + $0x10] sm:$0xff] }
   0x2   :  { %v380_v1 = vld [vmem:[%s897_s1] ss:$0 sm:$0xff]  ;;  %v17_v6 = vld [vmem:[%s896_s0 + $0x18] sm:$0xff]  ;;  %v19_v11 = vld [vmem:[%s896_s0 + $0x28] sm:$0xff] }
   0x3   :  { %v385_v2 = vld [vmem:[%s898_s2] ss:$0 sm:$0xff]  ;;  %v85_v3 = vmul.f32 %v380_v1, %v14_v0  ;;  %v86_v7 = vmul.f32 %v380_v1, %v15_v4  ;;  %v87_v8 = vmul.f32 %v380_v1, %v16_v5  ;;  %v88_v9 = vmul.f32 %v380_v1, %v17_v6  ;;  %v20_v12 = vld [vmem:[%s896_s0 + $0x30] sm:$0xff]  ;;  %v21_v17 = vld [vmem:[%s896_s0 + $0x38] sm:$0xff] }
   0x4   :  { %v18_v10 = vld [vmem:[%s896_s0 + $0x20] sm:$0xff]  ;;  %v90_v15 = vmul.f32 %v380_v1, %v19_v11  ;;  %v91_v16 = vmul.f32 %v380_v1, %v20_v12  ;;  %v92_v21 = vmul.f32 %v380_v1, %v21_v17  ;;  %v23_v27 = vld [vmem:[%s896_s0 + $0x48] sm:$0xff]  ;;  %v24_v28 = vld [vmem:[%s896_s0 + $0x50] sm:$0xff] }
   0x5   :  { %v156_v13 = vadd.f32 %v385_v2, %v85_v3  ;;  %v89_v14 = vmul.f32 %v380_v1, %v18_v10  ;;  %v157_v18 = vadd.f32 %v385_v2, %v86_v7  ;;  %v158_v19 = vadd.f32 %v385_v2, %v87_v8  ;;  %v22_v22 = vld [vmem:[%s896_s0 + $0x40] sm:$0xff]  ;;  %v25_v29 = vld [vmem:[%s896_s0 + $0x58] sm:$0xff]  ;;  %v27_v35 = vld [vmem:[%s896_s0 + $0x68] sm:$0xff] }
   0x6   :  { %v159_v20 = vadd.f32 %v385_v2, %v88_v9  ;;  %v161_v25 = vadd.f32 %v385_v2, %v90_v15  ;;  %v162_v26 = vadd.f32 %v385_v2, %v91_v16  ;;  %v163_v33 = vadd.f32 %v385_v2, %v92_v21  ;;  %v26_v34 = vld [vmem:[%s896_s0 + $0x60] sm:$0xff]  ;;  %v28_v36 = vld [vmem:[%s896_s0 + $0x70] sm:$0xff]  ;;  %v29_v41 = vld [vmem:[%s896_s0 + $0x78] sm:$0xff] }
   0x7   :  { %v220_v23 = vmax.f32 %v156_v13, 0.0  ;;  %v160_v24 = vadd.f32 %v385_v2, %v89_v14  ;;  %v221_v30 = vmax.f32 %v157_v18, 0.0  ;;  %v222_v31 = vmax.f32 %v158_v19, 0.0  ;;  %v30_v54 = vld [vmem:[%s896_s0 + $0x80] sm:$0xff]  ;;  %v31_v59 = vld [vmem:[%s896_s0 + $0x88] sm:$0xff]  ;;  %v32_v60 = vld [vmem:[%s896_s0 + $0x90] sm:$0xff] }
   0x8   :  { %v223_v32 = vmax.f32 %v159_v20, 0.0  ;;  %v225_v38 = vmax.f32 %v161_v25, 0.0  ;;  %v226_v39 = vmax.f32 %v162_v26, 0.0  ;;  %v93_v40 = vmul.f32 %v380_v1, %v22_v22  ;;  %v33_v61 = vld [vmem:[%s896_s0 + $0x98] sm:$0xff]  ;;  %v34_v4 = vld [vmem:[%s896_s0 + $0xa0] sm:$0xff]  ;;  %v35_v5 = vld [vmem:[%s896_s0 + $0xa8] sm:$0xff] }
   0x9   :  { %284 = vst [vmem:[%s899_s3] sm:$0xff] %v220_v23  ;;  %v224_v37 = vmax.f32 %v160_v24, 0.0  ;;  %285 = vst [vmem:[%s899_s3 + $0x8] sm:$0xff] %v221_v30  ;;  %v227_v42 = vmax.f32 %v163_v33, 0.0  ;;  %v94_v43 = vmul.f32 %v380_v1, %v23_v27  ;;  %v95_v44 = vmul.f32 %v380_v1, %v24_v28  ;;  %v36_v6 = vld [vmem:[%s896_s0 + $0xb0] sm:$0xff]  ;;  %v37_v11 = vld [vmem:[%s896_s0 + $0xb8] sm:$0xff] }
   0xa   :  { %286 = vst [vmem:[%s899_s3 + $0x10] sm:$0xff] %v222_v31  ;;  %287 = vst [vmem:[%s899_s3 + $0x18] sm:$0xff] %v223_v32  ;;  %v96_v45 = vmul.f32 %v380_v1, %v25_v29  ;;  %v164_v46 = vadd.f32 %v385_v2, %v93_v40  ;;  %v97_v47 = vmul.f32 %v380_v1, %v26_v34  ;;  %v38_v24 = vld [vmem:[%s896_s0 + $0xc0] sm:$0xff]  ;;  %v39_v29 = vld [vmem:[%s896_s0 + $0xc8] sm:$0xff] }
   0xb   :  { %288 = vst [vmem:[%s899_s3 + $0x20] sm:$0xff] %v224_v37  ;;  %289 = vst [vmem:[%s899_s3 + $0x28] sm:$0xff] %v225_v38  ;;  %v98_v48 = vmul.f32 %v380_v1, %v27_v35  ;;  %v99_v49 = vmul.f32 %v380_v1, %v28_v36  ;;  %v165_v50 = vadd.f32 %v385_v2, %v94_v43  ;;  %v40_v30 = vld [vmem:[%s896_s0 + $0xd0] sm:$0xff]  ;;  %v41_v31 = vld [vmem:[%s896_s0 + $0xd8] sm:$0xff] }
   0xc   :  { %290 = vst [vmem:[%s899_s3 + $0x30] sm:$0xff] %v226_v39  ;;  %291 = vst [vmem:[%s899_s3 + $0x38] sm:$0xff] %v227_v42  ;;  %v166_v51 = vadd.f32 %v385_v2, %v95_v44  ;;  %v167_v52 = vadd.f32 %v385_v2, %v96_v45  ;;  %v100_v53 = vmul.f32 %v380_v1, %v29_v41  ;;  %v228_v55 = vmax.f32 %v164_v46, 0.0  ;;  %v42_v36 = vld [vmem:[%s896_s0 + $0xe0] sm:$0xff]  ;;  %v43_v37 = vld [vmem:[%s896_s0 + $0xe8] sm:$0xff] }
   0xd   :  { %v168_v56 = vadd.f32 %v385_v2, %v97_v47  ;;  %v169_v57 = vadd.f32 %v385_v2, %v98_v48  ;;  %v170_v58 = vadd.f32 %v385_v2, %v99_v49  ;;  %v229_v62 = vmax.f32 %v165_v50, 0.0  ;;  %v44_v38 = vld [vmem:[%s896_s0 + $0xf0] sm:$0xff]  ;;  %v45_v43 = vld [vmem:[%s896_s0 + $0xf8] sm:$0xff] }
   0xe   :  { %v230_v63 = vmax.f32 %v166_v51, 0.0  ;;  %v231_v0 = vmax.f32 %v167_v52, 0.0  ;;  %v171_v3 = vadd.f32 %v385_v2, %v100_v53  ;;  %292 = vst [vmem:[%s899_s3 + $0x40] sm:$0xff] %v228_v55  ;;  %v101_v10 = vmul.f32 %v380_v1, %v30_v54 }
   0xf   :  { %v232_v7 = vmax.f32 %v168_v56, 0.0  ;;  %v233_v8 = vmax.f32 %v169_v57, 0.0  ;;  %v234_v9 = vmax.f32 %v170_v58, 0.0  ;;  %293 = vst [vmem:[%s899_s3 + $0x48] sm:$0xff] %v229_v62  ;;  %v102_v13 = vmul.f32 %v380_v1, %v31_v59  ;;  %v46_v56 = vld [vmem:[%s896_s0 + $0x100] sm:$0xff]  ;;  %v48_v62 = vld [vmem:[%s896_s0 + $0x110] sm:$0xff] }
  0x10   :  { %294 = vst [vmem:[%s899_s3 + $0x50] sm:$0xff] %v230_v63  ;;  %295 = vst [vmem:[%s899_s3 + $0x58] sm:$0xff] %v231_v0  ;;  %v235_v12 = vmax.f32 %v171_v3, 0.0  ;;  %v103_v14 = vmul.f32 %v380_v1, %v32_v60  ;;  %v104_v15 = vmul.f32 %v380_v1, %v33_v61  ;;  %v172_v16 = vadd.f32 %v385_v2, %v101_v10  ;;  %v47_v61 = vld [vmem:[%s896_s0 + $0x108] sm:$0xff]  ;;  %v49_v63 = vld [vmem:[%s896_s0 + $0x118] sm:$0xff] }
  0x11   :  { %296 = vst [vmem:[%s899_s3 + $0x60] sm:$0xff] %v232_v7  ;;  %297 = vst [vmem:[%s899_s3 + $0x68] sm:$0xff] %v233_v8  ;;  %v105_v17 = vmul.f32 %v380_v1, %v34_v4  ;;  %v106_v18 = vmul.f32 %v380_v1, %v35_v5  ;;  %v107_v19 = vmul.f32 %v380_v1, %v36_v6  ;;  %v50_v6 = vld [vmem:[%s896_s0 + $0x120] sm:$0xff]  ;;  %v51_v7 = vld [vmem:[%s896_s0 + $0x128] sm:$0xff] }
  0x12   :  { %298 = vst [vmem:[%s899_s3 + $0x70] sm:$0xff] %v234_v9  ;;  %299 = vst [vmem:[%s899_s3 + $0x78] sm:$0xff] %v235_v12  ;;  %v173_v20 = vadd.f32 %v385_v2, %v102_v13  ;;  %v174_v21 = vadd.f32 %v385_v2, %v103_v14  ;;  %v175_v22 = vadd.f32 %v385_v2, %v104_v15  ;;  %v236_v25 = vmax.f32 %v172_v16, 0.0  ;;  %v52_v8 = vld [vmem:[%s896_s0 + $0x130] sm:$0xff]  ;;  %v53_v13 = vld [vmem:[%s896_s0 + $0x138] sm:$0xff] }
  0x13   :  { %v108_v23 = vmul.f32 %v380_v1, %v37_v11  ;;  %v176_v26 = vadd.f32 %v385_v2, %v105_v17  ;;  %v177_v27 = vadd.f32 %v385_v2, %v106_v18  ;;  %v178_v28 = vadd.f32 %v385_v2, %v107_v19 }
  0x14   :  { %v237_v32 = vmax.f32 %v173_v20, 0.0  ;;  %v238_v33 = vmax.f32 %v174_v21, 0.0  ;;  %v239_v34 = vmax.f32 %v175_v22, 0.0  ;;  %300 = vst [vmem:[%s899_s3 + $0x80] sm:$0xff] %v236_v25  ;;  %v109_v42 = vmul.f32 %v380_v1, %v38_v24 }
  0x15   :  { %v179_v35 = vadd.f32 %v385_v2, %v108_v23  ;;  %v240_v39 = vmax.f32 %v176_v26, 0.0  ;;  %v241_v40 = vmax.f32 %v177_v27, 0.0  ;;  %v242_v41 = vmax.f32 %v178_v28, 0.0  ;;  %v54_v26 = vld [vmem:[%s896_s0 + $0x140] sm:$0xff] }
  0x16   :  { %301 = vst [vmem:[%s899_s3 + $0x88] sm:$0xff] %v237_v32  ;;  %302 = vst [vmem:[%s899_s3 + $0x90] sm:$0xff] %v238_v33  ;;  %v110_v45 = vmul.f32 %v380_v1, %v39_v29  ;;  %v111_v46 = vmul.f32 %v380_v1, %v40_v30  ;;  %v112_v47 = vmul.f32 %v380_v1, %v41_v31  ;;  %v55_v31 = vld [vmem:[%s896_s0 + $0x148] sm:$0xff]  ;;  %v56_v32 = vld [vmem:[%s896_s0 + $0x150] sm:$0xff] }
  0x17   :  { %303 = vst [vmem:[%s899_s3 + $0x98] sm:$0xff] %v239_v34  ;;  %v243_v44 = vmax.f32 %v179_v35, 0.0  ;;  %304 = vst [vmem:[%s899_s3 + $0xa0] sm:$0xff] %v240_v39  ;;  %v180_v48 = vadd.f32 %v385_v2, %v109_v42  ;;  %v113_v49 = vmul.f32 %v380_v1, %v42_v36  ;;  %v114_v50 = vmul.f32 %v380_v1, %v43_v37  ;;  %v57_v33 = vld [vmem:[%s896_s0 + $0x158] sm:$0xff]  ;;  %v59_v39 = vld [vmem:[%s896_s0 + $0x168] sm:$0xff] }
  0x18   :  { %305 = vst [vmem:[%s899_s3 + $0xa8] sm:$0xff] %v241_v40  ;;  %306 = vst [vmem:[%s899_s3 + $0xb0] sm:$0xff] %v242_v41  ;;  %v115_v51 = vmul.f32 %v380_v1, %v44_v38  ;;  %v181_v52 = vadd.f32 %v385_v2, %v110_v45  ;;  %v182_v53 = vadd.f32 %v385_v2, %v111_v46  ;;  %v58_v38 = vld [vmem:[%s896_s0 + $0x160] sm:$0xff]  ;;  %v60_v40 = vld [vmem:[%s896_s0 + $0x170] sm:$0xff] }
  0x19   :  { %307 = vst [vmem:[%s899_s3 + $0xb8] sm:$0xff] %v243_v44  ;;  %v183_v54 = vadd.f32 %v385_v2, %v112_v47  ;;  %v116_v55 = vmul.f32 %v380_v1, %v45_v43  ;;  %v244_v57 = vmax.f32 %v180_v48, 0.0  ;;  %v184_v58 = vadd.f32 %v385_v2, %v113_v49  ;;  %v61_v45 = vld [vmem:[%s896_s0 + $0x178] sm:$0xff] }
  0x1a   :  { %v185_v59 = vadd.f32 %v385_v2, %v114_v50  ;;  %v186_v60 = vadd.f32 %v385_v2, %v115_v51  ;;  %v245_v0 = vmax.f32 %v181_v52, 0.0  ;;  %v246_v3 = vmax.f32 %v182_v53, 0.0 }
  0x1b   :  { %v247_v4 = vmax.f32 %v183_v54, 0.0  ;;  %v187_v5 = vadd.f32 %v385_v2, %v116_v55  ;;  %308 = vst [vmem:[%s899_s3 + $0xc0] sm:$0xff] %v244_v57  ;;  %v248_v9 = vmax.f32 %v184_v58, 0.0  ;;  %v117_v12 = vmul.f32 %v380_v1, %v46_v56  ;;  %v62_v58 = vld [vmem:[%s896_s0 + $0x180] sm:$0xff] }
  0x1c   :  { %v249_v10 = vmax.f32 %v185_v59, 0.0  ;;  %v250_v11 = vmax.f32 %v186_v60, 0.0  ;;  %309 = vst [vmem:[%s899_s3 + $0xc8] sm:$0xff] %v245_v0  ;;  %310 = vst [vmem:[%s899_s3 + $0xd0] sm:$0xff] %v246_v3  ;;  %v118_v15 = vmul.f32 %v380_v1, %v47_v61  ;;  %v119_v16 = vmul.f32 %v380_v1, %v48_v62  ;;  %v64_v0 = vld [vmem:[%s896_s0 + $0x190] sm:$0xff]  ;;  %v65_v3 = vld [vmem:[%s896_s0 + $0x198] sm:$0xff] }
  0x1d   :  { %311 = vst [vmem:[%s899_s3 + $0xd8] sm:$0xff] %v247_v4  ;;  %v251_v14 = vmax.f32 %v187_v5, 0.0  ;;  %v120_v17 = vmul.f32 %v380_v1, %v49_v63  ;;  %312 = vst [vmem:[%s899_s3 + $0xe0] sm:$0xff] %v248_v9  ;;  %v188_v18 = vadd.f32 %v385_v2, %v117_v12  ;;  %v121_v19 = vmul.f32 %v380_v1, %v50_v6  ;;  %v63_v63 = vld [vmem:[%s896_s0 + $0x188] sm:$0xff] }
  0x1e   :  { %313 = vst [vmem:[%s899_s3 + $0xe8] sm:$0xff] %v249_v10  ;;  %314 = vst [vmem:[%s899_s3 + $0xf0] sm:$0xff] %v250_v11  ;;  %v122_v20 = vmul.f32 %v380_v1, %v51_v7  ;;  %v123_v21 = vmul.f32 %v380_v1, %v52_v8  ;;  %v189_v22 = vadd.f32 %v385_v2, %v118_v15  ;;  %v66_v8 = vld [vmem:[%s896_s0 + $0x1a0] sm:$0xff]  ;;  %v67_v9 = vld [vmem:[%s896_s0 + $0x1a8] sm:$0xff] }
  0x1f   :  { %315 = vst [vmem:[%s899_s3 + $0xf8] sm:$0xff] %v251_v14  ;;  %v190_v23 = vadd.f32 %v385_v2, %v119_v16  ;;  %v191_v24 = vadd.f32 %v385_v2, %v120_v17  ;;  %v124_v25 = vmul.f32 %v380_v1, %v53_v13  ;;  %v252_v27 = vmax.f32 %v188_v18, 0.0  ;;  %v68_v10 = vld [vmem:[%s896_s0 + $0x1b0] sm:$0xff]  ;;  %v69_v15 = vld [vmem:[%s896_s0 + $0x1b8] sm:$0xff] }
  0x20   :  { %v192_v28 = vadd.f32 %v385_v2, %v121_v19  ;;  %v193_v29 = vadd.f32 %v385_v2, %v122_v20  ;;  %v194_v30 = vadd.f32 %v385_v2, %v123_v21  ;;  %v253_v34 = vmax.f32 %v189_v22, 0.0 }
  0x21   :  { %v254_v35 = vmax.f32 %v190_v23, 0.0  ;;  %v255_v36 = vmax.f32 %v191_v24, 0.0  ;;  %v195_v37 = vadd.f32 %v385_v2, %v124_v25  ;;  %316 = vst [vmem:[%s899_s3 + $0x100] sm:$0xff] %v252_v27  ;;  %v125_v44 = vmul.f32 %v380_v1, %v54_v26 }
  0x22   :  { %v256_v41 = vmax.f32 %v192_v28, 0.0  ;;  %v257_v42 = vmax.f32 %v193_v29, 0.0  ;;  %v258_v43 = vmax.f32 %v194_v30, 0.0  ;;  %317 = vst [vmem:[%s899_s3 + $0x108] sm:$0xff] %v253_v34  ;;  %v126_v47 = vmul.f32 %v380_v1, %v55_v31  ;;  %v70_v28 = vld [vmem:[%s896_s0 + $0x1c0] sm:$0xff]  ;;  %v72_v34 = vld [vmem:[%s896_s0 + $0x1d0] sm:$0xff] }
  0x23   :  { %318 = vst [vmem:[%s899_s3 + $0x110] sm:$0xff] %v254_v35  ;;  %319 = vst [vmem:[%s899_s3 + $0x118] sm:$0xff] %v255_v36  ;;  %v259_v46 = vmax.f32 %v195_v37, 0.0  ;;  %v127_v48 = vmul.f32 %v380_v1, %v56_v32  ;;  %v128_v49 = vmul.f32 %v380_v1, %v57_v33  ;;  %v196_v50 = vadd.f32 %v385_v2, %v125_v44  ;;  %v71_v33 = vld [vmem:[%s896_s0 + $0x1c8] sm:$0xff]  ;;  %v73_v35 = vld [vmem:[%s896_s0 + $0x1d8] sm:$0xff] }
  0x24   :  { %320 = vst [vmem:[%s899_s3 + $0x120] sm:$0xff] %v256_v41  ;;  %321 = vst [vmem:[%s899_s3 + $0x128] sm:$0xff] %v257_v42  ;;  %v129_v51 = vmul.f32 %v380_v1, %v58_v38  ;;  %v130_v52 = vmul.f32 %v380_v1, %v59_v39  ;;  %v131_v53 = vmul.f32 %v380_v1, %v60_v40  ;;  %v74_v40 = vld [vmem:[%s896_s0 + $0x1e0] sm:$0xff]  ;;  %v75_v41 = vld [vmem:[%s896_s0 + $0x1e8] sm:$0xff] }
  0x25   :  { %322 = vst [vmem:[%s899_s3 + $0x130] sm:$0xff] %v258_v43  ;;  %323 = vst [vmem:[%s899_s3 + $0x138] sm:$0xff] %v259_v46  ;;  %v197_v54 = vadd.f32 %v385_v2, %v126_v47  ;;  %v198_v55 = vadd.f32 %v385_v2, %v127_v48  ;;  %v199_v56 = vadd.f32 %v385_v2, %v128_v49  ;;  %v260_v59 = vmax.f32 %v196_v50, 0.0  ;;  %v76_v42 = vld [vmem:[%s896_s0 + $0x1f0] sm:$0xff]  ;;  %v77_v47 = vld [vmem:[%s896_s0 + $0x1f8] sm:$0xff] }
  0x26   :  { %v132_v57 = vmul.f32 %v380_v1, %v61_v45  ;;  %v200_v60 = vadd.f32 %v385_v2, %v129_v51  ;;  %v201_v61 = vadd.f32 %v385_v2, %v130_v52  ;;  %v202_v62 = vadd.f32 %v385_v2, %v131_v53 }
  0x27   :  { %v261_v4 = vmax.f32 %v197_v54, 0.0  ;;  %v262_v5 = vmax.f32 %v198_v55, 0.0  ;;  %v263_v6 = vmax.f32 %v199_v56, 0.0  ;;  %324 = vst [vmem:[%s899_s3 + $0x140] sm:$0xff] %v260_v59  ;;  %v133_v14 = vmul.f32 %v380_v1, %v62_v58 }
  0x28   :  { %v203_v7 = vadd.f32 %v385_v2, %v132_v57  ;;  %v264_v11 = vmax.f32 %v200_v60, 0.0  ;;  %v265_v12 = vmax.f32 %v201_v61, 0.0  ;;  %v266_v13 = vmax.f32 %v202_v62, 0.0 }
  0x29   :  { %325 = vst [vmem:[%s899_s3 + $0x148] sm:$0xff] %v261_v4  ;;  %326 = vst [vmem:[%s899_s3 + $0x150] sm:$0xff] %v262_v5  ;;  %v134_v17 = vmul.f32 %v380_v1, %v63_v63  ;;  %v135_v18 = vmul.f32 %v380_v1, %v64_v0  ;;  %v136_v19 = vmul.f32 %v380_v1, %v65_v3 }
  0x2a   :  { %327 = vst [vmem:[%s899_s3 + $0x158] sm:$0xff] %v263_v6  ;;  %v267_v16 = vmax.f32 %v203_v7, 0.0  ;;  %328 = vst [vmem:[%s899_s3 + $0x160] sm:$0xff] %v264_v11  ;;  %v204_v20 = vadd.f32 %v385_v2, %v133_v14  ;;  %v137_v21 = vmul.f32 %v380_v1, %v66_v8  ;;  %v138_v22 = vmul.f32 %v380_v1, %v67_v9 }
  0x2b   :  { %329 = vst [vmem:[%s899_s3 + $0x168] sm:$0xff] %v265_v12  ;;  %330 = vst [vmem:[%s899_s3 + $0x170] sm:$0xff] %v266_v13  ;;  %v139_v23 = vmul.f32 %v380_v1, %v68_v10  ;;  %v205_v24 = vadd.f32 %v385_v2, %v134_v17  ;;  %v206_v25 = vadd.f32 %v385_v2, %v135_v18 }
  0x2c   :  { %331 = vst [vmem:[%s899_s3 + $0x178] sm:$0xff] %v267_v16  ;;  %v207_v26 = vadd.f32 %v385_v2, %v136_v19  ;;  %v140_v27 = vmul.f32 %v380_v1, %v69_v15  ;;  %v268_v29 = vmax.f32 %v204_v20, 0.0  ;;  %v208_v30 = vadd.f32 %v385_v2, %v137_v21 }
  0x2d   :  { %v209_v31 = vadd.f32 %v385_v2, %v138_v22  ;;  %v210_v32 = vadd.f32 %v385_v2, %v139_v23  ;;  %v269_v36 = vmax.f32 %v205_v24, 0.0  ;;  %v270_v37 = vmax.f32 %v206_v25, 0.0 }
  0x2e   :  { %v271_v38 = vmax.f32 %v207_v26, 0.0  ;;  %v211_v39 = vadd.f32 %v385_v2, %v140_v27  ;;  %332 = vst [vmem:[%s899_s3 + $0x180] sm:$0xff] %v268_v29  ;;  %v272_v43 = vmax.f32 %v208_v30, 0.0  ;;  %v141_v46 = vmul.f32 %v380_v1, %v70_v28 }
  0x2f   :  { %v273_v44 = vmax.f32 %v209_v31, 0.0  ;;  %v274_v45 = vmax.f32 %v210_v32, 0.0  ;;  %333 = vst [vmem:[%s899_s3 + $0x188] sm:$0xff] %v269_v36  ;;  %334 = vst [vmem:[%s899_s3 + $0x190] sm:$0xff] %v270_v37  ;;  %v142_v49 = vmul.f32 %v380_v1, %v71_v33  ;;  %v143_v50 = vmul.f32 %v380_v1, %v72_v34 }
  0x30   :  { %335 = vst [vmem:[%s899_s3 + $0x198] sm:$0xff] %v271_v38  ;;  %v275_v48 = vmax.f32 %v211_v39, 0.0  ;;  %v144_v51 = vmul.f32 %v380_v1, %v73_v35  ;;  %336 = vst [vmem:[%s899_s3 + $0x1a0] sm:$0xff] %v272_v43  ;;  %v212_v52 = vadd.f32 %v385_v2, %v141_v46  ;;  %v145_v53 = vmul.f32 %v380_v1, %v74_v40 }
  0x31   :  { %337 = vst [vmem:[%s899_s3 + $0x1a8] sm:$0xff] %v273_v44  ;;  %338 = vst [vmem:[%s899_s3 + $0x1b0] sm:$0xff] %v274_v45  ;;  %v146_v54 = vmul.f32 %v380_v1, %v75_v41  ;;  %v147_v55 = vmul.f32 %v380_v1, %v76_v42  ;;  %v213_v56 = vadd.f32 %v385_v2, %v142_v49 }
  0x32   :  { %339 = vst [vmem:[%s899_s3 + $0x1b8] sm:$0xff] %v275_v48  ;;  %v214_v57 = vadd.f32 %v385_v2, %v143_v50  ;;  %v215_v58 = vadd.f32 %v385_v2, %v144_v51  ;;  %v148_v59 = vmul.f32 %v380_v1, %v77_v47  ;;  %v276_v60 = vmax.f32 %v212_v52, 0.0 }
  0x33   :  { %v216_v61 = vadd.f32 %v385_v2, %v145_v53  ;;  %v217_v62 = vadd.f32 %v385_v2, %v146_v54  ;;  %v218_v63 = vadd.f32 %v385_v2, %v147_v55  ;;  %v277_v0 = vmax.f32 %v213_v56, 0.0 }
  0x34   :  { %v278_v3 = vmax.f32 %v214_v57, 0.0  ;;  %v279_v4 = vmax.f32 %v215_v58, 0.0  ;;  %v219_v5 = vadd.f32 %v385_v2, %v148_v59  ;;  %340 = vst [vmem:[%s899_s3 + $0x1c0] sm:$0xff] %v276_v60 }
  0x35   :  { %v280_v6 = vmax.f32 %v216_v61, 0.0  ;;  %v281_v7 = vmax.f32 %v217_v62, 0.0  ;;  %v282_v8 = vmax.f32 %v218_v63, 0.0  ;;  %341 = vst [vmem:[%s899_s3 + $0x1c8] sm:$0xff] %v277_v0 }
  0x36   :  { %342 = vst [vmem:[%s899_s3 + $0x1d0] sm:$0xff] %v278_v3  ;;  %343 = vst [vmem:[%s899_s3 + $0x1d8] sm:$0xff] %v279_v4  ;;  %v283_v1 = vmax.f32 %v219_v5, 0.0 }
  0x37   :  { %344 = vst [vmem:[%s899_s3 + $0x1e0] sm:$0xff] %v280_v6  ;;  %345 = vst [vmem:[%s899_s3 + $0x1e8] sm:$0xff] %v281_v7 }
  0x38   :  { %346 = vst [vmem:[%s899_s3 + $0x1f0] sm:$0xff] %v282_v8  ;;  %347 = vst [vmem:[%s899_s3 + $0x1f8] sm:$0xff] %v283_v1 }

// kernel: resnet_forward.24
= control target key start
LH: loop header
LB: loop body
LE: loop exit
PB: predicated region body
PF: predicated region fallthrough
CT: control target
= control target key end

     0   :  { %s1588_s15 = smov 0   ;;  %s1590_s16 = smov 0   ;;  %s1839_s0 = inlined_call_operand.vmem [shape: bf16[512,256], index: 0, kind: input, shape index: {}]   ;;  %s1840_s1 = inlined_call_operand.vmem [shape: bf16[256,128], index: 1, kind: input, shape index: {}]   ;;  %s1841_s2 = inlined_call_operand.vmem [shape: f32[512,128], index: 2, kind: output, shape index: {0}]   ;;  %s1842_s3 = inlined_call_operand.vmem [shape: f32[16,128], index: 3, kind: output, shape index: {1}]   ;;  %s1843_s4 = inlined_call_operand.vmem [shape: f32[16,128], index: 4, kind: output, shape index: {2}]  }
   0x1   :  { %s1592_s17 = smov 0  }
   0x2 LB: > { %s34_s18 = sadd.s32 1, %s1557_s16  ;;  %p1263_p0 = scmp.ge.s32.totalorder %s1561_s17, 1  ;;  %s1561_s17 = sphi %s1592_s17, %s15_s17   ;;  %s1557_s16 = sphi %s1590_s16, %s1845_s16   ;;  %s1553_s15 = sphi %s1588_s15, %s1844_s15  }
   0x3   : > { %p36_p1 = scmp.ge.s32.totalorder %s34_s18, 2  ;;  %p217_p2 = scmp.lt.s32.totalorder %s1561_s17, 3 }
   0x5   : > { %s1847_s18 = smov (%p36_p1, %s34_s18), 0  ;;  %p218_p3 = pnand %p1263_p0, %p217_p2 }
   0x6   : > { %v1475_v0 = vld [vmem:[%s1840_s1 + $0x40] sm:$0xff] (!%p218_p3)   ;;  %s1264_s21 = sshll.u32 (!%p218_p3), %s1553_s15, 5  ;;  %v1477_v2 = vld [vmem:[%s1840_s1 + $0x48] sm:$0xff] (!%p218_p3)   ;;  %v1479_v4 = vld [vmem:[%s1840_s1 + $0x50] sm:$0xff] (!%p218_p3)   ;;  %p303_p5 = scmp.lt.s32.totalorder (!%p218_p3), %s1553_s15, 1 }
   0x7   : > { %221 = sbr.rel (%p218_p3) target bundleno = 361 (0x169), region = 28  ;;  %v1476_v1 = vld [vmem:[%s1840_s1] sm:$0xff] (!%p218_p3)   ;;  %1322 = vmatprep.subr.bf16.mxu0 (!%p218_p3), %v1475_v0  ;;  %1434 = vmatprep.subr.bf16.mxu1 (!%p218_p3), %v1475_v0  ;;  %v1478_v3 = vld [vmem:[%s1840_s1 + $0x8] sm:$0xff] (!%p218_p3)   ;;  %p275_p4 = scmp.lt.s32.totalorder (!%p218_p3), %s1264_s21, 63  ;;  %v1480_v5 = vld [vmem:[%s1840_s1 + $0x10] sm:$0xff] (!%p218_p3)  }
   0x8   : > { %1323 = vmatpush3.bf16.msra.mxu0 (!%p218_p3), %v1476_v1  ;;  %1442 = vmatpush3.bf16.msra.mxu1 (!%p218_p3), %v1476_v1  ;;  %v1481_v6 = vld [vmem:[%s1840_s1 + $0x58] sm:$0xff] (!%p218_p3)   ;;  %v1483_v8 = vld [vmem:[%s1840_s1 + $0x60] sm:$0xff] (!%p218_p3)   ;;  %v1485_v10 = vld [vmem:[%s1840_s1 + $0x68] sm:$0xff] (!%p218_p3)  }
   0x9   : > { %1324 = vmatprep.subr.bf16.mxu0 (!%p218_p3), %v1477_v2  ;;  %1435 = vmatprep.subr.bf16.mxu1 (!%p218_p3), %v1477_v2  ;;  %v1482_v7 = vld [vmem:[%s1840_s1 + $0x18] sm:$0xff] (!%p218_p3)   ;;  %v1484_v9 = vld [vmem:[%s1840_s1 + $0x20] sm:$0xff] (!%p218_p3)   ;;  %v1486_v12 = vld [vmem:[%s1840_s1 + $0x28] sm:$0xff] (!%p218_p3)  }
   0xa   : > { %v1487_v13 = vld [vmem:[%s1840_s1 + $0x70] sm:$0xff] (!%p218_p3)   ;;  %v1489_v16 = vld [vmem:[%s1840_s1 + $0x78] sm:$0xff] (!%p218_p3)  }
   0xb   : > { %v1488_v15 = vld [vmem:[%s1840_s1 + $0x30] sm:$0xff] (!%p218_p3)   ;;  %v1490_v17 = vld [vmem:[%s1840_s1 + $0x38] sm:$0xff] (!%p218_p3)  }
   0xc   : > { %1325 = vmatpush3.bf16.msra.mxu0 (!%p218_p3), %v1478_v3  ;;  %1443 = vmatpush3.bf16.msra.mxu1 (!%p218_p3), %v1478_v3 }
   0xd   : > { %1326 = vmatprep.subr.bf16.mxu0 (!%p218_p3), %v1479_v4  ;;  %1436 = vmatprep.subr.bf16.mxu1 (!%p218_p3), %v1479_v4 }
   0xe   : > { %s1849_s21 = smov (!%p275_p4, %s1264_s21), 63  ;;  %s1851_s15 = smov (!%p303_p5, %s1553_s15), 1 }
   0xf   : > { %s1321_s10 = sshll.u32 %s1849_s21, 3  ;;  %s1269_s21 = sshll.u32 %s1851_s15, 3 }
  0x10   : > { %1327 = vmatpush3.bf16.msra.mxu0 %v1480_v5  ;;  %1444 = vmatpush3.bf16.msra.mxu1 %v1480_v5  ;;  %s1644_s19 = scalar_lea.vmem %s1839_s0, %s1321_s10  ;;  %s1704_s12 = scalar_lea.vmem %s1841_s2, %s1321_s10 }
  0x11   : > { %1328 = vmatprep.subr.bf16.mxu0 %v1481_v6  ;;  %1437 = vmatprep.subr.bf16.mxu1 %v1481_v6  ;;  %v1493_v11 = vld [vmem:[%s1644_s19 + $0x4] ss:$8 sps:$4 sm:$0xff]   ;;  %v1491_v18 = vld [vmem:[%s1644_s19] ss:$8 sps:$4 sm:$0xff]   ;;  %v1494_v19 = vld [vmem:[%s1644_s19 + $0x14] ss:$8 sps:$4 sm:$0xff]   ;;  %s309_s14 = scalar_lea.vmem %s1842_s3, %s1269_s21  ;;  %s316_s22 = scalar_lea.vmem %s1843_s4, %s1269_s21 }
  0x12   : > { %738 = vmatprep.mubr.bf16.mxu0 %v1493_v11  ;;  %v1505_v14 = vld [vmem:[%s1644_s19 + $0x84] ss:$8 sps:$4 sm:$0xff]   ;;  %v1503_v20 = vld [vmem:[%s1644_s19 + $0x80] ss:$8 sps:$4 sm:$0xff]   ;;  %v1509_v21 = vld [vmem:[%s1644_s19 + $0x94] ss:$8 sps:$4 sm:$0xff]  }
  0x13   : > { %802 = vmatprep.mubr.bf16.mxu1 %v1505_v14  ;;  %v1496_v22 = vld [vmem:[%s1644_s19 + $0x10] ss:$8 sps:$4 sm:$0xff]   ;;  %v1497_v23 = vld [vmem:[%s1644_s19 + $0x24] ss:$8 sps:$4 sm:$0xff]   ;;  %v1499_v26 = vld [vmem:[%s1644_s19 + $0x20] ss:$8 sps:$4 sm:$0xff]  }
  0x14   : > { %1329 = vmatpush3.bf16.msra.mxu0 %v1482_v7  ;;  %1445 = vmatpush3.bf16.msra.mxu1 %v1482_v7  ;;  %v1511_v24 = vld [vmem:[%s1644_s19 + $0x90] ss:$8 sps:$4 sm:$0xff]   ;;  %v1515_v25 = vld [vmem:[%s1644_s19 + $0xa4] ss:$8 sps:$4 sm:$0xff]   ;;  %v1500_v27 = vld [vmem:[%s1644_s19 + $0x34] ss:$8 sps:$4 sm:$0xff]  }
  0x15   : > { %1330 = vmatprep.subr.bf16.mxu0 %v1483_v8  ;;  %1438 = vmatprep.subr.bf16.mxu1 %v1483_v8  ;;  %v1517_v28 = vld [vmem:[%s1644_s19 + $0xa0] ss:$8 sps:$4 sm:$0xff]   ;;  %v1521_v29 = vld [vmem:[%s1644_s19 + $0xb4] ss:$8 sps:$4 sm:$0xff]   ;;  %v1502_v30 = vld [vmem:[%s1644_s19 + $0x30] ss:$8 sps:$4 sm:$0xff]  }
  0x16   : > { %v1506_v31 = vld [vmem:[%s1644_s19 + $0x44] ss:$8 sps:$4 sm:$0xff]   ;;  %v1523_v32 = vld [vmem:[%s1644_s19 + $0xb0] ss:$8 sps:$4 sm:$0xff]   ;;  %v1508_v34 = vld [vmem:[%s1644_s19 + $0x40] ss:$8 sps:$4 sm:$0xff]  }
  0x17   : > { %v1527_v33 = vld [vmem:[%s1644_s19 + $0xc4] ss:$8 sps:$4 sm:$0xff]   ;;  %v1512_v35 = vld [vmem:[%s1644_s19 + $0x54] ss:$8 sps:$4 sm:$0xff]   ;;  %v1529_v36 = vld [vmem:[%s1644_s19 + $0xc0] ss:$8 sps:$4 sm:$0xff]  }
  0x18   : > { %1331 = vmatpush3.bf16.msra.mxu0 %v1484_v9  ;;  %1446 = vmatpush3.bf16.msra.mxu1 %v1484_v9  ;;  %v1530_v37 = vld [vmem:[%s1644_s19 + $0xd4] ss:$8 sps:$4 sm:$0xff]   ;;  %v1514_v38 = vld [vmem:[%s1644_s19 + $0x50] ss:$8 sps:$4 sm:$0xff]   ;;  %v1518_v39 = vld [vmem:[%s1644_s19 + $0x64] ss:$8 sps:$4 sm:$0xff]  }
  0x19   : > { %1332 = vmatprep.subr.bf16.mxu0 %v1485_v10  ;;  %1439 = vmatprep.subr.bf16.mxu1 %v1485_v10  ;;  %v1532_v40 = vld [vmem:[%s1644_s19 + $0xd0] ss:$8 sps:$4 sm:$0xff]   ;;  %v1533_v41 = vld [vmem:[%s1644_s19 + $0xe4] ss:$8 sps:$4 sm:$0xff]   ;;  %v1520_v42 = vld [vmem:[%s1644_s19 + $0x60] ss:$8 sps:$4 sm:$0xff]  }
  0x1a   : > { %v1524_v43 = vld [vmem:[%s1644_s19 + $0x74] ss:$8 sps:$4 sm:$0xff]   ;;  %v1535_v44 = vld [vmem:[%s1644_s19 + $0xe0] ss:$8 sps:$4 sm:$0xff]   ;;  %v1526_v46 = vld [vmem:[%s1644_s19 + $0x70] ss:$8 sps:$4 sm:$0xff]  }
  0x1b   : > { %v1536_v45 = vld [vmem:[%s1644_s19 + $0xf4] ss:$8 sps:$4 sm:$0xff]   ;;  %v1538_v47 = vld [vmem:[%s1644_s19 + $0xf0] ss:$8 sps:$4 sm:$0xff]  }
  0x1c   : > { %1333 = vmatpush3.bf16.msra.mxu0 %v1486_v12  ;;  %1447 = vmatpush3.bf16.msra.mxu1 %v1486_v12 }
  0x1d   : > { %1334 = vmatprep.subr.bf16.mxu0 %v1487_v13  ;;  %1440 = vmatprep.subr.bf16.mxu1 %v1487_v13 }
  0x20   : > { %1335 = vmatpush3.bf16.msra.mxu0 %v1488_v15  ;;  %1448 = vmatpush3.bf16.msra.mxu1 %v1488_v15 }
  0x21   : > { %1336 = vmatprep.subr.bf16.mxu0 %v1489_v16  ;;  %1441 = vmatprep.subr.bf16.mxu1 %v1489_v16 }
  0x24   : > { %1337 = vmatpush3.bf16.msra.mxu0 %v1490_v17  ;;  %1449 = vmatpush3.bf16.msra.mxu1 %v1490_v17 }
  0x27   : > { %739 = vmatmul.mubr.bf16.vlgmr.msra.gmra.mrb[0].mxu0 %v1491_v18  ;;  %803 = vmatmul.mubr.bf16.vlgmr.msra.gmra.mrb[0].mxu1 %v1503_v20 }
  0x28   : > { %746 = vmatprep.mubr.bf16.mxu0 %v1494_v19  ;;  %810 = vmatprep.mubr.bf16.mxu1 %v1509_v21 }
  0x2f   : > { %747 = vmatmul.mubr.bf16.gmra.mrb[4].mxu0 %v1496_v22  ;;  %811 = vmatmul.mubr.bf16.gmra.mrb[4].mxu1 %v1511_v24 }
  0x30   : > { %754 = vmatprep.mubr.bf16.mxu0 %v1497_v23  ;;  %818 = vmatprep.mubr.bf16.mxu1 %v1515_v25 }
  0x37   : > { %755 = vmatmul.mubr.bf16.gmra.mrb[8].mxu0 %v1499_v26  ;;  %819 = vmatmul.mubr.bf16.gmra.mrb[8].mxu1 %v1517_v28 }
  0x38   : > { %762 = vmatprep.mubr.bf16.mxu0 %v1500_v27  ;;  %826 = vmatprep.mubr.bf16.mxu1 %v1521_v29 }
  0x3f   : > { %763 = vmatmul.mubr.bf16.gmra.mrb[12].mxu0 %v1502_v30  ;;  %827 = vmatmul.mubr.bf16.gmra.mrb[12].mxu1 %v1523_v32 }
  0x40   : > { %770 = vmatprep.mubr.bf16.mxu0 %v1506_v31  ;;  %834 = vmatprep.mubr.bf16.mxu1 %v1527_v33 }
  0x47   : > { %771 = vmatmul.mubr.bf16.gmra.mrb[16].mxu0 %v1508_v34  ;;  %835 = vmatmul.mubr.bf16.gmra.mrb[16].mxu1 %v1529_v36 }
  0x48   : > { %778 = vmatprep.mubr.bf16.mxu0 %v1512_v35  ;;  %842 = vmatprep.mubr.bf16.mxu1 %v1530_v37 }
  0x4f   : > { %779 = vmatmul.mubr.bf16.gmra.mrb[20].mxu0 %v1514_v38  ;;  %843 = vmatmul.mubr.bf16.gmra.mrb[20].mxu1 %v1532_v40 }
  0x50   : > { %786 = vmatprep.mubr.bf16.mxu0 %v1518_v39  ;;  %850 = vmatprep.mubr.bf16.mxu1 %v1533_v41 }
  0x57   : > { %787 = vmatmul.mubr.bf16.gmra.mrb[24].mxu0 %v1520_v42  ;;  %851 = vmatmul.mubr.bf16.gmra.mrb[24].mxu1 %v1535_v44 }
  0x58   : > { %794 = vmatprep.mubr.bf16.mxu0 %v1524_v43  ;;  %858 = vmatprep.mubr.bf16.mxu1 %v1536_v45 }
  0x5f   : > { %795 = vmatmul.mubr.bf16.gmra.mrb[28].mxu0 %v1526_v46  ;;  %859 = vmatmul.mubr.bf16.gmra.mrb[28].mxu1 %v1538_v47 }
  0xfa   : > { %v1338_v48 = vpop.f32.mrb[0].mxu0  ;;  %v1386_v50 = vpop.f32.mrb[0].mxu1 }
  0xfb   : > { %v1339_v49 = vpop.f32.mrb[1].mxu0  ;;  %v1387_v53 = vpop.f32.mrb[1].mxu1 }
  0xfc   : > { %v1340_v51 = vadd.f32 %v1339_v49, %v1338_v48  ;;  %v1341_v52 = vpop.f32.mrb[2].mxu0  ;;  %v1706_v55 = vadd.f32 %v1387_v53, %v1386_v50  ;;  %v1389_v56 = vpop.f32.mrb[2].mxu1 }
  0xfd   : > { %v1342_v54 = vpop.f32.mrb[3].mxu0  ;;  %v1390_v58 = vpop.f32.mrb[3].mxu1 }
  0xfe   : > { %v1343_v57 = vadd.f32 %v1342_v54, %v1341_v52  ;;  %v1708_v59 = vadd.f32 %v1390_v58, %v1389_v56  ;;  %899 = vst [vmem:[%s1704_s12] sm:$0xff] %v1340_v51  ;;  %915 = vst [vmem:[%s1704_s12 + $0x80] sm:$0xff] %v1706_v55  ;;  %v1003_v60 = vmul.f32 %v1340_v51, %v1340_v51 }
 0x100   : > { %900 = vst [vmem:[%s1704_s12 + $0x8] sm:$0xff] %v1343_v57  ;;  %v966_v61 = vadd.f32 %v1343_v57, %v1340_v51  ;;  %v1004_v62 = vmul.f32 %v1343_v57, %v1343_v57  ;;  %916 = vst [vmem:[%s1704_s12 + $0x88] sm:$0xff] %v1708_v59 }
 0x102   : > { %v1344_v63 = vpop.f32.mrb[4].mxu0  ;;  %v1392_v1 = vpop.f32.mrb[4].mxu1  ;;  %v1035_v2 = vadd.f32 %v1004_v62, %v1003_v60 }
 0x103   : > { %v1345_v0 = vpop.f32.mrb[5].mxu0  ;;  %v1393_v5 = vpop.f32.mrb[5].mxu1 }
 0x104   : > { %v1346_v3 = vadd.f32 %v1345_v0, %v1344_v63  ;;  %v1347_v4 = vpop.f32.mrb[6].mxu0  ;;  %v1716_v7 = vadd.f32 %v1393_v5, %v1392_v1  ;;  %v1395_v8 = vpop.f32.mrb[6].mxu1 }
 0x105   : > { %v1348_v6 = vpop.f32.mrb[7].mxu0  ;;  %v1396_v10 = vpop.f32.mrb[7].mxu1 }
 0x106   : > { %v1349_v9 = vadd.f32 %v1348_v6, %v1347_v4  ;;  %v1718_v11 = vadd.f32 %v1396_v10, %v1395_v8  ;;  %901 = vst [vmem:[%s1704_s12 + $0x10] sm:$0xff] %v1346_v3  ;;  %v967_v12 = vadd.f32 %v1346_v3, %v966_v61  ;;  %v1005_v13 = vmul.f32 %v1346_v3, %v1346_v3 }
 0x107   : > { %917 = vst [vmem:[%s1704_s12 + $0x90] sm:$0xff] %v1716_v7 }
 0x108   : > { %v1036_v14 = vadd.f32 %v1035_v2, %v1005_v13  ;;  %902 = vst [vmem:[%s1704_s12 + $0x18] sm:$0xff] %v1349_v9  ;;  %v968_v15 = vadd.f32 %v1349_v9, %v967_v12  ;;  %v1006_v16 = vmul.f32 %v1349_v9, %v1349_v9  ;;  %918 = vst [vmem:[%s1704_s12 + $0x98] sm:$0xff] %v1718_v11 }
 0x10a   : > { %v1350_v17 = vpop.f32.mrb[8].mxu0  ;;  %v1398_v19 = vpop.f32.mrb[8].mxu1  ;;  %v1037_v20 = vadd.f32 %v1036_v14, %v1006_v16 }
 0x10b   : > { %v1351_v18 = vpop.f32.mrb[9].mxu0  ;;  %v1399_v23 = vpop.f32.mrb[9].mxu1 }
 0x10c   : > { %v1352_v21 = vadd.f32 %v1351_v18, %v1350_v17  ;;  %v1353_v22 = vpop.f32.mrb[10].mxu0  ;;  %v1726_v25 = vadd.f32 %v1399_v23, %v1398_v19  ;;  %v1401_v26 = vpop.f32.mrb[10].mxu1 }
 0x10d   : > { %v1354_v24 = vpop.f32.mrb[11].mxu0  ;;  %v1402_v28 = vpop.f32.mrb[11].mxu1 }
 0x10e   : > { %v1355_v27 = vadd.f32 %v1354_v24, %v1353_v22  ;;  %v1728_v29 = vadd.f32 %v1402_v28, %v1401_v26  ;;  %903 = vst [vmem:[%s1704_s12 + $0x20] sm:$0xff] %v1352_v21  ;;  %v969_v30 = vadd.f32 %v1352_v21, %v968_v15  ;;  %v1007_v31 = vmul.f32 %v1352_v21, %v1352_v21 }
 0x10f   : > { %919 = vst [vmem:[%s1704_s12 + $0xa0] sm:$0xff] %v1726_v25 }
 0x110   : > { %v1038_v32 = vadd.f32 %v1037_v20, %v1007_v31  ;;  %904 = vst [vmem:[%s1704_s12 + $0x28] sm:$0xff] %v1355_v27  ;;  %v970_v33 = vadd.f32 %v1355_v27, %v969_v30  ;;  %v1008_v34 = vmul.f32 %v1355_v27, %v1355_v27  ;;  %920 = vst [vmem:[%s1704_s12 + $0xa8] sm:$0xff] %v1728_v29 }
 0x112   : > { %v1356_v35 = vpop.f32.mrb[12].mxu0  ;;  %v1404_v37 = vpop.f32.mrb[12].mxu1  ;;  %v1039_v38 = vadd.f32 %v1038_v32, %v1008_v34 }
 0x113   : > { %v1357_v36 = vpop.f32.mrb[13].mxu0  ;;  %v1405_v41 = vpop.f32.mrb[13].mxu1 }
 0x114   : > { %v1358_v39 = vadd.f32 %v1357_v36, %v1356_v35  ;;  %v1359_v40 = vpop.f32.mrb[14].mxu0  ;;  %v1736_v43 = vadd.f32 %v1405_v41, %v1404_v37  ;;  %v1407_v44 = vpop.f32.mrb[14].mxu1 }
 0x115   : > { %v1360_v42 = vpop.f32.mrb[15].mxu0  ;;  %v1408_v46 = vpop.f32.mrb[15].mxu1 }
 0x116   : > { %v1361_v45 = vadd.f32 %v1360_v42, %v1359_v40  ;;  %v1738_v47 = vadd.f32 %v1408_v46, %v1407_v44  ;;  %905 = vst [vmem:[%s1704_s12 + $0x30] sm:$0xff] %v1358_v39  ;;  %v971_v48 = vadd.f32 %v1358_v39, %v970_v33  ;;  %v1009_v49 = vmul.f32 %v1358_v39, %v1358_v39 }
 0x117   : > { %921 = vst [vmem:[%s1704_s12 + $0xb0] sm:$0xff] %v1736_v43 }
 0x118   : > { %v1040_v50 = vadd.f32 %v1039_v38, %v1009_v49  ;;  %906 = vst [vmem:[%s1704_s12 + $0x38] sm:$0xff] %v1361_v45  ;;  %v972_v51 = vadd.f32 %v1361_v45, %v971_v48  ;;  %v1010_v52 = vmul.f32 %v1361_v45, %v1361_v45  ;;  %922 = vst [vmem:[%s1704_s12 + $0xb8] sm:$0xff] %v1738_v47 }
 0x11a   : > { %v1362_v53 = vpop.f32.mrb[16].mxu0  ;;  %v1410_v56 = vpop.f32.mrb[16].mxu1  ;;  %v1041_v57 = vadd.f32 %v1040_v50, %v1010_v52 }
 0x11b   : > { %v1363_v54 = vpop.f32.mrb[17].mxu0  ;;  %v1411_v61 = vpop.f32.mrb[17].mxu1 }
 0x11c   : > { %v1364_v58 = vadd.f32 %v1363_v54, %v1362_v53  ;;  %v1365_v60 = vpop.f32.mrb[18].mxu0  ;;  %v1746_v63 = vadd.f32 %v1411_v61, %v1410_v56  ;;  %v1413_v0 = vpop.f32.mrb[18].mxu1 }
 0x11d   : > { %v1366_v62 = vpop.f32.mrb[19].mxu0  ;;  %v1414_v2 = vpop.f32.mrb[19].mxu1 }
 0x11e   : > { %v1367_v1 = vadd.f32 %v1366_v62, %v1365_v60  ;;  %v1748_v3 = vadd.f32 %v1414_v2, %v1413_v0  ;;  %907 = vst [vmem:[%s1704_s12 + $0x40] sm:$0xff] %v1364_v58  ;;  %v973_v4 = vadd.f32 %v1364_v58, %v972_v51  ;;  %v1011_v5 = vmul.f32 %v1364_v58, %v1364_v58 }
 0x11f   : > { %923 = vst [vmem:[%s1704_s12 + $0xc0] sm:$0xff] %v1746_v63 }
 0x120   : > { %v1042_v6 = vadd.f32 %v1041_v57, %v1011_v5  ;;  %908 = vst [vmem:[%s1704_s12 + $0x48] sm:$0xff] %v1367_v1  ;;  %v974_v8 = vadd.f32 %v1367_v1, %v973_v4  ;;  %v1012_v9 = vmul.f32 %v1367_v1, %v1367_v1  ;;  %924 = vst [vmem:[%s1704_s12 + $0xc8] sm:$0xff] %v1748_v3 }
 0x122   : > { %v1368_v10 = vpop.f32.mrb[20].mxu0  ;;  %v1416_v13 = vpop.f32.mrb[20].mxu1  ;;  %v1043_v14 = vadd.f32 %v1042_v6, %v1012_v9 }
 0x123   : > { %v1369_v12 = vpop.f32.mrb[21].mxu0  ;;  %v1417_v17 = vpop.f32.mrb[21].mxu1 }
 0x124   : > { %v1370_v15 = vadd.f32 %v1369_v12, %v1368_v10  ;;  %v1371_v16 = vpop.f32.mrb[22].mxu0  ;;  %v1756_v19 = vadd.f32 %v1417_v17, %v1416_v13  ;;  %v1419_v20 = vpop.f32.mrb[22].mxu1  ;;  %v1019_v10 = vmul.f32 %v1706_v55, %v1706_v55  ;;  %v1021_v17 = vmul.f32 %v1716_v7, %v1716_v7 }
 0x125   : > { %v1372_v18 = vpop.f32.mrb[23].mxu0  ;;  %v1420_v22 = vpop.f32.mrb[23].mxu1 }
 0x126   : > { %v1373_v21 = vadd.f32 %v1372_v18, %v1371_v16  ;;  %v1758_v23 = vadd.f32 %v1420_v22, %v1419_v20  ;;  %909 = vst [vmem:[%s1704_s12 + $0x50] sm:$0xff] %v1370_v15  ;;  %v975_v24 = vadd.f32 %v1370_v15, %v974_v8  ;;  %v1013_v26 = vmul.f32 %v1370_v15, %v1370_v15 }
 0x127   : > { %925 = vst [vmem:[%s1704_s12 + $0xd0] sm:$0xff] %v1756_v19 }
 0x128   : > { %v1044_v27 = vadd.f32 %v1043_v14, %v1013_v26  ;;  %910 = vst [vmem:[%s1704_s12 + $0x58] sm:$0xff] %v1373_v21  ;;  %v976_v28 = vadd.f32 %v1373_v21, %v975_v24  ;;  %v1014_v30 = vmul.f32 %v1373_v21, %v1373_v21  ;;  %926 = vst [vmem:[%s1704_s12 + $0xd8] sm:$0xff] %v1758_v23 }
 0x129   : > { %v1020_v14 = vmul.f32 %v1708_v59, %v1708_v59  ;;  %v1022_v21 = vmul.f32 %v1718_v11, %v1718_v11 }
 0x12a   : > { %v1374_v31 = vpop.f32.mrb[24].mxu0  ;;  %v1422_v33 = vpop.f32.mrb[24].mxu1  ;;  %v1045_v34 = vadd.f32 %v1044_v27, %v1014_v30 }
 0x12b   : > { %v1375_v32 = vpop.f32.mrb[25].mxu0  ;;  %v1423_v37 = vpop.f32.mrb[25].mxu1 }
 0x12c   : > { %v1376_v35 = vadd.f32 %v1375_v32, %v1374_v31  ;;  %v1377_v36 = vpop.f32.mrb[26].mxu0  ;;  %v1766_v39 = vadd.f32 %v1423_v37, %v1422_v33  ;;  %v1425_v40 = vpop.f32.mrb[26].mxu1 }
 0x12d   : > { %v1378_v38 = vpop.f32.mrb[27].mxu0  ;;  %v1426_v42 = vpop.f32.mrb[27].mxu1 }
 0x12e   : > { %v1379_v41 = vadd.f32 %v1378_v38, %v1377_v36  ;;  %v1768_v44 = vadd.f32 %v1426_v42, %v1425_v40  ;;  %911 = vst [vmem:[%s1704_s12 + $0x60] sm:$0xff] %v1376_v35  ;;  %v977_v45 = vadd.f32 %v1376_v35, %v976_v28  ;;  %v1015_v46 = vmul.f32 %v1376_v35, %v1376_v35 }
 0x12f   : > { %927 = vst [vmem:[%s1704_s12 + $0xe0] sm:$0xff] %v1766_v39  ;;  %v1027_v35 = vmul.f32 %v1746_v63, %v1746_v63  ;;  %v1028_v38 = vmul.f32 %v1748_v3, %v1748_v3 }
 0x130   : > { %v1046_v48 = vadd.f32 %v1045_v34, %v1015_v46  ;;  %912 = vst [vmem:[%s1704_s12 + $0x68] sm:$0xff] %v1379_v41  ;;  %v978_v49 = vadd.f32 %v1379_v41, %v977_v45  ;;  %v1016_v50 = vmul.f32 %v1379_v41, %v1379_v41  ;;  %928 = vst [vmem:[%s1704_s12 + $0xe8] sm:$0xff] %v1768_v44 }
 0x132   : > { %v1380_v51 = vpop.f32.mrb[28].mxu0  ;;  %v1428_v53 = vpop.f32.mrb[28].mxu1  ;;  %v1047_v54 = vadd.f32 %v1046_v48, %v1016_v50  ;;  %v1032_v50 = vmul.f32 %v1768_v44, %v1768_v44 }
 0x133   : > { %v1381_v52 = vpop.f32.mrb[29].mxu0  ;;  %v1429_v58 = vpop.f32.mrb[29].mxu1 }
 0x134   : > { %v1382_v56 = vadd.f32 %v1381_v52, %v1380_v51  ;;  %v1383_v57 = vpop.f32.mrb[30].mxu0  ;;  %v1430_v61 = vadd.f32 %v1429_v58, %v1428_v53  ;;  %v1431_v62 = vpop.f32.mrb[30].mxu1 }
 0x135   : > { %v1384_v60 = vpop.f32.mrb[31].mxu0  ;;  %v1432_v1 = vpop.f32.mrb[31].mxu1 }
 0x136   : > { %v1385_v0 = vadd.f32 %v1384_v60, %v1383_v57  ;;  %v1433_v2 = vadd.f32 %v1432_v1, %v1431_v62  ;;  %913 = vst [vmem:[%s1704_s12 + $0x70] sm:$0xff] %v1382_v56  ;;  %v979_v4 = vadd.f32 %v1382_v56, %v978_v49  ;;  %v1017_v5 = vmul.f32 %v1382_v56, %v1382_v56 }
 0x137   : > { %929 = vst [vmem:[%s1704_s12 + $0xf0] sm:$0xff] %v1430_v61 }
 0x138   : > { %v1048_v6 = vadd.f32 %v1047_v54, %v1017_v5  ;;  %914 = vst [vmem:[%s1704_s12 + $0x78] sm:$0xff] %v1385_v0  ;;  %v980_v8 = vadd.f32 %v1385_v0, %v979_v4  ;;  %v1018_v9 = vmul.f32 %v1385_v0, %v1385_v0  ;;  %930 = vst [vmem:[%s1704_s12 + $0xf8] sm:$0xff] %v1433_v2 }
 0x13a   : > { %v981_v12 = vadd.f32 %v1706_v55, %v980_v8  ;;  %v1049_v13 = vadd.f32 %v1048_v6, %v1018_v9  ;;  %v1023_v55 = vmul.f32 %v1726_v25, %v1726_v25 }
 0x13c   : > { %v982_v15 = vadd.f32 %v1708_v59, %v981_v12  ;;  %v1050_v16 = vadd.f32 %v1049_v13, %v1019_v10  ;;  %v1024_v59 = vmul.f32 %v1728_v29, %v1728_v29 }
 0x13e   : > { %v983_v18 = vadd.f32 %v1716_v7, %v982_v15  ;;  %v1051_v20 = vadd.f32 %v1050_v16, %v1020_v14  ;;  %v1025_v7 = vmul.f32 %v1736_v43, %v1736_v43 }
 0x140   : > { %v984_v22 = vadd.f32 %v1718_v11, %v983_v18  ;;  %v1052_v24 = vadd.f32 %v1051_v20, %v1021_v17  ;;  %v1026_v11 = vmul.f32 %v1738_v47, %v1738_v47 }
 0x142   : > { %v1053_v26 = vadd.f32 %v1052_v24, %v1022_v21  ;;  %v985_v27 = vadd.f32 %v1726_v25, %v984_v22 }
 0x144   : > { %v986_v28 = vadd.f32 %v1728_v29, %v985_v27  ;;  %v1054_v30 = vadd.f32 %v1053_v26, %v1023_v55 }
 0x146   : > { %v987_v31 = vadd.f32 %v1736_v43, %v986_v28  ;;  %v1055_v32 = vadd.f32 %v1054_v30, %v1024_v59 }
 0x148   : > { %v988_v33 = vadd.f32 %v1738_v47, %v987_v31  ;;  %v1056_v34 = vadd.f32 %v1055_v32, %v1025_v7  ;;  %v1029_v47 = vmul.f32 %v1756_v19, %v1756_v19 }
 0x14a   : > { %v989_v25 = vadd.f32 %v1746_v63, %v988_v33  ;;  %v1057_v36 = vadd.f32 %v1056_v34, %v1026_v11  ;;  %v1030_v63 = vmul.f32 %v1758_v23, %v1758_v23 }
 0x14c   : > { %v1058_v29 = vadd.f32 %v1057_v36, %v1027_v35  ;;  %v990_v37 = vadd.f32 %v1748_v3, %v989_v25  ;;  %v1031_v3 = vmul.f32 %v1766_v39, %v1766_v39 }
 0x14e   : > { %v1059_v43 = vadd.f32 %v1058_v29, %v1028_v38  ;;  %v991_v40 = vadd.f32 %v1756_v19, %v990_v37  ;;  %v1033_v19 = vmul.f32 %v1430_v61, %v1430_v61 }
 0x150   : > { %v1060_v41 = vadd.f32 %v1059_v43, %v1029_v47  ;;  %v992_v42 = vadd.f32 %v1758_v23, %v991_v40  ;;  %v1034_v23 = vmul.f32 %v1433_v2, %v1433_v2 }
 0x152   : > { %v1061_v45 = vadd.f32 %v1060_v41, %v1030_v63  ;;  %v993_v46 = vadd.f32 %v1766_v39, %v992_v42 }
 0x154   : > { %v1062_v48 = vadd.f32 %v1061_v45, %v1031_v3  ;;  %v994_v49 = vadd.f32 %v1768_v44, %v993_v46 }
 0x156   : > { %v1063_v51 = vadd.f32 %v1062_v48, %v1032_v50  ;;  %v995_v52 = vadd.f32 %v1430_v61, %v994_v49 }
 0x158   : > { %v1064_v53 = vadd.f32 %v1063_v51, %v1033_v19  ;;  %v996_v54 = vadd.f32 %v1433_v2, %v995_v52 }
 0x15a   : > { %v997_v56 = vrot.slane %v996_v54, 4  ;;  %v1065_v57 = vadd.f32 %v1064_v53, %v1034_v23 }
 0x15c   : > { %v998_v58 = vadd.f32 %v997_v56, %v996_v54  ;;  %v1066_v60 = vrot.slane %v1065_v57, 4 }
 0x15e   : > { %v999_v62 = vrot.slane %v998_v58, 2  ;;  %v1067_v39 = vadd.f32 %v1066_v60, %v1065_v57 }
 0x160   : > { %v1000_v0 = vadd.f32 %v999_v62, %v998_v58  ;;  %v1068_v1 = vrot.slane %v1067_v39, 2 }
 0x162   : > { %v1001_v4 = vrot.slane %v1000_v0, 1  ;;  %v1069_v5 = vadd.f32 %v1068_v1, %v1067_v39 }
 0x164   : > { %v1002_v44 = vadd.f32 %v1001_v4, %v1000_v0  ;;  %v1070_v61 = vrot.slane %v1069_v5, 1 }
 0x166   : > { %v1071_v2 = vadd.f32 %v1070_v61, %v1069_v5  ;;  %1072 = vst [vmem:[%s309_s14] sm:$0xff] %v1002_v44 }
 0x168   : > { %1073 = vst [vmem:[%s316_s22] sm:$0xff] %v1071_v2 }
 0x169 PF: > { %s15_s17 = sadd.s32 1, %s1561_s17   ;;  %s1844_s15 = smov %s1557_s16 }
 0x16a   : > { %p12_p6 = scmp.ge.s32.totalorder %s15_s17, 4   ;;  %s1845_s16 = smov %s1847_s18 }
 0x16c   :  { %14 = sbr.rel (!%p12_p6) target bundleno = 2 (0x2), region = 93 }

// kernel: resnet_forward.26
= control target key start
LH: loop header
LB: loop body
LE: loop exit
PB: predicated region body
PF: predicated region fallthrough
CT: control target
= control target key end

     0   :  { %s790_s0 = inlined_call_operand.vmem [shape: f32[9,128,128], index: 0, kind: input, shape index: {}]   ;;  %s791_s1 = inlined_call_operand.vmem [shape: f32[128,128], index: 1, kind: output, shape index: {}]  }
   0x1   :  { %v8_v0 = vld [vmem:[%s790_s0] sm:$0xff]  ;;  %v9_v6 = vld [vmem:[%s790_s0 + $0x8] sm:$0xff]  ;;  %v10_v15 = vld [vmem:[%s790_s0 + $0x10] sm:$0xff] }
   0x2   :  { %v24_v1 = vld [vmem:[%s790_s0 + $0x80] sm:$0xff]  ;;  %v25_v7 = vld [vmem:[%s790_s0 + $0x88] sm:$0xff]  ;;  %v26_v16 = vld [vmem:[%s790_s0 + $0x90] sm:$0xff] }
   0x3   :  { %v40_v2 = vld [vmem:[%s790_s0 + $0x100] sm:$0xff]  ;;  %v152_v3 = vmax.f32 %v8_v0, %v24_v1  ;;  %v41_v8 = vld [vmem:[%s790_s0 + $0x108] sm:$0xff]  ;;  %v160_v10 = vmax.f32 %v9_v6, %v25_v7  ;;  %v42_v17 = vld [vmem:[%s790_s0 + $0x110] sm:$0xff]  ;;  %v168_v20 = vmax.f32 %v10_v15, %v26_v16 }
   0x4   :  { %v56_v4 = vld [vmem:[%s790_s0 + $0x180] sm:$0xff]  ;;  %v57_v13 = vld [vmem:[%s790_s0 + $0x188] sm:$0xff]  ;;  %v58_v24 = vld [vmem:[%s790_s0 + $0x190] sm:$0xff] }
   0x5   :  { %v153_v5 = vmax.f32 %v152_v3, %v40_v2  ;;  %v72_v9 = vld [vmem:[%s790_s0 + $0x200] sm:$0xff]  ;;  %v161_v14 = vmax.f32 %v160_v10, %v41_v8  ;;  %v73_v19 = vld [vmem:[%s790_s0 + $0x208] sm:$0xff]  ;;  %v169_v26 = vmax.f32 %v168_v20, %v42_v17  ;;  %v11_v27 = vld [vmem:[%s790_s0 + $0x18] sm:$0xff] }
   0x6   :  { %v88_v11 = vld [vmem:[%s790_s0 + $0x280] sm:$0xff]  ;;  %v89_v22 = vld [vmem:[%s790_s0 + $0x288] sm:$0xff]  ;;  %v27_v28 = vld [vmem:[%s790_s0 + $0x98] sm:$0xff] }
   0x7   :  { %v154_v12 = vmax.f32 %v153_v5, %v56_v4  ;;  %v104_v21 = vld [vmem:[%s790_s0 + $0x300] sm:$0xff]  ;;  %v162_v23 = vmax.f32 %v161_v14, %v57_v13  ;;  %v43_v29 = vld [vmem:[%s790_s0 + $0x118] sm:$0xff]  ;;  %v74_v33 = vld [vmem:[%s790_s0 + $0x210] sm:$0xff]  ;;  %v176_v34 = vmax.f32 %v11_v27, %v27_v28  ;;  %v170_v38 = vmax.f32 %v169_v26, %v58_v24 }
   0x8   :  { %v120_v30 = vld [vmem:[%s790_s0 + $0x380] sm:$0xff]  ;;  %v105_v36 = vld [vmem:[%s790_s0 + $0x308] sm:$0xff]  ;;  %v90_v37 = vld [vmem:[%s790_s0 + $0x290] sm:$0xff] }
   0x9   :  { %v155_v18 = vmax.f32 %v154_v12, %v72_v9  ;;  %v136_v31 = vld [vmem:[%s790_s0 + $0x400] sm:$0xff]  ;;  %v163_v32 = vmax.f32 %v162_v23, %v73_v19  ;;  %v59_v39 = vld [vmem:[%s790_s0 + $0x198] sm:$0xff]  ;;  %v177_v41 = vmax.f32 %v176_v34, %v43_v29  ;;  %v121_v46 = vld [vmem:[%s790_s0 + $0x388] sm:$0xff]  ;;  %v171_v48 = vmax.f32 %v170_v38, %v74_v33 }
   0xa   :  { %v12_v42 = vld [vmem:[%s790_s0 + $0x20] sm:$0xff]  ;;  %v137_v47 = vld [vmem:[%s790_s0 + $0x408] sm:$0xff]  ;;  %v75_v49 = vld [vmem:[%s790_s0 + $0x218] sm:$0xff] }
   0xb   :  { %v156_v25 = vmax.f32 %v155_v18, %v88_v11  ;;  %v164_v40 = vmax.f32 %v163_v32, %v89_v22  ;;  %v28_v43 = vld [vmem:[%s790_s0 + $0xa0] sm:$0xff]  ;;  %v106_v52 = vld [vmem:[%s790_s0 + $0x310] sm:$0xff]  ;;  %v91_v53 = vld [vmem:[%s790_s0 + $0x298] sm:$0xff]  ;;  %v178_v54 = vmax.f32 %v177_v41, %v59_v39  ;;  %v172_v57 = vmax.f32 %v171_v48, %v90_v37 }
   0xc   :  { %v44_v44 = vld [vmem:[%s790_s0 + $0x120] sm:$0xff]  ;;  %v184_v50 = vmax.f32 %v12_v42, %v28_v43  ;;  %v13_v59 = vld [vmem:[%s790_s0 + $0x28] sm:$0xff]  ;;  %v122_v63 = vld [vmem:[%s790_s0 + $0x390] sm:$0xff] }
   0xd   :  { %v157_v35 = vmax.f32 %v156_v25, %v104_v21  ;;  %v165_v51 = vmax.f32 %v164_v40, %v105_v36  ;;  %v60_v55 = vld [vmem:[%s790_s0 + $0x1a0] sm:$0xff]  ;;  %v29_v60 = vld [vmem:[%s790_s0 + $0xa8] sm:$0xff]  ;;  %v138_v0 = vld [vmem:[%s790_s0 + $0x410] sm:$0xff]  ;;  %v179_v1 = vmax.f32 %v178_v54, %v75_v49  ;;  %v173_v4 = vmax.f32 %v172_v57, %v106_v52 }
   0xe   :  { %v185_v58 = vmax.f32 %v184_v50, %v44_v44  ;;  %v45_v61 = vld [vmem:[%s790_s0 + $0x128] sm:$0xff]  ;;  %v76_v2 = vld [vmem:[%s790_s0 + $0x220] sm:$0xff]  ;;  %v192_v3 = vmax.f32 %v13_v59, %v29_v60  ;;  %v107_v5 = vld [vmem:[%s790_s0 + $0x318] sm:$0xff] }
   0xf   :  { %v158_v45 = vmax.f32 %v157_v35, %v120_v30  ;;  %v166_v62 = vmax.f32 %v165_v51, %v121_v46  ;;  %v92_v6 = vld [vmem:[%s790_s0 + $0x2a0] sm:$0xff]  ;;  %v61_v8 = vld [vmem:[%s790_s0 + $0x1a8] sm:$0xff]  ;;  %v180_v10 = vmax.f32 %v179_v1, %v91_v53  ;;  %v14_v12 = vld [vmem:[%s790_s0 + $0x30] sm:$0xff]  ;;  %v174_v15 = vmax.f32 %v173_v4, %v122_v63 }
  0x10   :  { %v186_v7 = vmax.f32 %v185_v58, %v60_v55  ;;  %v193_v11 = vmax.f32 %v192_v3, %v45_v61  ;;  %v30_v13 = vld [vmem:[%s790_s0 + $0xb0] sm:$0xff]  ;;  %v123_v16 = vld [vmem:[%s790_s0 + $0x398] sm:$0xff]  ;;  %v77_v19 = vld [vmem:[%s790_s0 + $0x228] sm:$0xff] }
  0x11   :  { %v159_v56 = vmax.f32 %v158_v45, %v136_v31  ;;  %v167_v9 = vmax.f32 %v166_v62, %v137_v47  ;;  %v46_v14 = vld [vmem:[%s790_s0 + $0x130] sm:$0xff]  ;;  %v139_v17 = vld [vmem:[%s790_s0 + $0x418] sm:$0xff]  ;;  %v200_v20 = vmax.f32 %v14_v12, %v30_v13  ;;  %v181_v21 = vmax.f32 %v180_v10, %v107_v5  ;;  %v108_v22 = vld [vmem:[%s790_s0 + $0x320] sm:$0xff] }
  0x12   :  { %v187_v18 = vmax.f32 %v186_v7, %v76_v2  ;;  %v93_v23 = vld [vmem:[%s790_s0 + $0x2a8] sm:$0xff]  ;;  %v194_v24 = vmax.f32 %v193_v11, %v61_v8  ;;  %v62_v25 = vld [vmem:[%s790_s0 + $0x1b0] sm:$0xff]  ;;  %v175_v26 = vmax.f32 %v174_v15, %v138_v0  ;;  %v15_v29 = vld [vmem:[%s790_s0 + $0x38] sm:$0xff] }
  0x13   :  { %280 = vst [vmem:[%s791_s1] sm:$0xff] %v159_v56  ;;  %281 = vst [vmem:[%s791_s1 + $0x8] sm:$0xff] %v167_v9  ;;  %v201_v28 = vmax.f32 %v200_v20, %v46_v14  ;;  %v31_v30 = vld [vmem:[%s790_s0 + $0xb8] sm:$0xff]  ;;  %v182_v32 = vmax.f32 %v181_v21, %v123_v16  ;;  %v124_v33 = vld [vmem:[%s790_s0 + $0x3a0] sm:$0xff] }
  0x14   :  { %v188_v27 = vmax.f32 %v187_v18, %v92_v6  ;;  %v47_v31 = vld [vmem:[%s790_s0 + $0x138] sm:$0xff]  ;;  %v140_v34 = vld [vmem:[%s790_s0 + $0x420] sm:$0xff]  ;;  %v195_v35 = vmax.f32 %v194_v24, %v77_v19  ;;  %v78_v36 = vld [vmem:[%s790_s0 + $0x230] sm:$0xff]  ;;  %v208_v37 = vmax.f32 %v15_v29, %v31_v30  ;;  %282 = vst [vmem:[%s791_s1 + $0x10] sm:$0xff] %v175_v26 }
  0x15   :  { %v109_v39 = vld [vmem:[%s790_s0 + $0x328] sm:$0xff]  ;;  %v94_v40 = vld [vmem:[%s790_s0 + $0x2b0] sm:$0xff]  ;;  %v202_v41 = vmax.f32 %v201_v28, %v62_v25  ;;  %v63_v42 = vld [vmem:[%s790_s0 + $0x1b8] sm:$0xff]  ;;  %v183_v43 = vmax.f32 %v182_v32, %v139_v17 }
  0x16   :  { %v189_v38 = vmax.f32 %v188_v27, %v108_v22  ;;  %v196_v44 = vmax.f32 %v195_v35, %v93_v23  ;;  %v209_v45 = vmax.f32 %v208_v37, %v47_v31  ;;  %v16_v46 = vld [vmem:[%s790_s0 + $0x40] sm:$0xff]  ;;  %v125_v50 = vld [vmem:[%s790_s0 + $0x3a8] sm:$0xff]  ;;  %v79_v53 = vld [vmem:[%s790_s0 + $0x238] sm:$0xff] }
  0x17   :  { %v32_v47 = vld [vmem:[%s790_s0 + $0xc0] sm:$0xff]  ;;  %v141_v51 = vld [vmem:[%s790_s0 + $0x428] sm:$0xff]  ;;  %v203_v52 = vmax.f32 %v202_v41, %v78_v36  ;;  %283 = vst [vmem:[%s791_s1 + $0x18] sm:$0xff] %v183_v43  ;;  %v110_v56 = vld [vmem:[%s790_s0 + $0x330] sm:$0xff] }
  0x18   :  { %v48_v48 = vld [vmem:[%s790_s0 + $0x140] sm:$0xff]  ;;  %v190_v49 = vmax.f32 %v189_v38, %v124_v33  ;;  %v216_v54 = vmax.f32 %v16_v46, %v32_v47  ;;  %v197_v55 = vmax.f32 %v196_v44, %v109_v39  ;;  %v95_v57 = vld [vmem:[%s790_s0 + $0x2b8] sm:$0xff]  ;;  %v210_v58 = vmax.f32 %v209_v45, %v63_v42  ;;  %v17_v63 = vld [vmem:[%s790_s0 + $0x48] sm:$0xff] }
  0x19   :  { %v64_v59 = vld [vmem:[%s790_s0 + $0x1c0] sm:$0xff]  ;;  %v204_v61 = vmax.f32 %v203_v52, %v94_v40  ;;  %v33_v0 = vld [vmem:[%s790_s0 + $0xc8] sm:$0xff]  ;;  %v126_v3 = vld [vmem:[%s790_s0 + $0x3b0] sm:$0xff] }
  0x1a   :  { %v191_v60 = vmax.f32 %v190_v49, %v140_v34  ;;  %v217_v62 = vmax.f32 %v216_v54, %v48_v48  ;;  %v49_v1 = vld [vmem:[%s790_s0 + $0x148] sm:$0xff]  ;;  %v198_v2 = vmax.f32 %v197_v55, %v125_v50  ;;  %v142_v4 = vld [vmem:[%s790_s0 + $0x430] sm:$0xff]  ;;  %v211_v5 = vmax.f32 %v210_v58, %v79_v53  ;;  %v80_v6 = vld [vmem:[%s790_s0 + $0x240] sm:$0xff] }
  0x1b   :  { %v224_v7 = vmax.f32 %v17_v63, %v33_v0  ;;  %v205_v8 = vmax.f32 %v204_v61, %v110_v56  ;;  %v111_v9 = vld [vmem:[%s790_s0 + $0x338] sm:$0xff]  ;;  %v96_v10 = vld [vmem:[%s790_s0 + $0x2c0] sm:$0xff]  ;;  %v65_v12 = vld [vmem:[%s790_s0 + $0x1c8] sm:$0xff] }
  0x1c   :  { %284 = vst [vmem:[%s791_s1 + $0x20] sm:$0xff] %v191_v60  ;;  %v218_v11 = vmax.f32 %v217_v62, %v64_v59  ;;  %v199_v13 = vmax.f32 %v198_v2, %v141_v51  ;;  %v212_v14 = vmax.f32 %v211_v5, %v95_v57  ;;  %v18_v16 = vld [vmem:[%s790_s0 + $0x50] sm:$0xff]  ;;  %v127_v20 = vld [vmem:[%s790_s0 + $0x3b8] sm:$0xff]  ;;  %v81_v23 = vld [vmem:[%s790_s0 + $0x248] sm:$0xff] }
  0x1d   :  { %v225_v15 = vmax.f32 %v224_v7, %v49_v1  ;;  %v34_v17 = vld [vmem:[%s790_s0 + $0xd0] sm:$0xff]  ;;  %v206_v19 = vmax.f32 %v205_v8, %v126_v3  ;;  %v143_v21 = vld [vmem:[%s790_s0 + $0x438] sm:$0xff]  ;;  %v112_v26 = vld [vmem:[%s790_s0 + $0x340] sm:$0xff] }
  0x1e   :  { %v50_v18 = vld [vmem:[%s790_s0 + $0x150] sm:$0xff]  ;;  %v219_v22 = vmax.f32 %v218_v11, %v80_v6  ;;  %v232_v24 = vmax.f32 %v18_v16, %v34_v17  ;;  %285 = vst [vmem:[%s791_s1 + $0x28] sm:$0xff] %v199_v13  ;;  %v213_v25 = vmax.f32 %v212_v14, %v111_v9  ;;  %v97_v27 = vld [vmem:[%s790_s0 + $0x2c8] sm:$0xff]  ;;  %v19_v33 = vld [vmem:[%s790_s0 + $0x58] sm:$0xff] }
  0x1f   :  { %v226_v28 = vmax.f32 %v225_v15, %v65_v12  ;;  %v66_v29 = vld [vmem:[%s790_s0 + $0x1d0] sm:$0xff]  ;;  %v207_v30 = vmax.f32 %v206_v19, %v142_v4  ;;  %v35_v34 = vld [vmem:[%s790_s0 + $0xd8] sm:$0xff]  ;;  %v128_v37 = vld [vmem:[%s790_s0 + $0x3c0] sm:$0xff] }
  0x20   :  { %v220_v31 = vmax.f32 %v219_v22, %v96_v10  ;;  %v233_v32 = vmax.f32 %v232_v24, %v50_v18  ;;  %v51_v35 = vld [vmem:[%s790_s0 + $0x158] sm:$0xff]  ;;  %v214_v36 = vmax.f32 %v213_v25, %v127_v20  ;;  %v144_v38 = vld [vmem:[%s790_s0 + $0x440] sm:$0xff]  ;;  %v82_v40 = vld [vmem:[%s790_s0 + $0x250] sm:$0xff]  ;;  %v240_v41 = vmax.f32 %v19_v33, %v35_v34 }
  0x21   :  { %v227_v39 = vmax.f32 %v226_v28, %v81_v23  ;;  %286 = vst [vmem:[%s791_s1 + $0x30] sm:$0xff] %v207_v30  ;;  %v113_v43 = vld [vmem:[%s790_s0 + $0x348] sm:$0xff]  ;;  %v98_v44 = vld [vmem:[%s790_s0 + $0x2d0] sm:$0xff]  ;;  %v67_v46 = vld [vmem:[%s790_s0 + $0x1d8] sm:$0xff] }
  0x22   :  { %v221_v42 = vmax.f32 %v220_v31, %v112_v26  ;;  %v234_v45 = vmax.f32 %v233_v32, %v66_v29  ;;  %v215_v47 = vmax.f32 %v214_v36, %v143_v21  ;;  %v241_v49 = vmax.f32 %v240_v41, %v51_v35  ;;  %v20_v50 = vld [vmem:[%s790_s0 + $0x60] sm:$0xff]  ;;  %v129_v54 = vld [vmem:[%s790_s0 + $0x3c8] sm:$0xff]  ;;  %v83_v57 = vld [vmem:[%s790_s0 + $0x258] sm:$0xff] }
  0x23   :  { %v228_v48 = vmax.f32 %v227_v39, %v97_v27  ;;  %v36_v51 = vld [vmem:[%s790_s0 + $0xe0] sm:$0xff]  ;;  %v145_v55 = vld [vmem:[%s790_s0 + $0x448] sm:$0xff]  ;;  %v114_v60 = vld [vmem:[%s790_s0 + $0x350] sm:$0xff] }
  0x24   :  { %v52_v52 = vld [vmem:[%s790_s0 + $0x160] sm:$0xff]  ;;  %v222_v53 = vmax.f32 %v221_v42, %v128_v37  ;;  %v235_v56 = vmax.f32 %v234_v45, %v82_v40  ;;  %v248_v58 = vmax.f32 %v20_v50, %v36_v51  ;;  %287 = vst [vmem:[%s791_s1 + $0x38] sm:$0xff] %v215_v47  ;;  %v99_v61 = vld [vmem:[%s790_s0 + $0x2d8] sm:$0xff]  ;;  %v242_v62 = vmax.f32 %v241_v49, %v67_v46  ;;  %v21_v3 = vld [vmem:[%s790_s0 + $0x68] sm:$0xff] }
  0x25   :  { %v229_v59 = vmax.f32 %v228_v48, %v113_v43  ;;  %v68_v63 = vld [vmem:[%s790_s0 + $0x1e0] sm:$0xff]  ;;  %v37_v4 = vld [vmem:[%s790_s0 + $0xe8] sm:$0xff]  ;;  %v130_v7 = vld [vmem:[%s790_s0 + $0x3d0] sm:$0xff] }
  0x26   :  { %v223_v0 = vmax.f32 %v222_v53, %v144_v38  ;;  %v236_v1 = vmax.f32 %v235_v56, %v98_v44  ;;  %v249_v2 = vmax.f32 %v248_v58, %v52_v52  ;;  %v53_v5 = vld [vmem:[%s790_s0 + $0x168] sm:$0xff]  ;;  %v146_v8 = vld [vmem:[%s790_s0 + $0x450] sm:$0xff]  ;;  %v243_v9 = vmax.f32 %v242_v62, %v83_v57  ;;  %v84_v10 = vld [vmem:[%s790_s0 + $0x260] sm:$0xff] }
  0x27   :  { %v230_v6 = vmax.f32 %v229_v59, %v129_v54  ;;  %v256_v11 = vmax.f32 %v21_v3, %v37_v4  ;;  %v115_v13 = vld [vmem:[%s790_s0 + $0x358] sm:$0xff]  ;;  %v100_v14 = vld [vmem:[%s790_s0 + $0x2e0] sm:$0xff]  ;;  %v69_v16 = vld [vmem:[%s790_s0 + $0x1e8] sm:$0xff] }
  0x28   :  { %288 = vst [vmem:[%s791_s1 + $0x40] sm:$0xff] %v223_v0  ;;  %v237_v12 = vmax.f32 %v236_v1, %v114_v60  ;;  %v250_v15 = vmax.f32 %v249_v2, %v68_v63  ;;  %v244_v18 = vmax.f32 %v243_v9, %v99_v61  ;;  %v22_v20 = vld [vmem:[%s790_s0 + $0x70] sm:$0xff]  ;;  %v131_v24 = vld [vmem:[%s790_s0 + $0x3d8] sm:$0xff]  ;;  %v85_v27 = vld [vmem:[%s790_s0 + $0x268] sm:$0xff] }
  0x29   :  { %v231_v17 = vmax.f32 %v230_v6, %v145_v55  ;;  %v257_v19 = vmax.f32 %v256_v11, %v53_v5  ;;  %v38_v21 = vld [vmem:[%s790_s0 + $0xf0] sm:$0xff]  ;;  %v147_v25 = vld [vmem:[%s790_s0 + $0x458] sm:$0xff]  ;;  %v116_v30 = vld [vmem:[%s790_s0 + $0x360] sm:$0xff] }
  0x2a   :  { %v54_v22 = vld [vmem:[%s790_s0 + $0x170] sm:$0xff]  ;;  %v238_v23 = vmax.f32 %v237_v12, %v130_v7  ;;  %v251_v26 = vmax.f32 %v250_v15, %v84_v10  ;;  %v264_v28 = vmax.f32 %v22_v20, %v38_v21  ;;  %v245_v29 = vmax.f32 %v244_v18, %v115_v13  ;;  %v101_v31 = vld [vmem:[%s790_s0 + $0x2e8] sm:$0xff]  ;;  %v23_v37 = vld [vmem:[%s790_s0 + $0x78] sm:$0xff] }
  0x2b   :  { %289 = vst [vmem:[%s791_s1 + $0x48] sm:$0xff] %v231_v17  ;;  %v258_v32 = vmax.f32 %v257_v19, %v69_v16  ;;  %v70_v33 = vld [vmem:[%s790_s0 + $0x1f0] sm:$0xff]  ;;  %v39_v38 = vld [vmem:[%s790_s0 + $0xf8] sm:$0xff]  ;;  %v132_v41 = vld [vmem:[%s790_s0 + $0x3e0] sm:$0xff] }
  0x2c   :  { %v239_v34 = vmax.f32 %v238_v23, %v146_v8  ;;  %v252_v35 = vmax.f32 %v251_v26, %v100_v14  ;;  %v265_v36 = vmax.f32 %v264_v28, %v54_v22  ;;  %v55_v39 = vld [vmem:[%s790_s0 + $0x178] sm:$0xff]  ;;  %v246_v40 = vmax.f32 %v245_v29, %v131_v24  ;;  %v86_v43 = vld [vmem:[%s790_s0 + $0x270] sm:$0xff]  ;;  %v117_v46 = vld [vmem:[%s790_s0 + $0x368] sm:$0xff] }
  0x2d   :  { %v259_v42 = vmax.f32 %v258_v32, %v85_v27  ;;  %v272_v44 = vmax.f32 %v23_v37, %v39_v38  ;;  %v71_v48 = vld [vmem:[%s790_s0 + $0x1f8] sm:$0xff]  ;;  %v148_v50 = vld [vmem:[%s790_s0 + $0x460] sm:$0xff]  ;;  %v102_v52 = vld [vmem:[%s790_s0 + $0x2f0] sm:$0xff] }
  0x2e   :  { %290 = vst [vmem:[%s791_s1 + $0x50] sm:$0xff] %v239_v34  ;;  %v253_v45 = vmax.f32 %v252_v35, %v116_v30  ;;  %v266_v47 = vmax.f32 %v265_v36, %v70_v33  ;;  %v247_v49 = vmax.f32 %v246_v40, %v147_v25  ;;  %v133_v55 = vld [vmem:[%s790_s0 + $0x3e8] sm:$0xff]  ;;  %v87_v57 = vld [vmem:[%s790_s0 + $0x278] sm:$0xff]  ;;  %v118_v59 = vld [vmem:[%s790_s0 + $0x370] sm:$0xff] }
  0x2f   :  { %v260_v51 = vmax.f32 %v259_v42, %v101_v31  ;;  %v273_v53 = vmax.f32 %v272_v44, %v55_v39  ;;  %v149_v62 = vld [vmem:[%s790_s0 + $0x468] sm:$0xff]  ;;  %v103_v0 = vld [vmem:[%s790_s0 + $0x2f8] sm:$0xff]  ;;  %v134_v2 = vld [vmem:[%s790_s0 + $0x3f0] sm:$0xff] }
  0x30   :  { %v254_v54 = vmax.f32 %v253_v45, %v132_v41  ;;  %v267_v56 = vmax.f32 %v266_v47, %v86_v43  ;;  %291 = vst [vmem:[%s791_s1 + $0x58] sm:$0xff] %v247_v49  ;;  %v119_v5 = vld [vmem:[%s790_s0 + $0x378] sm:$0xff]  ;;  %v150_v7 = vld [vmem:[%s790_s0 + $0x470] sm:$0xff] }
  0x31   :  { %v261_v58 = vmax.f32 %v260_v51, %v117_v46  ;;  %v274_v60 = vmax.f32 %v273_v53, %v71_v48  ;;  %v135_v10 = vld [vmem:[%s790_s0 + $0x3f8] sm:$0xff] }
  0x32   :  { %v255_v61 = vmax.f32 %v254_v54, %v148_v50  ;;  %v268_v63 = vmax.f32 %v267_v56, %v102_v52  ;;  %v151_v13 = vld [vmem:[%s790_s0 + $0x478] sm:$0xff] }
  0x33   :  { %v262_v1 = vmax.f32 %v261_v58, %v133_v55  ;;  %v275_v3 = vmax.f32 %v274_v60, %v87_v57 }
  0x34   :  { %292 = vst [vmem:[%s791_s1 + $0x60] sm:$0xff] %v255_v61  ;;  %v269_v4 = vmax.f32 %v268_v63, %v118_v59 }
  0x35   :  { %v263_v6 = vmax.f32 %v262_v1, %v149_v62  ;;  %v276_v8 = vmax.f32 %v275_v3, %v103_v0 }
  0x36   :  { %v270_v9 = vmax.f32 %v269_v4, %v134_v2 }
  0x37   :  { %293 = vst [vmem:[%s791_s1 + $0x68] sm:$0xff] %v263_v6  ;;  %v277_v11 = vmax.f32 %v276_v8, %v119_v5 }
  0x38   :  { %v271_v12 = vmax.f32 %v270_v9, %v150_v7 }
  0x39   :  { %v278_v14 = vmax.f32 %v277_v11, %v135_v10 }
  0x3a   :  { %294 = vst [vmem:[%s791_s1 + $0x70] sm:$0xff] %v271_v12 }
  0x3b   :  { %v279_v15 = vmax.f32 %v278_v14, %v151_v13 }
  0x3d   :  { %295 = vst [vmem:[%s791_s1 + $0x78] sm:$0xff] %v279_v15 }

// kernel: resnet_forward.27
= control target key start
LH: loop header
LB: loop body
LE: loop exit
PB: predicated region body
PF: predicated region fallthrough
CT: control target
= control target key end

     0   :  { %s1768_s1 = inlined_call_operand.vmem [shape: bf16[640,128], index: 1, kind: input, shape index: {}]   ;;  %s1769_s0 = inlined_call_operand.vmem [shape: bf16[128,640], index: 0, kind: input, shape index: {}]   ;;  %s1770_s2 = inlined_call_operand.vmem [shape: f32[128,128], index: 2, kind: output, shape index: {0}]   ;;  %s1771_s3 = inlined_call_operand.vmem [shape: f32[8,128], index: 3, kind: output, shape index: {1}]   ;;  %s1772_s4 = inlined_call_operand.vmem [shape: f32[8,128], index: 4, kind: output, shape index: {2}]  }
   0x1   :  { %v1314_v0 = vld [vmem:[%s1768_s1 + $0x40] sm:$0xff]   ;;  %v1318_v4 = vld [vmem:[%s1768_s1 + $0x48] sm:$0xff]   ;;  %v1322_v8 = vld [vmem:[%s1768_s1 + $0x50] sm:$0xff]  }
   0x2   :  { %v1315_v1 = vld [vmem:[%s1768_s1 + $0xc0] sm:$0xff]   ;;  %1121 = vmatprep.subr.bf16.mxu0 %v1314_v0  ;;  %v1319_v5 = vld [vmem:[%s1768_s1 + $0xc8] sm:$0xff]   ;;  %v1323_v9 = vld [vmem:[%s1768_s1 + $0xd0] sm:$0xff]  }
   0x3   :  { %v1316_v2 = vld [vmem:[%s1768_s1] sm:$0xff]   ;;  %1185 = vmatprep.subr.bf16.mxu1 %v1315_v1  ;;  %v1320_v6 = vld [vmem:[%s1768_s1 + $0x8] sm:$0xff]   ;;  %v1324_v10 = vld [vmem:[%s1768_s1 + $0x10] sm:$0xff]  }
   0x4   :  { %v1317_v3 = vld [vmem:[%s1768_s1 + $0x80] sm:$0xff]   ;;  %1122 = vmatpush3.bf16.msra.mxu0 %v1316_v2  ;;  %v1321_v7 = vld [vmem:[%s1768_s1 + $0x88] sm:$0xff]   ;;  %v1325_v11 = vld [vmem:[%s1768_s1 + $0x90] sm:$0xff]  }
   0x5   :  { %1186 = vmatpush3.bf16.msra.mxu1 %v1317_v3  ;;  %1123 = vmatprep.subr.bf16.mxu0 %v1318_v4  ;;  %v1326_v12 = vld [vmem:[%s1768_s1 + $0x58] sm:$0xff]   ;;  %v1330_v16 = vld [vmem:[%s1768_s1 + $0x60] sm:$0xff]   ;;  %v1334_v20 = vld [vmem:[%s1768_s1 + $0x68] sm:$0xff]  }
   0x6   :  { %1187 = vmatprep.subr.bf16.mxu1 %v1319_v5  ;;  %v1327_v13 = vld [vmem:[%s1768_s1 + $0xd8] sm:$0xff]   ;;  %v1331_v17 = vld [vmem:[%s1768_s1 + $0xe0] sm:$0xff]   ;;  %v1335_v21 = vld [vmem:[%s1768_s1 + $0xe8] sm:$0xff]  }
   0x7   :  { %v1328_v14 = vld [vmem:[%s1768_s1 + $0x18] sm:$0xff]   ;;  %v1332_v18 = vld [vmem:[%s1768_s1 + $0x20] sm:$0xff]   ;;  %v1336_v22 = vld [vmem:[%s1768_s1 + $0x28] sm:$0xff]  }
   0x8   :  { %1124 = vmatpush3.bf16.msra.mxu0 %v1320_v6  ;;  %v1329_v15 = vld [vmem:[%s1768_s1 + $0x98] sm:$0xff]   ;;  %v1333_v19 = vld [vmem:[%s1768_s1 + $0xa0] sm:$0xff]   ;;  %v1337_v23 = vld [vmem:[%s1768_s1 + $0xa8] sm:$0xff]  }
   0x9   :  { %1188 = vmatpush3.bf16.msra.mxu1 %v1321_v7  ;;  %1125 = vmatprep.subr.bf16.mxu0 %v1322_v8  ;;  %v1338_v24 = vld [vmem:[%s1768_s1 + $0x70] sm:$0xff]   ;;  %v1342_v28 = vld [vmem:[%s1768_s1 + $0x78] sm:$0xff]   ;;  %v1351_v35 = vld [vmem:[%s1769_s0 + $0xc] ss:$20 sps:$4 sm:$0xff]  }
   0xa   :  { %1189 = vmatprep.subr.bf16.mxu1 %v1323_v9  ;;  %v1339_v25 = vld [vmem:[%s1768_s1 + $0xf0] sm:$0xff]   ;;  %v1343_v29 = vld [vmem:[%s1768_s1 + $0xf8] sm:$0xff]   ;;  %v1352_v36 = vld [vmem:[%s1768_s1 + $0x100] sm:$0xff]   ;;  %756 = vmatprep.mubr.bf16.mxu1 %v1351_v35 }
   0xb   :  { %v1340_v26 = vld [vmem:[%s1768_s1 + $0x30] sm:$0xff]   ;;  %v1344_v30 = vld [vmem:[%s1768_s1 + $0x38] sm:$0xff]   ;;  %v1353_v37 = vld [vmem:[%s1769_s0 + $0x2c] ss:$20 sps:$4 sm:$0xff]  }
   0xc   :  { %1126 = vmatpush3.bf16.msra.mxu0 %v1324_v10  ;;  %v1341_v27 = vld [vmem:[%s1768_s1 + $0xb0] sm:$0xff]   ;;  %v1345_v31 = vld [vmem:[%s1768_s1 + $0xb8] sm:$0xff]   ;;  %v1359_v39 = vld [vmem:[%s1768_s1 + $0x108] sm:$0xff]  }
   0xd   :  { %1190 = vmatpush3.bf16.msra.mxu1 %v1325_v11  ;;  %1127 = vmatprep.subr.bf16.mxu0 %v1326_v12  ;;  %v1346_v32 = vld [vmem:[%s1769_s0] ss:$20 sps:$4 sm:$0xff]   ;;  %v1348_v33 = vld [vmem:[%s1769_s0 + $0x4] ss:$20 sps:$4 sm:$0xff]   ;;  %v1349_v34 = vld [vmem:[%s1769_s0 + $0x8] ss:$20 sps:$4 sm:$0xff]  }
   0xe   :  { %1191 = vmatprep.subr.bf16.mxu1 %v1327_v13  ;;  %659 = vmatprep.mubr.bf16.mxu0 %v1348_v33  ;;  %v1355_v38 = vld [vmem:[%s1769_s0 + $0x34] ss:$20 sps:$4 sm:$0xff]   ;;  %v1358_v41 = vld [vmem:[%s1769_s0 + $0x30] ss:$20 sps:$4 sm:$0xff]   ;;  %v1373_v45 = vld [vmem:[%s1768_s1 + $0x118] sm:$0xff]  }
   0xf   :  { %v1357_v40 = vld [vmem:[%s1769_s0 + $0x28] ss:$20 sps:$4 sm:$0xff]   ;;  %v1366_v44 = vld [vmem:[%s1768_s1 + $0x110] sm:$0xff]   ;;  %v1365_v47 = vld [vmem:[%s1769_s0 + $0x58] ss:$20 sps:$4 sm:$0xff]  }
  0x10   :  { %1128 = vmatpush3.bf16.msra.mxu0 %v1328_v14  ;;  %v1360_v42 = vld [vmem:[%s1769_s0 + $0x54] ss:$20 sps:$4 sm:$0xff]   ;;  %v1362_v43 = vld [vmem:[%s1769_s0 + $0x5c] ss:$20 sps:$4 sm:$0xff]   ;;  %v1369_v49 = vld [vmem:[%s1769_s0 + $0x84] ss:$20 sps:$4 sm:$0xff]  }
  0x11   :  { %1192 = vmatpush3.bf16.msra.mxu1 %v1329_v15  ;;  %1129 = vmatprep.subr.bf16.mxu0 %v1330_v16  ;;  %v1364_v46 = vld [vmem:[%s1769_s0 + $0x50] ss:$20 sps:$4 sm:$0xff]   ;;  %v1387_v51 = vld [vmem:[%s1768_s1 + $0x128] sm:$0xff]   ;;  %v1372_v53 = vld [vmem:[%s1769_s0 + $0x80] ss:$20 sps:$4 sm:$0xff]  }
  0x12   :  { %1193 = vmatprep.subr.bf16.mxu1 %v1331_v17  ;;  %v1367_v48 = vld [vmem:[%s1769_s0 + $0x7c] ss:$20 sps:$4 sm:$0xff]   ;;  %v1380_v50 = vld [vmem:[%s1768_s1 + $0x120] sm:$0xff]   ;;  %v1371_v52 = vld [vmem:[%s1769_s0 + $0x78] ss:$20 sps:$4 sm:$0xff]  }
  0x13   :  { %v1374_v54 = vld [vmem:[%s1769_s0 + $0xa4] ss:$20 sps:$4 sm:$0xff]   ;;  %v1394_v55 = vld [vmem:[%s1768_s1 + $0x130] sm:$0xff]   ;;  %v1376_v56 = vld [vmem:[%s1769_s0 + $0xac] ss:$20 sps:$4 sm:$0xff]  }
  0x14   :  { %1130 = vmatpush3.bf16.msra.mxu0 %v1332_v18  ;;  %v1401_v57 = vld [vmem:[%s1768_s1 + $0x138] sm:$0xff]   ;;  %v1378_v58 = vld [vmem:[%s1769_s0 + $0xa0] ss:$20 sps:$4 sm:$0xff]   ;;  %v1386_v63 = vld [vmem:[%s1769_s0 + $0xd0] ss:$20 sps:$4 sm:$0xff]  }
  0x15   :  { %1194 = vmatpush3.bf16.msra.mxu1 %v1333_v19  ;;  %1131 = vmatprep.subr.bf16.mxu0 %v1334_v20  ;;  %v1379_v59 = vld [vmem:[%s1769_s0 + $0xa8] ss:$20 sps:$4 sm:$0xff]   ;;  %v1381_v60 = vld [vmem:[%s1769_s0 + $0xcc] ss:$20 sps:$4 sm:$0xff]   ;;  %v1392_v2 = vld [vmem:[%s1769_s0 + $0xf0] ss:$20 sps:$4 sm:$0xff]  }
  0x16   :  { %1195 = vmatprep.subr.bf16.mxu1 %v1335_v21  ;;  %v1383_v61 = vld [vmem:[%s1769_s0 + $0xd4] ss:$20 sps:$4 sm:$0xff]   ;;  %v1390_v1 = vld [vmem:[%s1769_s0 + $0xfc] ss:$20 sps:$4 sm:$0xff]   ;;  %v1393_v3 = vld [vmem:[%s1769_s0 + $0xf8] ss:$20 sps:$4 sm:$0xff]  }
  0x17   :  { %v1385_v62 = vld [vmem:[%s1769_s0 + $0xc8] ss:$20 sps:$4 sm:$0xff]   ;;  %v1397_v5 = vld [vmem:[%s1769_s0 + $0x124] ss:$20 sps:$4 sm:$0xff]   ;;  %v1400_v7 = vld [vmem:[%s1769_s0 + $0x120] ss:$20 sps:$4 sm:$0xff]  }
  0x18   :  { %1132 = vmatpush3.bf16.msra.mxu0 %v1336_v22  ;;  %v1388_v0 = vld [vmem:[%s1769_s0 + $0xf4] ss:$20 sps:$4 sm:$0xff]   ;;  %v1395_v4 = vld [vmem:[%s1769_s0 + $0x11c] ss:$20 sps:$4 sm:$0xff]   ;;  %v1399_v6 = vld [vmem:[%s1769_s0 + $0x118] ss:$20 sps:$4 sm:$0xff]  }
  0x19   :  { %1196 = vmatpush3.bf16.msra.mxu1 %v1337_v23  ;;  %1133 = vmatprep.subr.bf16.mxu0 %v1338_v24  ;;  %v1402_v8 = vld [vmem:[%s1769_s0 + $0x10] ss:$20 sps:$4 sm:$0xff]   ;;  %v1404_v10 = vld [vmem:[%s1769_s0 + $0x38] ss:$20 sps:$4 sm:$0xff]   ;;  %v1406_v12 = vld [vmem:[%s1769_s0 + $0x60] ss:$20 sps:$4 sm:$0xff]  }
  0x1a   :  { %1197 = vmatprep.subr.bf16.mxu1 %v1339_v25  ;;  %v1403_v9 = vld [vmem:[%s1769_s0 + $0xb0] ss:$20 sps:$4 sm:$0xff]   ;;  %v1405_v11 = vld [vmem:[%s1769_s0 + $0xd8] ss:$20 sps:$4 sm:$0xff]   ;;  %v1407_v13 = vld [vmem:[%s1769_s0 + $0x100] ss:$20 sps:$4 sm:$0xff]  }
  0x1b   :  { %v1408_v14 = vld [vmem:[%s1769_s0 + $0x88] ss:$20 sps:$4 sm:$0xff]  }
  0x1c   :  { %1134 = vmatpush3.bf16.msra.mxu0 %v1340_v26  ;;  %v1409_v15 = vld [vmem:[%s1769_s0 + $0x128] ss:$20 sps:$4 sm:$0xff]  }
  0x1d   :  { %1198 = vmatpush3.bf16.msra.mxu1 %v1341_v27  ;;  %1135 = vmatprep.subr.bf16.mxu0 %v1342_v28 }
  0x1e   :  { %1199 = vmatprep.subr.bf16.mxu1 %v1343_v29 }
  0x20   :  { %1136 = vmatpush3.bf16.msra.mxu0 %v1344_v30 }
  0x21   :  { %1200 = vmatpush3.bf16.msra.mxu1 %v1345_v31  ;;  %1265 = vmatprep.subr.bf16.mxu0 %v1352_v36 }
  0x22   :  { %1297 = vmatprep.subr.bf16.mxu1 %v1352_v36 }
  0x23   :  { %660 = vmatmul.mubr.bf16.vlgmr.msra.gmra.mrb[0].mxu0 %v1346_v32 }
  0x24   :  { %757 = vmatmul.mubr.bf16.vlgmr.msra.gmra.mrb[0].mxu1 %v1349_v34  ;;  %1266 = vmatpush3.bf16.msra.mxu0 %v1352_v36 }
  0x25   :  { %667 = vmatprep.mubr.bf16.mxu0 %v1353_v37  ;;  %764 = vmatprep.mubr.bf16.mxu1 %v1355_v38 }
  0x26   :  { %1305 = vmatpush3.bf16.msra.mxu1 %v1352_v36  ;;  %1267 = vmatprep.subr.bf16.mxu0 %v1359_v39 }
  0x27   :  { %1298 = vmatprep.subr.bf16.mxu1 %v1359_v39 }
  0x28   :  { %1268 = vmatpush3.bf16.msra.mxu0 %v1359_v39 }
  0x29   :  { %1269 = vmatprep.subr.bf16.mxu0 %v1366_v44 }
  0x2a   :  { %1306 = vmatpush3.bf16.msra.mxu1 %v1359_v39 }
  0x2b   :  { %668 = vmatmul.mubr.bf16.gmra.mrb[4].mxu0 %v1357_v40  ;;  %1299 = vmatprep.subr.bf16.mxu1 %v1366_v44 }
  0x2c   :  { %765 = vmatmul.mubr.bf16.gmra.mrb[4].mxu1 %v1358_v41  ;;  %675 = vmatprep.mubr.bf16.mxu0 %v1360_v42 }
  0x2d   :  { %772 = vmatprep.mubr.bf16.mxu1 %v1362_v43  ;;  %1270 = vmatpush3.bf16.msra.mxu0 %v1366_v44 }
  0x2e   :  { %1271 = vmatprep.subr.bf16.mxu0 %v1373_v45  ;;  %1307 = vmatpush3.bf16.msra.mxu1 %v1366_v44 }
  0x2f   :  { %1300 = vmatprep.subr.bf16.mxu1 %v1373_v45 }
  0x31   :  { %1272 = vmatpush3.bf16.msra.mxu0 %v1373_v45 }
  0x32   :  { %1273 = vmatprep.subr.bf16.mxu0 %v1380_v50  ;;  %1308 = vmatpush3.bf16.msra.mxu1 %v1373_v45 }
  0x33   :  { %676 = vmatmul.mubr.bf16.gmra.mrb[8].mxu0 %v1364_v46  ;;  %1301 = vmatprep.subr.bf16.mxu1 %v1380_v50 }
  0x34   :  { %773 = vmatmul.mubr.bf16.gmra.mrb[8].mxu1 %v1365_v47  ;;  %683 = vmatprep.mubr.bf16.mxu0 %v1367_v48 }
  0x35   :  { %780 = vmatprep.mubr.bf16.mxu1 %v1369_v49  ;;  %1274 = vmatpush3.bf16.msra.mxu0 %v1380_v50 }
  0x36   :  { %1275 = vmatprep.subr.bf16.mxu0 %v1387_v51  ;;  %1309 = vmatpush3.bf16.msra.mxu1 %v1380_v50 }
  0x37   :  { %1302 = vmatprep.subr.bf16.mxu1 %v1387_v51 }
  0x39   :  { %1276 = vmatpush3.bf16.msra.mxu0 %v1387_v51 }
  0x3a   :  { %1277 = vmatprep.subr.bf16.mxu0 %v1394_v55  ;;  %1310 = vmatpush3.bf16.msra.mxu1 %v1387_v51 }
  0x3b   :  { %684 = vmatmul.mubr.bf16.gmra.mrb[12].mxu0 %v1371_v52  ;;  %1303 = vmatprep.subr.bf16.mxu1 %v1394_v55 }
  0x3c   :  { %781 = vmatmul.mubr.bf16.gmra.mrb[12].mxu1 %v1372_v53  ;;  %691 = vmatprep.mubr.bf16.mxu0 %v1374_v54 }
  0x3d   :  { %788 = vmatprep.mubr.bf16.mxu1 %v1376_v56  ;;  %1278 = vmatpush3.bf16.msra.mxu0 %v1394_v55 }
  0x3e   :  { %1279 = vmatprep.subr.bf16.mxu0 %v1401_v57  ;;  %1311 = vmatpush3.bf16.msra.mxu1 %v1394_v55 }
  0x3f   :  { %1304 = vmatprep.subr.bf16.mxu1 %v1401_v57 }
  0x41   :  { %1280 = vmatpush3.bf16.msra.mxu0 %v1401_v57 }
  0x42   :  { %1312 = vmatpush3.bf16.msra.mxu1 %v1401_v57 }
  0x43   :  { %692 = vmatmul.mubr.bf16.gmra.mrb[16].mxu0 %v1378_v58 }
  0x44   :  { %789 = vmatmul.mubr.bf16.gmra.mrb[16].mxu1 %v1379_v59  ;;  %699 = vmatprep.mubr.bf16.mxu0 %v1381_v60 }
  0x45   :  { %796 = vmatprep.mubr.bf16.mxu1 %v1383_v61 }
  0x4b   :  { %700 = vmatmul.mubr.bf16.gmra.mrb[20].mxu0 %v1385_v62 }
  0x4c   :  { %797 = vmatmul.mubr.bf16.gmra.mrb[20].mxu1 %v1386_v63  ;;  %707 = vmatprep.mubr.bf16.mxu0 %v1388_v0 }
  0x4d   :  { %804 = vmatprep.mubr.bf16.mxu1 %v1390_v1 }
  0x53   :  { %708 = vmatmul.mubr.bf16.gmra.mrb[24].mxu0 %v1392_v2 }
  0x54   :  { %805 = vmatmul.mubr.bf16.gmra.mrb[24].mxu1 %v1393_v3  ;;  %715 = vmatprep.mubr.bf16.mxu0 %v1395_v4 }
  0x55   :  { %812 = vmatprep.mubr.bf16.mxu1 %v1397_v5 }
  0x5b   :  { %716 = vmatmul.mubr.bf16.gmra.mrb[28].mxu0 %v1399_v6 }
  0x5c   :  { %813 = vmatmul.mubr.bf16.gmra.mrb[28].mxu1 %v1400_v7  ;;  %1281 = vmatprep.mubr.bf16.mxu0 %v1402_v8 }
  0x5d   :  { %1289 = vmatprep.mubr.bf16.mxu1 %v1403_v9 }
  0x63   :  { %1282 = vmatmul.mubr.bf16.vlgmr.msra.gmra.mrb[32].mxu0 %v1404_v10 }
  0x64   :  { %1290 = vmatmul.mubr.bf16.vlgmr.msra.gmra.mrb[32].mxu1 %v1405_v11  ;;  %1285 = vmatprep.mubr.bf16.mxu0 %v1406_v12 }
  0x65   :  { %1293 = vmatprep.mubr.bf16.mxu1 %v1407_v13 }
  0x6b   :  { %1286 = vmatmul.mubr.bf16.gmra.mrb[36].mxu0 %v1408_v14 }
  0x6c   :  { %1294 = vmatmul.mubr.bf16.gmra.mrb[36].mxu1 %v1409_v15 }
  0xf6   :  { %v1137_v16 = vpop.f32.mrb[0].mxu0 }
  0xf7   :  { %v1201_v17 = vpop.f32.mrb[0].mxu1  ;;  %v1138_v18 = vpop.f32.mrb[1].mxu0 }
  0xf8   :  { %v1139_v19 = vadd.f32 %v1138_v18, %v1137_v16  ;;  %v1202_v20 = vpop.f32.mrb[1].mxu1  ;;  %v1140_v21 = vpop.f32.mrb[2].mxu0 }
  0xf9   :  { %v1203_v22 = vadd.f32 %v1202_v20, %v1201_v17  ;;  %v1204_v23 = vpop.f32.mrb[2].mxu1  ;;  %v1141_v24 = vpop.f32.mrb[3].mxu0 }
  0xfa   :  { %v1142_v25 = vadd.f32 %v1141_v24, %v1140_v21  ;;  %v1205_v26 = vpop.f32.mrb[3].mxu1 }
  0xfb   :  { %v1206_v27 = vadd.f32 %v1205_v26, %v1204_v23  ;;  %v1675_v28 = vadd.f32 %v1203_v22, %v1139_v19 }
  0xfd   :  { %v1677_v29 = vadd.f32 %v1206_v27, %v1142_v25 }
  0xfe   :  { %v1143_v30 = vpop.f32.mrb[4].mxu0 }
  0xff   :  { %v1207_v31 = vpop.f32.mrb[4].mxu1  ;;  %v1144_v32 = vpop.f32.mrb[5].mxu0 }
 0x100   :  { %v1145_v33 = vadd.f32 %v1144_v32, %v1143_v30  ;;  %v1208_v34 = vpop.f32.mrb[5].mxu1  ;;  %v1146_v35 = vpop.f32.mrb[6].mxu0 }
 0x101   :  { %v1209_v36 = vadd.f32 %v1208_v34, %v1207_v31  ;;  %v1210_v37 = vpop.f32.mrb[6].mxu1  ;;  %v1147_v38 = vpop.f32.mrb[7].mxu0 }
 0x102   :  { %v1148_v39 = vadd.f32 %v1147_v38, %v1146_v35  ;;  %v1211_v40 = vpop.f32.mrb[7].mxu1 }
 0x103   :  { %v1212_v41 = vadd.f32 %v1211_v40, %v1210_v37  ;;  %v1679_v42 = vadd.f32 %v1209_v36, %v1145_v33 }
 0x105   :  { %v1681_v43 = vadd.f32 %v1212_v41, %v1148_v39 }
 0x106   :  { %v1149_v44 = vpop.f32.mrb[8].mxu0 }
 0x107   :  { %v1213_v45 = vpop.f32.mrb[8].mxu1  ;;  %v1150_v46 = vpop.f32.mrb[9].mxu0 }
 0x108   :  { %v1151_v47 = vadd.f32 %v1150_v46, %v1149_v44  ;;  %v1214_v48 = vpop.f32.mrb[9].mxu1  ;;  %v1152_v49 = vpop.f32.mrb[10].mxu0 }
 0x109   :  { %v1215_v50 = vadd.f32 %v1214_v48, %v1213_v45  ;;  %v1216_v51 = vpop.f32.mrb[10].mxu1  ;;  %v1153_v52 = vpop.f32.mrb[11].mxu0 }
 0x10a   :  { %v1154_v53 = vadd.f32 %v1153_v52, %v1152_v49  ;;  %v1217_v54 = vpop.f32.mrb[11].mxu1 }
 0x10b   :  { %v1218_v55 = vadd.f32 %v1217_v54, %v1216_v51  ;;  %v1683_v56 = vadd.f32 %v1215_v50, %v1151_v47 }
 0x10d   :  { %v1685_v57 = vadd.f32 %v1218_v55, %v1154_v53 }
 0x10e   :  { %v1155_v58 = vpop.f32.mrb[12].mxu0 }
 0x10f   :  { %v1219_v59 = vpop.f32.mrb[12].mxu1  ;;  %v1156_v60 = vpop.f32.mrb[13].mxu0 }
 0x110   :  { %v1157_v61 = vadd.f32 %v1156_v60, %v1155_v58  ;;  %v1220_v62 = vpop.f32.mrb[13].mxu1  ;;  %v1158_v63 = vpop.f32.mrb[14].mxu0 }
 0x111   :  { %v1221_v0 = vadd.f32 %v1220_v62, %v1219_v59  ;;  %v1222_v1 = vpop.f32.mrb[14].mxu1  ;;  %v1159_v2 = vpop.f32.mrb[15].mxu0 }
 0x112   :  { %v1160_v3 = vadd.f32 %v1159_v2, %v1158_v63  ;;  %v1223_v4 = vpop.f32.mrb[15].mxu1 }
 0x113   :  { %v1224_v5 = vadd.f32 %v1223_v4, %v1222_v1  ;;  %v1687_v6 = vadd.f32 %v1221_v0, %v1157_v61 }
 0x115   :  { %v1689_v7 = vadd.f32 %v1224_v5, %v1160_v3 }
 0x116   :  { %v1161_v8 = vpop.f32.mrb[16].mxu0 }
 0x117   :  { %v1225_v9 = vpop.f32.mrb[16].mxu1  ;;  %v1162_v10 = vpop.f32.mrb[17].mxu0 }
 0x118   :  { %v1163_v11 = vadd.f32 %v1162_v10, %v1161_v8  ;;  %v1226_v12 = vpop.f32.mrb[17].mxu1  ;;  %v1164_v13 = vpop.f32.mrb[18].mxu0 }
 0x119   :  { %v1227_v14 = vadd.f32 %v1226_v12, %v1225_v9  ;;  %v1228_v15 = vpop.f32.mrb[18].mxu1  ;;  %v1165_v16 = vpop.f32.mrb[19].mxu0 }
 0x11a   :  { %v1166_v17 = vadd.f32 %v1165_v16, %v1164_v13  ;;  %v1229_v18 = vpop.f32.mrb[19].mxu1 }
 0x11b   :  { %v1230_v19 = vadd.f32 %v1229_v18, %v1228_v15  ;;  %v791_v20 = vadd.f32 %v1227_v14, %v1163_v11 }
 0x11d   :  { %v794_v21 = vadd.f32 %v1230_v19, %v1166_v17 }
 0x11e   :  { %v1167_v22 = vpop.f32.mrb[20].mxu0 }
 0x11f   :  { %v1231_v23 = vpop.f32.mrb[20].mxu1  ;;  %v1168_v24 = vpop.f32.mrb[21].mxu0 }
 0x120   :  { %v1169_v25 = vadd.f32 %v1168_v24, %v1167_v22  ;;  %v1232_v26 = vpop.f32.mrb[21].mxu1  ;;  %v1170_v27 = vpop.f32.mrb[22].mxu0 }
 0x121   :  { %v1233_v30 = vadd.f32 %v1232_v26, %v1231_v23  ;;  %v1234_v31 = vpop.f32.mrb[22].mxu1  ;;  %v1171_v32 = vpop.f32.mrb[23].mxu0 }
 0x122   :  { %v1172_v33 = vadd.f32 %v1171_v32, %v1170_v27  ;;  %v1235_v34 = vpop.f32.mrb[23].mxu1 }
 0x123   :  { %v1236_v35 = vadd.f32 %v1235_v34, %v1234_v31  ;;  %v799_v36 = vadd.f32 %v1233_v30, %v1169_v25 }
 0x125   :  { %v802_v37 = vadd.f32 %v1236_v35, %v1172_v33 }
 0x126   :  { %v1173_v38 = vpop.f32.mrb[24].mxu0 }
 0x127   :  { %v1237_v39 = vpop.f32.mrb[24].mxu1  ;;  %v1174_v40 = vpop.f32.mrb[25].mxu0 }
 0x128   :  { %v1175_v41 = vadd.f32 %v1174_v40, %v1173_v38  ;;  %v1238_v44 = vpop.f32.mrb[25].mxu1  ;;  %v1176_v45 = vpop.f32.mrb[26].mxu0 }
 0x129   :  { %v1239_v46 = vadd.f32 %v1238_v44, %v1237_v39  ;;  %v1240_v47 = vpop.f32.mrb[26].mxu1  ;;  %v1177_v48 = vpop.f32.mrb[27].mxu0 }
 0x12a   :  { %v1178_v49 = vadd.f32 %v1177_v48, %v1176_v45  ;;  %v1241_v50 = vpop.f32.mrb[27].mxu1 }
 0x12b   :  { %v1242_v51 = vadd.f32 %v1241_v50, %v1240_v47  ;;  %v807_v52 = vadd.f32 %v1239_v46, %v1175_v41 }
 0x12d   :  { %v1691_v53 = vadd.f32 %v1242_v51, %v1178_v49 }
 0x12e   :  { %v1179_v54 = vpop.f32.mrb[28].mxu0 }
 0x12f   :  { %v1243_v55 = vpop.f32.mrb[28].mxu1  ;;  %v1180_v58 = vpop.f32.mrb[29].mxu0 }
 0x130   :  { %v1181_v59 = vadd.f32 %v1180_v58, %v1179_v54  ;;  %v1244_v60 = vpop.f32.mrb[29].mxu1  ;;  %v1182_v61 = vpop.f32.mrb[30].mxu0 }
 0x131   :  { %v1245_v62 = vadd.f32 %v1244_v60, %v1243_v55  ;;  %v1246_v63 = vpop.f32.mrb[30].mxu1  ;;  %v1183_v0 = vpop.f32.mrb[31].mxu0 }
 0x132   :  { %v1184_v1 = vadd.f32 %v1183_v0, %v1182_v61  ;;  %v1247_v2 = vpop.f32.mrb[31].mxu1 }
 0x133   :  { %v1248_v3 = vadd.f32 %v1247_v2, %v1246_v63  ;;  %v815_v4 = vadd.f32 %v1245_v62, %v1181_v59 }
 0x135   :  { %v818_v5 = vadd.f32 %v1248_v3, %v1184_v1 }
 0x136   :  { %v1283_v8 = vpop.f32.mrb[32].mxu0 }
 0x137   :  { %v864_v9 = vadd.f32 %v1283_v8, %v1679_v42  ;;  %v1291_v10 = vpop.f32.mrb[32].mxu1  ;;  %v855_v11 = vpop.f32.mrb[33].mxu0 }
 0x138   :  { %v1694_v12 = vadd.f32 %v1291_v10, %v799_v36  ;;  %v856_v13 = vadd.f32 %v855_v11, %v1675_v28  ;;  %v887_v14 = vpop.f32.mrb[33].mxu1  ;;  %v1284_v15 = vpop.f32.mrb[34].mxu0 }
 0x139   :  { %v888_v16 = vadd.f32 %v887_v14, %v791_v20  ;;  %v867_v17 = vadd.f32 %v1284_v15, %v1681_v43  ;;  %v1292_v18 = vpop.f32.mrb[34].mxu1  ;;  %v858_v19 = vpop.f32.mrb[35].mxu0  ;;  %936 = vst [vmem:[%s1770_s2 + $0x10] sm:$0xff] %v864_v9 }
 0x13a   :  { %v1698_v22 = vadd.f32 %v1292_v18, %v802_v37  ;;  %v859_v23 = vadd.f32 %v858_v19, %v1677_v29  ;;  %v890_v24 = vpop.f32.mrb[35].mxu1  ;;  %944 = vst [vmem:[%s1770_s2 + $0x50] sm:$0xff] %v1694_v12  ;;  %934 = vst [vmem:[%s1770_s2] sm:$0xff] %v856_v13  ;;  %v990_v28 = vmul.f32 %v856_v13, %v856_v13 }
 0x13b   :  { %v891_v42 = vadd.f32 %v890_v24, %v794_v21  ;;  %942 = vst [vmem:[%s1770_s2 + $0x40] sm:$0xff] %v888_v16  ;;  %937 = vst [vmem:[%s1770_s2 + $0x18] sm:$0xff] %v867_v17  ;;  %v992_v21 = vmul.f32 %v864_v9, %v864_v9  ;;  %v993_v36 = vmul.f32 %v867_v17, %v867_v17 }
 0x13c   :  { %945 = vst [vmem:[%s1770_s2 + $0x58] sm:$0xff] %v1698_v22  ;;  %935 = vst [vmem:[%s1770_s2 + $0x8] sm:$0xff] %v859_v23  ;;  %v969_v29 = vadd.f32 %v859_v23, %v856_v13  ;;  %v991_v43 = vmul.f32 %v859_v23, %v859_v23  ;;  %v998_v59 = vmul.f32 %v888_v16, %v888_v16 }
 0x13d   :  { %943 = vst [vmem:[%s1770_s2 + $0x48] sm:$0xff] %v891_v42  ;;  %v999_v62 = vmul.f32 %v891_v42, %v891_v42  ;;  %v1000_v1 = vmul.f32 %v1694_v12, %v1694_v12 }
 0x13e   :  { %v1287_v20 = vpop.f32.mrb[36].mxu0  ;;  %v970_v30 = vadd.f32 %v969_v29, %v864_v9  ;;  %v1006_v31 = vadd.f32 %v991_v43, %v990_v28 }
 0x13f   :  { %v880_v25 = vadd.f32 %v1287_v20, %v1687_v6  ;;  %v1295_v26 = vpop.f32.mrb[36].mxu1  ;;  %v871_v27 = vpop.f32.mrb[37].mxu0 }
 0x140   :  { %v912_v32 = vadd.f32 %v1295_v26, %v815_v4  ;;  %v872_v33 = vadd.f32 %v871_v27, %v1683_v56  ;;  %v903_v34 = vpop.f32.mrb[37].mxu1  ;;  %v1288_v35 = vpop.f32.mrb[38].mxu0  ;;  %v1007_v41 = vadd.f32 %v1006_v31, %v992_v21  ;;  %v971_v44 = vadd.f32 %v970_v30, %v867_v17 }
 0x141   :  { %v904_v37 = vadd.f32 %v903_v34, %v807_v52  ;;  %v883_v38 = vadd.f32 %v1288_v35, %v1689_v7  ;;  %v1296_v39 = vpop.f32.mrb[38].mxu1  ;;  %v874_v40 = vpop.f32.mrb[39].mxu0  ;;  %940 = vst [vmem:[%s1770_s2 + $0x30] sm:$0xff] %v880_v25  ;;  %v996_v52 = vmul.f32 %v880_v25, %v880_v25  ;;  %v1001_v4 = vmul.f32 %v1698_v22, %v1698_v22 }
 0x142   :  { %v906_v45 = vpop.f32.mrb[39].mxu1  ;;  %v915_v6 = vadd.f32 %v1296_v39, %v818_v5  ;;  %948 = vst [vmem:[%s1770_s2 + $0x70] sm:$0xff] %v912_v32  ;;  %938 = vst [vmem:[%s1770_s2 + $0x20] sm:$0xff] %v872_v33  ;;  %v972_v56 = vadd.f32 %v971_v44, %v872_v33  ;;  %v994_v7 = vmul.f32 %v872_v33, %v872_v33 }
 0x143   :  { %v1008_v46 = vadd.f32 %v1007_v41, %v993_v36  ;;  %946 = vst [vmem:[%s1770_s2 + $0x60] sm:$0xff] %v904_v37  ;;  %941 = vst [vmem:[%s1770_s2 + $0x38] sm:$0xff] %v883_v38  ;;  %v875_v47 = vadd.f32 %v874_v40, %v1685_v57  ;;  %v907_v49 = vadd.f32 %v906_v45, %v1691_v53 }
 0x144   :  { %949 = vst [vmem:[%s1770_s2 + $0x78] sm:$0xff] %v915_v6  ;;  %v997_v55 = vmul.f32 %v883_v38, %v883_v38  ;;  %v1002_v9 = vmul.f32 %v904_v37, %v904_v37  ;;  %v1005_v19 = vmul.f32 %v915_v6, %v915_v6 }
 0x145   :  { %v1009_v48 = vadd.f32 %v1008_v46, %v994_v7  ;;  %939 = vst [vmem:[%s1770_s2 + $0x28] sm:$0xff] %v875_v47  ;;  %v973_v50 = vadd.f32 %v972_v56, %v875_v47  ;;  %v995_v51 = vmul.f32 %v875_v47, %v875_v47  ;;  %947 = vst [vmem:[%s1770_s2 + $0x68] sm:$0xff] %v907_v49 }
 0x146   :  { %v1003_v14 = vmul.f32 %v907_v49, %v907_v49 }
 0x147   :  { %v974_v54 = vadd.f32 %v973_v50, %v880_v25  ;;  %v1010_v57 = vadd.f32 %v1009_v48, %v995_v51 }
 0x149   :  { %v975_v58 = vadd.f32 %v974_v54, %v883_v38  ;;  %v1011_v53 = vadd.f32 %v1010_v57, %v996_v52 }
 0x14b   :  { %v976_v60 = vadd.f32 %v975_v58, %v888_v16  ;;  %v1012_v61 = vadd.f32 %v1011_v53, %v997_v55  ;;  %v1004_v16 = vmul.f32 %v912_v32, %v912_v32 }
 0x14d   :  { %v1013_v63 = vadd.f32 %v1012_v61, %v998_v59  ;;  %v977_v0 = vadd.f32 %v976_v60, %v891_v42 }
 0x14f   :  { %v978_v2 = vadd.f32 %v977_v0, %v1694_v12  ;;  %v1014_v3 = vadd.f32 %v1013_v63, %v999_v62 }
 0x151   :  { %v979_v5 = vadd.f32 %v978_v2, %v1698_v22  ;;  %v1015_v8 = vadd.f32 %v1014_v3, %v1000_v1 }
 0x153   :  { %v980_v10 = vadd.f32 %v979_v5, %v904_v37  ;;  %v1016_v11 = vadd.f32 %v1015_v8, %v1001_v4 }
 0x155   :  { %v981_v13 = vadd.f32 %v980_v10, %v907_v49  ;;  %v1017_v15 = vadd.f32 %v1016_v11, %v1002_v9 }
 0x157   :  { %v982_v17 = vadd.f32 %v981_v13, %v912_v32  ;;  %v1018_v18 = vadd.f32 %v1017_v15, %v1003_v14 }
 0x159   :  { %v983_v23 = vadd.f32 %v982_v17, %v915_v6  ;;  %v1019_v24 = vadd.f32 %v1018_v18, %v1004_v16 }
 0x15b   :  { %v984_v12 = vrot.slane %v983_v23, 4  ;;  %v1020_v42 = vadd.f32 %v1019_v24, %v1005_v19 }
 0x15d   :  { %v985_v28 = vadd.f32 %v984_v12, %v983_v23  ;;  %v1021_v29 = vrot.slane %v1020_v42, 4 }
 0x15f   :  { %v986_v43 = vrot.slane %v985_v28, 2  ;;  %v1022_v20 = vadd.f32 %v1021_v29, %v1020_v42 }
 0x161   :  { %v987_v22 = vadd.f32 %v986_v43, %v985_v28  ;;  %v1023_v21 = vrot.slane %v1022_v20, 2 }
 0x163   :  { %v988_v25 = vrot.slane %v987_v22, 1  ;;  %v1024_v26 = vadd.f32 %v1023_v21, %v1022_v20 }
 0x165   :  { %v989_v27 = vadd.f32 %v988_v25, %v987_v22  ;;  %v1025_v30 = vrot.slane %v1024_v26, 1 }
 0x167   :  { %v1026_v31 = vadd.f32 %v1025_v30, %v1024_v26  ;;  %1027 = vst [vmem:[%s1771_s3] sm:$0xff] %v989_v27 }
 0x169   :  { %1028 = vst [vmem:[%s1772_s4] sm:$0xff] %v1026_v31 }

// kernel: resnet_forward.28
= control target key start
LH: loop header
LB: loop body
LE: loop exit
PB: predicated region body
PF: predicated region fallthrough
CT: control target
= control target key end

     0   :  { %s254_s0 = inlined_call_operand.vmem [shape: f32[128,128], index: 0, kind: input, shape index: {}]   ;;  %s255_s1 = inlined_call_operand.vmem [shape: f32[1,128], index: 1, kind: input, shape index: {}]   ;;  %s256_s2 = inlined_call_operand.vmem [shape: f32[1,128], index: 2, kind: input, shape index: {}]   ;;  %s257_s3 = inlined_call_operand.vmem [shape: f32[128,128], index: 3, kind: output, shape index: {}]  }
   0x1   :  { %v14_v0 = vld [vmem:[%s254_s0] sm:$0xff]  ;;  %v15_v4 = vld [vmem:[%s254_s0 + $0x8] sm:$0xff]  ;;  %v16_v5 = vld [vmem:[%s254_s0 + $0x10] sm:$0xff] }
   0x2   :  { %v112_v1 = vld [vmem:[%s255_s1] ss:$0 sm:$0xff]  ;;  %v17_v6 = vld [vmem:[%s254_s0 + $0x18] sm:$0xff]  ;;  %v19_v11 = vld [vmem:[%s254_s0 + $0x28] sm:$0xff] }
   0x3   :  { %v143_v2 = vld [vmem:[%s256_s2] ss:$0 sm:$0xff]  ;;  %v37_v3 = vmul.f32 %v112_v1, %v14_v0  ;;  %v38_v7 = vmul.f32 %v112_v1, %v15_v4  ;;  %v39_v8 = vmul.f32 %v112_v1, %v16_v5  ;;  %v40_v9 = vmul.f32 %v112_v1, %v17_v6  ;;  %v20_v12 = vld [vmem:[%s254_s0 + $0x30] sm:$0xff]  ;;  %v21_v17 = vld [vmem:[%s254_s0 + $0x38] sm:$0xff] }
   0x4   :  { %v18_v10 = vld [vmem:[%s254_s0 + $0x20] sm:$0xff]  ;;  %v42_v15 = vmul.f32 %v112_v1, %v19_v11  ;;  %v43_v16 = vmul.f32 %v112_v1, %v20_v12  ;;  %v44_v21 = vmul.f32 %v112_v1, %v21_v17  ;;  %v23_v27 = vld [vmem:[%s254_s0 + $0x48] sm:$0xff]  ;;  %v24_v28 = vld [vmem:[%s254_s0 + $0x50] sm:$0xff] }
   0x5   :  { %v60_v13 = vadd.f32 %v143_v2, %v37_v3  ;;  %v41_v14 = vmul.f32 %v112_v1, %v18_v10  ;;  %v61_v18 = vadd.f32 %v143_v2, %v38_v7  ;;  %v62_v19 = vadd.f32 %v143_v2, %v39_v8  ;;  %v22_v22 = vld [vmem:[%s254_s0 + $0x40] sm:$0xff]  ;;  %v25_v29 = vld [vmem:[%s254_s0 + $0x58] sm:$0xff]  ;;  %v27_v35 = vld [vmem:[%s254_s0 + $0x68] sm:$0xff] }
   0x6   :  { %v63_v20 = vadd.f32 %v143_v2, %v40_v9  ;;  %v65_v25 = vadd.f32 %v143_v2, %v42_v15  ;;  %v66_v26 = vadd.f32 %v143_v2, %v43_v16  ;;  %v67_v33 = vadd.f32 %v143_v2, %v44_v21  ;;  %v26_v34 = vld [vmem:[%s254_s0 + $0x60] sm:$0xff]  ;;  %v28_v36 = vld [vmem:[%s254_s0 + $0x70] sm:$0xff]  ;;  %v29_v41 = vld [vmem:[%s254_s0 + $0x78] sm:$0xff] }
   0x7   :  { %v76_v23 = vmax.f32 %v60_v13, 0.0  ;;  %v64_v24 = vadd.f32 %v143_v2, %v41_v14  ;;  %v77_v30 = vmax.f32 %v61_v18, 0.0  ;;  %v78_v31 = vmax.f32 %v62_v19, 0.0 }
   0x8   :  { %v79_v32 = vmax.f32 %v63_v20, 0.0  ;;  %v81_v38 = vmax.f32 %v65_v25, 0.0  ;;  %v82_v39 = vmax.f32 %v66_v26, 0.0  ;;  %v45_v40 = vmul.f32 %v112_v1, %v22_v22 }
   0x9   :  { %92 = vst [vmem:[%s257_s3] sm:$0xff] %v76_v23  ;;  %v80_v37 = vmax.f32 %v64_v24, 0.0  ;;  %93 = vst [vmem:[%s257_s3 + $0x8] sm:$0xff] %v77_v30  ;;  %v83_v42 = vmax.f32 %v67_v33, 0.0  ;;  %v46_v43 = vmul.f32 %v112_v1, %v23_v27  ;;  %v47_v44 = vmul.f32 %v112_v1, %v24_v28 }
   0xa   :  { %94 = vst [vmem:[%s257_s3 + $0x10] sm:$0xff] %v78_v31  ;;  %95 = vst [vmem:[%s257_s3 + $0x18] sm:$0xff] %v79_v32  ;;  %v48_v45 = vmul.f32 %v112_v1, %v25_v29  ;;  %v68_v46 = vadd.f32 %v143_v2, %v45_v40  ;;  %v49_v47 = vmul.f32 %v112_v1, %v26_v34 }
   0xb   :  { %96 = vst [vmem:[%s257_s3 + $0x20] sm:$0xff] %v80_v37  ;;  %97 = vst [vmem:[%s257_s3 + $0x28] sm:$0xff] %v81_v38  ;;  %v50_v48 = vmul.f32 %v112_v1, %v27_v35  ;;  %v51_v49 = vmul.f32 %v112_v1, %v28_v36  ;;  %v69_v50 = vadd.f32 %v143_v2, %v46_v43 }
   0xc   :  { %98 = vst [vmem:[%s257_s3 + $0x30] sm:$0xff] %v82_v39  ;;  %99 = vst [vmem:[%s257_s3 + $0x38] sm:$0xff] %v83_v42  ;;  %v70_v51 = vadd.f32 %v143_v2, %v47_v44  ;;  %v71_v52 = vadd.f32 %v143_v2, %v48_v45  ;;  %v52_v53 = vmul.f32 %v112_v1, %v29_v41  ;;  %v84_v54 = vmax.f32 %v68_v46, 0.0 }
   0xd   :  { %v72_v55 = vadd.f32 %v143_v2, %v49_v47  ;;  %v73_v56 = vadd.f32 %v143_v2, %v50_v48  ;;  %v74_v57 = vadd.f32 %v143_v2, %v51_v49  ;;  %v85_v58 = vmax.f32 %v69_v50, 0.0 }
   0xe   :  { %v86_v59 = vmax.f32 %v70_v51, 0.0  ;;  %v87_v60 = vmax.f32 %v71_v52, 0.0  ;;  %v75_v61 = vadd.f32 %v143_v2, %v52_v53  ;;  %100 = vst [vmem:[%s257_s3 + $0x40] sm:$0xff] %v84_v54 }
   0xf   :  { %v88_v62 = vmax.f32 %v72_v55, 0.0  ;;  %v89_v63 = vmax.f32 %v73_v56, 0.0  ;;  %v90_v0 = vmax.f32 %v74_v57, 0.0  ;;  %101 = vst [vmem:[%s257_s3 + $0x48] sm:$0xff] %v85_v58 }
  0x10   :  { %102 = vst [vmem:[%s257_s3 + $0x50] sm:$0xff] %v86_v59  ;;  %103 = vst [vmem:[%s257_s3 + $0x58] sm:$0xff] %v87_v60  ;;  %v91_v1 = vmax.f32 %v75_v61, 0.0 }
  0x11   :  { %104 = vst [vmem:[%s257_s3 + $0x60] sm:$0xff] %v88_v62  ;;  %105 = vst [vmem:[%s257_s3 + $0x68] sm:$0xff] %v89_v63 }
  0x12   :  { %106 = vst [vmem:[%s257_s3 + $0x70] sm:$0xff] %v90_v0  ;;  %107 = vst [vmem:[%s257_s3 + $0x78] sm:$0xff] %v91_v1 }

// kernel: resnet_forward.30
= control target key start
LH: loop header
LB: loop body
LE: loop exit
PB: predicated region body
PF: predicated region fallthrough
CT: control target
= control target key end

     0   :  { %s466_s0 = inlined_call_operand.vmem [shape: f32[128,128], index: 0, kind: input, shape index: {}]   ;;  %s467_s1 = inlined_call_operand.vmem [shape: f32[1,128], index: 1, kind: input, shape index: {}]   ;;  %s468_s2 = inlined_call_operand.vmem [shape: f32[1,128], index: 2, kind: input, shape index: {}]   ;;  %s469_s3 = inlined_call_operand.vmem [shape: f32[128,128], index: 3, kind: input, shape index: {}]   ;;  %s470_s4 = inlined_call_operand.vmem [shape: f32[1,128], index: 4, kind: input, shape index: {}]   ;;  %s471_s5 = inlined_call_operand.vmem [shape: f32[1,128], index: 5, kind: input, shape index: {}]   ;;  %s472_s6 = inlined_call_operand.vmem [shape: f32[128,128], index: 6, kind: output, shape index: {}]  }
   0x1   :  { %v23_v0 = vld [vmem:[%s466_s0] sm:$0xff]  ;;  %v24_v8 = vld [vmem:[%s466_s0 + $0x8] sm:$0xff]  ;;  %v25_v10 = vld [vmem:[%s466_s0 + $0x10] sm:$0xff] }
   0x2   :  { %v244_v1 = vld [vmem:[%s467_s1] ss:$0 sm:$0xff]  ;;  %v86_v9 = vld [vmem:[%s469_s3 + $0x8] sm:$0xff]  ;;  %v87_v15 = vld [vmem:[%s469_s3 + $0x10] sm:$0xff] }
   0x3   :  { %v249_v2 = vld [vmem:[%s468_s2] ss:$0 sm:$0xff]  ;;  %v46_v3 = vmul.f32 %v244_v1, %v23_v0  ;;  %v47_v12 = vmul.f32 %v244_v1, %v24_v8  ;;  %v48_v14 = vmul.f32 %v244_v1, %v25_v10  ;;  %v26_v16 = vld [vmem:[%s466_s0 + $0x18] sm:$0xff]  ;;  %v28_v23 = vld [vmem:[%s466_s0 + $0x28] sm:$0xff] }
   0x4   :  { %v85_v4 = vld [vmem:[%s469_s3] sm:$0xff]  ;;  %v88_v17 = vld [vmem:[%s469_s3 + $0x18] sm:$0xff]  ;;  %v49_v19 = vmul.f32 %v244_v1, %v26_v16  ;;  %v90_v28 = vld [vmem:[%s469_s3 + $0x28] sm:$0xff]  ;;  %v51_v33 = vmul.f32 %v244_v1, %v28_v23 }
   0x5   :  { %v258_v5 = vld [vmem:[%s470_s4] ss:$0 sm:$0xff]  ;;  %v69_v11 = vadd.f32 %v249_v2, %v46_v3  ;;  %v70_v25 = vadd.f32 %v249_v2, %v47_v12  ;;  %v71_v26 = vadd.f32 %v249_v2, %v48_v14  ;;  %v29_v29 = vld [vmem:[%s466_s0 + $0x30] sm:$0xff]  ;;  %v30_v39 = vld [vmem:[%s466_s0 + $0x38] sm:$0xff] }
   0x6   :  { %v108_v6 = vmul.f32 %v258_v5, %v85_v4  ;;  %v264_v7 = vld [vmem:[%s471_s5] ss:$0 sm:$0xff]  ;;  %v109_v13 = vmul.f32 %v258_v5, %v86_v9  ;;  %v110_v18 = vmul.f32 %v258_v5, %v87_v15  ;;  %v111_v20 = vmul.f32 %v258_v5, %v88_v17  ;;  %v91_v30 = vld [vmem:[%s469_s3 + $0x30] sm:$0xff]  ;;  %v92_v44 = vld [vmem:[%s469_s3 + $0x38] sm:$0xff] }
   0x7   :  { %v27_v21 = vld [vmem:[%s466_s0 + $0x20] sm:$0xff]  ;;  %v72_v31 = vadd.f32 %v249_v2, %v49_v19  ;;  %v113_v34 = vmul.f32 %v258_v5, %v90_v28  ;;  %v74_v41 = vadd.f32 %v249_v2, %v51_v33  ;;  %v52_v42 = vmul.f32 %v244_v1, %v29_v29  ;;  %v32_v55 = vld [vmem:[%s466_s0 + $0x48] sm:$0xff]  ;;  %v33_v3 = vld [vmem:[%s466_s0 + $0x50] sm:$0xff] }
   0x8   :  { %v89_v22 = vld [vmem:[%s469_s3 + $0x20] sm:$0xff]  ;;  %v124_v24 = vadd.f32 %v108_v6, %v69_v11  ;;  %v50_v27 = vmul.f32 %v244_v1, %v27_v21  ;;  %v125_v36 = vadd.f32 %v109_v13, %v70_v25  ;;  %v126_v37 = vadd.f32 %v110_v18, %v71_v26  ;;  %v94_v60 = vld [vmem:[%s469_s3 + $0x48] sm:$0xff]  ;;  %v95_v4 = vld [vmem:[%s469_s3 + $0x50] sm:$0xff] }
   0x9   :  { %v112_v32 = vmul.f32 %v258_v5, %v89_v22  ;;  %v127_v40 = vadd.f32 %v111_v20, %v72_v31  ;;  %v114_v43 = vmul.f32 %v258_v5, %v91_v30  ;;  %v129_v50 = vadd.f32 %v113_v34, %v74_v41  ;;  %v31_v53 = vld [vmem:[%s466_s0 + $0x40] sm:$0xff]  ;;  %v34_v11 = vld [vmem:[%s466_s0 + $0x58] sm:$0xff]  ;;  %v36_v23 = vld [vmem:[%s466_s0 + $0x68] sm:$0xff] }
   0xa   :  { %v147_v35 = vadd.f32 %v264_v7, %v124_v24  ;;  %v73_v38 = vadd.f32 %v249_v2, %v50_v27  ;;  %v148_v46 = vadd.f32 %v264_v7, %v125_v36  ;;  %v149_v47 = vadd.f32 %v264_v7, %v126_v37  ;;  %v93_v54 = vld [vmem:[%s469_s3 + $0x40] sm:$0xff]  ;;  %v96_v12 = vld [vmem:[%s469_s3 + $0x58] sm:$0xff]  ;;  %v37_v33 = vld [vmem:[%s466_s0 + $0x70] sm:$0xff] }
   0xb   :  { %v150_v49 = vadd.f32 %v264_v7, %v127_v40  ;;  %v75_v51 = vadd.f32 %v249_v2, %v52_v42  ;;  %v53_v52 = vmul.f32 %v244_v1, %v30_v39  ;;  %v115_v59 = vmul.f32 %v258_v5, %v92_v44  ;;  %v35_v17 = vld [vmem:[%s466_s0 + $0x60] sm:$0xff]  ;;  %v99_v42 = vld [vmem:[%s469_s3 + $0x70] sm:$0xff] }
   0xc   :  { %v163_v45 = vmax.f32 %v147_v35, 0.0  ;;  %v128_v48 = vadd.f32 %v112_v32, %v73_v38  ;;  %v164_v56 = vmax.f32 %v148_v46, 0.0  ;;  %v165_v57 = vmax.f32 %v149_v47, 0.0  ;;  %v97_v22 = vld [vmem:[%s469_s3 + $0x60] sm:$0xff]  ;;  %v98_v32 = vld [vmem:[%s469_s3 + $0x68] sm:$0xff]  ;;  %v38_v47 = vld [vmem:[%s466_s0 + $0x78] sm:$0xff] }
   0xd   :  { %v166_v61 = vmax.f32 %v150_v49, 0.0  ;;  %v152_v62 = vadd.f32 %v264_v7, %v129_v50  ;;  %v130_v63 = vadd.f32 %v114_v43, %v75_v51  ;;  %v76_v0 = vadd.f32 %v249_v2, %v53_v52 }
   0xe   :  { %179 = vst [vmem:[%s472_s6] sm:$0xff] %v163_v45  ;;  %v151_v58 = vadd.f32 %v264_v7, %v128_v48  ;;  %180 = vst [vmem:[%s472_s6 + $0x8] sm:$0xff] %v164_v56  ;;  %v54_v8 = vmul.f32 %v244_v1, %v31_v53  ;;  %v116_v9 = vmul.f32 %v258_v5, %v93_v54  ;;  %v100_v48 = vld [vmem:[%s469_s3 + $0x78] sm:$0xff] }
   0xf   :  { %181 = vst [vmem:[%s472_s6 + $0x10] sm:$0xff] %v165_v57  ;;  %v55_v10 = vmul.f32 %v244_v1, %v32_v55  ;;  %182 = vst [vmem:[%s472_s6 + $0x18] sm:$0xff] %v166_v61  ;;  %v168_v13 = vmax.f32 %v152_v62, 0.0  ;;  %v153_v14 = vadd.f32 %v264_v7, %v130_v63  ;;  %v131_v15 = vadd.f32 %v115_v59, %v76_v0 }
  0x10   :  { %v167_v6 = vmax.f32 %v151_v58, 0.0  ;;  %v117_v16 = vmul.f32 %v258_v5, %v94_v60  ;;  %v77_v18 = vadd.f32 %v249_v2, %v54_v8  ;;  %v56_v20 = vmul.f32 %v244_v1, %v33_v3 }
  0x11   :  { %v78_v19 = vadd.f32 %v249_v2, %v55_v10  ;;  %v118_v21 = vmul.f32 %v258_v5, %v95_v4  ;;  %184 = vst [vmem:[%s472_s6 + $0x28] sm:$0xff] %v168_v13  ;;  %v169_v24 = vmax.f32 %v153_v14, 0.0  ;;  %v154_v25 = vadd.f32 %v264_v7, %v131_v15 }
  0x12   :  { %183 = vst [vmem:[%s472_s6 + $0x20] sm:$0xff] %v167_v6  ;;  %v57_v26 = vmul.f32 %v244_v1, %v34_v11  ;;  %v119_v27 = vmul.f32 %v258_v5, %v96_v12  ;;  %v132_v28 = vadd.f32 %v116_v9, %v77_v18  ;;  %v79_v30 = vadd.f32 %v249_v2, %v56_v20 }
  0x13   :  { %v133_v29 = vadd.f32 %v117_v16, %v78_v19  ;;  %v58_v31 = vmul.f32 %v244_v1, %v35_v17  ;;  %185 = vst [vmem:[%s472_s6 + $0x30] sm:$0xff] %v169_v24  ;;  %v170_v34 = vmax.f32 %v154_v25, 0.0  ;;  %v120_v36 = vmul.f32 %v258_v5, %v97_v22 }
  0x14   :  { %v80_v35 = vadd.f32 %v249_v2, %v57_v26  ;;  %v59_v37 = vmul.f32 %v244_v1, %v36_v23  ;;  %v155_v38 = vadd.f32 %v264_v7, %v132_v28  ;;  %v134_v40 = vadd.f32 %v118_v21, %v79_v30 }
  0x15   :  { %v156_v39 = vadd.f32 %v264_v7, %v133_v29  ;;  %v81_v41 = vadd.f32 %v249_v2, %v58_v31  ;;  %186 = vst [vmem:[%s472_s6 + $0x38] sm:$0xff] %v170_v34  ;;  %v121_v45 = vmul.f32 %v258_v5, %v98_v32  ;;  %v60_v46 = vmul.f32 %v244_v1, %v37_v33 }
  0x16   :  { %v135_v43 = vadd.f32 %v119_v27, %v80_v35  ;;  %v82_v44 = vadd.f32 %v249_v2, %v59_v37  ;;  %v171_v49 = vmax.f32 %v155_v38, 0.0  ;;  %v157_v51 = vadd.f32 %v264_v7, %v134_v40 }
  0x17   :  { %v172_v50 = vmax.f32 %v156_v39, 0.0  ;;  %v136_v52 = vadd.f32 %v120_v36, %v81_v41  ;;  %v83_v55 = vadd.f32 %v249_v2, %v60_v46  ;;  %v122_v56 = vmul.f32 %v258_v5, %v99_v42 }
  0x18   :  { %v158_v53 = vadd.f32 %v264_v7, %v135_v43  ;;  %v137_v54 = vadd.f32 %v121_v45, %v82_v44  ;;  %187 = vst [vmem:[%s472_s6 + $0x40] sm:$0xff] %v171_v49  ;;  %v173_v57 = vmax.f32 %v157_v51, 0.0  ;;  %v61_v59 = vmul.f32 %v244_v1, %v38_v47 }
  0x19   :  { %188 = vst [vmem:[%s472_s6 + $0x48] sm:$0xff] %v172_v50  ;;  %v159_v58 = vadd.f32 %v264_v7, %v136_v52  ;;  %v123_v60 = vmul.f32 %v258_v5, %v100_v48  ;;  %v138_v63 = vadd.f32 %v122_v56, %v83_v55 }
  0x1a   :  { %v174_v61 = vmax.f32 %v158_v53, 0.0  ;;  %v160_v62 = vadd.f32 %v264_v7, %v137_v54  ;;  %189 = vst [vmem:[%s472_s6 + $0x50] sm:$0xff] %v173_v57  ;;  %v84_v3 = vadd.f32 %v249_v2, %v61_v59 }
  0x1b   :  { %v175_v0 = vmax.f32 %v159_v58, 0.0  ;;  %v161_v1 = vadd.f32 %v264_v7, %v138_v63 }
  0x1c   :  { %190 = vst [vmem:[%s472_s6 + $0x58] sm:$0xff] %v174_v61  ;;  %v176_v4 = vmax.f32 %v160_v62, 0.0  ;;  %v139_v5 = vadd.f32 %v123_v60, %v84_v3 }
  0x1d   :  { %191 = vst [vmem:[%s472_s6 + $0x60] sm:$0xff] %v175_v0  ;;  %v177_v6 = vmax.f32 %v161_v1, 0.0 }
  0x1e   :  { %192 = vst [vmem:[%s472_s6 + $0x68] sm:$0xff] %v176_v4  ;;  %v162_v8 = vadd.f32 %v264_v7, %v139_v5 }
  0x1f   :  { %193 = vst [vmem:[%s472_s6 + $0x70] sm:$0xff] %v177_v6 }
  0x20   :  { %v178_v2 = vmax.f32 %v162_v8, 0.0 }
  0x22   :  { %194 = vst [vmem:[%s472_s6 + $0x78] sm:$0xff] %v178_v2 }

// kernel: resnet_forward.34
= control target key start
LH: loop header
LB: loop body
LE: loop exit
PB: predicated region body
PF: predicated region fallthrough
CT: control target
= control target key end

     0   :  { %s331_s1 = inlined_call_operand.vmem [shape: bf16[128,128], index: 1, kind: input, shape index: {}]   ;;  %s332_s0 = inlined_call_operand.vmem [shape: bf16[32,128], index: 0, kind: input, shape index: {}]   ;;  %s333_s2 = inlined_call_operand.vmem [shape: f32[32,128], index: 2, kind: output, shape index: {0}]   ;;  %s334_s3 = inlined_call_operand.vmem [shape: f32[8,128], index: 3, kind: output, shape index: {1}]   ;;  %s335_s4 = inlined_call_operand.vmem [shape: f32[8,128], index: 4, kind: output, shape index: {2}]  }
   0x1   :  { %v248_v0 = vld [vmem:[%s331_s1] sm:$0xff]   ;;  %v249_v1 = vld [vmem:[%s331_s1 + $0x8] sm:$0xff]   ;;  %v250_v2 = vld [vmem:[%s331_s1 + $0x10] sm:$0xff]  }
   0x2   :  { %227 = vmatprep.subr.bf16.mxu0 %v248_v0  ;;  %v251_v3 = vld [vmem:[%s331_s1 + $0x18] sm:$0xff]   ;;  %v256_v4 = vld [vmem:[%s332_s0] sm:$0xff]   ;;  %v253_v6 = vld [vmem:[%s331_s1 + $0x28] sm:$0xff]  }
   0x3   :  { %228 = vmatpush3.bf16.msra.mxu0 %v248_v0  ;;  %243 = vmatprep.mubr.bf16.mxu0 %v256_v4  ;;  %v252_v5 = vld [vmem:[%s331_s1 + $0x20] sm:$0xff]   ;;  %v254_v7 = vld [vmem:[%s331_s1 + $0x30] sm:$0xff]   ;;  %v255_v8 = vld [vmem:[%s331_s1 + $0x38] sm:$0xff]  }
   0x4   :  { %229 = vmatprep.subr.bf16.mxu0 %v249_v1  ;;  %v257_v9 = vld [vmem:[%s332_s0 + $0x8] sm:$0xff]  }
   0x7   :  { %230 = vmatpush3.bf16.msra.mxu0 %v249_v1 }
   0x8   :  { %231 = vmatprep.subr.bf16.mxu0 %v250_v2 }
   0xb   :  { %232 = vmatpush3.bf16.msra.mxu0 %v250_v2 }
   0xc   :  { %233 = vmatprep.subr.bf16.mxu0 %v251_v3 }
   0xf   :  { %234 = vmatpush3.bf16.msra.mxu0 %v251_v3 }
  0x10   :  { %235 = vmatprep.subr.bf16.mxu0 %v252_v5 }
  0x13   :  { %236 = vmatpush3.bf16.msra.mxu0 %v252_v5 }
  0x14   :  { %237 = vmatprep.subr.bf16.mxu0 %v253_v6 }
  0x17   :  { %238 = vmatpush3.bf16.msra.mxu0 %v253_v6 }
  0x18   :  { %239 = vmatprep.subr.bf16.mxu0 %v254_v7 }
  0x1b   :  { %240 = vmatpush3.bf16.msra.mxu0 %v254_v7 }
  0x1c   :  { %241 = vmatprep.subr.bf16.mxu0 %v255_v8 }
  0x1f   :  { %242 = vmatpush3.bf16.msra.mxu0 %v255_v8 }
  0x22   :  { %244 = vmatmul.mubr.bf16.vlgmr.msra.gmra.mrb[0].mxu0 %v257_v9 }
  0xf5   :  { %v245_v10 = vpop.f32.mrb[0].mxu0 }
  0xf6   :  { %v141_v11 = vpop.f32.mrb[1].mxu0  ;;  %162 = vst [vmem:[%s333_s2 + $0x10] sm:$0xff] %v245_v10  ;;  %v182_v17 = vmul.f32 %v245_v10, %v245_v10 }
  0xf7   :  { %v246_v12 = vpop.f32.mrb[2].mxu0  ;;  %160 = vst [vmem:[%s333_s2] sm:$0xff] %v141_v11  ;;  %v180_v14 = vmul.f32 %v141_v11, %v141_v11 }
  0xf8   :  { %v144_v13 = vpop.f32.mrb[3].mxu0  ;;  %163 = vst [vmem:[%s333_s2 + $0x18] sm:$0xff] %v246_v12  ;;  %v183_v20 = vmul.f32 %v246_v12, %v246_v12 }
  0xf9   :  { %161 = vst [vmem:[%s333_s2 + $0x8] sm:$0xff] %v144_v13  ;;  %v171_v15 = vadd.f32 %v144_v13, %v141_v11  ;;  %v181_v16 = vmul.f32 %v144_v13, %v144_v13 }
  0xfb   :  { %v172_v18 = vadd.f32 %v245_v10, %v171_v15  ;;  %v184_v19 = vadd.f32 %v181_v16, %v180_v14 }
  0xfd   :  { %v173_v21 = vadd.f32 %v246_v12, %v172_v18  ;;  %v185_v22 = vadd.f32 %v184_v19, %v182_v17 }
  0xff   :  { %v174_v23 = vrot.slane %v173_v21, 4  ;;  %v186_v24 = vadd.f32 %v185_v22, %v183_v20 }
 0x101   :  { %v175_v25 = vadd.f32 %v174_v23, %v173_v21  ;;  %v187_v26 = vrot.slane %v186_v24, 4 }
 0x103   :  { %v176_v27 = vrot.slane %v175_v25, 2  ;;  %v188_v28 = vadd.f32 %v187_v26, %v186_v24 }
 0x105   :  { %v177_v29 = vadd.f32 %v176_v27, %v175_v25  ;;  %v189_v30 = vrot.slane %v188_v28, 2 }
 0x107   :  { %v178_v31 = vrot.slane %v177_v29, 1  ;;  %v190_v32 = vadd.f32 %v189_v30, %v188_v28 }
 0x109   :  { %v179_v33 = vadd.f32 %v178_v31, %v177_v29  ;;  %v191_v34 = vrot.slane %v190_v32, 1 }
 0x10b   :  { %v192_v35 = vadd.f32 %v191_v34, %v190_v32  ;;  %193 = vst [vmem:[%s334_s3] sm:$0xff] %v179_v33 }
 0x10d   :  { %194 = vst [vmem:[%s335_s4] sm:$0xff] %v192_v35 }

// kernel: resnet_forward.32
= control target key start
LH: loop header
LB: loop body
LE: loop exit
PB: predicated region body
PF: predicated region fallthrough
CT: control target
= control target key end

     0   :  { %s104_s0 = inlined_call_operand.vmem [shape: f32[32,128], index: 0, kind: input, shape index: {}]   ;;  %s105_s1 = inlined_call_operand.vmem [shape: f32[1,128], index: 1, kind: input, shape index: {}]   ;;  %s106_s2 = inlined_call_operand.vmem [shape: f32[1,128], index: 2, kind: input, shape index: {}]   ;;  %s107_s3 = inlined_call_operand.vmem [shape: f32[32,128], index: 3, kind: output, shape index: {}]  }
   0x1   :  { %v14_v0 = vld [vmem:[%s104_s0] sm:$0xff]  ;;  %v15_v4 = vld [vmem:[%s104_s0 + $0x8] sm:$0xff]  ;;  %v16_v5 = vld [vmem:[%s104_s0 + $0x10] sm:$0xff] }
   0x2   :  { %v52_v1 = vld [vmem:[%s105_s1] ss:$0 sm:$0xff]  ;;  %v17_v6 = vld [vmem:[%s104_s0 + $0x18] sm:$0xff] }
   0x3   :  { %v53_v2 = vld [vmem:[%s106_s2] ss:$0 sm:$0xff]  ;;  %v25_v3 = vmul.f32 %v52_v1, %v14_v0  ;;  %v26_v7 = vmul.f32 %v52_v1, %v15_v4  ;;  %v27_v8 = vmul.f32 %v52_v1, %v16_v5  ;;  %v28_v9 = vmul.f32 %v52_v1, %v17_v6 }
   0x5   :  { %v36_v10 = vadd.f32 %v53_v2, %v25_v3  ;;  %v37_v11 = vadd.f32 %v53_v2, %v26_v7  ;;  %v38_v12 = vadd.f32 %v53_v2, %v27_v8  ;;  %v39_v13 = vadd.f32 %v53_v2, %v28_v9 }
   0x7   :  { %v40_v14 = vmax.f32 %v36_v10, 0.0  ;;  %v41_v15 = vmax.f32 %v37_v11, 0.0  ;;  %v42_v16 = vmax.f32 %v38_v12, 0.0  ;;  %v43_v17 = vmax.f32 %v39_v13, 0.0 }
   0x9   :  { %44 = vst [vmem:[%s107_s3] sm:$0xff] %v40_v14  ;;  %45 = vst [vmem:[%s107_s3 + $0x8] sm:$0xff] %v41_v15 }
   0xa   :  { %46 = vst [vmem:[%s107_s3 + $0x10] sm:$0xff] %v42_v16  ;;  %47 = vst [vmem:[%s107_s3 + $0x18] sm:$0xff] %v43_v17 }

// kernel: resnet_forward.31
= control target key start
LH: loop header
LB: loop body
LE: loop exit
PB: predicated region body
PF: predicated region fallthrough
CT: control target
= control target key end

     0   :  { %s993_s1 = inlined_call_operand.vmem [shape: bf16[640,128], index: 1, kind: input, shape index: {}]   ;;  %s994_s0 = inlined_call_operand.vmem [shape: bf16[32,640], index: 0, kind: input, shape index: {}]   ;;  %s995_s2 = inlined_call_operand.vmem [shape: f32[32,128], index: 2, kind: output, shape index: {0}]   ;;  %s996_s3 = inlined_call_operand.vmem [shape: f32[8,128], index: 3, kind: output, shape index: {1}]   ;;  %s997_s4 = inlined_call_operand.vmem [shape: f32[8,128], index: 4, kind: output, shape index: {2}]  }
   0x1   :  { %v746_v0 = vld [vmem:[%s993_s1 + $0x40] sm:$0xff]   ;;  %v750_v4 = vld [vmem:[%s993_s1 + $0x48] sm:$0xff]   ;;  %v754_v8 = vld [vmem:[%s993_s1 + $0x50] sm:$0xff]  }
   0x2   :  { %v747_v1 = vld [vmem:[%s993_s1 + $0xc0] sm:$0xff]   ;;  %659 = vmatprep.subr.bf16.mxu0 %v746_v0  ;;  %v751_v5 = vld [vmem:[%s993_s1 + $0xc8] sm:$0xff]   ;;  %v755_v9 = vld [vmem:[%s993_s1 + $0xd0] sm:$0xff]  }
   0x3   :  { %v748_v2 = vld [vmem:[%s993_s1] sm:$0xff]   ;;  %687 = vmatprep.subr.bf16.mxu1 %v747_v1  ;;  %v752_v6 = vld [vmem:[%s993_s1 + $0x8] sm:$0xff]   ;;  %v756_v10 = vld [vmem:[%s993_s1 + $0x10] sm:$0xff]  }
   0x4   :  { %v749_v3 = vld [vmem:[%s993_s1 + $0x80] sm:$0xff]   ;;  %660 = vmatpush3.bf16.msra.mxu0 %v748_v2  ;;  %v753_v7 = vld [vmem:[%s993_s1 + $0x88] sm:$0xff]   ;;  %v757_v11 = vld [vmem:[%s993_s1 + $0x90] sm:$0xff]  }
   0x5   :  { %688 = vmatpush3.bf16.msra.mxu1 %v749_v3  ;;  %661 = vmatprep.subr.bf16.mxu0 %v750_v4  ;;  %v758_v12 = vld [vmem:[%s993_s1 + $0x58] sm:$0xff]   ;;  %v762_v16 = vld [vmem:[%s993_s1 + $0x60] sm:$0xff]   ;;  %v766_v20 = vld [vmem:[%s993_s1 + $0x68] sm:$0xff]  }
   0x6   :  { %689 = vmatprep.subr.bf16.mxu1 %v751_v5  ;;  %v759_v13 = vld [vmem:[%s993_s1 + $0xd8] sm:$0xff]   ;;  %v763_v17 = vld [vmem:[%s993_s1 + $0xe0] sm:$0xff]   ;;  %v767_v21 = vld [vmem:[%s993_s1 + $0xe8] sm:$0xff]  }
   0x7   :  { %v760_v14 = vld [vmem:[%s993_s1 + $0x18] sm:$0xff]   ;;  %v764_v18 = vld [vmem:[%s993_s1 + $0x20] sm:$0xff]   ;;  %v768_v22 = vld [vmem:[%s993_s1 + $0x28] sm:$0xff]  }
   0x8   :  { %662 = vmatpush3.bf16.msra.mxu0 %v752_v6  ;;  %v761_v15 = vld [vmem:[%s993_s1 + $0x98] sm:$0xff]   ;;  %v765_v19 = vld [vmem:[%s993_s1 + $0xa0] sm:$0xff]   ;;  %v769_v23 = vld [vmem:[%s993_s1 + $0xa8] sm:$0xff]  }
   0x9   :  { %690 = vmatpush3.bf16.msra.mxu1 %v753_v7  ;;  %663 = vmatprep.subr.bf16.mxu0 %v754_v8  ;;  %v770_v24 = vld [vmem:[%s993_s1 + $0x70] sm:$0xff]   ;;  %v774_v28 = vld [vmem:[%s993_s1 + $0x78] sm:$0xff]   ;;  %v783_v35 = vld [vmem:[%s994_s0 + $0xc] ss:$20 sps:$4 sm:$0xff]  }
   0xa   :  { %691 = vmatprep.subr.bf16.mxu1 %v755_v9  ;;  %v771_v25 = vld [vmem:[%s993_s1 + $0xf0] sm:$0xff]   ;;  %v775_v29 = vld [vmem:[%s993_s1 + $0xf8] sm:$0xff]   ;;  %v784_v36 = vld [vmem:[%s993_s1 + $0x100] sm:$0xff]   ;;  %492 = vmatprep.mubr.bf16.mxu1 %v783_v35 }
   0xb   :  { %v772_v26 = vld [vmem:[%s993_s1 + $0x30] sm:$0xff]   ;;  %v776_v30 = vld [vmem:[%s993_s1 + $0x38] sm:$0xff]   ;;  %v785_v37 = vld [vmem:[%s993_s1 + $0x108] sm:$0xff]  }
   0xc   :  { %664 = vmatpush3.bf16.msra.mxu0 %v756_v10  ;;  %v773_v27 = vld [vmem:[%s993_s1 + $0xb0] sm:$0xff]   ;;  %v777_v31 = vld [vmem:[%s993_s1 + $0xb8] sm:$0xff]   ;;  %v789_v39 = vld [vmem:[%s994_s0 + $0x2c] ss:$20 sps:$4 sm:$0xff]  }
   0xd   :  { %692 = vmatpush3.bf16.msra.mxu1 %v757_v11  ;;  %665 = vmatprep.subr.bf16.mxu0 %v758_v12  ;;  %v778_v32 = vld [vmem:[%s994_s0] ss:$20 sps:$4 sm:$0xff]   ;;  %v780_v33 = vld [vmem:[%s994_s0 + $0x4] ss:$20 sps:$4 sm:$0xff]   ;;  %v781_v34 = vld [vmem:[%s994_s0 + $0x8] ss:$20 sps:$4 sm:$0xff]  }
   0xe   :  { %693 = vmatprep.subr.bf16.mxu1 %v759_v13  ;;  %443 = vmatprep.mubr.bf16.mxu0 %v780_v33  ;;  %v786_v38 = vld [vmem:[%s993_s1 + $0x110] sm:$0xff]   ;;  %v787_v41 = vld [vmem:[%s993_s1 + $0x118] sm:$0xff]   ;;  %v788_v45 = vld [vmem:[%s993_s1 + $0x120] sm:$0xff]  }
   0xf   :  { %v791_v40 = vld [vmem:[%s994_s0 + $0x34] ss:$20 sps:$4 sm:$0xff]   ;;  %v795_v43 = vld [vmem:[%s994_s0 + $0x30] ss:$20 sps:$4 sm:$0xff]   ;;  %v797_v48 = vld [vmem:[%s993_s1 + $0x138] sm:$0xff]  }
  0x10   :  { %666 = vmatpush3.bf16.msra.mxu0 %v760_v14  ;;  %v794_v42 = vld [vmem:[%s994_s0 + $0x28] ss:$20 sps:$4 sm:$0xff]   ;;  %v798_v44 = vld [vmem:[%s994_s0 + $0x10] ss:$20 sps:$4 sm:$0xff]   ;;  %v799_v49 = vld [vmem:[%s994_s0 + $0x38] ss:$20 sps:$4 sm:$0xff]  }
  0x11   :  { %694 = vmatpush3.bf16.msra.mxu1 %v761_v15  ;;  %667 = vmatprep.subr.bf16.mxu0 %v762_v16  ;;  %v793_v46 = vld [vmem:[%s993_s1 + $0x128] sm:$0xff]   ;;  %v796_v47 = vld [vmem:[%s993_s1 + $0x130] sm:$0xff]  }
  0x12   :  { %695 = vmatprep.subr.bf16.mxu1 %v763_v17 }
  0x14   :  { %668 = vmatpush3.bf16.msra.mxu0 %v764_v18 }
  0x15   :  { %696 = vmatpush3.bf16.msra.mxu1 %v765_v19  ;;  %669 = vmatprep.subr.bf16.mxu0 %v766_v20 }
  0x16   :  { %697 = vmatprep.subr.bf16.mxu1 %v767_v21 }
  0x18   :  { %670 = vmatpush3.bf16.msra.mxu0 %v768_v22 }
  0x19   :  { %698 = vmatpush3.bf16.msra.mxu1 %v769_v23  ;;  %671 = vmatprep.subr.bf16.mxu0 %v770_v24 }
  0x1a   :  { %699 = vmatprep.subr.bf16.mxu1 %v771_v25 }
  0x1c   :  { %672 = vmatpush3.bf16.msra.mxu0 %v772_v26 }
  0x1d   :  { %700 = vmatpush3.bf16.msra.mxu1 %v773_v27  ;;  %673 = vmatprep.subr.bf16.mxu0 %v774_v28 }
  0x1e   :  { %701 = vmatprep.subr.bf16.mxu1 %v775_v29 }
  0x20   :  { %674 = vmatpush3.bf16.msra.mxu0 %v776_v30 }
  0x21   :  { %702 = vmatpush3.bf16.msra.mxu1 %v777_v31  ;;  %725 = vmatprep.subr.bf16.mxu0 %v784_v36 }
  0x23   :  { %444 = vmatmul.mubr.bf16.vlgmr.msra.gmra.mrb[0].mxu0 %v778_v32 }
  0x24   :  { %493 = vmatmul.mubr.bf16.vlgmr.msra.gmra.mrb[0].mxu1 %v781_v34  ;;  %726 = vmatpush3.bf16.msra.mxu0 %v784_v36 }
  0x25   :  { %727 = vmatprep.subr.bf16.mxu0 %v785_v37  ;;  %451 = vmatprep.mubr.bf16.mxu0 %v789_v39 }
  0x26   :  { %500 = vmatprep.mubr.bf16.mxu1 %v791_v40 }
  0x28   :  { %728 = vmatpush3.bf16.msra.mxu0 %v785_v37 }
  0x29   :  { %729 = vmatprep.subr.bf16.mxu0 %v786_v38 }
  0x2b   :  { %452 = vmatmul.mubr.bf16.gmra.mrb[4].mxu0 %v794_v42 }
  0x2c   :  { %501 = vmatmul.mubr.bf16.gmra.mrb[4].mxu1 %v795_v43  ;;  %730 = vmatpush3.bf16.msra.mxu0 %v786_v38 }
  0x2d   :  { %731 = vmatprep.subr.bf16.mxu0 %v787_v41  ;;  %741 = vmatprep.mubr.bf16.mxu0 %v798_v44 }
  0x30   :  { %732 = vmatpush3.bf16.msra.mxu0 %v787_v41 }
  0x31   :  { %733 = vmatprep.subr.bf16.mxu0 %v788_v45 }
  0x34   :  { %734 = vmatpush3.bf16.msra.mxu0 %v788_v45 }
  0x35   :  { %735 = vmatprep.subr.bf16.mxu0 %v793_v46 }
  0x38   :  { %736 = vmatpush3.bf16.msra.mxu0 %v793_v46 }
  0x39   :  { %737 = vmatprep.subr.bf16.mxu0 %v796_v47 }
  0x3c   :  { %738 = vmatpush3.bf16.msra.mxu0 %v796_v47 }
  0x3d   :  { %739 = vmatprep.subr.bf16.mxu0 %v797_v48 }
  0x40   :  { %740 = vmatpush3.bf16.msra.mxu0 %v797_v48 }
  0x43   :  { %742 = vmatmul.mubr.bf16.vlgmr.msra.gmra.mrb[8].mxu0 %v799_v49 }
  0xf6   :  { %v675_v50 = vpop.f32.mrb[0].mxu0 }
  0xf7   :  { %v703_v51 = vpop.f32.mrb[0].mxu1  ;;  %v676_v52 = vpop.f32.mrb[1].mxu0 }
  0xf8   :  { %v677_v53 = vadd.f32 %v676_v52, %v675_v50  ;;  %v704_v54 = vpop.f32.mrb[1].mxu1  ;;  %v678_v55 = vpop.f32.mrb[2].mxu0 }
  0xf9   :  { %v705_v56 = vadd.f32 %v704_v54, %v703_v51  ;;  %v706_v57 = vpop.f32.mrb[2].mxu1  ;;  %v679_v58 = vpop.f32.mrb[3].mxu0 }
  0xfa   :  { %v680_v59 = vadd.f32 %v679_v58, %v678_v55  ;;  %v707_v60 = vpop.f32.mrb[3].mxu1 }
  0xfb   :  { %v708_v61 = vadd.f32 %v707_v60, %v706_v57  ;;  %v495_v62 = vadd.f32 %v705_v56, %v677_v53 }
  0xfd   :  { %v498_v63 = vadd.f32 %v708_v61, %v680_v59 }
  0xfe   :  { %v681_v0 = vpop.f32.mrb[4].mxu0 }
  0xff   :  { %v709_v1 = vpop.f32.mrb[4].mxu1  ;;  %v682_v2 = vpop.f32.mrb[5].mxu0 }
 0x100   :  { %v683_v3 = vadd.f32 %v682_v2, %v681_v0  ;;  %v710_v4 = vpop.f32.mrb[5].mxu1  ;;  %v684_v5 = vpop.f32.mrb[6].mxu0 }
 0x101   :  { %v711_v6 = vadd.f32 %v710_v4, %v709_v1  ;;  %v712_v7 = vpop.f32.mrb[6].mxu1  ;;  %v685_v8 = vpop.f32.mrb[7].mxu0 }
 0x102   :  { %v686_v9 = vadd.f32 %v685_v8, %v684_v5  ;;  %v713_v10 = vpop.f32.mrb[7].mxu1 }
 0x103   :  { %v714_v11 = vadd.f32 %v713_v10, %v712_v7  ;;  %v503_v12 = vadd.f32 %v711_v6, %v683_v3 }
 0x105   :  { %v506_v13 = vadd.f32 %v714_v11, %v686_v9 }
 0x116   :  { %v743_v14 = vpop.f32.mrb[8].mxu0 }
 0x117   :  { %v552_v15 = vadd.f32 %v743_v14, %v503_v12  ;;  %v543_v16 = vpop.f32.mrb[9].mxu0 }
 0x118   :  { %v544_v17 = vadd.f32 %v543_v16, %v495_v62  ;;  %v744_v18 = vpop.f32.mrb[10].mxu0 }
 0x119   :  { %v555_v19 = vadd.f32 %v744_v18, %v506_v13  ;;  %v546_v20 = vpop.f32.mrb[11].mxu0  ;;  %564 = vst [vmem:[%s995_s2 + $0x10] sm:$0xff] %v552_v15  ;;  %v584_v25 = vmul.f32 %v552_v15, %v552_v15 }
 0x11a   :  { %v547_v21 = vadd.f32 %v546_v20, %v498_v63  ;;  %562 = vst [vmem:[%s995_s2] sm:$0xff] %v544_v17  ;;  %v582_v22 = vmul.f32 %v544_v17, %v544_v17 }
 0x11b   :  { %565 = vst [vmem:[%s995_s2 + $0x18] sm:$0xff] %v555_v19  ;;  %v585_v28 = vmul.f32 %v555_v19, %v555_v19 }
 0x11c   :  { %563 = vst [vmem:[%s995_s2 + $0x8] sm:$0xff] %v547_v21  ;;  %v573_v23 = vadd.f32 %v547_v21, %v544_v17  ;;  %v583_v24 = vmul.f32 %v547_v21, %v547_v21 }
 0x11e   :  { %v574_v26 = vadd.f32 %v573_v23, %v552_v15  ;;  %v586_v27 = vadd.f32 %v583_v24, %v582_v22 }
 0x120   :  { %v575_v29 = vadd.f32 %v574_v26, %v555_v19  ;;  %v587_v30 = vadd.f32 %v586_v27, %v584_v25 }
 0x122   :  { %v576_v31 = vrot.slane %v575_v29, 4  ;;  %v588_v32 = vadd.f32 %v587_v30, %v585_v28 }
 0x124   :  { %v577_v33 = vadd.f32 %v576_v31, %v575_v29  ;;  %v589_v34 = vrot.slane %v588_v32, 4 }
 0x126   :  { %v578_v35 = vrot.slane %v577_v33, 2  ;;  %v590_v36 = vadd.f32 %v589_v34, %v588_v32 }
 0x128   :  { %v579_v37 = vadd.f32 %v578_v35, %v577_v33  ;;  %v591_v38 = vrot.slane %v590_v36, 2 }
 0x12a   :  { %v580_v39 = vrot.slane %v579_v37, 1  ;;  %v592_v40 = vadd.f32 %v591_v38, %v590_v36 }
 0x12c   :  { %v581_v41 = vadd.f32 %v580_v39, %v579_v37  ;;  %v593_v42 = vrot.slane %v592_v40, 1 }
 0x12e   :  { %v594_v43 = vadd.f32 %v593_v42, %v592_v40  ;;  %595 = vst [vmem:[%s996_s3] sm:$0xff] %v581_v41 }
 0x130   :  { %596 = vst [vmem:[%s997_s4] sm:$0xff] %v594_v43 }

// kernel: resnet_forward.35
= control target key start
LH: loop header
LB: loop body
LE: loop exit
PB: predicated region body
PF: predicated region fallthrough
CT: control target
= control target key end

     0   :  { %s178_s0 = inlined_call_operand.vmem [shape: f32[32,128], index: 0, kind: input, shape index: {}]   ;;  %s179_s1 = inlined_call_operand.vmem [shape: f32[1,128], index: 1, kind: input, shape index: {}]   ;;  %s180_s2 = inlined_call_operand.vmem [shape: f32[1,128], index: 2, kind: input, shape index: {}]   ;;  %s181_s3 = inlined_call_operand.vmem [shape: f32[32,128], index: 3, kind: input, shape index: {}]   ;;  %s182_s4 = inlined_call_operand.vmem [shape: f32[1,128], index: 4, kind: input, shape index: {}]   ;;  %s183_s5 = inlined_call_operand.vmem [shape: f32[1,128], index: 5, kind: input, shape index: {}]   ;;  %s184_s6 = inlined_call_operand.vmem [shape: f32[32,128], index: 6, kind: output, shape index: {}]  }
   0x1   :  { %v23_v0 = vld [vmem:[%s178_s0] sm:$0xff]  ;;  %v24_v7 = vld [vmem:[%s178_s0 + $0x8] sm:$0xff]  ;;  %v25_v9 = vld [vmem:[%s178_s0 + $0x10] sm:$0xff] }
   0x2   :  { %v91_v1 = vld [vmem:[%s179_s1] ss:$0 sm:$0xff]  ;;  %v50_v8 = vld [vmem:[%s181_s3 + $0x8] sm:$0xff]  ;;  %v51_v14 = vld [vmem:[%s181_s3 + $0x10] sm:$0xff] }
   0x3   :  { %v92_v2 = vld [vmem:[%s180_s2] ss:$0 sm:$0xff]  ;;  %v34_v3 = vmul.f32 %v91_v1, %v23_v0  ;;  %v35_v11 = vmul.f32 %v91_v1, %v24_v7  ;;  %v36_v13 = vmul.f32 %v91_v1, %v25_v9  ;;  %v26_v15 = vld [vmem:[%s178_s0 + $0x18] sm:$0xff] }
   0x4   :  { %v49_v4 = vld [vmem:[%s181_s3] sm:$0xff]  ;;  %v52_v16 = vld [vmem:[%s181_s3 + $0x18] sm:$0xff]  ;;  %v37_v19 = vmul.f32 %v91_v1, %v26_v15 }
   0x5   :  { %v93_v5 = vld [vmem:[%s182_s4] ss:$0 sm:$0xff]  ;;  %v45_v10 = vadd.f32 %v92_v2, %v34_v3  ;;  %v46_v22 = vadd.f32 %v92_v2, %v35_v11  ;;  %v47_v23 = vadd.f32 %v92_v2, %v36_v13 }
   0x6   :  { %v60_v6 = vmul.f32 %v93_v5, %v49_v4  ;;  %v61_v12 = vmul.f32 %v93_v5, %v50_v8  ;;  %v94_v17 = vld [vmem:[%s183_s5] ss:$0 sm:$0xff]  ;;  %v62_v18 = vmul.f32 %v93_v5, %v51_v14  ;;  %v63_v20 = vmul.f32 %v93_v5, %v52_v16 }
   0x7   :  { %v48_v24 = vadd.f32 %v92_v2, %v37_v19 }
   0x8   :  { %v64_v21 = vadd.f32 %v60_v6, %v45_v10  ;;  %v65_v26 = vadd.f32 %v61_v12, %v46_v22  ;;  %v66_v27 = vadd.f32 %v62_v18, %v47_v23 }
   0x9   :  { %v67_v28 = vadd.f32 %v63_v20, %v48_v24 }
   0xa   :  { %v75_v25 = vadd.f32 %v94_v17, %v64_v21  ;;  %v76_v30 = vadd.f32 %v94_v17, %v65_v26  ;;  %v77_v31 = vadd.f32 %v94_v17, %v66_v27 }
   0xb   :  { %v78_v32 = vadd.f32 %v94_v17, %v67_v28 }
   0xc   :  { %v79_v29 = vmax.f32 %v75_v25, 0.0  ;;  %v80_v33 = vmax.f32 %v76_v30, 0.0  ;;  %v81_v34 = vmax.f32 %v77_v31, 0.0 }
   0xd   :  { %v82_v35 = vmax.f32 %v78_v32, 0.0 }
   0xe   :  { %83 = vst [vmem:[%s184_s6] sm:$0xff] %v79_v29  ;;  %84 = vst [vmem:[%s184_s6 + $0x8] sm:$0xff] %v80_v33 }
   0xf   :  { %85 = vst [vmem:[%s184_s6 + $0x10] sm:$0xff] %v81_v34  ;;  %86 = vst [vmem:[%s184_s6 + $0x18] sm:$0xff] %v82_v35 }

// kernel: resnet_forward.33
= control target key start
LH: loop header
LB: loop body
LE: loop exit
PB: predicated region body
PF: predicated region fallthrough
CT: control target
= control target key end

     0   :  { %s1160_s15 = smov 0   ;;  %s1162_s16 = smov 0   ;;  %s1315_s0 = inlined_call_operand.vmem [shape: bf16[32,1152], index: 0, kind: input, shape index: {}]   ;;  %s1316_s1 = inlined_call_operand.vmem [shape: bf16[1152,128], index: 1, kind: input, shape index: {}]   ;;  %s1317_s2 = inlined_call_operand.vmem [shape: f32[32,128], index: 2, kind: output, shape index: {0}]   ;;  %s1318_s3 = inlined_call_operand.vmem [shape: f32[8,128], index: 3, kind: output, shape index: {1}]   ;;  %s1319_s4 = inlined_call_operand.vmem [shape: f32[8,128], index: 4, kind: output, shape index: {2}]  }
   0x1   :  { %s1164_s17 = smov 0   ;;  %s1166_s18 = smov 0  }
   0x2   :  { %s1168_s19 = smov 0  }
   0x3 LB: > { %s27_s20 = sadd.s32 1, %s1128_s18  ;;  %p50_p1 = scmp.ne.s32.totalorder %s1120_s16, %s1116_s15  ;;  %s1132_s19 = sphi %s1168_s19, %s15_s19   ;;  %s1128_s18 = sphi %s1166_s18, %s1323_s18   ;;  %s1124_s17 = sphi %s1164_s17, %s1322_s17   ;;  %s1120_s16 = sphi %s1162_s16, %s1321_s16   ;;  %s1116_s15 = sphi %s1160_s15, %s1320_s15  }
   0x4   : > { %p28_p0 = scmp.ge.s32.totalorder %s27_s20, 3  ;;  %p51_p2 = scmp.eq.s32.totalorder %s1132_s19, 0 }
   0x5   : > { %s43_s22 = sadd.s32 1, %s1120_s16  ;;  %p910_p5 = scmp.ge.s32.totalorder %s1132_s19, 3 }
   0x6   : > { %s1325_s20 = smov (%p28_p0, %s27_s20), 0  ;;  %p52_p3 = por %p51_p2, %p50_p1 }
   0x7   : > { %s39_s21 = ssub.s32 %s1128_s18, %s1325_s20  ;;  %188 = sbr.rel (%p910_p5) target bundleno = 23 (0x17), region = 16 }
   0x8   : > { %p41_p4 = scmp.eq.s32.totalorder %s39_s21, 0 }
   0xa   : > { %s1195_s23 = scalar_select %p41_p4, %s1120_s16, %s43_s22  }
   0xe   : > { %191 = sbr.rel (!%p52_p3) target bundleno = 23 (0x17), region = 20  ;;  %s193_s24 = sand.u32 (%p52_p3), 1, %s1120_s16  }
   0xf   : > { %s960_s25 = smul.u32 (%p52_p3), 12, %s1128_s18 }
  0x10   : > { %s1019_s26 = smul.u32 (%p52_p3), 48, %s193_s24 }
  0x11   : > { %s201_s29 = scalar_lea.vmem (%p52_p3), %s1315_s0, %s960_s25 }
  0x12   : > { %v216_v0 = vld [vmem:[%s201_s29] sm:$0xff] (%p52_p3)  ;;  %v220_v2 = vld [vmem:[%s201_s29 + $0x48] sm:$0xff] (%p52_p3)  ;;  %s195_s30 = scalar_lea.vmem (%p52_p3), [#allocation2], %s1019_s26  ;;  %v916_v6 = vld [vmem:[%s201_s29 + $0x50] sm:$0xf] (%p52_p3) }
  0x13   : > { %v218_v1 = vld [vmem:[%s201_s29 + $0x24] sm:$0xff] (%p52_p3)  ;;  %217 = vst [vmem:[%s195_s30] sm:$0xff] (%p52_p3), %v216_v0  ;;  %221 = vst [vmem:[%s195_s30 + $0x18] sm:$0xff] (%p52_p3), %v220_v2  ;;  %v222_v3 = vld [vmem:[%s201_s29 + $0x6c] sm:$0xff] (%p52_p3) }
  0x14   : > { %219 = vst [vmem:[%s195_s30 + $0xc] sm:$0xff] (%p52_p3), %v218_v1  ;;  %v912_v4 = vld [vmem:[%s201_s29 + $0x8] sm:$0xf] (%p52_p3)  ;;  %v914_v5 = vld [vmem:[%s201_s29 + $0x2c] sm:$0xf] (%p52_p3)  ;;  %223 = vst [vmem:[%s195_s30 + $0x24] sm:$0xff] (%p52_p3), %v222_v3 }
  0x15   : > { %913 = vst [vmem:[%s195_s30 + $0x8] sm:$0xf] %v912_v4  ;;  %915 = vst [vmem:[%s195_s30 + $0x14] sm:$0xf] %v914_v5  ;;  %v918_v7 = vld [vmem:[%s201_s29 + $0x74] sm:$0xf] }
  0x16   : > { %917 = vst [vmem:[%s195_s30 + $0x20] sm:$0xf] %v916_v6  ;;  %919 = vst [vmem:[%s195_s30 + $0x2c] sm:$0xf] %v918_v7 }
  0x17 PF: > { %p920_p6 = scmp.ge.s32.totalorder %s1132_s19, 1  ;;  %p255_p7 = scmp.lt.s32.totalorder %s1132_s19, 4 }
  0x19   : > { %p256_p8 = pnand %p920_p6, %p255_p7 }
  0x1a   : > { %s262_s5 = sand.u32 (!%p256_p8), 1, %s1116_s15   ;;  %s314_s6 = smul.u32 (!%p256_p8), 48, %s1124_s17 }
  0x1b   : > { %259 = sbr.rel (%p256_p8) target bundleno = 328 (0x148), region = 50  ;;  %p922_p10 = scmp.ne.s32.totalorder (!%p256_p8), %s1124_s17, 0 }
  0x1c   : > { %s1020_s7 = smul.u32 (!%p256_p8), 48, %s262_s5  ;;  %p315_p9 = scmp.lt.s32.totalorder (!%p256_p8), %s314_s6, 143 }
  0x1e   : > { %s1212_s12 = scalar_lea.vmem (!%p256_p8), [#allocation2], %s1020_s7 }
  0x22   : > { %s1327_s6 = smov (!%p315_p9, %s314_s6), 143  ;;  %350 = sbr.rel (%p922_p10) target bundleno = 41 (0x29), region = 58 }
  0x23   : > { %s921_s8 = sshll.u32 %s1327_s6, 2  ;;  %v1134_v8 = vmov (!%p922_p10), 0.0  }
  0x24   : > { %s1210_s11 = scalar_lea.vmem %s1316_s1, %s921_s8  ;;  %351 = vst [vmem:[%s1317_s2] sm:$0xff] (!%p922_p10), %v1134_v8  ;;  %352 = vst [vmem:[%s1317_s2 + $0x8] sm:$0xff] (!%p922_p10), %v1134_v8 }
  0x25   : > { %353 = vst [vmem:[%s1317_s2 + $0x10] sm:$0xff] (!%p922_p10), %v1134_v8  ;;  %354 = vst [vmem:[%s1317_s2 + $0x18] sm:$0xff] (!%p922_p10), %v1134_v8 }
  0x29 PF: > { %v1062_v9 = vld [vmem:[%s1210_s11 + $0x40] sm:$0xff]   ;;  %v1065_v12 = vld [vmem:[%s1210_s11 + $0x48] sm:$0xff]   ;;  %v1068_v15 = vld [vmem:[%s1210_s11 + $0x50] sm:$0xff]   ;;  %p953_p11 = scmp.ne.s32.totalorder %s1124_s17, 2 }
  0x2a   : > { %v1063_v10 = vld [vmem:[%s1210_s11] sm:$0xff]   ;;  %961 = vmatprep.subr.bf16.mxu0 %v1062_v9  ;;  %v1066_v13 = vld [vmem:[%s1210_s11 + $0x8] sm:$0xff]   ;;  %v1069_v16 = vld [vmem:[%s1210_s11 + $0x10] sm:$0xff]  }
  0x2b   : > { %v1064_v11 = vld [vmem:[%s1210_s11 + $0x80] sm:$0xff]   ;;  %962 = vmatpush3.bf16.msra.mxu0 %v1063_v10  ;;  %v1067_v14 = vld [vmem:[%s1210_s11 + $0x88] sm:$0xff]   ;;  %v1070_v17 = vld [vmem:[%s1210_s11 + $0x90] sm:$0xff]  }
  0x2c   : > { %999 = vmatprep.subr.bf16.mxu1 %v1064_v11  ;;  %963 = vmatprep.subr.bf16.mxu0 %v1065_v12  ;;  %v1071_v18 = vld [vmem:[%s1210_s11 + $0x58] sm:$0xff]   ;;  %v1074_v21 = vld [vmem:[%s1210_s11 + $0x60] sm:$0xff]   ;;  %v1077_v24 = vld [vmem:[%s1210_s11 + $0x68] sm:$0xff]  }
  0x2d   : > { %1000 = vmatpush3.bf16.msra.mxu1 %v1064_v11  ;;  %v1072_v19 = vld [vmem:[%s1210_s11 + $0x18] sm:$0xff]   ;;  %v1076_v22 = vld [vmem:[%s1210_s11 + $0xa0] sm:$0xff]   ;;  %v1079_v25 = vld [vmem:[%s1210_s11 + $0xa8] sm:$0xff]  }
  0x2e   : > { %1001 = vmatprep.subr.bf16.mxu1 %v1067_v14  ;;  %v1073_v20 = vld [vmem:[%s1210_s11 + $0x98] sm:$0xff]   ;;  %v1075_v23 = vld [vmem:[%s1210_s11 + $0x20] sm:$0xff]   ;;  %v1078_v26 = vld [vmem:[%s1210_s11 + $0x28] sm:$0xff]  }
  0x2f   : > { %964 = vmatpush3.bf16.msra.mxu0 %v1066_v13  ;;  %v1080_v27 = vld [vmem:[%s1210_s11 + $0x70] sm:$0xff]   ;;  %v1083_v30 = vld [vmem:[%s1210_s11 + $0x78] sm:$0xff]   ;;  %v355_v45 = vld [vmem:[%s1317_s2] sm:$0xff] }
  0x30   : > { %965 = vmatprep.subr.bf16.mxu0 %v1068_v15  ;;  %v1081_v28 = vld [vmem:[%s1210_s11 + $0x30] sm:$0xff]   ;;  %v1085_v31 = vld [vmem:[%s1210_s11 + $0xb8] sm:$0xff]   ;;  %v356_v50 = vld [vmem:[%s1317_s2 + $0x8] sm:$0xff] }
  0x31   : > { %1002 = vmatpush3.bf16.msra.mxu1 %v1067_v14  ;;  %v1082_v29 = vld [vmem:[%s1210_s11 + $0xb0] sm:$0xff]   ;;  %v1084_v34 = vld [vmem:[%s1210_s11 + $0x38] sm:$0xff]  }
  0x32   : > { %1003 = vmatprep.subr.bf16.mxu1 %v1070_v17  ;;  %v1088_v32 = vld [vmem:[%s1212_s12 + $0x4] ss:$12 sps:$4 sm:$0xff]   ;;  %v1089_v33 = vld [vmem:[%s1212_s12 + $0x8] ss:$12 sps:$4 sm:$0xff]   ;;  %v1086_v35 = vld [vmem:[%s1212_s12] ss:$12 sps:$4 sm:$0xff]  }
  0x33   : > { %966 = vmatpush3.bf16.msra.mxu0 %v1069_v16  ;;  %623 = vmatprep.mubr.bf16.mxu0 %v1088_v32  ;;  %v1091_v36 = vld [vmem:[%s1212_s12 + $0x1c] ss:$12 sps:$4 sm:$0xff]   ;;  %v1090_v37 = vld [vmem:[%s1212_s12 + $0x20] ss:$12 sps:$4 sm:$0xff]   ;;  %v1093_v38 = vld [vmem:[%s1212_s12 + $0x18] ss:$12 sps:$4 sm:$0xff]  }
  0x34   : > { %967 = vmatprep.subr.bf16.mxu0 %v1071_v18  ;;  %1015 = vmatprep.mubr.bf16.mxu1 %v1089_v33  ;;  %v357_v59 = vld [vmem:[%s1317_s2 + $0x10] sm:$0xff]  ;;  %v358_v63 = vld [vmem:[%s1317_s2 + $0x18] sm:$0xff] }
  0x35   : > { %1004 = vmatpush3.bf16.msra.mxu1 %v1070_v17 }
  0x36   : > { %1005 = vmatprep.subr.bf16.mxu1 %v1073_v20 }
  0x37   : > { %968 = vmatpush3.bf16.msra.mxu0 %v1072_v19 }
  0x38   : > { %969 = vmatprep.subr.bf16.mxu0 %v1074_v21 }
  0x39   : > { %1006 = vmatpush3.bf16.msra.mxu1 %v1073_v20 }
  0x3a   : > { %1007 = vmatprep.subr.bf16.mxu1 %v1076_v22 }
  0x3b   : > { %970 = vmatpush3.bf16.msra.mxu0 %v1075_v23 }
  0x3c   : > { %971 = vmatprep.subr.bf16.mxu0 %v1077_v24 }
  0x3d   : > { %1008 = vmatpush3.bf16.msra.mxu1 %v1076_v22 }
  0x3e   : > { %1009 = vmatprep.subr.bf16.mxu1 %v1079_v25 }
  0x3f   : > { %972 = vmatpush3.bf16.msra.mxu0 %v1078_v26 }
  0x40   : > { %973 = vmatprep.subr.bf16.mxu0 %v1080_v27 }
  0x41   : > { %1010 = vmatpush3.bf16.msra.mxu1 %v1079_v25 }
  0x42   : > { %1011 = vmatprep.subr.bf16.mxu1 %v1082_v29 }
  0x43   : > { %974 = vmatpush3.bf16.msra.mxu0 %v1081_v28 }
  0x44   : > { %975 = vmatprep.subr.bf16.mxu0 %v1083_v30 }
  0x45   : > { %1012 = vmatpush3.bf16.msra.mxu1 %v1082_v29 }
  0x46   : > { %1013 = vmatprep.subr.bf16.mxu1 %v1085_v31 }
  0x47   : > { %976 = vmatpush3.bf16.msra.mxu0 %v1084_v34 }
  0x49   : > { %1014 = vmatpush3.bf16.msra.mxu1 %v1085_v31 }
  0x4a   : > { %624 = vmatmul.mubr.bf16.vlgmr.msra.gmra.mrb[0].mxu0 %v1086_v35 }
  0x4b   : > { %631 = vmatprep.mubr.bf16.mxu0 %v1091_v36 }
  0x4c   : > { %1016 = vmatmul.mubr.bf16.vlgmr.msra.gmra.mrb[0].mxu1 %v1090_v37 }
  0x52   : > { %632 = vmatmul.mubr.bf16.gmra.mrb[4].mxu0 %v1093_v38 }
 0x11d   : > { %v977_v39 = vpop.f32.mrb[0].mxu0 }
 0x11e   : > { %v978_v40 = vpop.f32.mrb[1].mxu0 }
 0x11f   : > { %v979_v41 = vadd.f32 %v978_v40, %v977_v39  ;;  %v980_v42 = vpop.f32.mrb[2].mxu0  ;;  %v1017_v43 = vpop.f32.mrb[0].mxu1 }
 0x120   : > { %v981_v44 = vpop.f32.mrb[3].mxu0  ;;  %v674_v46 = vpop.f32.mrb[1].mxu1 }
 0x121   : > { %v982_v47 = vadd.f32 %v981_v44, %v980_v42  ;;  %v675_v48 = vadd.f32 %v979_v41, %v674_v46  ;;  %v1018_v49 = vpop.f32.mrb[2].mxu1 }
 0x122   : > { %v677_v51 = vpop.f32.mrb[3].mxu1 }
 0x123   : > { %v689_v52 = vadd.f32 %v675_v48, %v355_v45  ;;  %v678_v53 = vadd.f32 %v982_v47, %v677_v51 }
 0x125   : > { %693 = vst [vmem:[%s1317_s2] sm:$0xff] %v689_v52  ;;  %v690_v54 = vadd.f32 %v678_v53, %v356_v50  ;;  %v983_v55 = vpop.f32.mrb[4].mxu0 }
 0x126   : > { %v984_v56 = vpop.f32.mrb[5].mxu0 }
 0x127   : > { %694 = vst [vmem:[%s1317_s2 + $0x8] sm:$0xff] %v690_v54  ;;  %v985_v57 = vadd.f32 %v984_v56, %v983_v55  ;;  %v986_v58 = vpop.f32.mrb[6].mxu0 }
 0x128   : > { %v987_v60 = vpop.f32.mrb[7].mxu0 }
 0x129   : > { %v683_v61 = vadd.f32 %v1017_v43, %v985_v57  ;;  %v988_v62 = vadd.f32 %v987_v60, %v986_v58  ;;  %700 = sbr.rel (%p953_p11) target bundleno = 328 (0x148), region = 62 }
 0x12b   : > { %v691_v0 = vadd.f32 %v683_v61, %v357_v59  ;;  %v686_v1 = vadd.f32 %v1018_v49, %v988_v62 }
 0x12c   : > { %v701_v3 = vld [vmem:[%s1317_s2] sm:$0xff] (!%p953_p11) }
 0x12d   : > { %695 = vst [vmem:[%s1317_s2 + $0x10] sm:$0xff] %v691_v0  ;;  %v692_v2 = vadd.f32 %v686_v1, %v358_v63  ;;  %v714_v8 = vmul.f32 (!%p953_p11), %v701_v3, %v701_v3 }
 0x12e   : > { %v702_v4 = vld [vmem:[%s1317_s2 + $0x8] sm:$0xff] (!%p953_p11) }
 0x12f   : > { %696 = vst [vmem:[%s1317_s2 + $0x18] sm:$0xff] %v692_v2  ;;  %v705_v7 = vadd.f32 (!%p953_p11), %v702_v4, %v701_v3  ;;  %v715_v9 = vmul.f32 (!%p953_p11), %v702_v4, %v702_v4 }
 0x131   : > { %v718_v13 = vadd.f32 %v715_v9, %v714_v8 }
 0x134   : > { %v703_v5 = vld [vmem:[%s1317_s2 + $0x10] sm:$0xff] }
 0x135   : > { %v716_v10 = vmul.f32 %v703_v5, %v703_v5  ;;  %v706_v11 = vadd.f32 %v705_v7, %v703_v5 }
 0x136   : > { %v704_v6 = vld [vmem:[%s1317_s2 + $0x18] sm:$0xff] }
 0x137   : > { %v717_v12 = vmul.f32 %v704_v6, %v704_v6  ;;  %v707_v14 = vadd.f32 %v706_v11, %v704_v6  ;;  %v719_v15 = vadd.f32 %v718_v13, %v716_v10 }
 0x139   : > { %v708_v16 = vrot.slane %v707_v14, 4  ;;  %v720_v17 = vadd.f32 %v719_v15, %v717_v12 }
 0x13b   : > { %v709_v18 = vadd.f32 %v708_v16, %v707_v14  ;;  %v721_v19 = vrot.slane %v720_v17, 4 }
 0x13d   : > { %v710_v20 = vrot.slane %v709_v18, 2  ;;  %v722_v21 = vadd.f32 %v721_v19, %v720_v17 }
 0x13f   : > { %v711_v22 = vadd.f32 %v710_v20, %v709_v18  ;;  %v723_v23 = vrot.slane %v722_v21, 2 }
 0x141   : > { %v712_v24 = vrot.slane %v711_v22, 1  ;;  %v724_v25 = vadd.f32 %v723_v23, %v722_v21 }
 0x143   : > { %v713_v26 = vadd.f32 %v712_v24, %v711_v22  ;;  %v725_v27 = vrot.slane %v724_v25, 1 }
 0x145   : > { %727 = vst [vmem:[%s1318_s3] sm:$0xff] %v713_v26  ;;  %v726_v28 = vadd.f32 %v725_v27, %v724_v25 }
 0x147   : > { %728 = vst [vmem:[%s1319_s4] sm:$0xff] %v726_v28 }
 0x148 PF: > { %s15_s19 = sadd.s32 1, %s1132_s19   ;;  %s1320_s15 = smov %s1120_s16 }
 0x149   : > { %p12_p12 = scmp.ge.s32.totalorder %s15_s19, 5   ;;  %s1321_s16 = smov %s1195_s23 }
 0x14a   : > { %s1322_s17 = smov %s1128_s18  ;;  %s1323_s18 = smov %s1325_s20 }
 0x14b   :  { %14 = sbr.rel (!%p12_p12) target bundleno = 3 (0x3), region = 130 }

// kernel: resnet_forward.39
= control target key start
LH: loop header
LB: loop body
LE: loop exit
PB: predicated region body
PF: predicated region fallthrough
CT: control target
= control target key end

     0   :  { %v254_v1 = vmov 0   ;;  %s349_s1 = inlined_call_operand.vmem [shape: bf16[128,256], index: 1, kind: input, shape index: {}]   ;;  %s350_s0 = inlined_call_operand.vmem [shape: bf16[8,128], index: 0, kind: input, shape index: {}]   ;;  %s351_s2 = inlined_call_operand.vmem [shape: f32[8,256], index: 2, kind: output, shape index: {0}]   ;;  %s352_s3 = inlined_call_operand.vmem [shape: f32[8,256], index: 3, kind: output, shape index: {1}]   ;;  %s353_s4 = inlined_call_operand.vmem [shape: f32[8,256], index: 4, kind: output, shape index: {2}]  }
   0x1   :  { %v230_v0 = vld [vmem:[%s349_s1 + $0x4] ss:$8 sps:$4 sm:$0xff]   ;;  %152 = vmatprep.mubr.bf16.mxu0 %v254_v1  ;;  %v232_v2 = vld [vmem:[%s349_s1] ss:$8 sps:$4 sm:$0xff]   ;;  %v233_v3 = vld [vmem:[%s349_s1 + $0x14] ss:$8 sps:$4 sm:$0xff]  }
   0x2   :  { %120 = vmatprep.subr.bf16.mxu0 %v230_v0  ;;  %v235_v4 = vld [vmem:[%s349_s1 + $0x10] ss:$8 sps:$4 sm:$0xff]   ;;  %v236_v5 = vld [vmem:[%s349_s1 + $0x24] ss:$8 sps:$4 sm:$0xff]   ;;  %v238_v6 = vld [vmem:[%s349_s1 + $0x20] ss:$8 sps:$4 sm:$0xff]  }
   0x3   :  { %121 = vmatpush1.bf16.msra.mxu0 %v232_v2  ;;  %v239_v7 = vld [vmem:[%s349_s1 + $0x34] ss:$8 sps:$4 sm:$0xff]   ;;  %v241_v8 = vld [vmem:[%s349_s1 + $0x30] ss:$8 sps:$4 sm:$0xff]   ;;  %v242_v9 = vld [vmem:[%s349_s1 + $0x44] ss:$8 sps:$4 sm:$0xff]  }
   0x4   :  { %122 = vmatprep.subr.bf16.mxu0 %v233_v3  ;;  %v244_v10 = vld [vmem:[%s349_s1 + $0x40] ss:$8 sps:$4 sm:$0xff]   ;;  %v245_v11 = vld [vmem:[%s349_s1 + $0x54] ss:$8 sps:$4 sm:$0xff]   ;;  %v247_v12 = vld [vmem:[%s349_s1 + $0x50] ss:$8 sps:$4 sm:$0xff]  }
   0x5   :  { %v248_v13 = vld [vmem:[%s349_s1 + $0x64] ss:$8 sps:$4 sm:$0xff]   ;;  %v250_v14 = vld [vmem:[%s349_s1 + $0x60] ss:$8 sps:$4 sm:$0xff]   ;;  %v251_v15 = vld [vmem:[%s349_s1 + $0x74] ss:$8 sps:$4 sm:$0xff]  }
   0x6   :  { %v253_v16 = vld [vmem:[%s349_s1 + $0x70] ss:$8 sps:$4 sm:$0xff]   ;;  %v23_v17 = vld [vmem:[%s350_s0] sm:$0xf] }
   0x7   :  { %123 = vmatpush1.bf16.msra.mxu0 %v235_v4 }
   0x8   :  { %124 = vmatprep.subr.bf16.mxu0 %v236_v5 }
   0xb   :  { %125 = vmatpush1.bf16.msra.mxu0 %v238_v6 }
   0xc   :  { %126 = vmatprep.subr.bf16.mxu0 %v239_v7 }
   0xf   :  { %127 = vmatpush1.bf16.msra.mxu0 %v241_v8 }
  0x10   :  { %128 = vmatprep.subr.bf16.mxu0 %v242_v9 }
  0x13   :  { %129 = vmatpush1.bf16.msra.mxu0 %v244_v10 }
  0x14   :  { %130 = vmatprep.subr.bf16.mxu0 %v245_v11 }
  0x17   :  { %131 = vmatpush1.bf16.msra.mxu0 %v247_v12 }
  0x18   :  { %132 = vmatprep.subr.bf16.mxu0 %v248_v13 }
  0x1b   :  { %133 = vmatpush1.bf16.msra.mxu0 %v250_v14 }
  0x1c   :  { %134 = vmatprep.subr.bf16.mxu0 %v251_v15 }
  0x1f   :  { %135 = vmatpush1.bf16.msra.mxu0 %v253_v16 }
  0x22   :  { %153 = vmatmul.mubr.bf16.vlgmr.msra.gmra.mrb[0].mxu0 %v23_v17 }
  0xf5   :  { %v154_v18 = vpop.f32.mrb[0].mxu0 }
  0xf6   :  { %v156_v19 = vpop.f32.mrb[1].mxu0  ;;  %163 = vst [vmem:[%s351_s2] sm:$0xff] %v154_v18  ;;  %v170_v21 = vrot.slane %v154_v18, 4  ;;  %v182_v22 = vmul.f32 %v154_v18, %v154_v18 }
  0xf7   :  { %v158_v20 = vpop.f32.mrb[2].mxu0  ;;  %164 = vst [vmem:[%s351_s2 + $0x8] sm:$0xff] %v156_v19  ;;  %v176_v24 = vrot.slane %v156_v19, 4  ;;  %v183_v25 = vmul.f32 %v156_v19, %v156_v19 }
  0xf8   :  { %v159_v23 = vpop.f32.mrb[3].mxu0  ;;  %v171_v26 = vadd.f32 %v170_v21, %v154_v18  ;;  %v184_v27 = vrot.slane %v182_v22, 4 }
  0xf9   :  { %v177_v28 = vadd.f32 %v176_v24, %v156_v19  ;;  %v190_v29 = vrot.slane %v183_v25, 4 }
  0xfa   :  { %v172_v30 = vrot.slane %v171_v26, 2  ;;  %v185_v31 = vadd.f32 %v184_v27, %v182_v22 }
  0xfb   :  { %v178_v32 = vrot.slane %v177_v28, 2  ;;  %v191_v33 = vadd.f32 %v190_v29, %v183_v25 }
  0xfc   :  { %v173_v34 = vadd.f32 %v172_v30, %v171_v26  ;;  %v186_v35 = vrot.slane %v185_v31, 2 }
  0xfd   :  { %v179_v36 = vadd.f32 %v178_v32, %v177_v28  ;;  %v192_v37 = vrot.slane %v191_v33, 2 }
  0xfe   :  { %v174_v38 = vrot.slane %v173_v34, 1  ;;  %v187_v39 = vadd.f32 %v186_v35, %v185_v31 }
  0xff   :  { %v180_v40 = vrot.slane %v179_v36, 1  ;;  %v193_v41 = vadd.f32 %v192_v37, %v191_v33 }
 0x100   :  { %v175_v42 = vadd.f32 %v174_v38, %v173_v34  ;;  %v188_v43 = vrot.slane %v187_v39, 1 }
 0x101   :  { %v181_v44 = vadd.f32 %v180_v40, %v179_v36  ;;  %v194_v45 = vrot.slane %v193_v41, 1 }
 0x102   :  { %v189_v46 = vadd.f32 %v188_v43, %v187_v39  ;;  %196 = vst [vmem:[%s352_s3] sm:$0xff] %v175_v42 }
 0x103   :  { %v195_v47 = vadd.f32 %v194_v45, %v193_v41  ;;  %197 = vst [vmem:[%s352_s3 + $0x8] sm:$0xff] %v181_v44 }
 0x104   :  { %198 = vst [vmem:[%s353_s4] sm:$0xff] %v189_v46 }
 0x105   :  { %199 = vst [vmem:[%s353_s4 + $0x8] sm:$0xff] %v195_v47 }

// kernel: resnet_forward.37
= control target key start
LH: loop header
LB: loop body
LE: loop exit
PB: predicated region body
PF: predicated region fallthrough
CT: control target
= control target key end

     0   :  { %v18_v0 = vlaneseq  ;;  %s90_s1 = inlined_call_operand.vmem [shape: f32[1,256], index: 1, kind: input, shape index: {}]   ;;  %s91_s2 = inlined_call_operand.vmem [shape: f32[1,256], index: 2, kind: input, shape index: {}]   ;;  %s92_s0 = inlined_call_operand.vmem [shape: f32[8,256], index: 0, kind: input, shape index: {}]   ;;  %s93_s3 = inlined_call_operand.vmem [shape: f32[8,256], index: 3, kind: output, shape index: {}]  }
   0x1   :  { %v16_v2 = vld [vmem:[%s90_s1] sm:$0x3]  ;;  %v15_v7 = vld [vmem:[%s92_s0 + $0x8] sm:$0xff] }
   0x2   :  { %v19_v1 = vshrl.u32 %v18_v0, 7  ;;  %v30_v3 = vld [vmem:[%s91_s2] sm:$0x3] }
   0x3   :  { %v14_v6 = vld [vmem:[%s92_s0] sm:$0xff] }
   0x4   :  { %v20_v4 = vsub.s32 0, %v19_v1  ;;  %v24_v5 = vsub.s32 1, %v19_v1 }
   0x6   :  { %v21_v8 = vrot.slane %v16_v2, %v20_v4  ;;  %v35_v9 = vrot.slane %v30_v3, %v20_v4  ;;  %v25_v10 = vrot.slane %v16_v2, %v24_v5  ;;  %v39_v11 = vrot.slane %v30_v3, %v24_v5 }
   0x8   :  { %v28_v12 = vmul.f32 %v21_v8, %v14_v6  ;;  %v29_v13 = vmul.f32 %v25_v10, %v15_v7 }
   0xa   :  { %v42_v14 = vadd.f32 %v35_v9, %v28_v12  ;;  %v43_v15 = vadd.f32 %v39_v11, %v29_v13 }
   0xc   :  { %v44_v16 = vmax.f32 %v42_v14, 0.0  ;;  %v45_v17 = vmax.f32 %v43_v15, 0.0 }
   0xe   :  { %46 = vst [vmem:[%s93_s3] sm:$0xff] %v44_v16  ;;  %47 = vst [vmem:[%s93_s3 + $0x8] sm:$0xff] %v45_v17 }

// kernel: resnet_forward.36
= control target key start
LH: loop header
LB: loop body
LE: loop exit
PB: predicated region body
PF: predicated region fallthrough
CT: control target
= control target key end

     0   :  { %s1184_s15 = smov 0   ;;  %s1186_s16 = smov 0   ;;  %s1313_s0 = inlined_call_operand.vmem [shape: bf16[8,1152], index: 0, kind: input, shape index: {}]   ;;  %s1314_s1 = inlined_call_operand.vmem [shape: bf16[1152,256], index: 1, kind: input, shape index: {}]   ;;  %s1315_s2 = inlined_call_operand.vmem [shape: f32[8,256], index: 2, kind: output, shape index: {0}]   ;;  %s1316_s3 = inlined_call_operand.vmem [shape: f32[8,256], index: 3, kind: output, shape index: {1}]   ;;  %s1317_s4 = inlined_call_operand.vmem [shape: f32[8,256], index: 4, kind: output, shape index: {2}]  }
   0x1   :  { %s1188_s17 = smov 0  }
   0x2 LB: > { %s27_s18 = sadd.s32 1, %s1151_s16  ;;  %p966_p0 = scmp.ge.s32.totalorder %s1155_s17, 1  ;;  %s1155_s17 = sphi %s1188_s17, %s15_s17   ;;  %s1151_s16 = sphi %s1186_s16, %s1319_s16   ;;  %s1147_s15 = sphi %s1184_s15, %s1318_s15  }
   0x3   : > { %p28_p1 = scmp.ge.s32.totalorder %s27_s18, 3  ;;  %p218_p2 = scmp.lt.s32.totalorder %s1155_s17, 4 }
   0x5   : > { %s1321_s18 = smov (%p28_p1, %s27_s18), 0  ;;  %p219_p3 = pnand %p966_p0, %p218_p2 }
   0x6   : > { %s280_s19 = smul.u32 (!%p219_p3), 3, %s1147_s15  ;;  %p970_p6 = scmp.ne.s32.totalorder (!%p219_p3), %s1147_s15, 0 }
   0x7   : > { %222 = sbr.rel (%p219_p3) target bundleno = 329 (0x149), region = 28 }
   0x8   : > { %s290_s20 = smul.u32 (!%p219_p3), 48, %s1147_s15  ;;  %p283_p4 = scmp.lt.s32.totalorder (!%p219_p3), %s280_s19, 8 }
   0xa   : > { %p292_p5 = scmp.lt.s32.totalorder (!%p219_p3), %s290_s20, 143 }
   0xe   : > { %s1323_s19 = smov (!%p283_p4, %s280_s19), 8  ;;  %s1325_s20 = smov (!%p292_p5, %s290_s20), 143 }
   0xf   : > { %s967_s21 = sshll.u32 %s1323_s19, 2  ;;  %s1031_s25 = sshll.u32 %s1325_s20, 3  ;;  %v1157_v0 = vmov (!%p970_p6), 0.0  }
  0x10   : > { %s1209_s24 = scalar_lea.vmem %s1313_s0, %s967_s21  ;;  %s1214_s28 = scalar_lea.vmem %s1314_s1, %s1031_s25  ;;  %337 = vst [vmem:[%s1315_s2] sm:$0xff] (!%p970_p6), %v1157_v0  ;;  %338 = vst [vmem:[%s1315_s2 + $0x8] sm:$0xff] (!%p970_p6), %v1157_v0 }
  0x11   : > { %336 = sbr.rel (%p970_p6) target bundleno = 24 (0x18), region = 32 }
  0x18 PF: > { %v1058_v1 = vld [vmem:[%s1214_s28 + $0x4] ss:$8 sps:$4 sm:$0xff]   ;;  %v1060_v2 = vld [vmem:[%s1214_s28] ss:$8 sps:$4 sm:$0xff]   ;;  %v1158_v3 = vmov 0   ;;  %p1022_p7 = scmp.ne.s32.totalorder %s1147_s15, 2 }
  0x19   : > { %715 = vmatprep.mubr.bf16.mxu1 %v1158_v3  ;;  %642 = vmatprep.subr.bf16.mxu0 %v1058_v1  ;;  %v1061_v4 = vld [vmem:[%s1214_s28 + $0x14] ss:$8 sps:$4 sm:$0xff]   ;;  %v1063_v5 = vld [vmem:[%s1214_s28 + $0x10] ss:$8 sps:$4 sm:$0xff]   ;;  %v1064_v6 = vld [vmem:[%s1214_s28 + $0x24] ss:$8 sps:$4 sm:$0xff]  }
  0x1a   : > { %643 = vmatpush1.bf16.msra.mxu0 %v1060_v2  ;;  %v1066_v7 = vld [vmem:[%s1214_s28 + $0x20] ss:$8 sps:$4 sm:$0xff]   ;;  %v1067_v8 = vld [vmem:[%s1214_s28 + $0x34] ss:$8 sps:$4 sm:$0xff]   ;;  %v1069_v9 = vld [vmem:[%s1214_s28 + $0x30] ss:$8 sps:$4 sm:$0xff]  }
  0x1b   : > { %644 = vmatprep.subr.bf16.mxu0 %v1061_v4  ;;  %v1082_v10 = vld [vmem:[%s1214_s28 + $0x104] ss:$8 sps:$4 sm:$0xff]   ;;  %v1084_v11 = vld [vmem:[%s1214_s28 + $0x100] ss:$8 sps:$4 sm:$0xff]   ;;  %v1088_v13 = vld [vmem:[%s1214_s28 + $0x114] ss:$8 sps:$4 sm:$0xff]  }
  0x1c   : > { %v1070_v12 = vld [vmem:[%s1214_s28 + $0x44] ss:$8 sps:$4 sm:$0xff]   ;;  %683 = vmatprep.subr.bf16.mxu1 %v1082_v10  ;;  %v1090_v14 = vld [vmem:[%s1214_s28 + $0x110] ss:$8 sps:$4 sm:$0xff]   ;;  %v1072_v15 = vld [vmem:[%s1214_s28 + $0x40] ss:$8 sps:$4 sm:$0xff]  }
  0x1d   : > { %684 = vmatpush1.bf16.msra.mxu1 %v1084_v11  ;;  %v1073_v16 = vld [vmem:[%s1214_s28 + $0x54] ss:$8 sps:$4 sm:$0xff]   ;;  %v1094_v17 = vld [vmem:[%s1214_s28 + $0x124] ss:$8 sps:$4 sm:$0xff]   ;;  %v1096_v18 = vld [vmem:[%s1214_s28 + $0x120] ss:$8 sps:$4 sm:$0xff]  }
  0x1e   : > { %645 = vmatpush1.bf16.msra.mxu0 %v1063_v5  ;;  %685 = vmatprep.subr.bf16.mxu1 %v1088_v13  ;;  %v1075_v19 = vld [vmem:[%s1214_s28 + $0x50] ss:$8 sps:$4 sm:$0xff]   ;;  %v1100_v20 = vld [vmem:[%s1214_s28 + $0x134] ss:$8 sps:$4 sm:$0xff]   ;;  %v1076_v21 = vld [vmem:[%s1214_s28 + $0x64] ss:$8 sps:$4 sm:$0xff]  }
  0x1f   : > { %646 = vmatprep.subr.bf16.mxu0 %v1064_v6  ;;  %v1102_v22 = vld [vmem:[%s1214_s28 + $0x130] ss:$8 sps:$4 sm:$0xff]   ;;  %v1078_v23 = vld [vmem:[%s1214_s28 + $0x60] ss:$8 sps:$4 sm:$0xff]   ;;  %v1106_v24 = vld [vmem:[%s1214_s28 + $0x144] ss:$8 sps:$4 sm:$0xff]  }
  0x20   : > { %v1079_v25 = vld [vmem:[%s1214_s28 + $0x74] ss:$8 sps:$4 sm:$0xff]   ;;  %v1108_v26 = vld [vmem:[%s1214_s28 + $0x140] ss:$8 sps:$4 sm:$0xff]   ;;  %v1081_v27 = vld [vmem:[%s1214_s28 + $0x70] ss:$8 sps:$4 sm:$0xff]  }
  0x21   : > { %686 = vmatpush1.bf16.msra.mxu1 %v1090_v14  ;;  %v1112_v28 = vld [vmem:[%s1214_s28 + $0x154] ss:$8 sps:$4 sm:$0xff]   ;;  %v1085_v29 = vld [vmem:[%s1214_s28 + $0x84] ss:$8 sps:$4 sm:$0xff]   ;;  %v1114_v30 = vld [vmem:[%s1214_s28 + $0x150] ss:$8 sps:$4 sm:$0xff]  }
  0x22   : > { %647 = vmatpush1.bf16.msra.mxu0 %v1066_v7  ;;  %687 = vmatprep.subr.bf16.mxu1 %v1094_v17  ;;  %v1087_v31 = vld [vmem:[%s1214_s28 + $0x80] ss:$8 sps:$4 sm:$0xff]   ;;  %v1118_v32 = vld [vmem:[%s1214_s28 + $0x164] ss:$8 sps:$4 sm:$0xff]   ;;  %v1091_v33 = vld [vmem:[%s1214_s28 + $0x94] ss:$8 sps:$4 sm:$0xff]  }
  0x23   : > { %648 = vmatprep.subr.bf16.mxu0 %v1067_v8  ;;  %v341_v34 = vld [vmem:[%s1209_s24] sm:$0xff]  ;;  %v1093_v37 = vld [vmem:[%s1214_s28 + $0x90] ss:$8 sps:$4 sm:$0xff]   ;;  %v1124_v38 = vld [vmem:[%s1214_s28 + $0x174] ss:$8 sps:$4 sm:$0xff]  }
  0x24   : > { %v972_v35 = vcombine.high %v341_v34, %v341_v34  ;;  %v1120_v36 = vld [vmem:[%s1214_s28 + $0x160] ss:$8 sps:$4 sm:$0xff]   ;;  %v1097_v39 = vld [vmem:[%s1214_s28 + $0xa4] ss:$8 sps:$4 sm:$0xff]   ;;  %v1126_v40 = vld [vmem:[%s1214_s28 + $0x170] ss:$8 sps:$4 sm:$0xff]   ;;  %v971_v53 = vcombine.low %v341_v34, %v341_v34 }
  0x25   : > { %688 = vmatpush1.bf16.msra.mxu1 %v1096_v18  ;;  %v1099_v41 = vld [vmem:[%s1214_s28 + $0xa0] ss:$8 sps:$4 sm:$0xff]   ;;  %v1103_v42 = vld [vmem:[%s1214_s28 + $0xb4] ss:$8 sps:$4 sm:$0xff]   ;;  %v1105_v44 = vld [vmem:[%s1214_s28 + $0xb0] ss:$8 sps:$4 sm:$0xff]  }
  0x26   : > { %649 = vmatpush1.bf16.msra.mxu0 %v1069_v9  ;;  %689 = vmatprep.subr.bf16.mxu1 %v1100_v20  ;;  %v1130_v43 = vld [vmem:[%s1209_s24 + $0x8] ss:$0 sps:$4 sm:$0xff]   ;;  %v1109_v45 = vld [vmem:[%s1214_s28 + $0xc4] ss:$8 sps:$4 sm:$0xff]   ;;  %v1115_v47 = vld [vmem:[%s1214_s28 + $0xd4] ss:$8 sps:$4 sm:$0xff]  }
  0x27   : > { %650 = vmatprep.subr.bf16.mxu0 %v1070_v12  ;;  %674 = vmatprep.mubr.bf16.mxu0 %v972_v35  ;;  %v1111_v46 = vld [vmem:[%s1214_s28 + $0xc0] ss:$8 sps:$4 sm:$0xff]   ;;  %v1117_v48 = vld [vmem:[%s1214_s28 + $0xd0] ss:$8 sps:$4 sm:$0xff]   ;;  %v1121_v49 = vld [vmem:[%s1214_s28 + $0xe4] ss:$8 sps:$4 sm:$0xff]  }
  0x28   : > { %v1123_v50 = vld [vmem:[%s1214_s28 + $0xe0] ss:$8 sps:$4 sm:$0xff]   ;;  %v1127_v51 = vld [vmem:[%s1214_s28 + $0xf4] ss:$8 sps:$4 sm:$0xff]   ;;  %v1129_v52 = vld [vmem:[%s1214_s28 + $0xf0] ss:$8 sps:$4 sm:$0xff]  }
  0x29   : > { %690 = vmatpush1.bf16.msra.mxu1 %v1102_v22  ;;  %v339_v58 = vld [vmem:[%s1315_s2] sm:$0xff]  ;;  %v340_v61 = vld [vmem:[%s1315_s2 + $0x8] sm:$0xff] }
  0x2a   : > { %651 = vmatpush1.bf16.msra.mxu0 %v1072_v15  ;;  %691 = vmatprep.subr.bf16.mxu1 %v1106_v24 }
  0x2b   : > { %652 = vmatprep.subr.bf16.mxu0 %v1073_v16 }
  0x2d   : > { %692 = vmatpush1.bf16.msra.mxu1 %v1108_v26 }
  0x2e   : > { %653 = vmatpush1.bf16.msra.mxu0 %v1075_v19  ;;  %693 = vmatprep.subr.bf16.mxu1 %v1112_v28 }
  0x2f   : > { %654 = vmatprep.subr.bf16.mxu0 %v1076_v21 }
  0x31   : > { %694 = vmatpush1.bf16.msra.mxu1 %v1114_v30 }
  0x32   : > { %655 = vmatpush1.bf16.msra.mxu0 %v1078_v23  ;;  %695 = vmatprep.subr.bf16.mxu1 %v1118_v32 }
  0x33   : > { %656 = vmatprep.subr.bf16.mxu0 %v1079_v25 }
  0x35   : > { %696 = vmatpush1.bf16.msra.mxu1 %v1120_v36 }
  0x36   : > { %657 = vmatpush1.bf16.msra.mxu0 %v1081_v27  ;;  %697 = vmatprep.subr.bf16.mxu1 %v1124_v38 }
  0x37   : > { %658 = vmatprep.subr.bf16.mxu0 %v1085_v29 }
  0x39   : > { %698 = vmatpush1.bf16.msra.mxu1 %v1126_v40 }
  0x3a   : > { %659 = vmatpush1.bf16.msra.mxu0 %v1087_v31 }
  0x3b   : > { %660 = vmatprep.subr.bf16.mxu0 %v1091_v33 }
  0x3c   : > { %716 = vmatmul.mubr.bf16.vlgmr.msra.gmra.mrb[0].mxu1 %v1130_v43 }
  0x3e   : > { %661 = vmatpush1.bf16.msra.mxu0 %v1093_v37 }
  0x3f   : > { %662 = vmatprep.subr.bf16.mxu0 %v1097_v39 }
  0x42   : > { %663 = vmatpush1.bf16.msra.mxu0 %v1099_v41 }
  0x43   : > { %664 = vmatprep.subr.bf16.mxu0 %v1103_v42 }
  0x46   : > { %665 = vmatpush1.bf16.msra.mxu0 %v1105_v44 }
  0x47   : > { %666 = vmatprep.subr.bf16.mxu0 %v1109_v45 }
  0x4a   : > { %667 = vmatpush1.bf16.msra.mxu0 %v1111_v46 }
  0x4b   : > { %668 = vmatprep.subr.bf16.mxu0 %v1115_v47 }
  0x4e   : > { %669 = vmatpush1.bf16.msra.mxu0 %v1117_v48 }
  0x4f   : > { %670 = vmatprep.subr.bf16.mxu0 %v1121_v49 }
  0x52   : > { %671 = vmatpush1.bf16.msra.mxu0 %v1123_v50 }
  0x53   : > { %672 = vmatprep.subr.bf16.mxu0 %v1127_v51 }
  0x56   : > { %673 = vmatpush1.bf16.msra.mxu0 %v1129_v52 }
  0x59   : > { %675 = vmatmul.mubr.bf16.vlgmr.msra.gmra.mrb[0].mxu0 %v971_v53 }
 0x10f   : > { %v717_v54 = vpop.f32.mrb[0].mxu1 }
 0x110   : > { %v719_v55 = vpop.f32.mrb[1].mxu1 }
 0x111   : > { %v721_v56 = vpop.f32.mrb[2].mxu1 }
 0x112   : > { %v722_v57 = vpop.f32.mrb[3].mxu1 }
 0x12c   : > { %v676_v59 = vpop.f32.mrb[0].mxu0  ;;  %731 = sbr.rel (%p1022_p7) target bundleno = 329 (0x149), region = 36 }
 0x12d   : > { %v718_v60 = vadd.f32 %v717_v54, %v676_v59  ;;  %v678_v62 = vpop.f32.mrb[1].mxu0 }
 0x12e   : > { %v720_v63 = vadd.f32 %v719_v55, %v678_v62  ;;  %v680_v0 = vpop.f32.mrb[2].mxu0 }
 0x12f   : > { %v724_v1 = vadd.f32 %v718_v60, %v339_v58  ;;  %v681_v2 = vpop.f32.mrb[3].mxu0 }
 0x130   : > { %v725_v3 = vadd.f32 %v720_v63, %v340_v61 }
 0x131   : > { %726 = vst [vmem:[%s1315_s2] sm:$0xff] %v724_v1 }
 0x132   : > { %727 = vst [vmem:[%s1315_s2 + $0x8] sm:$0xff] %v725_v3 }
 0x138   : > { %v732_v4 = vld [vmem:[%s1315_s2] sm:$0xff] }
 0x139   : > { %v733_v5 = vld [vmem:[%s1315_s2 + $0x8] sm:$0xff]  ;;  %v734_v6 = vrot.slane %v732_v4, 4  ;;  %v746_v8 = vmul.f32 %v732_v4, %v732_v4 }
 0x13a   : > { %v740_v7 = vrot.slane %v733_v5, 4  ;;  %v747_v9 = vmul.f32 %v733_v5, %v733_v5 }
 0x13b   : > { %v735_v10 = vadd.f32 %v734_v6, %v732_v4  ;;  %v748_v12 = vrot.slane %v746_v8, 4 }
 0x13c   : > { %v741_v11 = vadd.f32 %v740_v7, %v733_v5  ;;  %v754_v13 = vrot.slane %v747_v9, 4 }
 0x13d   : > { %v736_v14 = vrot.slane %v735_v10, 2  ;;  %v749_v16 = vadd.f32 %v748_v12, %v746_v8 }
 0x13e   : > { %v742_v15 = vrot.slane %v741_v11, 2  ;;  %v755_v17 = vadd.f32 %v754_v13, %v747_v9 }
 0x13f   : > { %v737_v18 = vadd.f32 %v736_v14, %v735_v10  ;;  %v750_v20 = vrot.slane %v749_v16, 2 }
 0x140   : > { %v743_v19 = vadd.f32 %v742_v15, %v741_v11  ;;  %v756_v21 = vrot.slane %v755_v17, 2 }
 0x141   : > { %v738_v22 = vrot.slane %v737_v18, 1  ;;  %v751_v24 = vadd.f32 %v750_v20, %v749_v16 }
 0x142   : > { %v744_v23 = vrot.slane %v743_v19, 1  ;;  %v757_v25 = vadd.f32 %v756_v21, %v755_v17 }
 0x143   : > { %v739_v26 = vadd.f32 %v738_v22, %v737_v18  ;;  %v752_v28 = vrot.slane %v751_v24, 1 }
 0x144   : > { %v745_v27 = vadd.f32 %v744_v23, %v743_v19  ;;  %v758_v29 = vrot.slane %v757_v25, 1 }
 0x145   : > { %760 = vst [vmem:[%s1316_s3] sm:$0xff] %v739_v26  ;;  %v753_v30 = vadd.f32 %v752_v28, %v751_v24 }
 0x146   : > { %761 = vst [vmem:[%s1316_s3 + $0x8] sm:$0xff] %v745_v27  ;;  %v759_v31 = vadd.f32 %v758_v29, %v757_v25 }
 0x147   : > { %762 = vst [vmem:[%s1317_s4] sm:$0xff] %v753_v30 }
 0x148   : > { %763 = vst [vmem:[%s1317_s4 + $0x8] sm:$0xff] %v759_v31 }
 0x149 PF: > { %s15_s17 = sadd.s32 1, %s1155_s17   ;;  %s1318_s15 = smov %s1151_s16 }
 0x14a   : > { %p12_p8 = scmp.ge.s32.totalorder %s15_s17, 5   ;;  %s1319_s16 = smov %s1321_s18 }
 0x14c   :  { %14 = sbr.rel (!%p12_p8) target bundleno = 2 (0x2), region = 93 }

// kernel: resnet_forward.40
= control target key start
LH: loop header
LB: loop body
LE: loop exit
PB: predicated region body
PF: predicated region fallthrough
CT: control target
= control target key end

     0   :  { %v27_v0 = vlaneseq  ;;  %s158_s1 = inlined_call_operand.vmem [shape: f32[1,256], index: 1, kind: input, shape index: {}]   ;;  %s159_s2 = inlined_call_operand.vmem [shape: f32[1,256], index: 2, kind: input, shape index: {}]   ;;  %s160_s4 = inlined_call_operand.vmem [shape: f32[1,256], index: 4, kind: input, shape index: {}]   ;;  %s161_s0 = inlined_call_operand.vmem [shape: f32[8,256], index: 0, kind: input, shape index: {}]   ;;  %s162_s3 = inlined_call_operand.vmem [shape: f32[8,256], index: 3, kind: input, shape index: {}]   ;;  %s163_s5 = inlined_call_operand.vmem [shape: f32[1,256], index: 5, kind: input, shape index: {}]   ;;  %s164_s6 = inlined_call_operand.vmem [shape: f32[8,256], index: 6, kind: output, shape index: {}]  }
   0x1   :  { %v25_v2 = vld [vmem:[%s158_s1] sm:$0x3]  ;;  %v24_v12 = vld [vmem:[%s161_s0 + $0x8] sm:$0xff] }
   0x2   :  { %v28_v1 = vshrl.u32 %v27_v0, 7  ;;  %v39_v3 = vld [vmem:[%s159_s2] sm:$0x3]  ;;  %v54_v13 = vld [vmem:[%s162_s3 + $0x8] sm:$0xff] }
   0x3   :  { %v55_v4 = vld [vmem:[%s160_s4] sm:$0x3] }
   0x4   :  { %v29_v5 = vsub.s32 0, %v28_v1  ;;  %v33_v6 = vsub.s32 1, %v28_v1  ;;  %v23_v7 = vld [vmem:[%s161_s0] sm:$0xff] }
   0x5   :  { %v53_v8 = vld [vmem:[%s162_s3] sm:$0xff] }
   0x6   :  { %v30_v9 = vrot.slane %v25_v2, %v29_v5  ;;  %v44_v10 = vrot.slane %v39_v3, %v29_v5  ;;  %v60_v11 = vrot.slane %v55_v4, %v29_v5  ;;  %v71_v14 = vld [vmem:[%s163_s5] sm:$0x3]  ;;  %v34_v15 = vrot.slane %v25_v2, %v33_v6 }
   0x7   :  { %v48_v16 = vrot.slane %v39_v3, %v33_v6  ;;  %v64_v17 = vrot.slane %v55_v4, %v33_v6  ;;  %v76_v23 = vrot.slane %v71_v14, %v29_v5  ;;  %v80_v25 = vrot.slane %v71_v14, %v33_v6 }
   0x8   :  { %v37_v18 = vmul.f32 %v30_v9, %v23_v7  ;;  %v67_v19 = vmul.f32 %v60_v11, %v53_v8  ;;  %v38_v20 = vmul.f32 %v34_v15, %v24_v12 }
   0x9   :  { %v68_v21 = vmul.f32 %v64_v17, %v54_v13 }
   0xa   :  { %v51_v22 = vadd.f32 %v44_v10, %v37_v18  ;;  %v52_v24 = vadd.f32 %v48_v16, %v38_v20 }
   0xc   :  { %v69_v26 = vadd.f32 %v67_v19, %v51_v22  ;;  %v70_v27 = vadd.f32 %v68_v21, %v52_v24 }
   0xe   :  { %v83_v28 = vadd.f32 %v76_v23, %v69_v26  ;;  %v84_v29 = vadd.f32 %v80_v25, %v70_v27 }
  0x10   :  { %v85_v30 = vmax.f32 %v83_v28, 0.0  ;;  %v86_v31 = vmax.f32 %v84_v29, 0.0 }
  0x12   :  { %87 = vst [vmem:[%s164_s6] sm:$0xff] %v85_v30  ;;  %88 = vst [vmem:[%s164_s6 + $0x8] sm:$0xff] %v86_v31 }

// kernel: resnet_forward.44
= control target key start
LH: loop header
LB: loop body
LE: loop exit
PB: predicated region body
PF: predicated region fallthrough
CT: control target
= control target key end

     0   :  { %s1008_s1 = inlined_call_operand.vmem [shape: bf16[256,512], index: 1, kind: input, shape index: {}]   ;;  %s1009_s0 = inlined_call_operand.vmem [shape: bf16[8,256], index: 0, kind: input, shape index: {}]   ;;  %s1010_s2 = inlined_call_operand.vmem [shape: f32[8,512], index: 2, kind: output, shape index: {0}]   ;;  %s1011_s3 = inlined_call_operand.vmem [shape: f32[8,512], index: 3, kind: output, shape index: {1}]   ;;  %s1012_s4 = inlined_call_operand.vmem [shape: f32[8,512], index: 4, kind: output, shape index: {2}]  }
   0x1   :  { %v654_v0 = vld [vmem:[%s1008_s1 + $0x4] ss:$16 sps:$4 sm:$0xff]   ;;  %v656_v1 = vld [vmem:[%s1008_s1 + $0xc] ss:$16 sps:$4 sm:$0xff]   ;;  %v658_v2 = vld [vmem:[%s1008_s1] ss:$16 sps:$4 sm:$0xff]  }
   0x2   :  { %418 = vmatprep.subr.bf16.mxu0 %v654_v0  ;;  %v659_v3 = vld [vmem:[%s1008_s1 + $0x8] ss:$16 sps:$4 sm:$0xff]   ;;  %459 = vmatprep.subr.bf16.mxu1 %v656_v1  ;;  %v660_v4 = vld [vmem:[%s1008_s1 + $0x24] ss:$16 sps:$4 sm:$0xff]   ;;  %v662_v5 = vld [vmem:[%s1008_s1 + $0x2c] ss:$16 sps:$4 sm:$0xff]  }
   0x3   :  { %419 = vmatpush1.bf16.msra.mxu0 %v658_v2  ;;  %460 = vmatpush1.bf16.msra.mxu1 %v659_v3  ;;  %v664_v6 = vld [vmem:[%s1008_s1 + $0x20] ss:$16 sps:$4 sm:$0xff]   ;;  %v665_v7 = vld [vmem:[%s1008_s1 + $0x28] ss:$16 sps:$4 sm:$0xff]   ;;  %v666_v8 = vld [vmem:[%s1008_s1 + $0x44] ss:$16 sps:$4 sm:$0xff]  }
   0x4   :  { %420 = vmatprep.subr.bf16.mxu0 %v660_v4  ;;  %461 = vmatprep.subr.bf16.mxu1 %v662_v5  ;;  %v668_v9 = vld [vmem:[%s1008_s1 + $0x4c] ss:$16 sps:$4 sm:$0xff]   ;;  %v670_v10 = vld [vmem:[%s1008_s1 + $0x40] ss:$16 sps:$4 sm:$0xff]   ;;  %v671_v11 = vld [vmem:[%s1008_s1 + $0x48] ss:$16 sps:$4 sm:$0xff]  }
   0x5   :  { %v672_v12 = vld [vmem:[%s1008_s1 + $0x64] ss:$16 sps:$4 sm:$0xff]   ;;  %v674_v13 = vld [vmem:[%s1008_s1 + $0x6c] ss:$16 sps:$4 sm:$0xff]   ;;  %v676_v14 = vld [vmem:[%s1008_s1 + $0x60] ss:$16 sps:$4 sm:$0xff]  }
   0x6   :  { %v677_v15 = vld [vmem:[%s1008_s1 + $0x68] ss:$16 sps:$4 sm:$0xff]   ;;  %v678_v16 = vld [vmem:[%s1008_s1 + $0x84] ss:$16 sps:$4 sm:$0xff]   ;;  %v680_v17 = vld [vmem:[%s1008_s1 + $0x8c] ss:$16 sps:$4 sm:$0xff]  }
   0x7   :  { %421 = vmatpush1.bf16.msra.mxu0 %v664_v6  ;;  %462 = vmatpush1.bf16.msra.mxu1 %v665_v7  ;;  %v682_v18 = vld [vmem:[%s1008_s1 + $0x80] ss:$16 sps:$4 sm:$0xff]   ;;  %v683_v19 = vld [vmem:[%s1008_s1 + $0x88] ss:$16 sps:$4 sm:$0xff]   ;;  %v684_v20 = vld [vmem:[%s1008_s1 + $0xa4] ss:$16 sps:$4 sm:$0xff]  }
   0x8   :  { %422 = vmatprep.subr.bf16.mxu0 %v666_v8  ;;  %463 = vmatprep.subr.bf16.mxu1 %v668_v9  ;;  %v686_v21 = vld [vmem:[%s1008_s1 + $0xac] ss:$16 sps:$4 sm:$0xff]   ;;  %v688_v22 = vld [vmem:[%s1008_s1 + $0xa0] ss:$16 sps:$4 sm:$0xff]   ;;  %v689_v23 = vld [vmem:[%s1008_s1 + $0xa8] ss:$16 sps:$4 sm:$0xff]  }
   0x9   :  { %v690_v24 = vld [vmem:[%s1008_s1 + $0xc4] ss:$16 sps:$4 sm:$0xff]   ;;  %v692_v25 = vld [vmem:[%s1008_s1 + $0xcc] ss:$16 sps:$4 sm:$0xff]   ;;  %v694_v26 = vld [vmem:[%s1008_s1 + $0xc0] ss:$16 sps:$4 sm:$0xff]  }
   0xa   :  { %v695_v27 = vld [vmem:[%s1008_s1 + $0xc8] ss:$16 sps:$4 sm:$0xff]   ;;  %v696_v28 = vld [vmem:[%s1008_s1 + $0xe4] ss:$16 sps:$4 sm:$0xff]   ;;  %v698_v29 = vld [vmem:[%s1008_s1 + $0xec] ss:$16 sps:$4 sm:$0xff]  }
   0xb   :  { %423 = vmatpush1.bf16.msra.mxu0 %v670_v10  ;;  %464 = vmatpush1.bf16.msra.mxu1 %v671_v11  ;;  %v700_v30 = vld [vmem:[%s1008_s1 + $0xe0] ss:$16 sps:$4 sm:$0xff]   ;;  %v701_v31 = vld [vmem:[%s1008_s1 + $0xe8] ss:$16 sps:$4 sm:$0xff]   ;;  %v702_v32 = vld [vmem:[%s1008_s1 + $0x104] ss:$16 sps:$4 sm:$0xff]  }
   0xc   :  { %424 = vmatprep.subr.bf16.mxu0 %v672_v12  ;;  %465 = vmatprep.subr.bf16.mxu1 %v674_v13  ;;  %v704_v33 = vld [vmem:[%s1008_s1 + $0x10c] ss:$16 sps:$4 sm:$0xff]   ;;  %v706_v34 = vld [vmem:[%s1008_s1 + $0x100] ss:$16 sps:$4 sm:$0xff]   ;;  %v707_v35 = vld [vmem:[%s1008_s1 + $0x108] ss:$16 sps:$4 sm:$0xff]  }
   0xd   :  { %v708_v36 = vld [vmem:[%s1008_s1 + $0x124] ss:$16 sps:$4 sm:$0xff]   ;;  %v710_v37 = vld [vmem:[%s1008_s1 + $0x12c] ss:$16 sps:$4 sm:$0xff]   ;;  %v712_v38 = vld [vmem:[%s1008_s1 + $0x120] ss:$16 sps:$4 sm:$0xff]  }
   0xe   :  { %v713_v39 = vld [vmem:[%s1008_s1 + $0x128] ss:$16 sps:$4 sm:$0xff]   ;;  %v714_v40 = vld [vmem:[%s1008_s1 + $0x144] ss:$16 sps:$4 sm:$0xff]   ;;  %v716_v41 = vld [vmem:[%s1008_s1 + $0x14c] ss:$16 sps:$4 sm:$0xff]  }
   0xf   :  { %425 = vmatpush1.bf16.msra.mxu0 %v676_v14  ;;  %466 = vmatpush1.bf16.msra.mxu1 %v677_v15  ;;  %v718_v42 = vld [vmem:[%s1008_s1 + $0x140] ss:$16 sps:$4 sm:$0xff]   ;;  %v719_v43 = vld [vmem:[%s1008_s1 + $0x148] ss:$16 sps:$4 sm:$0xff]   ;;  %v720_v44 = vld [vmem:[%s1008_s1 + $0x164] ss:$16 sps:$4 sm:$0xff]  }
  0x10   :  { %426 = vmatprep.subr.bf16.mxu0 %v678_v16  ;;  %467 = vmatprep.subr.bf16.mxu1 %v680_v17  ;;  %v722_v45 = vld [vmem:[%s1008_s1 + $0x16c] ss:$16 sps:$4 sm:$0xff]   ;;  %v26_v46 = vld [vmem:[%s1009_s0] sm:$0xff]  ;;  %v725_v49 = vld [vmem:[%s1008_s1 + $0x168] ss:$16 sps:$4 sm:$0xff]  }
  0x11   :  { %v588_v47 = vcombine.high %v26_v46, %v26_v46  ;;  %v724_v48 = vld [vmem:[%s1008_s1 + $0x160] ss:$16 sps:$4 sm:$0xff]   ;;  %v726_v50 = vld [vmem:[%s1008_s1 + $0x184] ss:$16 sps:$4 sm:$0xff]   ;;  %v728_v51 = vld [vmem:[%s1008_s1 + $0x18c] ss:$16 sps:$4 sm:$0xff]   ;;  %v587_v2 = vcombine.low %v26_v46, %v26_v46 }
  0x12   :  { %v730_v52 = vld [vmem:[%s1008_s1 + $0x180] ss:$16 sps:$4 sm:$0xff]   ;;  %v731_v53 = vld [vmem:[%s1008_s1 + $0x188] ss:$16 sps:$4 sm:$0xff]   ;;  %v732_v54 = vld [vmem:[%s1008_s1 + $0x1a4] ss:$16 sps:$4 sm:$0xff]  }
  0x13   :  { %427 = vmatpush1.bf16.msra.mxu0 %v682_v18  ;;  %468 = vmatpush1.bf16.msra.mxu1 %v683_v19  ;;  %v734_v55 = vld [vmem:[%s1008_s1 + $0x1ac] ss:$16 sps:$4 sm:$0xff]   ;;  %v736_v56 = vld [vmem:[%s1008_s1 + $0x1a0] ss:$16 sps:$4 sm:$0xff]   ;;  %v737_v57 = vld [vmem:[%s1008_s1 + $0x1a8] ss:$16 sps:$4 sm:$0xff]  }
  0x14   :  { %428 = vmatprep.subr.bf16.mxu0 %v684_v20  ;;  %469 = vmatprep.subr.bf16.mxu1 %v686_v21  ;;  %v738_v58 = vld [vmem:[%s1008_s1 + $0x1c4] ss:$16 sps:$4 sm:$0xff]   ;;  %v740_v59 = vld [vmem:[%s1008_s1 + $0x1cc] ss:$16 sps:$4 sm:$0xff]   ;;  %v742_v60 = vld [vmem:[%s1008_s1 + $0x1c0] ss:$16 sps:$4 sm:$0xff]  }
  0x15   :  { %450 = vmatprep.mubr.bf16.mxu0 %v588_v47  ;;  %491 = vmatprep.mubr.bf16.mxu1 %v588_v47  ;;  %v743_v61 = vld [vmem:[%s1008_s1 + $0x1c8] ss:$16 sps:$4 sm:$0xff]   ;;  %v744_v62 = vld [vmem:[%s1008_s1 + $0x1e4] ss:$16 sps:$4 sm:$0xff]   ;;  %v746_v63 = vld [vmem:[%s1008_s1 + $0x1ec] ss:$16 sps:$4 sm:$0xff]  }
  0x16   :  { %v748_v0 = vld [vmem:[%s1008_s1 + $0x1e0] ss:$16 sps:$4 sm:$0xff]   ;;  %v749_v1 = vld [vmem:[%s1008_s1 + $0x1e8] ss:$16 sps:$4 sm:$0xff]  }
  0x17   :  { %429 = vmatpush1.bf16.msra.mxu0 %v688_v22  ;;  %470 = vmatpush1.bf16.msra.mxu1 %v689_v23 }
  0x18   :  { %430 = vmatprep.subr.bf16.mxu0 %v690_v24  ;;  %471 = vmatprep.subr.bf16.mxu1 %v692_v25 }
  0x1b   :  { %431 = vmatpush1.bf16.msra.mxu0 %v694_v26  ;;  %472 = vmatpush1.bf16.msra.mxu1 %v695_v27 }
  0x1c   :  { %432 = vmatprep.subr.bf16.mxu0 %v696_v28  ;;  %473 = vmatprep.subr.bf16.mxu1 %v698_v29 }
  0x1f   :  { %433 = vmatpush1.bf16.msra.mxu0 %v700_v30  ;;  %474 = vmatpush1.bf16.msra.mxu1 %v701_v31 }
  0x20   :  { %434 = vmatprep.subr.bf16.mxu0 %v702_v32  ;;  %475 = vmatprep.subr.bf16.mxu1 %v704_v33 }
  0x23   :  { %435 = vmatpush1.bf16.msra.mxu0 %v706_v34  ;;  %476 = vmatpush1.bf16.msra.mxu1 %v707_v35 }
  0x24   :  { %436 = vmatprep.subr.bf16.mxu0 %v708_v36  ;;  %477 = vmatprep.subr.bf16.mxu1 %v710_v37 }
  0x27   :  { %437 = vmatpush1.bf16.msra.mxu0 %v712_v38  ;;  %478 = vmatpush1.bf16.msra.mxu1 %v713_v39 }
  0x28   :  { %438 = vmatprep.subr.bf16.mxu0 %v714_v40  ;;  %479 = vmatprep.subr.bf16.mxu1 %v716_v41 }
  0x2b   :  { %439 = vmatpush1.bf16.msra.mxu0 %v718_v42  ;;  %480 = vmatpush1.bf16.msra.mxu1 %v719_v43 }
  0x2c   :  { %440 = vmatprep.subr.bf16.mxu0 %v720_v44  ;;  %481 = vmatprep.subr.bf16.mxu1 %v722_v45 }
  0x2f   :  { %441 = vmatpush1.bf16.msra.mxu0 %v724_v48  ;;  %482 = vmatpush1.bf16.msra.mxu1 %v725_v49 }
  0x30   :  { %442 = vmatprep.subr.bf16.mxu0 %v726_v50  ;;  %483 = vmatprep.subr.bf16.mxu1 %v728_v51 }
  0x33   :  { %443 = vmatpush1.bf16.msra.mxu0 %v730_v52  ;;  %484 = vmatpush1.bf16.msra.mxu1 %v731_v53 }
  0x34   :  { %444 = vmatprep.subr.bf16.mxu0 %v732_v54  ;;  %485 = vmatprep.subr.bf16.mxu1 %v734_v55 }
  0x37   :  { %445 = vmatpush1.bf16.msra.mxu0 %v736_v56  ;;  %486 = vmatpush1.bf16.msra.mxu1 %v737_v57 }
  0x38   :  { %446 = vmatprep.subr.bf16.mxu0 %v738_v58  ;;  %487 = vmatprep.subr.bf16.mxu1 %v740_v59 }
  0x3b   :  { %447 = vmatpush1.bf16.msra.mxu0 %v742_v60  ;;  %488 = vmatpush1.bf16.msra.mxu1 %v743_v61 }
  0x3c   :  { %448 = vmatprep.subr.bf16.mxu0 %v744_v62  ;;  %489 = vmatprep.subr.bf16.mxu1 %v746_v63 }
  0x3f   :  { %449 = vmatpush1.bf16.msra.mxu0 %v748_v0  ;;  %490 = vmatpush1.bf16.msra.mxu1 %v749_v1 }
  0x42   :  { %451 = vmatmul.mubr.bf16.vlgmr.msra.gmra.mrb[0].mxu0 %v587_v2  ;;  %492 = vmatmul.mubr.bf16.vlgmr.msra.gmra.mrb[0].mxu1 %v587_v2 }
 0x115   :  { %v452_v3 = vpop.f32.mrb[0].mxu0  ;;  %v493_v4 = vpop.f32.mrb[0].mxu1 }
 0x116   :  { %v454_v5 = vpop.f32.mrb[1].mxu0  ;;  %v495_v6 = vpop.f32.mrb[1].mxu1  ;;  %504 = vst [vmem:[%s1010_s2] sm:$0xff] %v452_v3  ;;  %v515_v9 = vrot.slane %v452_v3, 4  ;;  %v539_v10 = vmul.f32 %v452_v3, %v452_v3  ;;  %506 = vst [vmem:[%s1010_s2 + $0x10] sm:$0xff] %v493_v4  ;;  %v527_v11 = vrot.slane %v493_v4, 4  ;;  %v541_v12 = vmul.f32 %v493_v4, %v493_v4 }
 0x117   :  { %v456_v7 = vpop.f32.mrb[2].mxu0  ;;  %v497_v8 = vpop.f32.mrb[2].mxu1  ;;  %505 = vst [vmem:[%s1010_s2 + $0x8] sm:$0xff] %v454_v5  ;;  %v521_v15 = vrot.slane %v454_v5, 4  ;;  %v540_v16 = vmul.f32 %v454_v5, %v454_v5  ;;  %507 = vst [vmem:[%s1010_s2 + $0x18] sm:$0xff] %v495_v6  ;;  %v533_v17 = vrot.slane %v495_v6, 4  ;;  %v542_v18 = vmul.f32 %v495_v6, %v495_v6 }
 0x118   :  { %v457_v13 = vpop.f32.mrb[3].mxu0  ;;  %v498_v14 = vpop.f32.mrb[3].mxu1  ;;  %v516_v19 = vadd.f32 %v515_v9, %v452_v3  ;;  %v543_v20 = vrot.slane %v539_v10, 4  ;;  %v528_v21 = vadd.f32 %v527_v11, %v493_v4  ;;  %v555_v22 = vrot.slane %v541_v12, 4 }
 0x119   :  { %v522_v23 = vadd.f32 %v521_v15, %v454_v5  ;;  %v549_v24 = vrot.slane %v540_v16, 4  ;;  %v534_v25 = vadd.f32 %v533_v17, %v495_v6  ;;  %v561_v26 = vrot.slane %v542_v18, 4 }
 0x11a   :  { %v517_v27 = vrot.slane %v516_v19, 2  ;;  %v544_v28 = vadd.f32 %v543_v20, %v539_v10  ;;  %v529_v29 = vrot.slane %v528_v21, 2  ;;  %v556_v30 = vadd.f32 %v555_v22, %v541_v12 }
 0x11b   :  { %v523_v31 = vrot.slane %v522_v23, 2  ;;  %v550_v32 = vadd.f32 %v549_v24, %v540_v16  ;;  %v535_v33 = vrot.slane %v534_v25, 2  ;;  %v562_v34 = vadd.f32 %v561_v26, %v542_v18 }
 0x11c   :  { %v518_v35 = vadd.f32 %v517_v27, %v516_v19  ;;  %v545_v36 = vrot.slane %v544_v28, 2  ;;  %v530_v37 = vadd.f32 %v529_v29, %v528_v21  ;;  %v557_v38 = vrot.slane %v556_v30, 2 }
 0x11d   :  { %v524_v39 = vadd.f32 %v523_v31, %v522_v23  ;;  %v551_v40 = vrot.slane %v550_v32, 2  ;;  %v536_v41 = vadd.f32 %v535_v33, %v534_v25  ;;  %v563_v42 = vrot.slane %v562_v34, 2 }
 0x11e   :  { %v519_v43 = vrot.slane %v518_v35, 1  ;;  %v546_v44 = vadd.f32 %v545_v36, %v544_v28  ;;  %v531_v45 = vrot.slane %v530_v37, 1  ;;  %v558_v46 = vadd.f32 %v557_v38, %v556_v30 }
 0x11f   :  { %v525_v47 = vrot.slane %v524_v39, 1  ;;  %v552_v48 = vadd.f32 %v551_v40, %v550_v32  ;;  %v537_v49 = vrot.slane %v536_v41, 1  ;;  %v564_v50 = vadd.f32 %v563_v42, %v562_v34 }
 0x120   :  { %v520_v51 = vadd.f32 %v519_v43, %v518_v35  ;;  %v547_v52 = vrot.slane %v546_v44, 1  ;;  %v532_v53 = vadd.f32 %v531_v45, %v530_v37  ;;  %v559_v54 = vrot.slane %v558_v46, 1 }
 0x121   :  { %v526_v55 = vadd.f32 %v525_v47, %v524_v39  ;;  %v553_v56 = vrot.slane %v552_v48, 1  ;;  %v538_v57 = vadd.f32 %v537_v49, %v536_v41  ;;  %v565_v58 = vrot.slane %v564_v50, 1 }
 0x122   :  { %v548_v59 = vadd.f32 %v547_v52, %v546_v44  ;;  %567 = vst [vmem:[%s1011_s3] sm:$0xff] %v520_v51  ;;  %v560_v60 = vadd.f32 %v559_v54, %v558_v46  ;;  %569 = vst [vmem:[%s1011_s3 + $0x10] sm:$0xff] %v532_v53 }
 0x123   :  { %v554_v61 = vadd.f32 %v553_v56, %v552_v48  ;;  %568 = vst [vmem:[%s1011_s3 + $0x8] sm:$0xff] %v526_v55  ;;  %v566_v62 = vadd.f32 %v565_v58, %v564_v50  ;;  %570 = vst [vmem:[%s1011_s3 + $0x18] sm:$0xff] %v538_v57 }
 0x124   :  { %571 = vst [vmem:[%s1012_s4] sm:$0xff] %v548_v59  ;;  %573 = vst [vmem:[%s1012_s4 + $0x10] sm:$0xff] %v560_v60 }
 0x125   :  { %572 = vst [vmem:[%s1012_s4 + $0x8] sm:$0xff] %v554_v61  ;;  %574 = vst [vmem:[%s1012_s4 + $0x18] sm:$0xff] %v566_v62 }

// kernel: resnet_forward.38
= control target key start
LH: loop header
LB: loop body
LE: loop exit
PB: predicated region body
PF: predicated region fallthrough
CT: control target
= control target key end

     0   :  { %s1647_s15 = smov 0   ;;  %s1649_s16 = smov 0   ;;  %s1831_s0 = inlined_call_operand.vmem [shape: bf16[8,2304], index: 0, kind: input, shape index: {}]   ;;  %s1832_s1 = inlined_call_operand.vmem [shape: bf16[2304,256], index: 1, kind: input, shape index: {}]   ;;  %s1833_s2 = inlined_call_operand.vmem [shape: f32[8,256], index: 2, kind: output, shape index: {0}]   ;;  %s1834_s3 = inlined_call_operand.vmem [shape: f32[8,256], index: 3, kind: output, shape index: {1}]   ;;  %s1835_s4 = inlined_call_operand.vmem [shape: f32[8,256], index: 4, kind: output, shape index: {2}]  }
   0x1   :  { %s1651_s17 = smov 0  }
   0x2 LB: > { %s27_s18 = sadd.s32 1, %s1615_s16  ;;  %p1305_p0 = scmp.ge.s32.totalorder %s1619_s17, 1  ;;  %s1619_s17 = sphi %s1651_s17, %s15_s17   ;;  %s1615_s16 = sphi %s1649_s16, %s1837_s16   ;;  %s1611_s15 = sphi %s1647_s15, %s1836_s15  }
   0x3   : > { %p28_p1 = scmp.ge.s32.totalorder %s27_s18, 3  ;;  %p218_p2 = scmp.lt.s32.totalorder %s1619_s17, 4 }
   0x5   : > { %s1839_s18 = smov (%p28_p1, %s27_s18), 0  ;;  %p219_p3 = pnand %p1305_p0, %p218_p2 }
   0x6   : > { %s280_s19 = smul.u32 (!%p219_p3), 6, %s1611_s15  ;;  %p1309_p6 = scmp.ne.s32.totalorder (!%p219_p3), %s1611_s15, 0 }
   0x7   : > { %222 = sbr.rel (%p219_p3) target bundleno = 393 (0x189), region = 28 }
   0x8   : > { %s290_s20 = smul.u32 (!%p219_p3), 96, %s1611_s15  ;;  %p283_p4 = scmp.lt.s32.totalorder (!%p219_p3), %s280_s19, 17 }
   0xa   : > { %p292_p5 = scmp.lt.s32.totalorder (!%p219_p3), %s290_s20, 287 }
   0xe   : > { %s1841_s19 = smov (!%p283_p4, %s280_s19), 17  ;;  %s1843_s20 = smov (!%p292_p5, %s290_s20), 287 }
   0xf   : > { %s1306_s21 = sshll.u32 %s1841_s19, 2  ;;  %s1421_s25 = sshll.u32 %s1843_s20, 3  ;;  %v1621_v0 = vmov (!%p1309_p6), 0.0  }
  0x10   : > { %s1672_s24 = scalar_lea.vmem %s1831_s0, %s1306_s21  ;;  %s1677_s28 = scalar_lea.vmem %s1832_s1, %s1421_s25  ;;  %336 = vst [vmem:[%s1833_s2] sm:$0xff] (!%p1309_p6), %v1621_v0  ;;  %337 = vst [vmem:[%s1833_s2 + $0x8] sm:$0xff] (!%p1309_p6), %v1621_v0 }
  0x11   : > { %335 = sbr.rel (%p1309_p6) target bundleno = 24 (0x18), region = 32 }
  0x18 PF: > { %v1447_v1 = vld [vmem:[%s1677_s28 + $0x4] ss:$8 sps:$4 sm:$0xff]   ;;  %v1451_v3 = vld [vmem:[%s1677_s28] ss:$8 sps:$4 sm:$0xff]   ;;  %v1453_v5 = vld [vmem:[%s1677_s28 + $0x14] ss:$8 sps:$4 sm:$0xff]  }
  0x19   : > { %v1449_v2 = vld [vmem:[%s1677_s28 + $0x104] ss:$8 sps:$4 sm:$0xff]   ;;  %940 = vmatprep.subr.bf16.mxu0 %v1447_v1  ;;  %v1452_v4 = vld [vmem:[%s1677_s28 + $0x100] ss:$8 sps:$4 sm:$0xff]   ;;  %v1455_v6 = vld [vmem:[%s1677_s28 + $0x114] ss:$8 sps:$4 sm:$0xff]  }
  0x1a   : > { %981 = vmatprep.subr.bf16.mxu1 %v1449_v2  ;;  %941 = vmatpush1.bf16.msra.mxu0 %v1451_v3  ;;  %v1457_v7 = vld [vmem:[%s1677_s28 + $0x10] ss:$8 sps:$4 sm:$0xff]   ;;  %v1459_v9 = vld [vmem:[%s1677_s28 + $0x24] ss:$8 sps:$4 sm:$0xff]   ;;  %v1463_v11 = vld [vmem:[%s1677_s28 + $0x20] ss:$8 sps:$4 sm:$0xff]  }
  0x1b   : > { %982 = vmatpush1.bf16.msra.mxu1 %v1452_v4  ;;  %942 = vmatprep.subr.bf16.mxu0 %v1453_v5  ;;  %v1458_v8 = vld [vmem:[%s1677_s28 + $0x110] ss:$8 sps:$4 sm:$0xff]   ;;  %v1461_v10 = vld [vmem:[%s1677_s28 + $0x124] ss:$8 sps:$4 sm:$0xff]   ;;  %v1464_v12 = vld [vmem:[%s1677_s28 + $0x120] ss:$8 sps:$4 sm:$0xff]  }
  0x1c   : > { %983 = vmatprep.subr.bf16.mxu1 %v1455_v6  ;;  %v1465_v13 = vld [vmem:[%s1677_s28 + $0x34] ss:$8 sps:$4 sm:$0xff]   ;;  %v1469_v15 = vld [vmem:[%s1677_s28 + $0x30] ss:$8 sps:$4 sm:$0xff]   ;;  %v1471_v17 = vld [vmem:[%s1677_s28 + $0x44] ss:$8 sps:$4 sm:$0xff]  }
  0x1d   : > { %v1467_v14 = vld [vmem:[%s1677_s28 + $0x134] ss:$8 sps:$4 sm:$0xff]   ;;  %v1470_v16 = vld [vmem:[%s1677_s28 + $0x130] ss:$8 sps:$4 sm:$0xff]   ;;  %v1473_v18 = vld [vmem:[%s1677_s28 + $0x144] ss:$8 sps:$4 sm:$0xff]  }
  0x1e   : > { %943 = vmatpush1.bf16.msra.mxu0 %v1457_v7  ;;  %v1475_v19 = vld [vmem:[%s1677_s28 + $0x40] ss:$8 sps:$4 sm:$0xff]   ;;  %v1477_v21 = vld [vmem:[%s1677_s28 + $0x54] ss:$8 sps:$4 sm:$0xff]   ;;  %v1481_v23 = vld [vmem:[%s1677_s28 + $0x50] ss:$8 sps:$4 sm:$0xff]  }
  0x1f   : > { %984 = vmatpush1.bf16.msra.mxu1 %v1458_v8  ;;  %944 = vmatprep.subr.bf16.mxu0 %v1459_v9  ;;  %v1476_v20 = vld [vmem:[%s1677_s28 + $0x140] ss:$8 sps:$4 sm:$0xff]   ;;  %v1479_v22 = vld [vmem:[%s1677_s28 + $0x154] ss:$8 sps:$4 sm:$0xff]   ;;  %v1482_v24 = vld [vmem:[%s1677_s28 + $0x150] ss:$8 sps:$4 sm:$0xff]  }
  0x20   : > { %985 = vmatprep.subr.bf16.mxu1 %v1461_v10  ;;  %v1483_v25 = vld [vmem:[%s1677_s28 + $0x64] ss:$8 sps:$4 sm:$0xff]   ;;  %v1487_v27 = vld [vmem:[%s1677_s28 + $0x60] ss:$8 sps:$4 sm:$0xff]   ;;  %v1489_v29 = vld [vmem:[%s1677_s28 + $0x74] ss:$8 sps:$4 sm:$0xff]  }
  0x21   : > { %v1485_v26 = vld [vmem:[%s1677_s28 + $0x164] ss:$8 sps:$4 sm:$0xff]   ;;  %v1488_v28 = vld [vmem:[%s1677_s28 + $0x160] ss:$8 sps:$4 sm:$0xff]   ;;  %v1491_v30 = vld [vmem:[%s1677_s28 + $0x174] ss:$8 sps:$4 sm:$0xff]  }
  0x22   : > { %945 = vmatpush1.bf16.msra.mxu0 %v1463_v11  ;;  %v1493_v31 = vld [vmem:[%s1677_s28 + $0x70] ss:$8 sps:$4 sm:$0xff]   ;;  %v1495_v33 = vld [vmem:[%s1677_s28 + $0x84] ss:$8 sps:$4 sm:$0xff]   ;;  %v1499_v35 = vld [vmem:[%s1677_s28 + $0x80] ss:$8 sps:$4 sm:$0xff]  }
  0x23   : > { %986 = vmatpush1.bf16.msra.mxu1 %v1464_v12  ;;  %946 = vmatprep.subr.bf16.mxu0 %v1465_v13  ;;  %v1494_v32 = vld [vmem:[%s1677_s28 + $0x170] ss:$8 sps:$4 sm:$0xff]   ;;  %v1497_v34 = vld [vmem:[%s1677_s28 + $0x184] ss:$8 sps:$4 sm:$0xff]   ;;  %v1500_v36 = vld [vmem:[%s1677_s28 + $0x180] ss:$8 sps:$4 sm:$0xff]  }
  0x24   : > { %987 = vmatprep.subr.bf16.mxu1 %v1467_v14  ;;  %v1501_v37 = vld [vmem:[%s1677_s28 + $0x94] ss:$8 sps:$4 sm:$0xff]   ;;  %v1505_v39 = vld [vmem:[%s1677_s28 + $0x90] ss:$8 sps:$4 sm:$0xff]   ;;  %v1507_v41 = vld [vmem:[%s1677_s28 + $0xa4] ss:$8 sps:$4 sm:$0xff]  }
  0x25   : > { %v1503_v38 = vld [vmem:[%s1677_s28 + $0x194] ss:$8 sps:$4 sm:$0xff]   ;;  %v1506_v40 = vld [vmem:[%s1677_s28 + $0x190] ss:$8 sps:$4 sm:$0xff]   ;;  %v1509_v42 = vld [vmem:[%s1677_s28 + $0x1a4] ss:$8 sps:$4 sm:$0xff]  }
  0x26   : > { %947 = vmatpush1.bf16.msra.mxu0 %v1469_v15  ;;  %v1511_v43 = vld [vmem:[%s1677_s28 + $0xa0] ss:$8 sps:$4 sm:$0xff]   ;;  %v1513_v45 = vld [vmem:[%s1677_s28 + $0xb4] ss:$8 sps:$4 sm:$0xff]   ;;  %v1517_v50 = vld [vmem:[%s1677_s28 + $0xb0] ss:$8 sps:$4 sm:$0xff]  }
  0x27   : > { %988 = vmatpush1.bf16.msra.mxu1 %v1470_v16  ;;  %948 = vmatprep.subr.bf16.mxu0 %v1471_v17  ;;  %v1512_v44 = vld [vmem:[%s1677_s28 + $0x1a0] ss:$8 sps:$4 sm:$0xff]   ;;  %v1515_v46 = vld [vmem:[%s1677_s28 + $0x1b4] ss:$8 sps:$4 sm:$0xff]   ;;  %v1518_v51 = vld [vmem:[%s1677_s28 + $0x1b0] ss:$8 sps:$4 sm:$0xff]  }
  0x28   : > { %989 = vmatprep.subr.bf16.mxu1 %v1473_v18  ;;  %v340_v47 = vld [vmem:[%s1672_s24] sm:$0xff]  ;;  %v341_v49 = vld [vmem:[%s1672_s24 + $0x8] sm:$0xff]  ;;  %v1525_v57 = vld [vmem:[%s1677_s28 + $0xd4] ss:$8 sps:$4 sm:$0xff]   ;;  %p1412_p7 = scmp.ne.s32.totalorder %s1611_s15, 2 }
  0x29   : > { %v1311_v48 = vcombine.high %v340_v47, %v340_v47  ;;  %v1313_v52 = vcombine.high %v341_v49, %v341_v49  ;;  %v1519_v53 = vld [vmem:[%s1677_s28 + $0xc4] ss:$8 sps:$4 sm:$0xff]   ;;  %v1523_v55 = vld [vmem:[%s1677_s28 + $0xc0] ss:$8 sps:$4 sm:$0xff]   ;;  %v1527_v58 = vld [vmem:[%s1677_s28 + $0x1d4] ss:$8 sps:$4 sm:$0xff]   ;;  %v1310_v6 = vcombine.low %v340_v47, %v340_v47  ;;  %v1312_v7 = vcombine.low %v341_v49, %v341_v49 }
  0x2a   : > { %949 = vmatpush1.bf16.msra.mxu0 %v1475_v19  ;;  %v1521_v54 = vld [vmem:[%s1677_s28 + $0x1c4] ss:$8 sps:$4 sm:$0xff]   ;;  %v1524_v56 = vld [vmem:[%s1677_s28 + $0x1c0] ss:$8 sps:$4 sm:$0xff]   ;;  %v1529_v59 = vld [vmem:[%s1677_s28 + $0xd0] ss:$8 sps:$4 sm:$0xff]  }
  0x2b   : > { %990 = vmatpush1.bf16.msra.mxu1 %v1476_v20  ;;  %950 = vmatprep.subr.bf16.mxu0 %v1477_v21  ;;  %v1530_v60 = vld [vmem:[%s1677_s28 + $0x1d0] ss:$8 sps:$4 sm:$0xff]   ;;  %v1531_v61 = vld [vmem:[%s1677_s28 + $0xe4] ss:$8 sps:$4 sm:$0xff]   ;;  %v1535_v63 = vld [vmem:[%s1677_s28 + $0xe0] ss:$8 sps:$4 sm:$0xff]  }
  0x2c   : > { %991 = vmatprep.subr.bf16.mxu1 %v1479_v22  ;;  %972 = vmatprep.mubr.bf16.mxu0 %v1311_v48  ;;  %v1533_v62 = vld [vmem:[%s1677_s28 + $0x1e4] ss:$8 sps:$4 sm:$0xff]   ;;  %v1536_v0 = vld [vmem:[%s1677_s28 + $0x1e0] ss:$8 sps:$4 sm:$0xff]   ;;  %v1537_v1 = vld [vmem:[%s1677_s28 + $0xf4] ss:$8 sps:$4 sm:$0xff]  }
  0x2d   : > { %1013 = vmatprep.mubr.bf16.mxu1 %v1313_v52  ;;  %v1539_v2 = vld [vmem:[%s1677_s28 + $0x1f4] ss:$8 sps:$4 sm:$0xff]   ;;  %v1541_v3 = vld [vmem:[%s1677_s28 + $0xf0] ss:$8 sps:$4 sm:$0xff]   ;;  %v1549_v5 = vld [vmem:[%s1677_s28 + $0x204] ss:$8 sps:$4 sm:$0xff]  }
  0x2e   : > { %951 = vmatpush1.bf16.msra.mxu0 %v1481_v23  ;;  %v1542_v4 = vld [vmem:[%s1677_s28 + $0x1f0] ss:$8 sps:$4 sm:$0xff]   ;;  %v1547_v8 = vld [vmem:[%s1677_s28 + $0x200] ss:$8 sps:$4 sm:$0xff]   ;;  %v1552_v10 = vld [vmem:[%s1677_s28 + $0x214] ss:$8 sps:$4 sm:$0xff]  }
  0x2f   : > { %992 = vmatpush1.bf16.msra.mxu1 %v1482_v24  ;;  %952 = vmatprep.subr.bf16.mxu0 %v1483_v25  ;;  %v1755_v9 = vld [vmem:[%s1672_s24 + $0x10] sm:$0xff]  ;;  %v1555_v13 = vld [vmem:[%s1677_s28 + $0x224] ss:$8 sps:$4 sm:$0xff]   ;;  %v1553_v14 = vld [vmem:[%s1677_s28 + $0x220] ss:$8 sps:$4 sm:$0xff]  }
  0x30   : > { %993 = vmatprep.subr.bf16.mxu1 %v1485_v26  ;;  %v1315_v11 = vcombine.high %v1755_v9, %v1755_v9  ;;  %v1550_v12 = vld [vmem:[%s1677_s28 + $0x210] ss:$8 sps:$4 sm:$0xff]   ;;  %v1558_v15 = vld [vmem:[%s1677_s28 + $0x234] ss:$8 sps:$4 sm:$0xff]   ;;  %v1561_v17 = vld [vmem:[%s1677_s28 + $0x244] ss:$8 sps:$4 sm:$0xff]  }
  0x31   : > { %v1556_v16 = vld [vmem:[%s1677_s28 + $0x230] ss:$8 sps:$4 sm:$0xff]   ;;  %v1559_v18 = vld [vmem:[%s1677_s28 + $0x240] ss:$8 sps:$4 sm:$0xff]   ;;  %v1564_v19 = vld [vmem:[%s1677_s28 + $0x254] ss:$8 sps:$4 sm:$0xff]  }
  0x32   : > { %953 = vmatpush1.bf16.msra.mxu0 %v1487_v27  ;;  %v1562_v20 = vld [vmem:[%s1677_s28 + $0x250] ss:$8 sps:$4 sm:$0xff]   ;;  %v1567_v21 = vld [vmem:[%s1677_s28 + $0x264] ss:$8 sps:$4 sm:$0xff]   ;;  %v1565_v22 = vld [vmem:[%s1677_s28 + $0x260] ss:$8 sps:$4 sm:$0xff]  }
  0x33   : > { %994 = vmatpush1.bf16.msra.mxu1 %v1488_v28  ;;  %954 = vmatprep.subr.bf16.mxu0 %v1489_v29  ;;  %v1570_v23 = vld [vmem:[%s1677_s28 + $0x274] ss:$8 sps:$4 sm:$0xff]   ;;  %v1568_v24 = vld [vmem:[%s1677_s28 + $0x270] ss:$8 sps:$4 sm:$0xff]   ;;  %v1573_v25 = vld [vmem:[%s1677_s28 + $0x284] ss:$8 sps:$4 sm:$0xff]  }
  0x34   : > { %995 = vmatprep.subr.bf16.mxu1 %v1491_v30  ;;  %v1571_v26 = vld [vmem:[%s1677_s28 + $0x280] ss:$8 sps:$4 sm:$0xff]   ;;  %v1576_v27 = vld [vmem:[%s1677_s28 + $0x294] ss:$8 sps:$4 sm:$0xff]   ;;  %v1574_v28 = vld [vmem:[%s1677_s28 + $0x290] ss:$8 sps:$4 sm:$0xff]  }
  0x35   : > { %v1579_v29 = vld [vmem:[%s1677_s28 + $0x2a4] ss:$8 sps:$4 sm:$0xff]   ;;  %v1577_v30 = vld [vmem:[%s1677_s28 + $0x2a0] ss:$8 sps:$4 sm:$0xff]  }
  0x36   : > { %955 = vmatpush1.bf16.msra.mxu0 %v1493_v31  ;;  %v1582_v31 = vld [vmem:[%s1677_s28 + $0x2b4] ss:$8 sps:$4 sm:$0xff]   ;;  %v338_v52 = vld [vmem:[%s1833_s2] sm:$0xff] }
  0x37   : > { %996 = vmatpush1.bf16.msra.mxu1 %v1494_v32  ;;  %956 = vmatprep.subr.bf16.mxu0 %v1495_v33  ;;  %v1580_v32 = vld [vmem:[%s1677_s28 + $0x2b0] ss:$8 sps:$4 sm:$0xff]   ;;  %v1585_v33 = vld [vmem:[%s1677_s28 + $0x2c4] ss:$8 sps:$4 sm:$0xff]  }
  0x38   : > { %997 = vmatprep.subr.bf16.mxu1 %v1497_v34  ;;  %v1583_v34 = vld [vmem:[%s1677_s28 + $0x2c0] ss:$8 sps:$4 sm:$0xff]  }
  0x3a   : > { %957 = vmatpush1.bf16.msra.mxu0 %v1499_v35  ;;  %v1588_v35 = vld [vmem:[%s1677_s28 + $0x2d4] ss:$8 sps:$4 sm:$0xff]  }
  0x3b   : > { %998 = vmatpush1.bf16.msra.mxu1 %v1500_v36  ;;  %958 = vmatprep.subr.bf16.mxu0 %v1501_v37  ;;  %v1586_v36 = vld [vmem:[%s1677_s28 + $0x2d0] ss:$8 sps:$4 sm:$0xff]   ;;  %v1591_v37 = vld [vmem:[%s1677_s28 + $0x2e4] ss:$8 sps:$4 sm:$0xff]  }
  0x3c   : > { %999 = vmatprep.subr.bf16.mxu1 %v1503_v38  ;;  %v1589_v38 = vld [vmem:[%s1677_s28 + $0x2e0] ss:$8 sps:$4 sm:$0xff]  }
  0x3e   : > { %959 = vmatpush1.bf16.msra.mxu0 %v1505_v39  ;;  %v1594_v39 = vld [vmem:[%s1677_s28 + $0x2f4] ss:$8 sps:$4 sm:$0xff]  }
  0x3f   : > { %1000 = vmatpush1.bf16.msra.mxu1 %v1506_v40  ;;  %960 = vmatprep.subr.bf16.mxu0 %v1507_v41  ;;  %v1592_v40 = vld [vmem:[%s1677_s28 + $0x2f0] ss:$8 sps:$4 sm:$0xff]   ;;  %v1314_v41 = vcombine.low %v1755_v9, %v1755_v9 }
  0x40   : > { %1001 = vmatprep.subr.bf16.mxu1 %v1509_v42 }
  0x42   : > { %961 = vmatpush1.bf16.msra.mxu0 %v1511_v43 }
  0x43   : > { %1002 = vmatpush1.bf16.msra.mxu1 %v1512_v44  ;;  %962 = vmatprep.subr.bf16.mxu0 %v1513_v45 }
  0x44   : > { %1003 = vmatprep.subr.bf16.mxu1 %v1515_v46 }
  0x46   : > { %963 = vmatpush1.bf16.msra.mxu0 %v1517_v50 }
  0x47   : > { %1004 = vmatpush1.bf16.msra.mxu1 %v1518_v51  ;;  %964 = vmatprep.subr.bf16.mxu0 %v1519_v53 }
  0x48   : > { %1005 = vmatprep.subr.bf16.mxu1 %v1521_v54 }
  0x4a   : > { %965 = vmatpush1.bf16.msra.mxu0 %v1523_v55  ;;  %v339_v55 = vld [vmem:[%s1833_s2 + $0x8] sm:$0xff] }
  0x4b   : > { %1006 = vmatpush1.bf16.msra.mxu1 %v1524_v56  ;;  %966 = vmatprep.subr.bf16.mxu0 %v1525_v57 }
  0x4c   : > { %1007 = vmatprep.subr.bf16.mxu1 %v1527_v58 }
  0x4e   : > { %967 = vmatpush1.bf16.msra.mxu0 %v1529_v59 }
  0x4f   : > { %1008 = vmatpush1.bf16.msra.mxu1 %v1530_v60  ;;  %968 = vmatprep.subr.bf16.mxu0 %v1531_v61 }
  0x50   : > { %1009 = vmatprep.subr.bf16.mxu1 %v1533_v62 }
  0x52   : > { %969 = vmatpush1.bf16.msra.mxu0 %v1535_v63 }
  0x53   : > { %1010 = vmatpush1.bf16.msra.mxu1 %v1536_v0  ;;  %970 = vmatprep.subr.bf16.mxu0 %v1537_v1 }
  0x54   : > { %1011 = vmatprep.subr.bf16.mxu1 %v1539_v2 }
  0x56   : > { %971 = vmatpush1.bf16.msra.mxu0 %v1541_v3 }
  0x57   : > { %1012 = vmatpush1.bf16.msra.mxu1 %v1542_v4  ;;  %1022 = vmatprep.subr.bf16.mxu0 %v1549_v5 }
  0x59   : > { %973 = vmatmul.mubr.bf16.vlgmr.msra.gmra.mrb[0].mxu0 %v1310_v6 }
  0x5a   : > { %1014 = vmatmul.mubr.bf16.vlgmr.msra.gmra.mrb[0].mxu1 %v1312_v7  ;;  %1023 = vmatpush1.bf16.msra.mxu0 %v1547_v8 }
  0x5b   : > { %1054 = vmatprep.mubr.bf16.mxu0 %v1315_v11  ;;  %1024 = vmatprep.subr.bf16.mxu0 %v1552_v10 }
  0x5e   : > { %1025 = vmatpush1.bf16.msra.mxu0 %v1550_v12 }
  0x5f   : > { %1026 = vmatprep.subr.bf16.mxu0 %v1555_v13 }
  0x62   : > { %1027 = vmatpush1.bf16.msra.mxu0 %v1553_v14 }
  0x63   : > { %1028 = vmatprep.subr.bf16.mxu0 %v1558_v15 }
  0x66   : > { %1029 = vmatpush1.bf16.msra.mxu0 %v1556_v16 }
  0x67   : > { %1030 = vmatprep.subr.bf16.mxu0 %v1561_v17 }
  0x6a   : > { %1031 = vmatpush1.bf16.msra.mxu0 %v1559_v18 }
  0x6b   : > { %1032 = vmatprep.subr.bf16.mxu0 %v1564_v19 }
  0x6e   : > { %1033 = vmatpush1.bf16.msra.mxu0 %v1562_v20 }
  0x6f   : > { %1034 = vmatprep.subr.bf16.mxu0 %v1567_v21 }
  0x72   : > { %1035 = vmatpush1.bf16.msra.mxu0 %v1565_v22 }
  0x73   : > { %1036 = vmatprep.subr.bf16.mxu0 %v1570_v23 }
  0x76   : > { %1037 = vmatpush1.bf16.msra.mxu0 %v1568_v24 }
  0x77   : > { %1038 = vmatprep.subr.bf16.mxu0 %v1573_v25 }
  0x7a   : > { %1039 = vmatpush1.bf16.msra.mxu0 %v1571_v26 }
  0x7b   : > { %1040 = vmatprep.subr.bf16.mxu0 %v1576_v27 }
  0x7e   : > { %1041 = vmatpush1.bf16.msra.mxu0 %v1574_v28 }
  0x7f   : > { %1042 = vmatprep.subr.bf16.mxu0 %v1579_v29 }
  0x82   : > { %1043 = vmatpush1.bf16.msra.mxu0 %v1577_v30 }
  0x83   : > { %1044 = vmatprep.subr.bf16.mxu0 %v1582_v31 }
  0x86   : > { %1045 = vmatpush1.bf16.msra.mxu0 %v1580_v32 }
  0x87   : > { %1046 = vmatprep.subr.bf16.mxu0 %v1585_v33 }
  0x8a   : > { %1047 = vmatpush1.bf16.msra.mxu0 %v1583_v34 }
  0x8b   : > { %1048 = vmatprep.subr.bf16.mxu0 %v1588_v35 }
  0x8e   : > { %1049 = vmatpush1.bf16.msra.mxu0 %v1586_v36 }
  0x8f   : > { %1050 = vmatprep.subr.bf16.mxu0 %v1591_v37 }
  0x92   : > { %1051 = vmatpush1.bf16.msra.mxu0 %v1589_v38 }
  0x93   : > { %1052 = vmatprep.subr.bf16.mxu0 %v1594_v39 }
  0x96   : > { %1053 = vmatpush1.bf16.msra.mxu0 %v1592_v40 }
  0x99   : > { %1055 = vmatmul.mubr.bf16.vlgmr.msra.gmra.mrb[4].mxu0 %v1314_v41 }
 0x12c   : > { %v974_v42 = vpop.f32.mrb[0].mxu0 }
 0x12d   : > { %v1015_v43 = vpop.f32.mrb[0].mxu1  ;;  %v976_v45 = vpop.f32.mrb[1].mxu0 }
 0x12e   : > { %v1016_v44 = vadd.f32 %v1015_v43, %v974_v42  ;;  %v1017_v46 = vpop.f32.mrb[1].mxu1  ;;  %v978_v48 = vpop.f32.mrb[2].mxu0 }
 0x12f   : > { %v1018_v47 = vadd.f32 %v1017_v46, %v976_v45  ;;  %v1019_v49 = vpop.f32.mrb[2].mxu1  ;;  %v979_v50 = vpop.f32.mrb[3].mxu0 }
 0x130   : > { %v1020_v51 = vpop.f32.mrb[3].mxu1 }
 0x16c   : > { %v1056_v53 = vpop.f32.mrb[4].mxu0  ;;  %1070 = sbr.rel (%p1412_p7) target bundleno = 393 (0x189), region = 36 }
 0x16d   : > { %v1057_v54 = vadd.f32 %v1056_v53, %v1016_v44  ;;  %v1058_v56 = vpop.f32.mrb[5].mxu0 }
 0x16e   : > { %v1059_v57 = vadd.f32 %v1058_v56, %v1018_v47  ;;  %v1060_v58 = vpop.f32.mrb[6].mxu0 }
 0x16f   : > { %v1063_v59 = vadd.f32 %v1057_v54, %v338_v52  ;;  %v1061_v60 = vpop.f32.mrb[7].mxu0 }
 0x170   : > { %v1064_v61 = vadd.f32 %v1059_v57, %v339_v55 }
 0x171   : > { %1065 = vst [vmem:[%s1833_s2] sm:$0xff] %v1063_v59 }
 0x172   : > { %1066 = vst [vmem:[%s1833_s2 + $0x8] sm:$0xff] %v1064_v61 }
 0x178   : > { %v1071_v62 = vld [vmem:[%s1833_s2] sm:$0xff] }
 0x179   : > { %v1072_v63 = vld [vmem:[%s1833_s2 + $0x8] sm:$0xff]  ;;  %v1073_v0 = vrot.slane %v1071_v62, 4  ;;  %v1085_v2 = vmul.f32 %v1071_v62, %v1071_v62 }
 0x17a   : > { %v1079_v1 = vrot.slane %v1072_v63, 4  ;;  %v1086_v3 = vmul.f32 %v1072_v63, %v1072_v63 }
 0x17b   : > { %v1074_v4 = vadd.f32 %v1073_v0, %v1071_v62  ;;  %v1087_v6 = vrot.slane %v1085_v2, 4 }
 0x17c   : > { %v1080_v5 = vadd.f32 %v1079_v1, %v1072_v63  ;;  %v1093_v7 = vrot.slane %v1086_v3, 4 }
 0x17d   : > { %v1075_v8 = vrot.slane %v1074_v4, 2  ;;  %v1088_v10 = vadd.f32 %v1087_v6, %v1085_v2 }
 0x17e   : > { %v1081_v9 = vrot.slane %v1080_v5, 2  ;;  %v1094_v11 = vadd.f32 %v1093_v7, %v1086_v3 }
 0x17f   : > { %v1076_v12 = vadd.f32 %v1075_v8, %v1074_v4  ;;  %v1089_v14 = vrot.slane %v1088_v10, 2 }
 0x180   : > { %v1082_v13 = vadd.f32 %v1081_v9, %v1080_v5  ;;  %v1095_v15 = vrot.slane %v1094_v11, 2 }
 0x181   : > { %v1077_v16 = vrot.slane %v1076_v12, 1  ;;  %v1090_v18 = vadd.f32 %v1089_v14, %v1088_v10 }
 0x182   : > { %v1083_v17 = vrot.slane %v1082_v13, 1  ;;  %v1096_v19 = vadd.f32 %v1095_v15, %v1094_v11 }
 0x183   : > { %v1078_v20 = vadd.f32 %v1077_v16, %v1076_v12  ;;  %v1091_v22 = vrot.slane %v1090_v18, 1 }
 0x184   : > { %v1084_v21 = vadd.f32 %v1083_v17, %v1082_v13  ;;  %v1097_v23 = vrot.slane %v1096_v19, 1 }
 0x185   : > { %1099 = vst [vmem:[%s1834_s3] sm:$0xff] %v1078_v20  ;;  %v1092_v24 = vadd.f32 %v1091_v22, %v1090_v18 }
 0x186   : > { %1100 = vst [vmem:[%s1834_s3 + $0x8] sm:$0xff] %v1084_v21  ;;  %v1098_v25 = vadd.f32 %v1097_v23, %v1096_v19 }
 0x187   : > { %1101 = vst [vmem:[%s1835_s4] sm:$0xff] %v1092_v24 }
 0x188   : > { %1102 = vst [vmem:[%s1835_s4 + $0x8] sm:$0xff] %v1098_v25 }
 0x189 PF: > { %s15_s17 = sadd.s32 1, %s1619_s17   ;;  %s1836_s15 = smov %s1615_s16 }
 0x18a   : > { %p12_p8 = scmp.ge.s32.totalorder %s15_s17, 5   ;;  %s1837_s16 = smov %s1839_s18 }
 0x18c   :  { %14 = sbr.rel (!%p12_p8) target bundleno = 2 (0x2), region = 93 }

// kernel: resnet_forward.42
= control target key start
LH: loop header
LB: loop body
LE: loop exit
PB: predicated region body
PF: predicated region fallthrough
CT: control target
= control target key end

     0   :  { %v20_v0 = vlaneseq  ;;  %s132_s1 = inlined_call_operand.vmem [shape: f32[1,512], index: 1, kind: input, shape index: {}]   ;;  %s133_s2 = inlined_call_operand.vmem [shape: f32[1,512], index: 2, kind: input, shape index: {}]   ;;  %s134_s0 = inlined_call_operand.vmem [shape: f32[8,512], index: 0, kind: input, shape index: {}]   ;;  %s135_s3 = inlined_call_operand.vmem [shape: f32[8,512], index: 3, kind: output, shape index: {}]  }
   0x1   :  { %v18_v2 = vld [vmem:[%s132_s1] sm:$0xf]  ;;  %v15_v9 = vld [vmem:[%s134_s0 + $0x8] sm:$0xff]  ;;  %v16_v14 = vld [vmem:[%s134_s0 + $0x10] sm:$0xff] }
   0x2   :  { %v21_v1 = vshrl.u32 %v20_v0, 7  ;;  %v44_v3 = vld [vmem:[%s133_s2] sm:$0xf]  ;;  %v17_v15 = vld [vmem:[%s134_s0 + $0x18] sm:$0xff] }
   0x3   :  { %v14_v8 = vld [vmem:[%s134_s0] sm:$0xff] }
   0x4   :  { %v22_v4 = vsub.s32 0, %v21_v1  ;;  %v26_v5 = vsub.s32 1, %v21_v1  ;;  %v30_v6 = vsub.s32 2, %v21_v1  ;;  %v34_v7 = vsub.s32 3, %v21_v1 }
   0x6   :  { %v23_v10 = vrot.slane %v18_v2, %v22_v4  ;;  %v49_v11 = vrot.slane %v44_v3, %v22_v4  ;;  %v27_v12 = vrot.slane %v18_v2, %v26_v5  ;;  %v53_v13 = vrot.slane %v44_v3, %v26_v5 }
   0x7   :  { %v31_v16 = vrot.slane %v18_v2, %v30_v6  ;;  %v57_v17 = vrot.slane %v44_v3, %v30_v6  ;;  %v35_v18 = vrot.slane %v18_v2, %v34_v7  ;;  %v61_v19 = vrot.slane %v44_v3, %v34_v7 }
   0x8   :  { %v40_v20 = vmul.f32 %v23_v10, %v14_v8  ;;  %v41_v21 = vmul.f32 %v27_v12, %v15_v9 }
   0x9   :  { %v42_v22 = vmul.f32 %v31_v16, %v16_v14  ;;  %v43_v23 = vmul.f32 %v35_v18, %v17_v15 }
   0xa   :  { %v66_v24 = vadd.f32 %v49_v11, %v40_v20  ;;  %v67_v25 = vadd.f32 %v53_v13, %v41_v21 }
   0xb   :  { %v68_v26 = vadd.f32 %v57_v17, %v42_v22  ;;  %v69_v27 = vadd.f32 %v61_v19, %v43_v23 }
   0xc   :  { %v70_v28 = vmax.f32 %v66_v24, 0.0  ;;  %v71_v29 = vmax.f32 %v67_v25, 0.0 }
   0xd   :  { %v72_v30 = vmax.f32 %v68_v26, 0.0  ;;  %v73_v31 = vmax.f32 %v69_v27, 0.0 }
   0xe   :  { %74 = vst [vmem:[%s135_s3] sm:$0xff] %v70_v28  ;;  %75 = vst [vmem:[%s135_s3 + $0x8] sm:$0xff] %v71_v29 }
   0xf   :  { %76 = vst [vmem:[%s135_s3 + $0x10] sm:$0xff] %v72_v30  ;;  %77 = vst [vmem:[%s135_s3 + $0x18] sm:$0xff] %v73_v31 }

// kernel: resnet_forward.45
= control target key start
LH: loop header
LB: loop body
LE: loop exit
PB: predicated region body
PF: predicated region fallthrough
CT: control target
= control target key end

     0   :  { %v29_v0 = vlaneseq  ;;  %s234_s1 = inlined_call_operand.vmem [shape: f32[1,512], index: 1, kind: input, shape index: {}]   ;;  %s235_s2 = inlined_call_operand.vmem [shape: f32[1,512], index: 2, kind: input, shape index: {}]   ;;  %s236_s4 = inlined_call_operand.vmem [shape: f32[1,512], index: 4, kind: input, shape index: {}]   ;;  %s237_s0 = inlined_call_operand.vmem [shape: f32[8,512], index: 0, kind: input, shape index: {}]   ;;  %s238_s3 = inlined_call_operand.vmem [shape: f32[8,512], index: 3, kind: input, shape index: {}]   ;;  %s239_s5 = inlined_call_operand.vmem [shape: f32[1,512], index: 5, kind: input, shape index: {}]   ;;  %s240_s6 = inlined_call_operand.vmem [shape: f32[8,512], index: 6, kind: output, shape index: {}]  }
   0x1   :  { %v27_v2 = vld [vmem:[%s234_s1] sm:$0xf]  ;;  %v24_v14 = vld [vmem:[%s237_s0 + $0x8] sm:$0xff]  ;;  %v25_v20 = vld [vmem:[%s237_s0 + $0x10] sm:$0xff] }
   0x2   :  { %v30_v1 = vshrl.u32 %v29_v0, 7  ;;  %v53_v3 = vld [vmem:[%s235_s2] sm:$0xf]  ;;  %v80_v15 = vld [vmem:[%s238_s3 + $0x8] sm:$0xff]  ;;  %v81_v25 = vld [vmem:[%s238_s3 + $0x10] sm:$0xff] }
   0x3   :  { %v83_v4 = vld [vmem:[%s236_s4] sm:$0xf]  ;;  %v26_v30 = vld [vmem:[%s237_s0 + $0x18] sm:$0xff] }
   0x4   :  { %v31_v5 = vsub.s32 0, %v30_v1  ;;  %v35_v6 = vsub.s32 1, %v30_v1  ;;  %v39_v7 = vsub.s32 2, %v30_v1  ;;  %v23_v8 = vld [vmem:[%s237_s0] sm:$0xff]  ;;  %v43_v16 = vsub.s32 3, %v30_v1  ;;  %v82_v35 = vld [vmem:[%s238_s3 + $0x18] sm:$0xff] }
   0x5   :  { %v79_v9 = vld [vmem:[%s238_s3] sm:$0xff] }
   0x6   :  { %v32_v10 = vrot.slane %v27_v2, %v31_v5  ;;  %v58_v11 = vrot.slane %v53_v3, %v31_v5  ;;  %v88_v12 = vrot.slane %v83_v4, %v31_v5  ;;  %v113_v13 = vld [vmem:[%s239_s5] sm:$0xf]  ;;  %v36_v17 = vrot.slane %v27_v2, %v35_v6 }
   0x7   :  { %v62_v18 = vrot.slane %v53_v3, %v35_v6  ;;  %v92_v19 = vrot.slane %v83_v4, %v35_v6  ;;  %v40_v23 = vrot.slane %v27_v2, %v39_v7  ;;  %v66_v24 = vrot.slane %v53_v3, %v39_v7 }
   0x8   :  { %v49_v21 = vmul.f32 %v32_v10, %v23_v8  ;;  %v105_v22 = vmul.f32 %v88_v12, %v79_v9  ;;  %v118_v26 = vrot.slane %v113_v13, %v31_v5  ;;  %v50_v27 = vmul.f32 %v36_v17, %v24_v14 }
   0x9   :  { %v106_v28 = vmul.f32 %v92_v19, %v80_v15  ;;  %v96_v29 = vrot.slane %v83_v4, %v39_v7  ;;  %v51_v32 = vmul.f32 %v40_v23, %v25_v20  ;;  %v44_v33 = vrot.slane %v27_v2, %v43_v16 }
   0xa   :  { %v75_v31 = vadd.f32 %v58_v11, %v49_v21  ;;  %v70_v34 = vrot.slane %v53_v3, %v43_v16  ;;  %v76_v36 = vadd.f32 %v62_v18, %v50_v27  ;;  %v122_v37 = vrot.slane %v113_v13, %v35_v6 }
   0xb   :  { %v107_v38 = vmul.f32 %v96_v29, %v81_v25  ;;  %v100_v39 = vrot.slane %v83_v4, %v43_v16  ;;  %v77_v41 = vadd.f32 %v66_v24, %v51_v32  ;;  %v126_v42 = vrot.slane %v113_v13, %v39_v7 }
   0xc   :  { %v109_v40 = vadd.f32 %v105_v22, %v75_v31  ;;  %v52_v43 = vmul.f32 %v44_v33, %v26_v30  ;;  %v110_v44 = vadd.f32 %v106_v28, %v76_v36  ;;  %v130_v49 = vrot.slane %v113_v13, %v43_v16 }
   0xd   :  { %v108_v45 = vmul.f32 %v100_v39, %v82_v35  ;;  %v111_v47 = vadd.f32 %v107_v38, %v77_v41 }
   0xe   :  { %v135_v46 = vadd.f32 %v118_v26, %v109_v40  ;;  %v78_v48 = vadd.f32 %v70_v34, %v52_v43  ;;  %v136_v50 = vadd.f32 %v122_v37, %v110_v44 }
   0xf   :  { %v137_v52 = vadd.f32 %v126_v42, %v111_v47 }
  0x10   :  { %v139_v51 = vmax.f32 %v135_v46, 0.0  ;;  %v112_v53 = vadd.f32 %v108_v45, %v78_v48  ;;  %v140_v54 = vmax.f32 %v136_v50, 0.0 }
  0x11   :  { %v141_v55 = vmax.f32 %v137_v52, 0.0 }
  0x12   :  { %143 = vst [vmem:[%s240_s6] sm:$0xff] %v139_v51  ;;  %v138_v56 = vadd.f32 %v130_v49, %v112_v53  ;;  %144 = vst [vmem:[%s240_s6 + $0x8] sm:$0xff] %v140_v54 }
  0x13   :  { %145 = vst [vmem:[%s240_s6 + $0x10] sm:$0xff] %v141_v55 }
  0x14   :  { %v142_v57 = vmax.f32 %v138_v56, 0.0 }
  0x16   :  { %146 = vst [vmem:[%s240_s6 + $0x18] sm:$0xff] %v142_v57 }

// kernel: resnet_forward.41
= control target key start
LH: loop header
LB: loop body
LE: loop exit
PB: predicated region body
PF: predicated region fallthrough
CT: control target
= control target key end

     0   :  { %s2626_s15 = smov 0   ;;  %s2628_s16 = smov 0   ;;  %s2966_s0 = inlined_call_operand.vmem [shape: bf16[8,2304], index: 0, kind: input, shape index: {}]   ;;  %s2967_s1 = inlined_call_operand.vmem [shape: bf16[2304,512], index: 1, kind: input, shape index: {}]   ;;  %s2968_s2 = inlined_call_operand.vmem [shape: f32[8,512], index: 2, kind: output, shape index: {0}]   ;;  %s2969_s3 = inlined_call_operand.vmem [shape: f32[8,512], index: 3, kind: output, shape index: {1}]   ;;  %s2970_s4 = inlined_call_operand.vmem [shape: f32[8,512], index: 4, kind: output, shape index: {2}]  }
   0x1   :  { %s2630_s17 = smov 0  }
   0x2 LB: > { %s27_s18 = sadd.s32 1, %s2594_s16  ;;  %p2044_p0 = scmp.ge.s32.totalorder %s2598_s17, 1  ;;  %s2598_s17 = sphi %s2630_s17, %s15_s17   ;;  %s2594_s16 = sphi %s2628_s16, %s2972_s16   ;;  %s2590_s15 = sphi %s2626_s15, %s2971_s15  }
   0x3   : > { %p28_p1 = scmp.ge.s32.totalorder %s27_s18, 3  ;;  %p218_p2 = scmp.lt.s32.totalorder %s2598_s17, 4 }
   0x5   : > { %s2974_s18 = smov (%p28_p1, %s27_s18), 0  ;;  %p219_p3 = pnand %p2044_p0, %p218_p2 }
   0x6   : > { %s280_s19 = smul.u32 (!%p219_p3), 6, %s2590_s15  ;;  %p2048_p6 = scmp.ne.s32.totalorder (!%p219_p3), %s2590_s15, 0 }
   0x7   : > { %222 = sbr.rel (%p219_p3) target bundleno = 459 (0x1cb), region = 28 }
   0x8   : > { %s290_s20 = smul.u32 (!%p219_p3), 96, %s2590_s15  ;;  %p283_p4 = scmp.lt.s32.totalorder (!%p219_p3), %s280_s19, 17 }
   0xa   : > { %p292_p5 = scmp.lt.s32.totalorder (!%p219_p3), %s290_s20, 287 }
   0xe   : > { %s2976_s19 = smov (!%p283_p4, %s280_s19), 17  ;;  %s2978_s20 = smov (!%p292_p5, %s290_s20), 287 }
   0xf   : > { %s2045_s21 = sshll.u32 %s2976_s19, 2  ;;  %s2256_s25 = sshll.u32 %s2978_s20, 4  ;;  %v2600_v0 = vmov (!%p2048_p6), 0.0  }
  0x10   : > { %s2651_s24 = scalar_lea.vmem %s2966_s0, %s2045_s21  ;;  %s2656_s28 = scalar_lea.vmem %s2967_s1, %s2256_s25  ;;  %336 = vst [vmem:[%s2968_s2] sm:$0xff] (!%p2048_p6), %v2600_v0  ;;  %337 = vst [vmem:[%s2968_s2 + $0x8] sm:$0xff] (!%p2048_p6), %v2600_v0 }
  0x11   : > { %335 = sbr.rel (%p2048_p6) target bundleno = 24 (0x18), region = 32  ;;  %338 = vst [vmem:[%s2968_s2 + $0x10] sm:$0xff] (!%p2048_p6), %v2600_v0  ;;  %339 = vst [vmem:[%s2968_s2 + $0x18] sm:$0xff] (!%p2048_p6), %v2600_v0 }
  0x18 PF: > { %v2282_v1 = vld [vmem:[%s2656_s28 + $0x4] ss:$16 sps:$4 sm:$0xff]   ;;  %v2286_v3 = vld [vmem:[%s2656_s28] ss:$16 sps:$4 sm:$0xff]   ;;  %v345_v49 = vld [vmem:[%s2651_s24 + $0x8] sm:$0xff]  ;;  %p2247_p7 = scmp.ne.s32.totalorder %s2590_s15, 2 }
  0x19   : > { %v2284_v2 = vld [vmem:[%s2656_s28 + $0x204] ss:$16 sps:$4 sm:$0xff]   ;;  %1520 = vmatprep.subr.bf16.mxu0 %v2282_v1  ;;  %v2287_v4 = vld [vmem:[%s2656_s28 + $0x200] ss:$16 sps:$4 sm:$0xff]   ;;  %v2723_v52 = vcombine.high %v345_v49, %v345_v49 }
  0x1a   : > { %1561 = vmatprep.subr.bf16.mxu1 %v2284_v2  ;;  %v2288_v5 = vld [vmem:[%s2656_s28 + $0x24] ss:$16 sps:$4 sm:$0xff]   ;;  %1521 = vmatpush1.bf16.msra.mxu0 %v2286_v3  ;;  %v2292_v7 = vld [vmem:[%s2656_s28 + $0x20] ss:$16 sps:$4 sm:$0xff]  }
  0x1b   : > { %1562 = vmatpush1.bf16.msra.mxu1 %v2287_v4  ;;  %v2290_v6 = vld [vmem:[%s2656_s28 + $0x224] ss:$16 sps:$4 sm:$0xff]   ;;  %1522 = vmatprep.subr.bf16.mxu0 %v2288_v5  ;;  %v2293_v8 = vld [vmem:[%s2656_s28 + $0x220] ss:$16 sps:$4 sm:$0xff]  }
  0x1c   : > { %1563 = vmatprep.subr.bf16.mxu1 %v2290_v6  ;;  %v2294_v9 = vld [vmem:[%s2656_s28 + $0x44] ss:$16 sps:$4 sm:$0xff]   ;;  %v2298_v11 = vld [vmem:[%s2656_s28 + $0x40] ss:$16 sps:$4 sm:$0xff]   ;;  %1593 = vmatprep.mubr.bf16.mxu1 %v2723_v52  ;;  %v2387_v6 = vld [vmem:[%s2656_s28 + $0xc] ss:$16 sps:$4 sm:$0xff]  }
  0x1d   : > { %v2296_v10 = vld [vmem:[%s2656_s28 + $0x244] ss:$16 sps:$4 sm:$0xff]   ;;  %v2299_v12 = vld [vmem:[%s2656_s28 + $0x240] ss:$16 sps:$4 sm:$0xff]  }
  0x1e   : > { %1523 = vmatpush1.bf16.msra.mxu0 %v2292_v7  ;;  %v2300_v13 = vld [vmem:[%s2656_s28 + $0x64] ss:$16 sps:$4 sm:$0xff]   ;;  %v2304_v15 = vld [vmem:[%s2656_s28 + $0x60] ss:$16 sps:$4 sm:$0xff]  }
  0x1f   : > { %1564 = vmatpush1.bf16.msra.mxu1 %v2293_v8  ;;  %1524 = vmatprep.subr.bf16.mxu0 %v2294_v9  ;;  %v2302_v14 = vld [vmem:[%s2656_s28 + $0x264] ss:$16 sps:$4 sm:$0xff]   ;;  %v2305_v16 = vld [vmem:[%s2656_s28 + $0x260] ss:$16 sps:$4 sm:$0xff]   ;;  %v2747_v8 = vcombine.low %v345_v49, %v345_v49 }
  0x20   : > { %1565 = vmatprep.subr.bf16.mxu1 %v2296_v10  ;;  %v2306_v17 = vld [vmem:[%s2656_s28 + $0x84] ss:$16 sps:$4 sm:$0xff]   ;;  %v2310_v19 = vld [vmem:[%s2656_s28 + $0x80] ss:$16 sps:$4 sm:$0xff]   ;;  %v2385_v10 = vld [vmem:[%s2656_s28 + $0x8] ss:$16 sps:$4 sm:$0xff]  }
  0x21   : > { %v2308_v18 = vld [vmem:[%s2656_s28 + $0x284] ss:$16 sps:$4 sm:$0xff]   ;;  %v2311_v20 = vld [vmem:[%s2656_s28 + $0x280] ss:$16 sps:$4 sm:$0xff]  }
  0x22   : > { %1525 = vmatpush1.bf16.msra.mxu0 %v2298_v11  ;;  %v2312_v21 = vld [vmem:[%s2656_s28 + $0xa4] ss:$16 sps:$4 sm:$0xff]   ;;  %v2316_v23 = vld [vmem:[%s2656_s28 + $0xa0] ss:$16 sps:$4 sm:$0xff]  }
  0x23   : > { %1566 = vmatpush1.bf16.msra.mxu1 %v2299_v12  ;;  %1526 = vmatprep.subr.bf16.mxu0 %v2300_v13  ;;  %v2314_v22 = vld [vmem:[%s2656_s28 + $0x2a4] ss:$16 sps:$4 sm:$0xff]   ;;  %v2317_v24 = vld [vmem:[%s2656_s28 + $0x2a0] ss:$16 sps:$4 sm:$0xff]   ;;  %v2393_v12 = vld [vmem:[%s2656_s28 + $0x2c] ss:$16 sps:$4 sm:$0xff]  }
  0x24   : > { %1567 = vmatprep.subr.bf16.mxu1 %v2302_v14  ;;  %v2318_v25 = vld [vmem:[%s2656_s28 + $0xc4] ss:$16 sps:$4 sm:$0xff]   ;;  %v2322_v27 = vld [vmem:[%s2656_s28 + $0xc0] ss:$16 sps:$4 sm:$0xff]   ;;  %v2391_v14 = vld [vmem:[%s2656_s28 + $0x28] ss:$16 sps:$4 sm:$0xff]  }
  0x25   : > { %v2320_v26 = vld [vmem:[%s2656_s28 + $0x2c4] ss:$16 sps:$4 sm:$0xff]   ;;  %v2323_v28 = vld [vmem:[%s2656_s28 + $0x2c0] ss:$16 sps:$4 sm:$0xff]  }
  0x26   : > { %1527 = vmatpush1.bf16.msra.mxu0 %v2304_v15  ;;  %v2324_v29 = vld [vmem:[%s2656_s28 + $0xe4] ss:$16 sps:$4 sm:$0xff]   ;;  %v2328_v31 = vld [vmem:[%s2656_s28 + $0xe0] ss:$16 sps:$4 sm:$0xff]  }
  0x27   : > { %1568 = vmatpush1.bf16.msra.mxu1 %v2305_v16  ;;  %1528 = vmatprep.subr.bf16.mxu0 %v2306_v17  ;;  %v2326_v30 = vld [vmem:[%s2656_s28 + $0x2e4] ss:$16 sps:$4 sm:$0xff]   ;;  %v2329_v32 = vld [vmem:[%s2656_s28 + $0x2e0] ss:$16 sps:$4 sm:$0xff]   ;;  %v2399_v16 = vld [vmem:[%s2656_s28 + $0x4c] ss:$16 sps:$4 sm:$0xff]  }
  0x28   : > { %1569 = vmatprep.subr.bf16.mxu1 %v2308_v18  ;;  %v2330_v33 = vld [vmem:[%s2656_s28 + $0x104] ss:$16 sps:$4 sm:$0xff]   ;;  %v2334_v35 = vld [vmem:[%s2656_s28 + $0x100] ss:$16 sps:$4 sm:$0xff]   ;;  %v2397_v18 = vld [vmem:[%s2656_s28 + $0x48] ss:$16 sps:$4 sm:$0xff]  }
  0x29   : > { %v2332_v34 = vld [vmem:[%s2656_s28 + $0x304] ss:$16 sps:$4 sm:$0xff]   ;;  %v2335_v36 = vld [vmem:[%s2656_s28 + $0x300] ss:$16 sps:$4 sm:$0xff]  }
  0x2a   : > { %1529 = vmatpush1.bf16.msra.mxu0 %v2310_v19  ;;  %v2336_v37 = vld [vmem:[%s2656_s28 + $0x124] ss:$16 sps:$4 sm:$0xff]   ;;  %v2340_v39 = vld [vmem:[%s2656_s28 + $0x120] ss:$16 sps:$4 sm:$0xff]  }
  0x2b   : > { %1570 = vmatpush1.bf16.msra.mxu1 %v2311_v20  ;;  %1530 = vmatprep.subr.bf16.mxu0 %v2312_v21  ;;  %v2338_v38 = vld [vmem:[%s2656_s28 + $0x324] ss:$16 sps:$4 sm:$0xff]   ;;  %v2341_v40 = vld [vmem:[%s2656_s28 + $0x320] ss:$16 sps:$4 sm:$0xff]   ;;  %v2405_v20 = vld [vmem:[%s2656_s28 + $0x6c] ss:$16 sps:$4 sm:$0xff]  }
  0x2c   : > { %1571 = vmatprep.subr.bf16.mxu1 %v2314_v22  ;;  %v2342_v41 = vld [vmem:[%s2656_s28 + $0x144] ss:$16 sps:$4 sm:$0xff]   ;;  %v2346_v43 = vld [vmem:[%s2656_s28 + $0x140] ss:$16 sps:$4 sm:$0xff]   ;;  %v2403_v22 = vld [vmem:[%s2656_s28 + $0x68] ss:$16 sps:$4 sm:$0xff]  }
  0x2d   : > { %v2344_v42 = vld [vmem:[%s2656_s28 + $0x344] ss:$16 sps:$4 sm:$0xff]   ;;  %v2347_v44 = vld [vmem:[%s2656_s28 + $0x340] ss:$16 sps:$4 sm:$0xff]  }
  0x2e   : > { %1531 = vmatpush1.bf16.msra.mxu0 %v2316_v23  ;;  %v2348_v45 = vld [vmem:[%s2656_s28 + $0x164] ss:$16 sps:$4 sm:$0xff]   ;;  %v2352_v50 = vld [vmem:[%s2656_s28 + $0x160] ss:$16 sps:$4 sm:$0xff]  }
  0x2f   : > { %1572 = vmatpush1.bf16.msra.mxu1 %v2317_v24  ;;  %1532 = vmatprep.subr.bf16.mxu0 %v2318_v25  ;;  %v2350_v46 = vld [vmem:[%s2656_s28 + $0x364] ss:$16 sps:$4 sm:$0xff]   ;;  %v2353_v51 = vld [vmem:[%s2656_s28 + $0x360] ss:$16 sps:$4 sm:$0xff]   ;;  %v2411_v24 = vld [vmem:[%s2656_s28 + $0x8c] ss:$16 sps:$4 sm:$0xff]  }
  0x30   : > { %1573 = vmatprep.subr.bf16.mxu1 %v2320_v26  ;;  %v344_v47 = vld [vmem:[%s2651_s24] sm:$0xff]  ;;  %v2409_v26 = vld [vmem:[%s2656_s28 + $0x88] ss:$16 sps:$4 sm:$0xff]  }
  0x31   : > { %v2718_v48 = vcombine.high %v344_v47, %v344_v47  ;;  %v2354_v53 = vld [vmem:[%s2656_s28 + $0x184] ss:$16 sps:$4 sm:$0xff]   ;;  %v2358_v55 = vld [vmem:[%s2656_s28 + $0x180] ss:$16 sps:$4 sm:$0xff]   ;;  %v2745_v7 = vcombine.low %v344_v47, %v344_v47 }
  0x32   : > { %1533 = vmatpush1.bf16.msra.mxu0 %v2322_v27  ;;  %v2356_v54 = vld [vmem:[%s2656_s28 + $0x384] ss:$16 sps:$4 sm:$0xff]   ;;  %v2359_v56 = vld [vmem:[%s2656_s28 + $0x380] ss:$16 sps:$4 sm:$0xff]  }
  0x33   : > { %1574 = vmatpush1.bf16.msra.mxu1 %v2323_v28  ;;  %1534 = vmatprep.subr.bf16.mxu0 %v2324_v29  ;;  %v2360_v57 = vld [vmem:[%s2656_s28 + $0x1a4] ss:$16 sps:$4 sm:$0xff]   ;;  %v2364_v59 = vld [vmem:[%s2656_s28 + $0x1a0] ss:$16 sps:$4 sm:$0xff]   ;;  %v2417_v28 = vld [vmem:[%s2656_s28 + $0xac] ss:$16 sps:$4 sm:$0xff]  }
  0x34   : > { %1575 = vmatprep.subr.bf16.mxu1 %v2326_v30  ;;  %1552 = vmatprep.mubr.bf16.mxu0 %v2718_v48  ;;  %v2362_v58 = vld [vmem:[%s2656_s28 + $0x3a4] ss:$16 sps:$4 sm:$0xff]   ;;  %v2365_v60 = vld [vmem:[%s2656_s28 + $0x3a0] ss:$16 sps:$4 sm:$0xff]   ;;  %v2415_v30 = vld [vmem:[%s2656_s28 + $0xa8] ss:$16 sps:$4 sm:$0xff]  }
  0x35   : > { %v2366_v61 = vld [vmem:[%s2656_s28 + $0x1c4] ss:$16 sps:$4 sm:$0xff]   ;;  %v2370_v63 = vld [vmem:[%s2656_s28 + $0x1c0] ss:$16 sps:$4 sm:$0xff]  }
  0x36   : > { %1535 = vmatpush1.bf16.msra.mxu0 %v2328_v31  ;;  %v2368_v62 = vld [vmem:[%s2656_s28 + $0x3c4] ss:$16 sps:$4 sm:$0xff]   ;;  %v2371_v0 = vld [vmem:[%s2656_s28 + $0x3c0] ss:$16 sps:$4 sm:$0xff]  }
  0x37   : > { %1576 = vmatpush1.bf16.msra.mxu1 %v2329_v32  ;;  %1536 = vmatprep.subr.bf16.mxu0 %v2330_v33  ;;  %v2372_v1 = vld [vmem:[%s2656_s28 + $0x1e4] ss:$16 sps:$4 sm:$0xff]   ;;  %v2376_v3 = vld [vmem:[%s2656_s28 + $0x1e0] ss:$16 sps:$4 sm:$0xff]   ;;  %v2423_v32 = vld [vmem:[%s2656_s28 + $0xcc] ss:$16 sps:$4 sm:$0xff]  }
  0x38   : > { %1577 = vmatprep.subr.bf16.mxu1 %v2332_v34  ;;  %v2374_v2 = vld [vmem:[%s2656_s28 + $0x3e4] ss:$16 sps:$4 sm:$0xff]   ;;  %v2377_v4 = vld [vmem:[%s2656_s28 + $0x3e0] ss:$16 sps:$4 sm:$0xff]  }
  0x39   : > { %v2384_v5 = vld [vmem:[%s2656_s28 + $0x404] ss:$16 sps:$4 sm:$0xff]   ;;  %v2382_v9 = vld [vmem:[%s2656_s28 + $0x400] ss:$16 sps:$4 sm:$0xff]  }
  0x3a   : > { %1537 = vmatpush1.bf16.msra.mxu0 %v2334_v35  ;;  %v2390_v11 = vld [vmem:[%s2656_s28 + $0x424] ss:$16 sps:$4 sm:$0xff]   ;;  %v2388_v13 = vld [vmem:[%s2656_s28 + $0x420] ss:$16 sps:$4 sm:$0xff]  }
  0x3b   : > { %1578 = vmatpush1.bf16.msra.mxu1 %v2335_v36  ;;  %1538 = vmatprep.subr.bf16.mxu0 %v2336_v37  ;;  %v2396_v15 = vld [vmem:[%s2656_s28 + $0x444] ss:$16 sps:$4 sm:$0xff]   ;;  %v2394_v17 = vld [vmem:[%s2656_s28 + $0x440] ss:$16 sps:$4 sm:$0xff]   ;;  %v2421_v36 = vld [vmem:[%s2656_s28 + $0xc8] ss:$16 sps:$4 sm:$0xff]  }
  0x3c   : > { %1579 = vmatprep.subr.bf16.mxu1 %v2338_v38  ;;  %v2402_v19 = vld [vmem:[%s2656_s28 + $0x464] ss:$16 sps:$4 sm:$0xff]   ;;  %v2400_v21 = vld [vmem:[%s2656_s28 + $0x460] ss:$16 sps:$4 sm:$0xff]   ;;  %v2429_v38 = vld [vmem:[%s2656_s28 + $0xec] ss:$16 sps:$4 sm:$0xff]  }
  0x3d   : > { %v2408_v23 = vld [vmem:[%s2656_s28 + $0x484] ss:$16 sps:$4 sm:$0xff]   ;;  %v2406_v25 = vld [vmem:[%s2656_s28 + $0x480] ss:$16 sps:$4 sm:$0xff]  }
  0x3e   : > { %1539 = vmatpush1.bf16.msra.mxu0 %v2340_v39  ;;  %v2414_v27 = vld [vmem:[%s2656_s28 + $0x4a4] ss:$16 sps:$4 sm:$0xff]   ;;  %v2412_v29 = vld [vmem:[%s2656_s28 + $0x4a0] ss:$16 sps:$4 sm:$0xff]  }
  0x3f   : > { %1580 = vmatpush1.bf16.msra.mxu1 %v2341_v40  ;;  %1540 = vmatprep.subr.bf16.mxu0 %v2342_v41  ;;  %v2420_v31 = vld [vmem:[%s2656_s28 + $0x4c4] ss:$16 sps:$4 sm:$0xff]   ;;  %v2418_v34 = vld [vmem:[%s2656_s28 + $0x4c0] ss:$16 sps:$4 sm:$0xff]   ;;  %v2427_v40 = vld [vmem:[%s2656_s28 + $0xe8] ss:$16 sps:$4 sm:$0xff]  }
  0x40   : > { %1581 = vmatprep.subr.bf16.mxu1 %v2344_v42  ;;  %v2777_v33 = vld [vmem:[%s2651_s24 + $0x10] sm:$0xff]  ;;  %v2435_v42 = vld [vmem:[%s2656_s28 + $0x10c] ss:$16 sps:$4 sm:$0xff]  }
  0x41   : > { %v2782_v35 = vcombine.high %v2777_v33, %v2777_v33  ;;  %v2426_v37 = vld [vmem:[%s2656_s28 + $0x4e4] ss:$16 sps:$4 sm:$0xff]   ;;  %v2424_v39 = vld [vmem:[%s2656_s28 + $0x4e0] ss:$16 sps:$4 sm:$0xff]  }
  0x42   : > { %1541 = vmatpush1.bf16.msra.mxu0 %v2346_v43  ;;  %v2432_v41 = vld [vmem:[%s2656_s28 + $0x504] ss:$16 sps:$4 sm:$0xff]   ;;  %v2430_v43 = vld [vmem:[%s2656_s28 + $0x500] ss:$16 sps:$4 sm:$0xff]  }
  0x43   : > { %1582 = vmatpush1.bf16.msra.mxu1 %v2347_v44  ;;  %1542 = vmatprep.subr.bf16.mxu0 %v2348_v45  ;;  %v2433_v44 = vld [vmem:[%s2656_s28 + $0x108] ss:$16 sps:$4 sm:$0xff]   ;;  %v2438_v45 = vld [vmem:[%s2656_s28 + $0x524] ss:$16 sps:$4 sm:$0xff]   ;;  %v2436_v47 = vld [vmem:[%s2656_s28 + $0x520] ss:$16 sps:$4 sm:$0xff]  }
  0x44   : > { %1583 = vmatprep.subr.bf16.mxu1 %v2350_v46  ;;  %v2441_v46 = vld [vmem:[%s2656_s28 + $0x12c] ss:$16 sps:$4 sm:$0xff]   ;;  %v2444_v49 = vld [vmem:[%s2656_s28 + $0x544] ss:$16 sps:$4 sm:$0xff]  }
  0x46   : > { %1543 = vmatpush1.bf16.msra.mxu0 %v2352_v50  ;;  %v2447_v50 = vld [vmem:[%s2656_s28 + $0x14c] ss:$16 sps:$4 sm:$0xff]  }
  0x47   : > { %1584 = vmatpush1.bf16.msra.mxu1 %v2353_v51  ;;  %1544 = vmatprep.subr.bf16.mxu0 %v2354_v53  ;;  %v2442_v51 = vld [vmem:[%s2656_s28 + $0x540] ss:$16 sps:$4 sm:$0xff]   ;;  %v2445_v53 = vld [vmem:[%s2656_s28 + $0x148] ss:$16 sps:$4 sm:$0xff]  }
  0x48   : > { %1585 = vmatprep.subr.bf16.mxu1 %v2356_v54  ;;  %v2450_v54 = vld [vmem:[%s2656_s28 + $0x564] ss:$16 sps:$4 sm:$0xff]  }
  0x4a   : > { %1545 = vmatpush1.bf16.msra.mxu0 %v2358_v55  ;;  %v2453_v55 = vld [vmem:[%s2656_s28 + $0x16c] ss:$16 sps:$4 sm:$0xff]  }
  0x4b   : > { %1586 = vmatpush1.bf16.msra.mxu1 %v2359_v56  ;;  %1546 = vmatprep.subr.bf16.mxu0 %v2360_v57  ;;  %v2448_v56 = vld [vmem:[%s2656_s28 + $0x560] ss:$16 sps:$4 sm:$0xff]   ;;  %v2451_v57 = vld [vmem:[%s2656_s28 + $0x168] ss:$16 sps:$4 sm:$0xff]  }
  0x4c   : > { %1587 = vmatprep.subr.bf16.mxu1 %v2362_v58  ;;  %v2456_v58 = vld [vmem:[%s2656_s28 + $0x584] ss:$16 sps:$4 sm:$0xff]  }
  0x4e   : > { %1547 = vmatpush1.bf16.msra.mxu0 %v2364_v59  ;;  %v2459_v59 = vld [vmem:[%s2656_s28 + $0x18c] ss:$16 sps:$4 sm:$0xff]  }
  0x4f   : > { %1588 = vmatpush1.bf16.msra.mxu1 %v2365_v60  ;;  %1548 = vmatprep.subr.bf16.mxu0 %v2366_v61  ;;  %v2454_v60 = vld [vmem:[%s2656_s28 + $0x580] ss:$16 sps:$4 sm:$0xff]   ;;  %v2457_v61 = vld [vmem:[%s2656_s28 + $0x188] ss:$16 sps:$4 sm:$0xff]  }
  0x50   : > { %1589 = vmatprep.subr.bf16.mxu1 %v2368_v62  ;;  %v2462_v62 = vld [vmem:[%s2656_s28 + $0x5a4] ss:$16 sps:$4 sm:$0xff]  }
  0x52   : > { %1549 = vmatpush1.bf16.msra.mxu0 %v2370_v63  ;;  %v2465_v63 = vld [vmem:[%s2656_s28 + $0x1ac] ss:$16 sps:$4 sm:$0xff]  }
  0x53   : > { %1590 = vmatpush1.bf16.msra.mxu1 %v2371_v0  ;;  %1550 = vmatprep.subr.bf16.mxu0 %v2372_v1  ;;  %v2460_v0 = vld [vmem:[%s2656_s28 + $0x5a0] ss:$16 sps:$4 sm:$0xff]   ;;  %v2463_v1 = vld [vmem:[%s2656_s28 + $0x1a8] ss:$16 sps:$4 sm:$0xff]  }
  0x54   : > { %1591 = vmatprep.subr.bf16.mxu1 %v2374_v2  ;;  %v2468_v2 = vld [vmem:[%s2656_s28 + $0x5c4] ss:$16 sps:$4 sm:$0xff]  }
  0x56   : > { %1551 = vmatpush1.bf16.msra.mxu0 %v2376_v3  ;;  %v2471_v3 = vld [vmem:[%s2656_s28 + $0x1cc] ss:$16 sps:$4 sm:$0xff]  }
  0x57   : > { %1592 = vmatpush1.bf16.msra.mxu1 %v2377_v4  ;;  %1602 = vmatprep.subr.bf16.mxu0 %v2384_v5  ;;  %v2466_v4 = vld [vmem:[%s2656_s28 + $0x5c0] ss:$16 sps:$4 sm:$0xff]   ;;  %v2469_v5 = vld [vmem:[%s2656_s28 + $0x1c8] ss:$16 sps:$4 sm:$0xff]  }
  0x58   : > { %1643 = vmatprep.subr.bf16.mxu1 %v2387_v6  ;;  %v2474_v6 = vld [vmem:[%s2656_s28 + $0x5e4] ss:$16 sps:$4 sm:$0xff]  }
  0x59   : > { %1553 = vmatmul.mubr.bf16.vlgmr.msra.gmra.mrb[0].mxu0 %v2745_v7 }
  0x5a   : > { %1594 = vmatmul.mubr.bf16.vlgmr.msra.gmra.mrb[0].mxu1 %v2747_v8  ;;  %1603 = vmatpush1.bf16.msra.mxu0 %v2382_v9  ;;  %v2477_v9 = vld [vmem:[%s2656_s28 + $0x1ec] ss:$16 sps:$4 sm:$0xff]  }
  0x5b   : > { %1644 = vmatpush1.bf16.msra.mxu1 %v2385_v10  ;;  %1604 = vmatprep.subr.bf16.mxu0 %v2390_v11  ;;  %v2472_v10 = vld [vmem:[%s2656_s28 + $0x5e0] ss:$16 sps:$4 sm:$0xff]   ;;  %v2475_v11 = vld [vmem:[%s2656_s28 + $0x1e8] ss:$16 sps:$4 sm:$0xff]  }
  0x5c   : > { %1645 = vmatprep.subr.bf16.mxu1 %v2393_v12  ;;  %1675 = vmatprep.mubr.bf16.mxu1 %v2718_v48  ;;  %v2439_v48 = vld [vmem:[%s2656_s28 + $0x128] ss:$16 sps:$4 sm:$0xff]   ;;  %v2482_v12 = vld [vmem:[%s2656_s28 + $0x20c] ss:$16 sps:$4 sm:$0xff]  }
  0x5d   : > { %1634 = vmatprep.mubr.bf16.mxu0 %v2782_v35 }
  0x5e   : > { %1605 = vmatpush1.bf16.msra.mxu0 %v2388_v13  ;;  %v2485_v13 = vld [vmem:[%s2656_s28 + $0x40c] ss:$16 sps:$4 sm:$0xff]  }
  0x5f   : > { %1646 = vmatpush1.bf16.msra.mxu1 %v2391_v14  ;;  %1606 = vmatprep.subr.bf16.mxu0 %v2396_v15  ;;  %v2826_v14 = vcombine.low %v2777_v33, %v2777_v33  ;;  %v2480_v15 = vld [vmem:[%s2656_s28 + $0x208] ss:$16 sps:$4 sm:$0xff]  }
  0x60   : > { %1647 = vmatprep.subr.bf16.mxu1 %v2399_v16  ;;  %v2483_v16 = vld [vmem:[%s2656_s28 + $0x408] ss:$16 sps:$4 sm:$0xff]  }
  0x61   : > { %v2510_v33 = vld [vmem:[%s2656_s28 + $0x2a8] ss:$16 sps:$4 sm:$0xff]  }
  0x62   : > { %1607 = vmatpush1.bf16.msra.mxu0 %v2394_v17  ;;  %v2488_v17 = vld [vmem:[%s2656_s28 + $0x22c] ss:$16 sps:$4 sm:$0xff]  }
  0x63   : > { %1648 = vmatpush1.bf16.msra.mxu1 %v2397_v18  ;;  %1608 = vmatprep.subr.bf16.mxu0 %v2402_v19  ;;  %v2491_v18 = vld [vmem:[%s2656_s28 + $0x42c] ss:$16 sps:$4 sm:$0xff]   ;;  %v2486_v19 = vld [vmem:[%s2656_s28 + $0x228] ss:$16 sps:$4 sm:$0xff]  }
  0x64   : > { %1649 = vmatprep.subr.bf16.mxu1 %v2405_v20  ;;  %v2489_v20 = vld [vmem:[%s2656_s28 + $0x428] ss:$16 sps:$4 sm:$0xff]  }
  0x66   : > { %1609 = vmatpush1.bf16.msra.mxu0 %v2400_v21  ;;  %v2494_v21 = vld [vmem:[%s2656_s28 + $0x24c] ss:$16 sps:$4 sm:$0xff]  }
  0x67   : > { %1650 = vmatpush1.bf16.msra.mxu1 %v2403_v22  ;;  %1610 = vmatprep.subr.bf16.mxu0 %v2408_v23  ;;  %v2497_v22 = vld [vmem:[%s2656_s28 + $0x44c] ss:$16 sps:$4 sm:$0xff]   ;;  %v2495_v23 = vld [vmem:[%s2656_s28 + $0x448] ss:$16 sps:$4 sm:$0xff]  }
  0x68   : > { %1651 = vmatprep.subr.bf16.mxu1 %v2411_v24  ;;  %v2500_v24 = vld [vmem:[%s2656_s28 + $0x26c] ss:$16 sps:$4 sm:$0xff]  }
  0x6a   : > { %1611 = vmatpush1.bf16.msra.mxu0 %v2406_v25  ;;  %v2503_v25 = vld [vmem:[%s2656_s28 + $0x46c] ss:$16 sps:$4 sm:$0xff]  }
  0x6b   : > { %1652 = vmatpush1.bf16.msra.mxu1 %v2409_v26  ;;  %1612 = vmatprep.subr.bf16.mxu0 %v2414_v27  ;;  %v2498_v26 = vld [vmem:[%s2656_s28 + $0x268] ss:$16 sps:$4 sm:$0xff]   ;;  %v2506_v27 = vld [vmem:[%s2656_s28 + $0x28c] ss:$16 sps:$4 sm:$0xff]  }
  0x6c   : > { %1653 = vmatprep.subr.bf16.mxu1 %v2417_v28  ;;  %v2509_v28 = vld [vmem:[%s2656_s28 + $0x48c] ss:$16 sps:$4 sm:$0xff]  }
  0x6e   : > { %1613 = vmatpush1.bf16.msra.mxu0 %v2412_v29  ;;  %v2504_v29 = vld [vmem:[%s2656_s28 + $0x288] ss:$16 sps:$4 sm:$0xff]  }
  0x6f   : > { %1654 = vmatpush1.bf16.msra.mxu1 %v2415_v30  ;;  %1614 = vmatprep.subr.bf16.mxu0 %v2420_v31  ;;  %v2507_v30 = vld [vmem:[%s2656_s28 + $0x488] ss:$16 sps:$4 sm:$0xff]   ;;  %v2512_v31 = vld [vmem:[%s2656_s28 + $0x2ac] ss:$16 sps:$4 sm:$0xff]  }
  0x70   : > { %1655 = vmatprep.subr.bf16.mxu1 %v2423_v32  ;;  %v2515_v32 = vld [vmem:[%s2656_s28 + $0x4ac] ss:$16 sps:$4 sm:$0xff]  }
  0x72   : > { %1615 = vmatpush1.bf16.msra.mxu0 %v2418_v34  ;;  %v2513_v34 = vld [vmem:[%s2656_s28 + $0x4a8] ss:$16 sps:$4 sm:$0xff]  }
  0x73   : > { %1656 = vmatpush1.bf16.msra.mxu1 %v2421_v36  ;;  %1616 = vmatprep.subr.bf16.mxu0 %v2426_v37  ;;  %v2521_v36 = vld [vmem:[%s2656_s28 + $0x4cc] ss:$16 sps:$4 sm:$0xff]   ;;  %v2516_v37 = vld [vmem:[%s2656_s28 + $0x2c8] ss:$16 sps:$4 sm:$0xff]  }
  0x74   : > { %1657 = vmatprep.subr.bf16.mxu1 %v2429_v38  ;;  %v2519_v38 = vld [vmem:[%s2656_s28 + $0x4c8] ss:$16 sps:$4 sm:$0xff]  }
  0x76   : > { %1617 = vmatpush1.bf16.msra.mxu0 %v2424_v39  ;;  %v2524_v39 = vld [vmem:[%s2656_s28 + $0x2ec] ss:$16 sps:$4 sm:$0xff]  }
  0x77   : > { %1658 = vmatpush1.bf16.msra.mxu1 %v2427_v40  ;;  %1618 = vmatprep.subr.bf16.mxu0 %v2432_v41  ;;  %v2527_v40 = vld [vmem:[%s2656_s28 + $0x4ec] ss:$16 sps:$4 sm:$0xff]   ;;  %v2522_v41 = vld [vmem:[%s2656_s28 + $0x2e8] ss:$16 sps:$4 sm:$0xff]  }
  0x78   : > { %1659 = vmatprep.subr.bf16.mxu1 %v2435_v42  ;;  %v2525_v42 = vld [vmem:[%s2656_s28 + $0x4e8] ss:$16 sps:$4 sm:$0xff]  }
  0x7a   : > { %1619 = vmatpush1.bf16.msra.mxu0 %v2430_v43  ;;  %v2530_v43 = vld [vmem:[%s2656_s28 + $0x30c] ss:$16 sps:$4 sm:$0xff]  }
  0x7b   : > { %1660 = vmatpush1.bf16.msra.mxu1 %v2433_v44  ;;  %1620 = vmatprep.subr.bf16.mxu0 %v2438_v45  ;;  %v2533_v44 = vld [vmem:[%s2656_s28 + $0x50c] ss:$16 sps:$4 sm:$0xff]   ;;  %v2528_v45 = vld [vmem:[%s2656_s28 + $0x308] ss:$16 sps:$4 sm:$0xff]  }
  0x7c   : > { %1661 = vmatprep.subr.bf16.mxu1 %v2441_v46  ;;  %v2531_v46 = vld [vmem:[%s2656_s28 + $0x508] ss:$16 sps:$4 sm:$0xff]  }
  0x7e   : > { %1621 = vmatpush1.bf16.msra.mxu0 %v2436_v47  ;;  %v2536_v47 = vld [vmem:[%s2656_s28 + $0x32c] ss:$16 sps:$4 sm:$0xff]  }
  0x7f   : > { %1662 = vmatpush1.bf16.msra.mxu1 %v2439_v48  ;;  %1622 = vmatprep.subr.bf16.mxu0 %v2444_v49  ;;  %v2539_v48 = vld [vmem:[%s2656_s28 + $0x52c] ss:$16 sps:$4 sm:$0xff]   ;;  %v2534_v49 = vld [vmem:[%s2656_s28 + $0x328] ss:$16 sps:$4 sm:$0xff]  }
  0x80   : > { %1663 = vmatprep.subr.bf16.mxu1 %v2447_v50  ;;  %v2537_v50 = vld [vmem:[%s2656_s28 + $0x528] ss:$16 sps:$4 sm:$0xff]  }
  0x82   : > { %1623 = vmatpush1.bf16.msra.mxu0 %v2442_v51  ;;  %v2542_v51 = vld [vmem:[%s2656_s28 + $0x34c] ss:$16 sps:$4 sm:$0xff]  }
  0x83   : > { %1664 = vmatpush1.bf16.msra.mxu1 %v2445_v53  ;;  %1624 = vmatprep.subr.bf16.mxu0 %v2450_v54  ;;  %v2545_v53 = vld [vmem:[%s2656_s28 + $0x54c] ss:$16 sps:$4 sm:$0xff]   ;;  %v2540_v54 = vld [vmem:[%s2656_s28 + $0x348] ss:$16 sps:$4 sm:$0xff]  }
  0x84   : > { %1665 = vmatprep.subr.bf16.mxu1 %v2453_v55  ;;  %v2543_v55 = vld [vmem:[%s2656_s28 + $0x548] ss:$16 sps:$4 sm:$0xff]  }
  0x86   : > { %1625 = vmatpush1.bf16.msra.mxu0 %v2448_v56  ;;  %v2548_v56 = vld [vmem:[%s2656_s28 + $0x36c] ss:$16 sps:$4 sm:$0xff]  }
  0x87   : > { %1666 = vmatpush1.bf16.msra.mxu1 %v2451_v57  ;;  %1626 = vmatprep.subr.bf16.mxu0 %v2456_v58  ;;  %v2551_v57 = vld [vmem:[%s2656_s28 + $0x56c] ss:$16 sps:$4 sm:$0xff]   ;;  %v2546_v58 = vld [vmem:[%s2656_s28 + $0x368] ss:$16 sps:$4 sm:$0xff]  }
  0x88   : > { %1667 = vmatprep.subr.bf16.mxu1 %v2459_v59  ;;  %v2549_v59 = vld [vmem:[%s2656_s28 + $0x568] ss:$16 sps:$4 sm:$0xff]  }
  0x8a   : > { %1627 = vmatpush1.bf16.msra.mxu0 %v2454_v60  ;;  %v2554_v60 = vld [vmem:[%s2656_s28 + $0x38c] ss:$16 sps:$4 sm:$0xff]  }
  0x8b   : > { %1668 = vmatpush1.bf16.msra.mxu1 %v2457_v61  ;;  %1628 = vmatprep.subr.bf16.mxu0 %v2462_v62  ;;  %v2557_v61 = vld [vmem:[%s2656_s28 + $0x58c] ss:$16 sps:$4 sm:$0xff]   ;;  %v2552_v62 = vld [vmem:[%s2656_s28 + $0x388] ss:$16 sps:$4 sm:$0xff]  }
  0x8c   : > { %1669 = vmatprep.subr.bf16.mxu1 %v2465_v63  ;;  %v2555_v63 = vld [vmem:[%s2656_s28 + $0x588] ss:$16 sps:$4 sm:$0xff]  }
  0x8e   : > { %1629 = vmatpush1.bf16.msra.mxu0 %v2460_v0  ;;  %v2560_v0 = vld [vmem:[%s2656_s28 + $0x3ac] ss:$16 sps:$4 sm:$0xff]  }
  0x8f   : > { %1670 = vmatpush1.bf16.msra.mxu1 %v2463_v1  ;;  %1630 = vmatprep.subr.bf16.mxu0 %v2468_v2  ;;  %v2563_v1 = vld [vmem:[%s2656_s28 + $0x5ac] ss:$16 sps:$4 sm:$0xff]   ;;  %v2558_v2 = vld [vmem:[%s2656_s28 + $0x3a8] ss:$16 sps:$4 sm:$0xff]  }
  0x90   : > { %1671 = vmatprep.subr.bf16.mxu1 %v2471_v3  ;;  %v2561_v3 = vld [vmem:[%s2656_s28 + $0x5a8] ss:$16 sps:$4 sm:$0xff]  }
  0x92   : > { %1631 = vmatpush1.bf16.msra.mxu0 %v2466_v4  ;;  %v2566_v4 = vld [vmem:[%s2656_s28 + $0x3cc] ss:$16 sps:$4 sm:$0xff]  }
  0x93   : > { %1672 = vmatpush1.bf16.msra.mxu1 %v2469_v5  ;;  %1632 = vmatprep.subr.bf16.mxu0 %v2474_v6  ;;  %v2569_v5 = vld [vmem:[%s2656_s28 + $0x5cc] ss:$16 sps:$4 sm:$0xff]   ;;  %v2564_v6 = vld [vmem:[%s2656_s28 + $0x3c8] ss:$16 sps:$4 sm:$0xff]  }
  0x94   : > { %1673 = vmatprep.subr.bf16.mxu1 %v2477_v9  ;;  %v2567_v9 = vld [vmem:[%s2656_s28 + $0x5c8] ss:$16 sps:$4 sm:$0xff]  }
  0x96   : > { %1633 = vmatpush1.bf16.msra.mxu0 %v2472_v10  ;;  %v2572_v10 = vld [vmem:[%s2656_s28 + $0x3ec] ss:$16 sps:$4 sm:$0xff]  }
  0x97   : > { %1674 = vmatpush1.bf16.msra.mxu1 %v2475_v11  ;;  %1684 = vmatprep.subr.bf16.mxu0 %v2482_v12  ;;  %v2575_v11 = vld [vmem:[%s2656_s28 + $0x5ec] ss:$16 sps:$4 sm:$0xff]   ;;  %v2570_v12 = vld [vmem:[%s2656_s28 + $0x3e8] ss:$16 sps:$4 sm:$0xff]  }
  0x98   : > { %1725 = vmatprep.subr.bf16.mxu1 %v2485_v13  ;;  %v2573_v13 = vld [vmem:[%s2656_s28 + $0x5e8] ss:$16 sps:$4 sm:$0xff]  }
  0x99   : > { %1635 = vmatmul.mubr.bf16.vlgmr.msra.gmra.mrb[4].mxu0 %v2826_v14 }
  0x9a   : > { %1676 = vmatmul.mubr.bf16.vlgmr.msra.gmra.mrb[4].mxu1 %v2745_v7  ;;  %1685 = vmatpush1.bf16.msra.mxu0 %v2480_v15  ;;  %v2492_v7 = vld [vmem:[%s2656_s28 + $0x248] ss:$16 sps:$4 sm:$0xff]  }
  0x9b   : > { %1726 = vmatpush1.bf16.msra.mxu1 %v2483_v16  ;;  %1686 = vmatprep.subr.bf16.mxu0 %v2488_v17 }
  0x9c   : > { %1727 = vmatprep.subr.bf16.mxu1 %v2491_v18  ;;  %1716 = vmatprep.mubr.bf16.mxu0 %v2723_v52  ;;  %v2501_v52 = vld [vmem:[%s2656_s28 + $0x468] ss:$16 sps:$4 sm:$0xff]  }
  0x9d   : > { %1757 = vmatprep.mubr.bf16.mxu1 %v2782_v35  ;;  %v2518_v35 = vld [vmem:[%s2656_s28 + $0x2cc] ss:$16 sps:$4 sm:$0xff]  }
  0x9e   : > { %1687 = vmatpush1.bf16.msra.mxu0 %v2486_v19 }
  0x9f   : > { %1728 = vmatpush1.bf16.msra.mxu1 %v2489_v20  ;;  %1688 = vmatprep.subr.bf16.mxu0 %v2494_v21 }
  0xa0   : > { %1729 = vmatprep.subr.bf16.mxu1 %v2497_v22 }
  0xa2   : > { %1689 = vmatpush1.bf16.msra.mxu0 %v2492_v7 }
  0xa3   : > { %1730 = vmatpush1.bf16.msra.mxu1 %v2495_v23  ;;  %1690 = vmatprep.subr.bf16.mxu0 %v2500_v24  ;;  %v340_v24 = vld [vmem:[%s2968_s2] sm:$0xff] }
  0xa4   : > { %1731 = vmatprep.subr.bf16.mxu1 %v2503_v25 }
  0xa6   : > { %1691 = vmatpush1.bf16.msra.mxu0 %v2498_v26 }
  0xa7   : > { %1732 = vmatpush1.bf16.msra.mxu1 %v2501_v52  ;;  %1692 = vmatprep.subr.bf16.mxu0 %v2506_v27 }
  0xa8   : > { %1733 = vmatprep.subr.bf16.mxu1 %v2509_v28 }
  0xaa   : > { %1693 = vmatpush1.bf16.msra.mxu0 %v2504_v29 }
  0xab   : > { %1734 = vmatpush1.bf16.msra.mxu1 %v2507_v30  ;;  %1694 = vmatprep.subr.bf16.mxu0 %v2512_v31 }
  0xac   : > { %1735 = vmatprep.subr.bf16.mxu1 %v2515_v32 }
  0xae   : > { %1695 = vmatpush1.bf16.msra.mxu0 %v2510_v33 }
  0xaf   : > { %1736 = vmatpush1.bf16.msra.mxu1 %v2513_v34  ;;  %1696 = vmatprep.subr.bf16.mxu0 %v2518_v35 }
  0xb0   : > { %1737 = vmatprep.subr.bf16.mxu1 %v2521_v36 }
  0xb2   : > { %1697 = vmatpush1.bf16.msra.mxu0 %v2516_v37 }
  0xb3   : > { %1738 = vmatpush1.bf16.msra.mxu1 %v2519_v38  ;;  %1698 = vmatprep.subr.bf16.mxu0 %v2524_v39 }
  0xb4   : > { %1739 = vmatprep.subr.bf16.mxu1 %v2527_v40  ;;  %v342_v40 = vld [vmem:[%s2968_s2 + $0x10] sm:$0xff] }
  0xb6   : > { %1699 = vmatpush1.bf16.msra.mxu0 %v2522_v41 }
  0xb7   : > { %1740 = vmatpush1.bf16.msra.mxu1 %v2525_v42  ;;  %1700 = vmatprep.subr.bf16.mxu0 %v2530_v43 }
  0xb8   : > { %1741 = vmatprep.subr.bf16.mxu1 %v2533_v44 }
  0xba   : > { %1701 = vmatpush1.bf16.msra.mxu0 %v2528_v45  ;;  %v343_v45 = vld [vmem:[%s2968_s2 + $0x18] sm:$0xff] }
  0xbb   : > { %1742 = vmatpush1.bf16.msra.mxu1 %v2531_v46  ;;  %1702 = vmatprep.subr.bf16.mxu0 %v2536_v47 }
  0xbc   : > { %1743 = vmatprep.subr.bf16.mxu1 %v2539_v48 }
  0xbe   : > { %1703 = vmatpush1.bf16.msra.mxu0 %v2534_v49 }
  0xbf   : > { %1744 = vmatpush1.bf16.msra.mxu1 %v2537_v50  ;;  %1704 = vmatprep.subr.bf16.mxu0 %v2542_v51 }
  0xc0   : > { %1745 = vmatprep.subr.bf16.mxu1 %v2545_v53 }
  0xc2   : > { %1705 = vmatpush1.bf16.msra.mxu0 %v2540_v54 }
  0xc3   : > { %1746 = vmatpush1.bf16.msra.mxu1 %v2543_v55  ;;  %1706 = vmatprep.subr.bf16.mxu0 %v2548_v56 }
  0xc4   : > { %1747 = vmatprep.subr.bf16.mxu1 %v2551_v57 }
  0xc6   : > { %1707 = vmatpush1.bf16.msra.mxu0 %v2546_v58 }
  0xc7   : > { %1748 = vmatpush1.bf16.msra.mxu1 %v2549_v59  ;;  %1708 = vmatprep.subr.bf16.mxu0 %v2554_v60 }
  0xc8   : > { %1749 = vmatprep.subr.bf16.mxu1 %v2557_v61 }
  0xca   : > { %1709 = vmatpush1.bf16.msra.mxu0 %v2552_v62 }
  0xcb   : > { %1750 = vmatpush1.bf16.msra.mxu1 %v2555_v63  ;;  %1710 = vmatprep.subr.bf16.mxu0 %v2560_v0 }
  0xcc   : > { %1751 = vmatprep.subr.bf16.mxu1 %v2563_v1 }
  0xce   : > { %1711 = vmatpush1.bf16.msra.mxu0 %v2558_v2 }
  0xcf   : > { %1752 = vmatpush1.bf16.msra.mxu1 %v2561_v3  ;;  %1712 = vmatprep.subr.bf16.mxu0 %v2566_v4 }
  0xd0   : > { %1753 = vmatprep.subr.bf16.mxu1 %v2569_v5 }
  0xd2   : > { %1713 = vmatpush1.bf16.msra.mxu0 %v2564_v6 }
  0xd3   : > { %1754 = vmatpush1.bf16.msra.mxu1 %v2567_v9  ;;  %1714 = vmatprep.subr.bf16.mxu0 %v2572_v10 }
  0xd4   : > { %1755 = vmatprep.subr.bf16.mxu1 %v2575_v11 }
  0xd6   : > { %1715 = vmatpush1.bf16.msra.mxu0 %v2570_v12 }
  0xd7   : > { %1756 = vmatpush1.bf16.msra.mxu1 %v2573_v13 }
  0xd9   : > { %1717 = vmatmul.mubr.bf16.vlgmr.msra.gmra.mrb[8].mxu0 %v2747_v8  ;;  %v341_v8 = vld [vmem:[%s2968_s2 + $0x8] sm:$0xff] }
  0xda   : > { %1758 = vmatmul.mubr.bf16.vlgmr.msra.gmra.mrb[8].mxu1 %v2826_v14 }
 0x12c   : > { %v1554_v15 = vpop.f32.mrb[0].mxu0 }
 0x12d   : > { %v1595_v16 = vpop.f32.mrb[0].mxu1  ;;  %v1556_v18 = vpop.f32.mrb[1].mxu0 }
 0x12e   : > { %v1596_v17 = vadd.f32 %v1595_v16, %v1554_v15  ;;  %v1597_v19 = vpop.f32.mrb[1].mxu1  ;;  %v1558_v21 = vpop.f32.mrb[2].mxu0 }
 0x12f   : > { %v1598_v20 = vadd.f32 %v1597_v19, %v1556_v18  ;;  %v1599_v22 = vpop.f32.mrb[2].mxu1  ;;  %v1559_v7 = vpop.f32.mrb[3].mxu0 }
 0x130   : > { %v1600_v23 = vpop.f32.mrb[3].mxu1 }
 0x16c   : > { %v1636_v25 = vpop.f32.mrb[4].mxu0 }
 0x16d   : > { %v1677_v26 = vpop.f32.mrb[4].mxu1  ;;  %v1637_v52 = vadd.f32 %v1636_v25, %v1596_v17  ;;  %v1638_v14 = vpop.f32.mrb[5].mxu0 }
 0x16e   : > { %v1679_v27 = vpop.f32.mrb[5].mxu1  ;;  %v1639_v28 = vadd.f32 %v1638_v14, %v1598_v20  ;;  %v1640_v29 = vpop.f32.mrb[6].mxu0 }
 0x16f   : > { %v1681_v30 = vpop.f32.mrb[6].mxu1  ;;  %v1766_v31 = vadd.f32 %v1637_v52, %v340_v24  ;;  %v1641_v32 = vpop.f32.mrb[7].mxu0 }
 0x170   : > { %v1682_v33 = vpop.f32.mrb[7].mxu1  ;;  %v1767_v34 = vadd.f32 %v1639_v28, %v341_v8 }
 0x171   : > { %1770 = vst [vmem:[%s2968_s2] sm:$0xff] %v1766_v31 }
 0x172   : > { %1771 = vst [vmem:[%s2968_s2 + $0x8] sm:$0xff] %v1767_v34 }
 0x178   : > { %v1778_v51 = vld [vmem:[%s2968_s2] sm:$0xff] (!%p2247_p7) }
 0x179   : > { %v1779_v53 = vld [vmem:[%s2968_s2 + $0x8] sm:$0xff] (!%p2247_p7)  ;;  %v1782_v55 = vrot.slane (!%p2247_p7), %v1778_v51, 4  ;;  %v1806_v59 = vmul.f32 (!%p2247_p7), %v1778_v51, %v1778_v51 }
 0x17a   : > { %v1788_v56 = vrot.slane (!%p2247_p7), %v1779_v53, 4  ;;  %v1807_v61 = vmul.f32 (!%p2247_p7), %v1779_v53, %v1779_v53 }
 0x17b   : > { %v1783_v0 = vadd.f32 (!%p2247_p7), %v1782_v55, %v1778_v51  ;;  %v1810_v3 = vrot.slane (!%p2247_p7), %v1806_v59, 4 }
 0x17c   : > { %v1789_v1 = vadd.f32 (!%p2247_p7), %v1788_v56, %v1779_v53  ;;  %v1816_v5 = vrot.slane (!%p2247_p7), %v1807_v61, 4 }
 0x17d   : > { %v1784_v10 = vrot.slane (!%p2247_p7), %v1783_v0, 2  ;;  %v1811_v13 = vadd.f32 (!%p2247_p7), %v1810_v3, %v1806_v59 }
 0x17e   : > { %v1790_v11 = vrot.slane (!%p2247_p7), %v1789_v1, 2  ;;  %v1817_v16 = vadd.f32 (!%p2247_p7), %v1816_v5, %v1807_v61 }
 0x17f   : > { %v1785_v19 = vadd.f32 (!%p2247_p7), %v1784_v10, %v1783_v0  ;;  %v1812_v22 = vrot.slane (!%p2247_p7), %v1811_v13, 2 }
 0x180   : > { %v1791_v20 = vadd.f32 (!%p2247_p7), %v1790_v11, %v1789_v1  ;;  %v1818_v23 = vrot.slane (!%p2247_p7), %v1817_v16, 2 }
 0x181   : > { %v1813_v14 = vadd.f32 (!%p2247_p7), %v1812_v22, %v1811_v13 }
 0x182   : > { %v1792_v52 = vrot.slane (!%p2247_p7), %v1791_v20, 1  ;;  %v1819_v28 = vadd.f32 (!%p2247_p7), %v1818_v23, %v1817_v16 }
 0x183   : > { %v1814_v34 = vrot.slane (!%p2247_p7), %v1813_v14, 1 }
 0x184   : > { %v1793_v32 = vadd.f32 (!%p2247_p7), %v1792_v52, %v1791_v20 }
 0x186   : > { %1835 = vst [vmem:[%s2969_s3 + $0x8] sm:$0xff] (!%p2247_p7), %v1793_v32 }
 0x1ac   : > { %v1718_v35 = vpop.f32.mrb[8].mxu0 }
 0x1ad   : > { %v1759_v36 = vpop.f32.mrb[8].mxu1  ;;  %v1719_v37 = vadd.f32 %v1718_v35, %v1677_v26  ;;  %v1720_v38 = vpop.f32.mrb[9].mxu0  ;;  %v1786_v26 = vrot.slane (!%p2247_p7), %v1785_v19, 1 }
 0x1ae   : > { %v1761_v39 = vpop.f32.mrb[9].mxu1  ;;  %v1721_v41 = vadd.f32 %v1720_v38, %v1679_v27  ;;  %v1722_v42 = vpop.f32.mrb[10].mxu0  ;;  %1777 = sbr.rel (%p2247_p7) target bundleno = 459 (0x1cb), region = 36 }
 0x1af   : > { %v1763_v43 = vpop.f32.mrb[10].mxu1  ;;  %v1760_v44 = vadd.f32 %v1759_v36, %v1719_v37  ;;  %v1723_v46 = vpop.f32.mrb[11].mxu0  ;;  %v1787_v31 = vadd.f32 (!%p2247_p7), %v1786_v26, %v1785_v19  ;;  %v1820_v36 = vrot.slane (!%p2247_p7), %v1819_v28, 1 }
 0x1b0   : > { %v1764_v47 = vpop.f32.mrb[11].mxu1  ;;  %v1762_v48 = vadd.f32 %v1761_v39, %v1721_v41  ;;  %v1815_v39 = vadd.f32 (!%p2247_p7), %v1814_v34, %v1813_v14 }
 0x1b1   : > { %v1768_v49 = vadd.f32 %v1760_v44, %v342_v40  ;;  %1834 = vst [vmem:[%s2969_s3] sm:$0xff] (!%p2247_p7), %v1787_v31  ;;  %v1821_v40 = vadd.f32 (!%p2247_p7), %v1820_v36, %v1819_v28 }
 0x1b2   : > { %v1769_v50 = vadd.f32 %v1762_v48, %v343_v45  ;;  %1838 = vst [vmem:[%s2970_s4] sm:$0xff] (!%p2247_p7), %v1815_v39 }
 0x1b3   : > { %1772 = vst [vmem:[%s2968_s2 + $0x10] sm:$0xff] %v1768_v49  ;;  %1839 = vst [vmem:[%s2970_s4 + $0x8] sm:$0xff] (!%p2247_p7), %v1821_v40 }
 0x1b4   : > { %1773 = vst [vmem:[%s2968_s2 + $0x18] sm:$0xff] %v1769_v50 }
 0x1ba   : > { %v1780_v54 = vld [vmem:[%s2968_s2 + $0x10] sm:$0xff] }
 0x1bb   : > { %v1794_v57 = vrot.slane %v1780_v54, 4  ;;  %v1781_v58 = vld [vmem:[%s2968_s2 + $0x18] sm:$0xff]  ;;  %v1808_v62 = vmul.f32 %v1780_v54, %v1780_v54 }
 0x1bc   : > { %v1800_v60 = vrot.slane %v1781_v58, 4  ;;  %v1809_v63 = vmul.f32 %v1781_v58, %v1781_v58 }
 0x1bd   : > { %v1795_v2 = vadd.f32 %v1794_v57, %v1780_v54  ;;  %v1822_v6 = vrot.slane %v1808_v62, 4 }
 0x1be   : > { %v1801_v4 = vadd.f32 %v1800_v60, %v1781_v58  ;;  %v1828_v9 = vrot.slane %v1809_v63, 4 }
 0x1bf   : > { %v1796_v12 = vrot.slane %v1795_v2, 2  ;;  %v1823_v17 = vadd.f32 %v1822_v6, %v1808_v62 }
 0x1c0   : > { %v1802_v15 = vrot.slane %v1801_v4, 2  ;;  %v1829_v18 = vadd.f32 %v1828_v9, %v1809_v63 }
 0x1c1   : > { %v1797_v21 = vadd.f32 %v1796_v12, %v1795_v2  ;;  %v1824_v24 = vrot.slane %v1823_v17, 2 }
 0x1c2   : > { %v1803_v7 = vadd.f32 %v1802_v15, %v1801_v4  ;;  %v1830_v25 = vrot.slane %v1829_v18, 2 }
 0x1c3   : > { %v1798_v8 = vrot.slane %v1797_v21, 1  ;;  %v1825_v29 = vadd.f32 %v1824_v24, %v1823_v17 }
 0x1c4   : > { %v1804_v27 = vrot.slane %v1803_v7, 1  ;;  %v1831_v30 = vadd.f32 %v1830_v25, %v1829_v18 }
 0x1c5   : > { %v1799_v33 = vadd.f32 %v1798_v8, %v1797_v21  ;;  %v1826_v37 = vrot.slane %v1825_v29, 1 }
 0x1c6   : > { %v1805_v35 = vadd.f32 %v1804_v27, %v1803_v7  ;;  %v1832_v38 = vrot.slane %v1831_v30, 1 }
 0x1c7   : > { %1836 = vst [vmem:[%s2969_s3 + $0x10] sm:$0xff] %v1799_v33  ;;  %v1827_v41 = vadd.f32 %v1826_v37, %v1825_v29 }
 0x1c8   : > { %1837 = vst [vmem:[%s2969_s3 + $0x18] sm:$0xff] %v1805_v35  ;;  %v1833_v42 = vadd.f32 %v1832_v38, %v1831_v30 }
 0x1c9   : > { %1840 = vst [vmem:[%s2970_s4 + $0x10] sm:$0xff] %v1827_v41 }
 0x1ca   : > { %1841 = vst [vmem:[%s2970_s4 + $0x18] sm:$0xff] %v1833_v42 }
 0x1cb PF: > { %s15_s17 = sadd.s32 1, %s2598_s17   ;;  %s2971_s15 = smov %s2594_s16 }
 0x1cc   : > { %p12_p8 = scmp.ge.s32.totalorder %s15_s17, 5   ;;  %s2972_s16 = smov %s2974_s18 }
 0x1ce   :  { %14 = sbr.rel (!%p12_p8) target bundleno = 2 (0x2), region = 93 }

// kernel: resnet_forward.46
= control target key start
LH: loop header
LB: loop body
LE: loop exit
PB: predicated region body
PF: predicated region fallthrough
CT: control target
= control target key end

     0   :  { %s46_s0 = inlined_call_operand.vmem [shape: f32[2,1,512], index: 0, kind: input, shape index: {}]   ;;  %s47_s1 = inlined_call_operand.vmem [shape: f32[2,512], index: 1, kind: output, shape index: {}]  }
   0x1   :  { %v29_v0 = vld [vmem:[%s46_s0] sm:$0xff]  }
   0x2   :  { %28 = vst.sshfl [vmem:[%s47_s1] sm:$0xff pattern:$0x75316420] %v29_v0 }

// kernel: resnet_forward.43
= control target key start
LH: loop header
LB: loop body
LE: loop exit
PB: predicated region body
PF: predicated region fallthrough
CT: control target
= control target key end

     0   :  { %s2626_s15 = smov 0   ;;  %s2628_s16 = smov 0   ;;  %s2966_s0 = inlined_call_operand.vmem [shape: bf16[8,4608], index: 0, kind: input, shape index: {}]   ;;  %s2967_s1 = inlined_call_operand.vmem [shape: bf16[4608,512], index: 1, kind: input, shape index: {}]   ;;  %s2968_s2 = inlined_call_operand.vmem [shape: f32[8,512], index: 2, kind: output, shape index: {0}]   ;;  %s2969_s3 = inlined_call_operand.vmem [shape: f32[8,512], index: 3, kind: output, shape index: {1}]   ;;  %s2970_s4 = inlined_call_operand.vmem [shape: f32[8,512], index: 4, kind: output, shape index: {2}]  }
   0x1   :  { %s2630_s17 = smov 0  }
   0x2 LB: > { %s27_s18 = sadd.s32 1, %s2594_s16  ;;  %p2044_p0 = scmp.ge.s32.totalorder %s2598_s17, 1  ;;  %s2598_s17 = sphi %s2630_s17, %s15_s17   ;;  %s2594_s16 = sphi %s2628_s16, %s2972_s16   ;;  %s2590_s15 = sphi %s2626_s15, %s2971_s15  }
   0x3   : > { %p28_p1 = scmp.ge.s32.totalorder %s27_s18, 6  ;;  %p218_p2 = scmp.lt.s32.totalorder %s2598_s17, 7 }
   0x5   : > { %s2974_s18 = smov (%p28_p1, %s27_s18), 0  ;;  %p219_p3 = pnand %p2044_p0, %p218_p2 }
   0x6   : > { %s280_s19 = smul.u32 (!%p219_p3), 6, %s2590_s15  ;;  %p2048_p6 = scmp.ne.s32.totalorder (!%p219_p3), %s2590_s15, 0 }
   0x7   : > { %222 = sbr.rel (%p219_p3) target bundleno = 459 (0x1cb), region = 28 }
   0x8   : > { %s290_s20 = smul.u32 (!%p219_p3), 96, %s2590_s15  ;;  %p283_p4 = scmp.lt.s32.totalorder (!%p219_p3), %s280_s19, 35 }
   0xa   : > { %p292_p5 = scmp.lt.s32.totalorder (!%p219_p3), %s290_s20, 575 }
   0xe   : > { %s2976_s19 = smov (!%p283_p4, %s280_s19), 35  ;;  %s2978_s20 = smov (!%p292_p5, %s290_s20), 575 }
   0xf   : > { %s2045_s21 = sshll.u32 %s2976_s19, 2  ;;  %s2256_s25 = sshll.u32 %s2978_s20, 4  ;;  %v2600_v0 = vmov (!%p2048_p6), 0.0  }
  0x10   : > { %s2651_s24 = scalar_lea.vmem %s2966_s0, %s2045_s21  ;;  %s2656_s28 = scalar_lea.vmem %s2967_s1, %s2256_s25  ;;  %336 = vst [vmem:[%s2968_s2] sm:$0xff] (!%p2048_p6), %v2600_v0  ;;  %337 = vst [vmem:[%s2968_s2 + $0x8] sm:$0xff] (!%p2048_p6), %v2600_v0 }
  0x11   : > { %335 = sbr.rel (%p2048_p6) target bundleno = 24 (0x18), region = 32  ;;  %338 = vst [vmem:[%s2968_s2 + $0x10] sm:$0xff] (!%p2048_p6), %v2600_v0  ;;  %339 = vst [vmem:[%s2968_s2 + $0x18] sm:$0xff] (!%p2048_p6), %v2600_v0 }
  0x18 PF: > { %v2282_v1 = vld [vmem:[%s2656_s28 + $0x4] ss:$16 sps:$4 sm:$0xff]   ;;  %v2286_v3 = vld [vmem:[%s2656_s28] ss:$16 sps:$4 sm:$0xff]   ;;  %v345_v49 = vld [vmem:[%s2651_s24 + $0x8] sm:$0xff]  ;;  %p2247_p7 = scmp.ne.s32.totalorder %s2590_s15, 5 }
  0x19   : > { %v2284_v2 = vld [vmem:[%s2656_s28 + $0x204] ss:$16 sps:$4 sm:$0xff]   ;;  %1520 = vmatprep.subr.bf16.mxu0 %v2282_v1  ;;  %v2287_v4 = vld [vmem:[%s2656_s28 + $0x200] ss:$16 sps:$4 sm:$0xff]   ;;  %v2723_v52 = vcombine.high %v345_v49, %v345_v49 }
  0x1a   : > { %1561 = vmatprep.subr.bf16.mxu1 %v2284_v2  ;;  %v2288_v5 = vld [vmem:[%s2656_s28 + $0x24] ss:$16 sps:$4 sm:$0xff]   ;;  %1521 = vmatpush1.bf16.msra.mxu0 %v2286_v3  ;;  %v2292_v7 = vld [vmem:[%s2656_s28 + $0x20] ss:$16 sps:$4 sm:$0xff]  }
  0x1b   : > { %1562 = vmatpush1.bf16.msra.mxu1 %v2287_v4  ;;  %v2290_v6 = vld [vmem:[%s2656_s28 + $0x224] ss:$16 sps:$4 sm:$0xff]   ;;  %1522 = vmatprep.subr.bf16.mxu0 %v2288_v5  ;;  %v2293_v8 = vld [vmem:[%s2656_s28 + $0x220] ss:$16 sps:$4 sm:$0xff]  }
  0x1c   : > { %1563 = vmatprep.subr.bf16.mxu1 %v2290_v6  ;;  %v2294_v9 = vld [vmem:[%s2656_s28 + $0x44] ss:$16 sps:$4 sm:$0xff]   ;;  %v2298_v11 = vld [vmem:[%s2656_s28 + $0x40] ss:$16 sps:$4 sm:$0xff]   ;;  %1593 = vmatprep.mubr.bf16.mxu1 %v2723_v52  ;;  %v2387_v6 = vld [vmem:[%s2656_s28 + $0xc] ss:$16 sps:$4 sm:$0xff]  }
  0x1d   : > { %v2296_v10 = vld [vmem:[%s2656_s28 + $0x244] ss:$16 sps:$4 sm:$0xff]   ;;  %v2299_v12 = vld [vmem:[%s2656_s28 + $0x240] ss:$16 sps:$4 sm:$0xff]  }
  0x1e   : > { %1523 = vmatpush1.bf16.msra.mxu0 %v2292_v7  ;;  %v2300_v13 = vld [vmem:[%s2656_s28 + $0x64] ss:$16 sps:$4 sm:$0xff]   ;;  %v2304_v15 = vld [vmem:[%s2656_s28 + $0x60] ss:$16 sps:$4 sm:$0xff]  }
  0x1f   : > { %1564 = vmatpush1.bf16.msra.mxu1 %v2293_v8  ;;  %1524 = vmatprep.subr.bf16.mxu0 %v2294_v9  ;;  %v2302_v14 = vld [vmem:[%s2656_s28 + $0x264] ss:$16 sps:$4 sm:$0xff]   ;;  %v2305_v16 = vld [vmem:[%s2656_s28 + $0x260] ss:$16 sps:$4 sm:$0xff]   ;;  %v2747_v8 = vcombine.low %v345_v49, %v345_v49 }
  0x20   : > { %1565 = vmatprep.subr.bf16.mxu1 %v2296_v10  ;;  %v2306_v17 = vld [vmem:[%s2656_s28 + $0x84] ss:$16 sps:$4 sm:$0xff]   ;;  %v2310_v19 = vld [vmem:[%s2656_s28 + $0x80] ss:$16 sps:$4 sm:$0xff]   ;;  %v2385_v10 = vld [vmem:[%s2656_s28 + $0x8] ss:$16 sps:$4 sm:$0xff]  }
  0x21   : > { %v2308_v18 = vld [vmem:[%s2656_s28 + $0x284] ss:$16 sps:$4 sm:$0xff]   ;;  %v2311_v20 = vld [vmem:[%s2656_s28 + $0x280] ss:$16 sps:$4 sm:$0xff]  }
  0x22   : > { %1525 = vmatpush1.bf16.msra.mxu0 %v2298_v11  ;;  %v2312_v21 = vld [vmem:[%s2656_s28 + $0xa4] ss:$16 sps:$4 sm:$0xff]   ;;  %v2316_v23 = vld [vmem:[%s2656_s28 + $0xa0] ss:$16 sps:$4 sm:$0xff]  }
  0x23   : > { %1566 = vmatpush1.bf16.msra.mxu1 %v2299_v12  ;;  %1526 = vmatprep.subr.bf16.mxu0 %v2300_v13  ;;  %v2314_v22 = vld [vmem:[%s2656_s28 + $0x2a4] ss:$16 sps:$4 sm:$0xff]   ;;  %v2317_v24 = vld [vmem:[%s2656_s28 + $0x2a0] ss:$16 sps:$4 sm:$0xff]   ;;  %v2393_v12 = vld [vmem:[%s2656_s28 + $0x2c] ss:$16 sps:$4 sm:$0xff]  }
  0x24   : > { %1567 = vmatprep.subr.bf16.mxu1 %v2302_v14  ;;  %v2318_v25 = vld [vmem:[%s2656_s28 + $0xc4] ss:$16 sps:$4 sm:$0xff]   ;;  %v2322_v27 = vld [vmem:[%s2656_s28 + $0xc0] ss:$16 sps:$4 sm:$0xff]   ;;  %v2391_v14 = vld [vmem:[%s2656_s28 + $0x28] ss:$16 sps:$4 sm:$0xff]  }
  0x25   : > { %v2320_v26 = vld [vmem:[%s2656_s28 + $0x2c4] ss:$16 sps:$4 sm:$0xff]   ;;  %v2323_v28 = vld [vmem:[%s2656_s28 + $0x2c0] ss:$16 sps:$4 sm:$0xff]  }
  0x26   : > { %1527 = vmatpush1.bf16.msra.mxu0 %v2304_v15  ;;  %v2324_v29 = vld [vmem:[%s2656_s28 + $0xe4] ss:$16 sps:$4 sm:$0xff]   ;;  %v2328_v31 = vld [vmem:[%s2656_s28 + $0xe0] ss:$16 sps:$4 sm:$0xff]  }
  0x27   : > { %1568 = vmatpush1.bf16.msra.mxu1 %v2305_v16  ;;  %1528 = vmatprep.subr.bf16.mxu0 %v2306_v17  ;;  %v2326_v30 = vld [vmem:[%s2656_s28 + $0x2e4] ss:$16 sps:$4 sm:$0xff]   ;;  %v2329_v32 = vld [vmem:[%s2656_s28 + $0x2e0] ss:$16 sps:$4 sm:$0xff]   ;;  %v2399_v16 = vld [vmem:[%s2656_s28 + $0x4c] ss:$16 sps:$4 sm:$0xff]  }
  0x28   : > { %1569 = vmatprep.subr.bf16.mxu1 %v2308_v18  ;;  %v2330_v33 = vld [vmem:[%s2656_s28 + $0x104] ss:$16 sps:$4 sm:$0xff]   ;;  %v2334_v35 = vld [vmem:[%s2656_s28 + $0x100] ss:$16 sps:$4 sm:$0xff]   ;;  %v2397_v18 = vld [vmem:[%s2656_s28 + $0x48] ss:$16 sps:$4 sm:$0xff]  }
  0x29   : > { %v2332_v34 = vld [vmem:[%s2656_s28 + $0x304] ss:$16 sps:$4 sm:$0xff]   ;;  %v2335_v36 = vld [vmem:[%s2656_s28 + $0x300] ss:$16 sps:$4 sm:$0xff]  }
  0x2a   : > { %1529 = vmatpush1.bf16.msra.mxu0 %v2310_v19  ;;  %v2336_v37 = vld [vmem:[%s2656_s28 + $0x124] ss:$16 sps:$4 sm:$0xff]   ;;  %v2340_v39 = vld [vmem:[%s2656_s28 + $0x120] ss:$16 sps:$4 sm:$0xff]  }
  0x2b   : > { %1570 = vmatpush1.bf16.msra.mxu1 %v2311_v20  ;;  %1530 = vmatprep.subr.bf16.mxu0 %v2312_v21  ;;  %v2338_v38 = vld [vmem:[%s2656_s28 + $0x324] ss:$16 sps:$4 sm:$0xff]   ;;  %v2341_v40 = vld [vmem:[%s2656_s28 + $0x320] ss:$16 sps:$4 sm:$0xff]   ;;  %v2405_v20 = vld [vmem:[%s2656_s28 + $0x6c] ss:$16 sps:$4 sm:$0xff]  }
  0x2c   : > { %1571 = vmatprep.subr.bf16.mxu1 %v2314_v22  ;;  %v2342_v41 = vld [vmem:[%s2656_s28 + $0x144] ss:$16 sps:$4 sm:$0xff]   ;;  %v2346_v43 = vld [vmem:[%s2656_s28 + $0x140] ss:$16 sps:$4 sm:$0xff]   ;;  %v2403_v22 = vld [vmem:[%s2656_s28 + $0x68] ss:$16 sps:$4 sm:$0xff]  }
  0x2d   : > { %v2344_v42 = vld [vmem:[%s2656_s28 + $0x344] ss:$16 sps:$4 sm:$0xff]   ;;  %v2347_v44 = vld [vmem:[%s2656_s28 + $0x340] ss:$16 sps:$4 sm:$0xff]  }
  0x2e   : > { %1531 = vmatpush1.bf16.msra.mxu0 %v2316_v23  ;;  %v2348_v45 = vld [vmem:[%s2656_s28 + $0x164] ss:$16 sps:$4 sm:$0xff]   ;;  %v2352_v50 = vld [vmem:[%s2656_s28 + $0x160] ss:$16 sps:$4 sm:$0xff]  }
  0x2f   : > { %1572 = vmatpush1.bf16.msra.mxu1 %v2317_v24  ;;  %1532 = vmatprep.subr.bf16.mxu0 %v2318_v25  ;;  %v2350_v46 = vld [vmem:[%s2656_s28 + $0x364] ss:$16 sps:$4 sm:$0xff]   ;;  %v2353_v51 = vld [vmem:[%s2656_s28 + $0x360] ss:$16 sps:$4 sm:$0xff]   ;;  %v2411_v24 = vld [vmem:[%s2656_s28 + $0x8c] ss:$16 sps:$4 sm:$0xff]  }
  0x30   : > { %1573 = vmatprep.subr.bf16.mxu1 %v2320_v26  ;;  %v344_v47 = vld [vmem:[%s2651_s24] sm:$0xff]  ;;  %v2409_v26 = vld [vmem:[%s2656_s28 + $0x88] ss:$16 sps:$4 sm:$0xff]  }
  0x31   : > { %v2718_v48 = vcombine.high %v344_v47, %v344_v47  ;;  %v2354_v53 = vld [vmem:[%s2656_s28 + $0x184] ss:$16 sps:$4 sm:$0xff]   ;;  %v2358_v55 = vld [vmem:[%s2656_s28 + $0x180] ss:$16 sps:$4 sm:$0xff]   ;;  %v2745_v7 = vcombine.low %v344_v47, %v344_v47 }
  0x32   : > { %1533 = vmatpush1.bf16.msra.mxu0 %v2322_v27  ;;  %v2356_v54 = vld [vmem:[%s2656_s28 + $0x384] ss:$16 sps:$4 sm:$0xff]   ;;  %v2359_v56 = vld [vmem:[%s2656_s28 + $0x380] ss:$16 sps:$4 sm:$0xff]  }
  0x33   : > { %1574 = vmatpush1.bf16.msra.mxu1 %v2323_v28  ;;  %1534 = vmatprep.subr.bf16.mxu0 %v2324_v29  ;;  %v2360_v57 = vld [vmem:[%s2656_s28 + $0x1a4] ss:$16 sps:$4 sm:$0xff]   ;;  %v2364_v59 = vld [vmem:[%s2656_s28 + $0x1a0] ss:$16 sps:$4 sm:$0xff]   ;;  %v2417_v28 = vld [vmem:[%s2656_s28 + $0xac] ss:$16 sps:$4 sm:$0xff]  }
  0x34   : > { %1575 = vmatprep.subr.bf16.mxu1 %v2326_v30  ;;  %1552 = vmatprep.mubr.bf16.mxu0 %v2718_v48  ;;  %v2362_v58 = vld [vmem:[%s2656_s28 + $0x3a4] ss:$16 sps:$4 sm:$0xff]   ;;  %v2365_v60 = vld [vmem:[%s2656_s28 + $0x3a0] ss:$16 sps:$4 sm:$0xff]   ;;  %v2415_v30 = vld [vmem:[%s2656_s28 + $0xa8] ss:$16 sps:$4 sm:$0xff]  }
  0x35   : > { %v2366_v61 = vld [vmem:[%s2656_s28 + $0x1c4] ss:$16 sps:$4 sm:$0xff]   ;;  %v2370_v63 = vld [vmem:[%s2656_s28 + $0x1c0] ss:$16 sps:$4 sm:$0xff]  }
  0x36   : > { %1535 = vmatpush1.bf16.msra.mxu0 %v2328_v31  ;;  %v2368_v62 = vld [vmem:[%s2656_s28 + $0x3c4] ss:$16 sps:$4 sm:$0xff]   ;;  %v2371_v0 = vld [vmem:[%s2656_s28 + $0x3c0] ss:$16 sps:$4 sm:$0xff]  }
  0x37   : > { %1576 = vmatpush1.bf16.msra.mxu1 %v2329_v32  ;;  %1536 = vmatprep.subr.bf16.mxu0 %v2330_v33  ;;  %v2372_v1 = vld [vmem:[%s2656_s28 + $0x1e4] ss:$16 sps:$4 sm:$0xff]   ;;  %v2376_v3 = vld [vmem:[%s2656_s28 + $0x1e0] ss:$16 sps:$4 sm:$0xff]   ;;  %v2423_v32 = vld [vmem:[%s2656_s28 + $0xcc] ss:$16 sps:$4 sm:$0xff]  }
  0x38   : > { %1577 = vmatprep.subr.bf16.mxu1 %v2332_v34  ;;  %v2374_v2 = vld [vmem:[%s2656_s28 + $0x3e4] ss:$16 sps:$4 sm:$0xff]   ;;  %v2377_v4 = vld [vmem:[%s2656_s28 + $0x3e0] ss:$16 sps:$4 sm:$0xff]  }
  0x39   : > { %v2384_v5 = vld [vmem:[%s2656_s28 + $0x404] ss:$16 sps:$4 sm:$0xff]   ;;  %v2382_v9 = vld [vmem:[%s2656_s28 + $0x400] ss:$16 sps:$4 sm:$0xff]  }
  0x3a   : > { %1537 = vmatpush1.bf16.msra.mxu0 %v2334_v35  ;;  %v2390_v11 = vld [vmem:[%s2656_s28 + $0x424] ss:$16 sps:$4 sm:$0xff]   ;;  %v2388_v13 = vld [vmem:[%s2656_s28 + $0x420] ss:$16 sps:$4 sm:$0xff]  }
  0x3b   : > { %1578 = vmatpush1.bf16.msra.mxu1 %v2335_v36  ;;  %1538 = vmatprep.subr.bf16.mxu0 %v2336_v37  ;;  %v2396_v15 = vld [vmem:[%s2656_s28 + $0x444] ss:$16 sps:$4 sm:$0xff]   ;;  %v2394_v17 = vld [vmem:[%s2656_s28 + $0x440] ss:$16 sps:$4 sm:$0xff]   ;;  %v2421_v36 = vld [vmem:[%s2656_s28 + $0xc8] ss:$16 sps:$4 sm:$0xff]  }
  0x3c   : > { %1579 = vmatprep.subr.bf16.mxu1 %v2338_v38  ;;  %v2402_v19 = vld [vmem:[%s2656_s28 + $0x464] ss:$16 sps:$4 sm:$0xff]   ;;  %v2400_v21 = vld [vmem:[%s2656_s28 + $0x460] ss:$16 sps:$4 sm:$0xff]   ;;  %v2429_v38 = vld [vmem:[%s2656_s28 + $0xec] ss:$16 sps:$4 sm:$0xff]  }
  0x3d   : > { %v2408_v23 = vld [vmem:[%s2656_s28 + $0x484] ss:$16 sps:$4 sm:$0xff]   ;;  %v2406_v25 = vld [vmem:[%s2656_s28 + $0x480] ss:$16 sps:$4 sm:$0xff]  }
  0x3e   : > { %1539 = vmatpush1.bf16.msra.mxu0 %v2340_v39  ;;  %v2414_v27 = vld [vmem:[%s2656_s28 + $0x4a4] ss:$16 sps:$4 sm:$0xff]   ;;  %v2412_v29 = vld [vmem:[%s2656_s28 + $0x4a0] ss:$16 sps:$4 sm:$0xff]  }
  0x3f   : > { %1580 = vmatpush1.bf16.msra.mxu1 %v2341_v40  ;;  %1540 = vmatprep.subr.bf16.mxu0 %v2342_v41  ;;  %v2420_v31 = vld [vmem:[%s2656_s28 + $0x4c4] ss:$16 sps:$4 sm:$0xff]   ;;  %v2418_v34 = vld [vmem:[%s2656_s28 + $0x4c0] ss:$16 sps:$4 sm:$0xff]   ;;  %v2427_v40 = vld [vmem:[%s2656_s28 + $0xe8] ss:$16 sps:$4 sm:$0xff]  }
  0x40   : > { %1581 = vmatprep.subr.bf16.mxu1 %v2344_v42  ;;  %v2777_v33 = vld [vmem:[%s2651_s24 + $0x10] sm:$0xff]  ;;  %v2435_v42 = vld [vmem:[%s2656_s28 + $0x10c] ss:$16 sps:$4 sm:$0xff]  }
  0x41   : > { %v2782_v35 = vcombine.high %v2777_v33, %v2777_v33  ;;  %v2426_v37 = vld [vmem:[%s2656_s28 + $0x4e4] ss:$16 sps:$4 sm:$0xff]   ;;  %v2424_v39 = vld [vmem:[%s2656_s28 + $0x4e0] ss:$16 sps:$4 sm:$0xff]  }
  0x42   : > { %1541 = vmatpush1.bf16.msra.mxu0 %v2346_v43  ;;  %v2432_v41 = vld [vmem:[%s2656_s28 + $0x504] ss:$16 sps:$4 sm:$0xff]   ;;  %v2430_v43 = vld [vmem:[%s2656_s28 + $0x500] ss:$16 sps:$4 sm:$0xff]  }
  0x43   : > { %1582 = vmatpush1.bf16.msra.mxu1 %v2347_v44  ;;  %1542 = vmatprep.subr.bf16.mxu0 %v2348_v45  ;;  %v2433_v44 = vld [vmem:[%s2656_s28 + $0x108] ss:$16 sps:$4 sm:$0xff]   ;;  %v2438_v45 = vld [vmem:[%s2656_s28 + $0x524] ss:$16 sps:$4 sm:$0xff]   ;;  %v2436_v47 = vld [vmem:[%s2656_s28 + $0x520] ss:$16 sps:$4 sm:$0xff]  }
  0x44   : > { %1583 = vmatprep.subr.bf16.mxu1 %v2350_v46  ;;  %v2441_v46 = vld [vmem:[%s2656_s28 + $0x12c] ss:$16 sps:$4 sm:$0xff]   ;;  %v2444_v49 = vld [vmem:[%s2656_s28 + $0x544] ss:$16 sps:$4 sm:$0xff]  }
  0x46   : > { %1543 = vmatpush1.bf16.msra.mxu0 %v2352_v50  ;;  %v2447_v50 = vld [vmem:[%s2656_s28 + $0x14c] ss:$16 sps:$4 sm:$0xff]  }
  0x47   : > { %1584 = vmatpush1.bf16.msra.mxu1 %v2353_v51  ;;  %1544 = vmatprep.subr.bf16.mxu0 %v2354_v53  ;;  %v2442_v51 = vld [vmem:[%s2656_s28 + $0x540] ss:$16 sps:$4 sm:$0xff]   ;;  %v2445_v53 = vld [vmem:[%s2656_s28 + $0x148] ss:$16 sps:$4 sm:$0xff]  }
  0x48   : > { %1585 = vmatprep.subr.bf16.mxu1 %v2356_v54  ;;  %v2450_v54 = vld [vmem:[%s2656_s28 + $0x564] ss:$16 sps:$4 sm:$0xff]  }
  0x4a   : > { %1545 = vmatpush1.bf16.msra.mxu0 %v2358_v55  ;;  %v2453_v55 = vld [vmem:[%s2656_s28 + $0x16c] ss:$16 sps:$4 sm:$0xff]  }
  0x4b   : > { %1586 = vmatpush1.bf16.msra.mxu1 %v2359_v56  ;;  %1546 = vmatprep.subr.bf16.mxu0 %v2360_v57  ;;  %v2448_v56 = vld [vmem:[%s2656_s28 + $0x560] ss:$16 sps:$4 sm:$0xff]   ;;  %v2451_v57 = vld [vmem:[%s2656_s28 + $0x168] ss:$16 sps:$4 sm:$0xff]  }
  0x4c   : > { %1587 = vmatprep.subr.bf16.mxu1 %v2362_v58  ;;  %v2456_v58 = vld [vmem:[%s2656_s28 + $0x584] ss:$16 sps:$4 sm:$0xff]  }
  0x4e   : > { %1547 = vmatpush1.bf16.msra.mxu0 %v2364_v59  ;;  %v2459_v59 = vld [vmem:[%s2656_s28 + $0x18c] ss:$16 sps:$4 sm:$0xff]  }
  0x4f   : > { %1588 = vmatpush1.bf16.msra.mxu1 %v2365_v60  ;;  %1548 = vmatprep.subr.bf16.mxu0 %v2366_v61  ;;  %v2454_v60 = vld [vmem:[%s2656_s28 + $0x580] ss:$16 sps:$4 sm:$0xff]   ;;  %v2457_v61 = vld [vmem:[%s2656_s28 + $0x188] ss:$16 sps:$4 sm:$0xff]  }
  0x50   : > { %1589 = vmatprep.subr.bf16.mxu1 %v2368_v62  ;;  %v2462_v62 = vld [vmem:[%s2656_s28 + $0x5a4] ss:$16 sps:$4 sm:$0xff]  }
  0x52   : > { %1549 = vmatpush1.bf16.msra.mxu0 %v2370_v63  ;;  %v2465_v63 = vld [vmem:[%s2656_s28 + $0x1ac] ss:$16 sps:$4 sm:$0xff]  }
  0x53   : > { %1590 = vmatpush1.bf16.msra.mxu1 %v2371_v0  ;;  %1550 = vmatprep.subr.bf16.mxu0 %v2372_v1  ;;  %v2460_v0 = vld [vmem:[%s2656_s28 + $0x5a0] ss:$16 sps:$4 sm:$0xff]   ;;  %v2463_v1 = vld [vmem:[%s2656_s28 + $0x1a8] ss:$16 sps:$4 sm:$0xff]  }
  0x54   : > { %1591 = vmatprep.subr.bf16.mxu1 %v2374_v2  ;;  %v2468_v2 = vld [vmem:[%s2656_s28 + $0x5c4] ss:$16 sps:$4 sm:$0xff]  }
  0x56   : > { %1551 = vmatpush1.bf16.msra.mxu0 %v2376_v3  ;;  %v2471_v3 = vld [vmem:[%s2656_s28 + $0x1cc] ss:$16 sps:$4 sm:$0xff]  }
  0x57   : > { %1592 = vmatpush1.bf16.msra.mxu1 %v2377_v4  ;;  %1602 = vmatprep.subr.bf16.mxu0 %v2384_v5  ;;  %v2466_v4 = vld [vmem:[%s2656_s28 + $0x5c0] ss:$16 sps:$4 sm:$0xff]   ;;  %v2469_v5 = vld [vmem:[%s2656_s28 + $0x1c8] ss:$16 sps:$4 sm:$0xff]  }
  0x58   : > { %1643 = vmatprep.subr.bf16.mxu1 %v2387_v6  ;;  %v2474_v6 = vld [vmem:[%s2656_s28 + $0x5e4] ss:$16 sps:$4 sm:$0xff]  }
  0x59   : > { %1553 = vmatmul.mubr.bf16.vlgmr.msra.gmra.mrb[0].mxu0 %v2745_v7 }
  0x5a   : > { %1594 = vmatmul.mubr.bf16.vlgmr.msra.gmra.mrb[0].mxu1 %v2747_v8  ;;  %1603 = vmatpush1.bf16.msra.mxu0 %v2382_v9  ;;  %v2477_v9 = vld [vmem:[%s2656_s28 + $0x1ec] ss:$16 sps:$4 sm:$0xff]  }
  0x5b   : > { %1644 = vmatpush1.bf16.msra.mxu1 %v2385_v10  ;;  %1604 = vmatprep.subr.bf16.mxu0 %v2390_v11  ;;  %v2472_v10 = vld [vmem:[%s2656_s28 + $0x5e0] ss:$16 sps:$4 sm:$0xff]   ;;  %v2475_v11 = vld [vmem:[%s2656_s28 + $0x1e8] ss:$16 sps:$4 sm:$0xff]  }
  0x5c   : > { %1645 = vmatprep.subr.bf16.mxu1 %v2393_v12  ;;  %1675 = vmatprep.mubr.bf16.mxu1 %v2718_v48  ;;  %v2439_v48 = vld [vmem:[%s2656_s28 + $0x128] ss:$16 sps:$4 sm:$0xff]   ;;  %v2482_v12 = vld [vmem:[%s2656_s28 + $0x20c] ss:$16 sps:$4 sm:$0xff]  }
  0x5d   : > { %1634 = vmatprep.mubr.bf16.mxu0 %v2782_v35 }
  0x5e   : > { %1605 = vmatpush1.bf16.msra.mxu0 %v2388_v13  ;;  %v2485_v13 = vld [vmem:[%s2656_s28 + $0x40c] ss:$16 sps:$4 sm:$0xff]  }
  0x5f   : > { %1646 = vmatpush1.bf16.msra.mxu1 %v2391_v14  ;;  %1606 = vmatprep.subr.bf16.mxu0 %v2396_v15  ;;  %v2826_v14 = vcombine.low %v2777_v33, %v2777_v33  ;;  %v2480_v15 = vld [vmem:[%s2656_s28 + $0x208] ss:$16 sps:$4 sm:$0xff]  }
  0x60   : > { %1647 = vmatprep.subr.bf16.mxu1 %v2399_v16  ;;  %v2483_v16 = vld [vmem:[%s2656_s28 + $0x408] ss:$16 sps:$4 sm:$0xff]  }
  0x61   : > { %v2510_v33 = vld [vmem:[%s2656_s28 + $0x2a8] ss:$16 sps:$4 sm:$0xff]  }
  0x62   : > { %1607 = vmatpush1.bf16.msra.mxu0 %v2394_v17  ;;  %v2488_v17 = vld [vmem:[%s2656_s28 + $0x22c] ss:$16 sps:$4 sm:$0xff]  }
  0x63   : > { %1648 = vmatpush1.bf16.msra.mxu1 %v2397_v18  ;;  %1608 = vmatprep.subr.bf16.mxu0 %v2402_v19  ;;  %v2491_v18 = vld [vmem:[%s2656_s28 + $0x42c] ss:$16 sps:$4 sm:$0xff]   ;;  %v2486_v19 = vld [vmem:[%s2656_s28 + $0x228] ss:$16 sps:$4 sm:$0xff]  }
  0x64   : > { %1649 = vmatprep.subr.bf16.mxu1 %v2405_v20  ;;  %v2489_v20 = vld [vmem:[%s2656_s28 + $0x428] ss:$16 sps:$4 sm:$0xff]  }
  0x66   : > { %1609 = vmatpush1.bf16.msra.mxu0 %v2400_v21  ;;  %v2494_v21 = vld [vmem:[%s2656_s28 + $0x24c] ss:$16 sps:$4 sm:$0xff]  }
  0x67   : > { %1650 = vmatpush1.bf16.msra.mxu1 %v2403_v22  ;;  %1610 = vmatprep.subr.bf16.mxu0 %v2408_v23  ;;  %v2497_v22 = vld [vmem:[%s2656_s28 + $0x44c] ss:$16 sps:$4 sm:$0xff]   ;;  %v2495_v23 = vld [vmem:[%s2656_s28 + $0x448] ss:$16 sps:$4 sm:$0xff]  }
  0x68   : > { %1651 = vmatprep.subr.bf16.mxu1 %v2411_v24  ;;  %v2500_v24 = vld [vmem:[%s2656_s28 + $0x26c] ss:$16 sps:$4 sm:$0xff]  }
  0x6a   : > { %1611 = vmatpush1.bf16.msra.mxu0 %v2406_v25  ;;  %v2503_v25 = vld [vmem:[%s2656_s28 + $0x46c] ss:$16 sps:$4 sm:$0xff]  }
  0x6b   : > { %1652 = vmatpush1.bf16.msra.mxu1 %v2409_v26  ;;  %1612 = vmatprep.subr.bf16.mxu0 %v2414_v27  ;;  %v2498_v26 = vld [vmem:[%s2656_s28 + $0x268] ss:$16 sps:$4 sm:$0xff]   ;;  %v2506_v27 = vld [vmem:[%s2656_s28 + $0x28c] ss:$16 sps:$4 sm:$0xff]  }
  0x6c   : > { %1653 = vmatprep.subr.bf16.mxu1 %v2417_v28  ;;  %v2509_v28 = vld [vmem:[%s2656_s28 + $0x48c] ss:$16 sps:$4 sm:$0xff]  }
  0x6e   : > { %1613 = vmatpush1.bf16.msra.mxu0 %v2412_v29  ;;  %v2504_v29 = vld [vmem:[%s2656_s28 + $0x288] ss:$16 sps:$4 sm:$0xff]  }
  0x6f   : > { %1654 = vmatpush1.bf16.msra.mxu1 %v2415_v30  ;;  %1614 = vmatprep.subr.bf16.mxu0 %v2420_v31  ;;  %v2507_v30 = vld [vmem:[%s2656_s28 + $0x488] ss:$16 sps:$4 sm:$0xff]   ;;  %v2512_v31 = vld [vmem:[%s2656_s28 + $0x2ac] ss:$16 sps:$4 sm:$0xff]  }
  0x70   : > { %1655 = vmatprep.subr.bf16.mxu1 %v2423_v32  ;;  %v2515_v32 = vld [vmem:[%s2656_s28 + $0x4ac] ss:$16 sps:$4 sm:$0xff]  }
  0x72   : > { %1615 = vmatpush1.bf16.msra.mxu0 %v2418_v34  ;;  %v2513_v34 = vld [vmem:[%s2656_s28 + $0x4a8] ss:$16 sps:$4 sm:$0xff]  }
  0x73   : > { %1656 = vmatpush1.bf16.msra.mxu1 %v2421_v36  ;;  %1616 = vmatprep.subr.bf16.mxu0 %v2426_v37  ;;  %v2521_v36 = vld [vmem:[%s2656_s28 + $0x4cc] ss:$16 sps:$4 sm:$0xff]   ;;  %v2516_v37 = vld [vmem:[%s2656_s28 + $0x2c8] ss:$16 sps:$4 sm:$0xff]  }
  0x74   : > { %1657 = vmatprep.subr.bf16.mxu1 %v2429_v38  ;;  %v2519_v38 = vld [vmem:[%s2656_s28 + $0x4c8] ss:$16 sps:$4 sm:$0xff]  }
  0x76   : > { %1617 = vmatpush1.bf16.msra.mxu0 %v2424_v39  ;;  %v2524_v39 = vld [vmem:[%s2656_s28 + $0x2ec] ss:$16 sps:$4 sm:$0xff]  }
  0x77   : > { %1658 = vmatpush1.bf16.msra.mxu1 %v2427_v40  ;;  %1618 = vmatprep.subr.bf16.mxu0 %v2432_v41  ;;  %v2527_v40 = vld [vmem:[%s2656_s28 + $0x4ec] ss:$16 sps:$4 sm:$0xff]   ;;  %v2522_v41 = vld [vmem:[%s2656_s28 + $0x2e8] ss:$16 sps:$4 sm:$0xff]  }
  0x78   : > { %1659 = vmatprep.subr.bf16.mxu1 %v2435_v42  ;;  %v2525_v42 = vld [vmem:[%s2656_s28 + $0x4e8] ss:$16 sps:$4 sm:$0xff]  }
  0x7a   : > { %1619 = vmatpush1.bf16.msra.mxu0 %v2430_v43  ;;  %v2530_v43 = vld [vmem:[%s2656_s28 + $0x30c] ss:$16 sps:$4 sm:$0xff]  }
  0x7b   : > { %1660 = vmatpush1.bf16.msra.mxu1 %v2433_v44  ;;  %1620 = vmatprep.subr.bf16.mxu0 %v2438_v45  ;;  %v2533_v44 = vld [vmem:[%s2656_s28 + $0x50c] ss:$16 sps:$4 sm:$0xff]   ;;  %v2528_v45 = vld [vmem:[%s2656_s28 + $0x308] ss:$16 sps:$4 sm:$0xff]  }
  0x7c   : > { %1661 = vmatprep.subr.bf16.mxu1 %v2441_v46  ;;  %v2531_v46 = vld [vmem:[%s2656_s28 + $0x508] ss:$16 sps:$4 sm:$0xff]  }
  0x7e   : > { %1621 = vmatpush1.bf16.msra.mxu0 %v2436_v47  ;;  %v2536_v47 = vld [vmem:[%s2656_s28 + $0x32c] ss:$16 sps:$4 sm:$0xff]  }
  0x7f   : > { %1662 = vmatpush1.bf16.msra.mxu1 %v2439_v48  ;;  %1622 = vmatprep.subr.bf16.mxu0 %v2444_v49  ;;  %v2539_v48 = vld [vmem:[%s2656_s28 + $0x52c] ss:$16 sps:$4 sm:$0xff]   ;;  %v2534_v49 = vld [vmem:[%s2656_s28 + $0x328] ss:$16 sps:$4 sm:$0xff]  }
  0x80   : > { %1663 = vmatprep.subr.bf16.mxu1 %v2447_v50  ;;  %v2537_v50 = vld [vmem:[%s2656_s28 + $0x528] ss:$16 sps:$4 sm:$0xff]  }
  0x82   : > { %1623 = vmatpush1.bf16.msra.mxu0 %v2442_v51  ;;  %v2542_v51 = vld [vmem:[%s2656_s28 + $0x34c] ss:$16 sps:$4 sm:$0xff]  }
  0x83   : > { %1664 = vmatpush1.bf16.msra.mxu1 %v2445_v53  ;;  %1624 = vmatprep.subr.bf16.mxu0 %v2450_v54  ;;  %v2545_v53 = vld [vmem:[%s2656_s28 + $0x54c] ss:$16 sps:$4 sm:$0xff]   ;;  %v2540_v54 = vld [vmem:[%s2656_s28 + $0x348] ss:$16 sps:$4 sm:$0xff]  }
  0x84   : > { %1665 = vmatprep.subr.bf16.mxu1 %v2453_v55  ;;  %v2543_v55 = vld [vmem:[%s2656_s28 + $0x548] ss:$16 sps:$4 sm:$0xff]  }
  0x86   : > { %1625 = vmatpush1.bf16.msra.mxu0 %v2448_v56  ;;  %v2548_v56 = vld [vmem:[%s2656_s28 + $0x36c] ss:$16 sps:$4 sm:$0xff]  }
  0x87   : > { %1666 = vmatpush1.bf16.msra.mxu1 %v2451_v57  ;;  %1626 = vmatprep.subr.bf16.mxu0 %v2456_v58  ;;  %v2551_v57 = vld [vmem:[%s2656_s28 + $0x56c] ss:$16 sps:$4 sm:$0xff]   ;;  %v2546_v58 = vld [vmem:[%s2656_s28 + $0x368] ss:$16 sps:$4 sm:$0xff]  }
  0x88   : > { %1667 = vmatprep.subr.bf16.mxu1 %v2459_v59  ;;  %v2549_v59 = vld [vmem:[%s2656_s28 + $0x568] ss:$16 sps:$4 sm:$0xff]  }
  0x8a   : > { %1627 = vmatpush1.bf16.msra.mxu0 %v2454_v60  ;;  %v2554_v60 = vld [vmem:[%s2656_s28 + $0x38c] ss:$16 sps:$4 sm:$0xff]  }
  0x8b   : > { %1668 = vmatpush1.bf16.msra.mxu1 %v2457_v61  ;;  %1628 = vmatprep.subr.bf16.mxu0 %v2462_v62  ;;  %v2557_v61 = vld [vmem:[%s2656_s28 + $0x58c] ss:$16 sps:$4 sm:$0xff]   ;;  %v2552_v62 = vld [vmem:[%s2656_s28 + $0x388] ss:$16 sps:$4 sm:$0xff]  }
  0x8c   : > { %1669 = vmatprep.subr.bf16.mxu1 %v2465_v63  ;;  %v2555_v63 = vld [vmem:[%s2656_s28 + $0x588] ss:$16 sps:$4 sm:$0xff]  }
  0x8e   : > { %1629 = vmatpush1.bf16.msra.mxu0 %v2460_v0  ;;  %v2560_v0 = vld [vmem:[%s2656_s28 + $0x3ac] ss:$16 sps:$4 sm:$0xff]  }
  0x8f   : > { %1670 = vmatpush1.bf16.msra.mxu1 %v2463_v1  ;;  %1630 = vmatprep.subr.bf16.mxu0 %v2468_v2  ;;  %v2563_v1 = vld [vmem:[%s2656_s28 + $0x5ac] ss:$16 sps:$4 sm:$0xff]   ;;  %v2558_v2 = vld [vmem:[%s2656_s28 + $0x3a8] ss:$16 sps:$4 sm:$0xff]  }
  0x90   : > { %1671 = vmatprep.subr.bf16.mxu1 %v2471_v3  ;;  %v2561_v3 = vld [vmem:[%s2656_s28 + $0x5a8] ss:$16 sps:$4 sm:$0xff]  }
  0x92   : > { %1631 = vmatpush1.bf16.msra.mxu0 %v2466_v4  ;;  %v2566_v4 = vld [vmem:[%s2656_s28 + $0x3cc] ss:$16 sps:$4 sm:$0xff]  }
  0x93   : > { %1672 = vmatpush1.bf16.msra.mxu1 %v2469_v5  ;;  %1632 = vmatprep.subr.bf16.mxu0 %v2474_v6  ;;  %v2569_v5 = vld [vmem:[%s2656_s28 + $0x5cc] ss:$16 sps:$4 sm:$0xff]   ;;  %v2564_v6 = vld [vmem:[%s2656_s28 + $0x3c8] ss:$16 sps:$4 sm:$0xff]  }
  0x94   : > { %1673 = vmatprep.subr.bf16.mxu1 %v2477_v9  ;;  %v2567_v9 = vld [vmem:[%s2656_s28 + $0x5c8] ss:$16 sps:$4 sm:$0xff]  }
  0x96   : > { %1633 = vmatpush1.bf16.msra.mxu0 %v2472_v10  ;;  %v2572_v10 = vld [vmem:[%s2656_s28 + $0x3ec] ss:$16 sps:$4 sm:$0xff]  }
  0x97   : > { %1674 = vmatpush1.bf16.msra.mxu1 %v2475_v11  ;;  %1684 = vmatprep.subr.bf16.mxu0 %v2482_v12  ;;  %v2575_v11 = vld [vmem:[%s2656_s28 + $0x5ec] ss:$16 sps:$4 sm:$0xff]   ;;  %v2570_v12 = vld [vmem:[%s2656_s28 + $0x3e8] ss:$16 sps:$4 sm:$0xff]  }
  0x98   : > { %1725 = vmatprep.subr.bf16.mxu1 %v2485_v13  ;;  %v2573_v13 = vld [vmem:[%s2656_s28 + $0x5e8] ss:$16 sps:$4 sm:$0xff]  }
  0x99   : > { %1635 = vmatmul.mubr.bf16.vlgmr.msra.gmra.mrb[4].mxu0 %v2826_v14 }
  0x9a   : > { %1676 = vmatmul.mubr.bf16.vlgmr.msra.gmra.mrb[4].mxu1 %v2745_v7  ;;  %1685 = vmatpush1.bf16.msra.mxu0 %v2480_v15  ;;  %v2492_v7 = vld [vmem:[%s2656_s28 + $0x248] ss:$16 sps:$4 sm:$0xff]  }
  0x9b   : > { %1726 = vmatpush1.bf16.msra.mxu1 %v2483_v16  ;;  %1686 = vmatprep.subr.bf16.mxu0 %v2488_v17 }
  0x9c   : > { %1727 = vmatprep.subr.bf16.mxu1 %v2491_v18  ;;  %1716 = vmatprep.mubr.bf16.mxu0 %v2723_v52  ;;  %v2501_v52 = vld [vmem:[%s2656_s28 + $0x468] ss:$16 sps:$4 sm:$0xff]  }
  0x9d   : > { %1757 = vmatprep.mubr.bf16.mxu1 %v2782_v35  ;;  %v2518_v35 = vld [vmem:[%s2656_s28 + $0x2cc] ss:$16 sps:$4 sm:$0xff]  }
  0x9e   : > { %1687 = vmatpush1.bf16.msra.mxu0 %v2486_v19 }
  0x9f   : > { %1728 = vmatpush1.bf16.msra.mxu1 %v2489_v20  ;;  %1688 = vmatprep.subr.bf16.mxu0 %v2494_v21 }
  0xa0   : > { %1729 = vmatprep.subr.bf16.mxu1 %v2497_v22 }
  0xa2   : > { %1689 = vmatpush1.bf16.msra.mxu0 %v2492_v7 }
  0xa3   : > { %1730 = vmatpush1.bf16.msra.mxu1 %v2495_v23  ;;  %1690 = vmatprep.subr.bf16.mxu0 %v2500_v24  ;;  %v340_v24 = vld [vmem:[%s2968_s2] sm:$0xff] }
  0xa4   : > { %1731 = vmatprep.subr.bf16.mxu1 %v2503_v25 }
  0xa6   : > { %1691 = vmatpush1.bf16.msra.mxu0 %v2498_v26 }
  0xa7   : > { %1732 = vmatpush1.bf16.msra.mxu1 %v2501_v52  ;;  %1692 = vmatprep.subr.bf16.mxu0 %v2506_v27 }
  0xa8   : > { %1733 = vmatprep.subr.bf16.mxu1 %v2509_v28 }
  0xaa   : > { %1693 = vmatpush1.bf16.msra.mxu0 %v2504_v29 }
  0xab   : > { %1734 = vmatpush1.bf16.msra.mxu1 %v2507_v30  ;;  %1694 = vmatprep.subr.bf16.mxu0 %v2512_v31 }
  0xac   : > { %1735 = vmatprep.subr.bf16.mxu1 %v2515_v32 }
  0xae   : > { %1695 = vmatpush1.bf16.msra.mxu0 %v2510_v33 }
  0xaf   : > { %1736 = vmatpush1.bf16.msra.mxu1 %v2513_v34  ;;  %1696 = vmatprep.subr.bf16.mxu0 %v2518_v35 }
  0xb0   : > { %1737 = vmatprep.subr.bf16.mxu1 %v2521_v36 }
  0xb2   : > { %1697 = vmatpush1.bf16.msra.mxu0 %v2516_v37 }
  0xb3   : > { %1738 = vmatpush1.bf16.msra.mxu1 %v2519_v38  ;;  %1698 = vmatprep.subr.bf16.mxu0 %v2524_v39 }
  0xb4   : > { %1739 = vmatprep.subr.bf16.mxu1 %v2527_v40  ;;  %v342_v40 = vld [vmem:[%s2968_s2 + $0x10] sm:$0xff] }
  0xb6   : > { %1699 = vmatpush1.bf16.msra.mxu0 %v2522_v41 }
  0xb7   : > { %1740 = vmatpush1.bf16.msra.mxu1 %v2525_v42  ;;  %1700 = vmatprep.subr.bf16.mxu0 %v2530_v43 }
  0xb8   : > { %1741 = vmatprep.subr.bf16.mxu1 %v2533_v44 }
  0xba   : > { %1701 = vmatpush1.bf16.msra.mxu0 %v2528_v45  ;;  %v343_v45 = vld [vmem:[%s2968_s2 + $0x18] sm:$0xff] }
  0xbb   : > { %1742 = vmatpush1.bf16.msra.mxu1 %v2531_v46  ;;  %1702 = vmatprep.subr.bf16.mxu0 %v2536_v47 }
  0xbc   : > { %1743 = vmatprep.subr.bf16.mxu1 %v2539_v48 }
  0xbe   : > { %1703 = vmatpush1.bf16.msra.mxu0 %v2534_v49 }
  0xbf   : > { %1744 = vmatpush1.bf16.msra.mxu1 %v2537_v50  ;;  %1704 = vmatprep.subr.bf16.mxu0 %v2542_v51 }
  0xc0   : > { %1745 = vmatprep.subr.bf16.mxu1 %v2545_v53 }
  0xc2   : > { %1705 = vmatpush1.bf16.msra.mxu0 %v2540_v54 }
  0xc3   : > { %1746 = vmatpush1.bf16.msra.mxu1 %v2543_v55  ;;  %1706 = vmatprep.subr.bf16.mxu0 %v2548_v56 }
  0xc4   : > { %1747 = vmatprep.subr.bf16.mxu1 %v2551_v57 }
  0xc6   : > { %1707 = vmatpush1.bf16.msra.mxu0 %v2546_v58 }
  0xc7   : > { %1748 = vmatpush1.bf16.msra.mxu1 %v2549_v59  ;;  %1708 = vmatprep.subr.bf16.mxu0 %v2554_v60 }
  0xc8   : > { %1749 = vmatprep.subr.bf16.mxu1 %v2557_v61 }
  0xca   : > { %1709 = vmatpush1.bf16.msra.mxu0 %v2552_v62 }
  0xcb   : > { %1750 = vmatpush1.bf16.msra.mxu1 %v2555_v63  ;;  %1710 = vmatprep.subr.bf16.mxu0 %v2560_v0 }
  0xcc   : > { %1751 = vmatprep.subr.bf16.mxu1 %v2563_v1 }
  0xce   : > { %1711 = vmatpush1.bf16.msra.mxu0 %v2558_v2 }
  0xcf   : > { %1752 = vmatpush1.bf16.msra.mxu1 %v2561_v3  ;;  %1712 = vmatprep.subr.bf16.mxu0 %v2566_v4 }
  0xd0   : > { %1753 = vmatprep.subr.bf16.mxu1 %v2569_v5 }
  0xd2   : > { %1713 = vmatpush1.bf16.msra.mxu0 %v2564_v6 }
  0xd3   : > { %1754 = vmatpush1.bf16.msra.mxu1 %v2567_v9  ;;  %1714 = vmatprep.subr.bf16.mxu0 %v2572_v10 }
  0xd4   : > { %1755 = vmatprep.subr.bf16.mxu1 %v2575_v11 }
  0xd6   : > { %1715 = vmatpush1.bf16.msra.mxu0 %v2570_v12 }
  0xd7   : > { %1756 = vmatpush1.bf16.msra.mxu1 %v2573_v13 }
  0xd9   : > { %1717 = vmatmul.mubr.bf16.vlgmr.msra.gmra.mrb[8].mxu0 %v2747_v8  ;;  %v341_v8 = vld [vmem:[%s2968_s2 + $0x8] sm:$0xff] }
  0xda   : > { %1758 = vmatmul.mubr.bf16.vlgmr.msra.gmra.mrb[8].mxu1 %v2826_v14 }
 0x12c   : > { %v1554_v15 = vpop.f32.mrb[0].mxu0 }
 0x12d   : > { %v1595_v16 = vpop.f32.mrb[0].mxu1  ;;  %v1556_v18 = vpop.f32.mrb[1].mxu0 }
 0x12e   : > { %v1596_v17 = vadd.f32 %v1595_v16, %v1554_v15  ;;  %v1597_v19 = vpop.f32.mrb[1].mxu1  ;;  %v1558_v21 = vpop.f32.mrb[2].mxu0 }
 0x12f   : > { %v1598_v20 = vadd.f32 %v1597_v19, %v1556_v18  ;;  %v1599_v22 = vpop.f32.mrb[2].mxu1  ;;  %v1559_v7 = vpop.f32.mrb[3].mxu0 }
 0x130   : > { %v1600_v23 = vpop.f32.mrb[3].mxu1 }
 0x16c   : > { %v1636_v25 = vpop.f32.mrb[4].mxu0 }
 0x16d   : > { %v1677_v26 = vpop.f32.mrb[4].mxu1  ;;  %v1637_v52 = vadd.f32 %v1636_v25, %v1596_v17  ;;  %v1638_v14 = vpop.f32.mrb[5].mxu0 }
 0x16e   : > { %v1679_v27 = vpop.f32.mrb[5].mxu1  ;;  %v1639_v28 = vadd.f32 %v1638_v14, %v1598_v20  ;;  %v1640_v29 = vpop.f32.mrb[6].mxu0 }
 0x16f   : > { %v1681_v30 = vpop.f32.mrb[6].mxu1  ;;  %v1766_v31 = vadd.f32 %v1637_v52, %v340_v24  ;;  %v1641_v32 = vpop.f32.mrb[7].mxu0 }
 0x170   : > { %v1682_v33 = vpop.f32.mrb[7].mxu1  ;;  %v1767_v34 = vadd.f32 %v1639_v28, %v341_v8 }
 0x171   : > { %1770 = vst [vmem:[%s2968_s2] sm:$0xff] %v1766_v31 }
 0x172   : > { %1771 = vst [vmem:[%s2968_s2 + $0x8] sm:$0xff] %v1767_v34 }
 0x178   : > { %v1778_v51 = vld [vmem:[%s2968_s2] sm:$0xff] (!%p2247_p7) }
 0x179   : > { %v1779_v53 = vld [vmem:[%s2968_s2 + $0x8] sm:$0xff] (!%p2247_p7)  ;;  %v1782_v55 = vrot.slane (!%p2247_p7), %v1778_v51, 4  ;;  %v1806_v59 = vmul.f32 (!%p2247_p7), %v1778_v51, %v1778_v51 }
 0x17a   : > { %v1788_v56 = vrot.slane (!%p2247_p7), %v1779_v53, 4  ;;  %v1807_v61 = vmul.f32 (!%p2247_p7), %v1779_v53, %v1779_v53 }
 0x17b   : > { %v1783_v0 = vadd.f32 (!%p2247_p7), %v1782_v55, %v1778_v51  ;;  %v1810_v3 = vrot.slane (!%p2247_p7), %v1806_v59, 4 }
 0x17c   : > { %v1789_v1 = vadd.f32 (!%p2247_p7), %v1788_v56, %v1779_v53  ;;  %v1816_v5 = vrot.slane (!%p2247_p7), %v1807_v61, 4 }
 0x17d   : > { %v1784_v10 = vrot.slane (!%p2247_p7), %v1783_v0, 2  ;;  %v1811_v13 = vadd.f32 (!%p2247_p7), %v1810_v3, %v1806_v59 }
 0x17e   : > { %v1790_v11 = vrot.slane (!%p2247_p7), %v1789_v1, 2  ;;  %v1817_v16 = vadd.f32 (!%p2247_p7), %v1816_v5, %v1807_v61 }
 0x17f   : > { %v1785_v19 = vadd.f32 (!%p2247_p7), %v1784_v10, %v1783_v0  ;;  %v1812_v22 = vrot.slane (!%p2247_p7), %v1811_v13, 2 }
 0x180   : > { %v1791_v20 = vadd.f32 (!%p2247_p7), %v1790_v11, %v1789_v1  ;;  %v1818_v23 = vrot.slane (!%p2247_p7), %v1817_v16, 2 }
 0x181   : > { %v1813_v14 = vadd.f32 (!%p2247_p7), %v1812_v22, %v1811_v13 }
 0x182   : > { %v1792_v52 = vrot.slane (!%p2247_p7), %v1791_v20, 1  ;;  %v1819_v28 = vadd.f32 (!%p2247_p7), %v1818_v23, %v1817_v16 }
 0x183   : > { %v1814_v34 = vrot.slane (!%p2247_p7), %v1813_v14, 1 }
 0x184   : > { %v1793_v32 = vadd.f32 (!%p2247_p7), %v1792_v52, %v1791_v20 }
 0x186   : > { %1835 = vst [vmem:[%s2969_s3 + $0x8] sm:$0xff] (!%p2247_p7), %v1793_v32 }
 0x1ac   : > { %v1718_v35 = vpop.f32.mrb[8].mxu0 }
 0x1ad   : > { %v1759_v36 = vpop.f32.mrb[8].mxu1  ;;  %v1719_v37 = vadd.f32 %v1718_v35, %v1677_v26  ;;  %v1720_v38 = vpop.f32.mrb[9].mxu0  ;;  %v1786_v26 = vrot.slane (!%p2247_p7), %v1785_v19, 1 }
 0x1ae   : > { %v1761_v39 = vpop.f32.mrb[9].mxu1  ;;  %v1721_v41 = vadd.f32 %v1720_v38, %v1679_v27  ;;  %v1722_v42 = vpop.f32.mrb[10].mxu0  ;;  %1777 = sbr.rel (%p2247_p7) target bundleno = 459 (0x1cb), region = 36 }
 0x1af   : > { %v1763_v43 = vpop.f32.mrb[10].mxu1  ;;  %v1760_v44 = vadd.f32 %v1759_v36, %v1719_v37  ;;  %v1723_v46 = vpop.f32.mrb[11].mxu0  ;;  %v1787_v31 = vadd.f32 (!%p2247_p7), %v1786_v26, %v1785_v19  ;;  %v1820_v36 = vrot.slane (!%p2247_p7), %v1819_v28, 1 }
 0x1b0   : > { %v1764_v47 = vpop.f32.mrb[11].mxu1  ;;  %v1762_v48 = vadd.f32 %v1761_v39, %v1721_v41  ;;  %v1815_v39 = vadd.f32 (!%p2247_p7), %v1814_v34, %v1813_v14 }
 0x1b1   : > { %v1768_v49 = vadd.f32 %v1760_v44, %v342_v40  ;;  %1834 = vst [vmem:[%s2969_s3] sm:$0xff] (!%p2247_p7), %v1787_v31  ;;  %v1821_v40 = vadd.f32 (!%p2247_p7), %v1820_v36, %v1819_v28 }
 0x1b2   : > { %v1769_v50 = vadd.f32 %v1762_v48, %v343_v45  ;;  %1838 = vst [vmem:[%s2970_s4] sm:$0xff] (!%p2247_p7), %v1815_v39 }
 0x1b3   : > { %1772 = vst [vmem:[%s2968_s2 + $0x10] sm:$0xff] %v1768_v49  ;;  %1839 = vst [vmem:[%s2970_s4 + $0x8] sm:$0xff] (!%p2247_p7), %v1821_v40 }
 0x1b4   : > { %1773 = vst [vmem:[%s2968_s2 + $0x18] sm:$0xff] %v1769_v50 }
 0x1ba   : > { %v1780_v54 = vld [vmem:[%s2968_s2 + $0x10] sm:$0xff] }
 0x1bb   : > { %v1794_v57 = vrot.slane %v1780_v54, 4  ;;  %v1781_v58 = vld [vmem:[%s2968_s2 + $0x18] sm:$0xff]  ;;  %v1808_v62 = vmul.f32 %v1780_v54, %v1780_v54 }
 0x1bc   : > { %v1800_v60 = vrot.slane %v1781_v58, 4  ;;  %v1809_v63 = vmul.f32 %v1781_v58, %v1781_v58 }
 0x1bd   : > { %v1795_v2 = vadd.f32 %v1794_v57, %v1780_v54  ;;  %v1822_v6 = vrot.slane %v1808_v62, 4 }
 0x1be   : > { %v1801_v4 = vadd.f32 %v1800_v60, %v1781_v58  ;;  %v1828_v9 = vrot.slane %v1809_v63, 4 }
 0x1bf   : > { %v1796_v12 = vrot.slane %v1795_v2, 2  ;;  %v1823_v17 = vadd.f32 %v1822_v6, %v1808_v62 }
 0x1c0   : > { %v1802_v15 = vrot.slane %v1801_v4, 2  ;;  %v1829_v18 = vadd.f32 %v1828_v9, %v1809_v63 }
 0x1c1   : > { %v1797_v21 = vadd.f32 %v1796_v12, %v1795_v2  ;;  %v1824_v24 = vrot.slane %v1823_v17, 2 }
 0x1c2   : > { %v1803_v7 = vadd.f32 %v1802_v15, %v1801_v4  ;;  %v1830_v25 = vrot.slane %v1829_v18, 2 }
 0x1c3   : > { %v1798_v8 = vrot.slane %v1797_v21, 1  ;;  %v1825_v29 = vadd.f32 %v1824_v24, %v1823_v17 }
 0x1c4   : > { %v1804_v27 = vrot.slane %v1803_v7, 1  ;;  %v1831_v30 = vadd.f32 %v1830_v25, %v1829_v18 }
 0x1c5   : > { %v1799_v33 = vadd.f32 %v1798_v8, %v1797_v21  ;;  %v1826_v37 = vrot.slane %v1825_v29, 1 }
 0x1c6   : > { %v1805_v35 = vadd.f32 %v1804_v27, %v1803_v7  ;;  %v1832_v38 = vrot.slane %v1831_v30, 1 }
 0x1c7   : > { %1836 = vst [vmem:[%s2969_s3 + $0x10] sm:$0xff] %v1799_v33  ;;  %v1827_v41 = vadd.f32 %v1826_v37, %v1825_v29 }
 0x1c8   : > { %1837 = vst [vmem:[%s2969_s3 + $0x18] sm:$0xff] %v1805_v35  ;;  %v1833_v42 = vadd.f32 %v1832_v38, %v1831_v30 }
 0x1c9   : > { %1840 = vst [vmem:[%s2970_s4 + $0x10] sm:$0xff] %v1827_v41 }
 0x1ca   : > { %1841 = vst [vmem:[%s2970_s4 + $0x18] sm:$0xff] %v1833_v42 }
 0x1cb PF: > { %s15_s17 = sadd.s32 1, %s2598_s17   ;;  %s2971_s15 = smov %s2594_s16 }
 0x1cc   : > { %p12_p8 = scmp.ge.s32.totalorder %s15_s17, 8   ;;  %s2972_s16 = smov %s2974_s18 }
 0x1ce   :  { %14 = sbr.rel (!%p12_p8) target bundleno = 2 (0x2), region = 93 }

// kernel: resnet_forward.47
= control target key start
LH: loop header
LB: loop body
LE: loop exit
PB: predicated region body
PF: predicated region fallthrough
CT: control target
= control target key end

     0   :  { %s624_s1 = inlined_call_operand.vmem [shape: bf16[512,128], index: 1, kind: input, shape index: {}]   ;;  %s625_s0 = inlined_call_operand.vmem [shape: bf16[8,512], index: 0, kind: input, shape index: {}]   ;;  %s626_s2 = inlined_call_operand.vmem [shape: f32[1,128], index: 2, kind: input, shape index: {}]   ;;  %s627_s3 = inlined_call_operand.vmem [shape: f32[8,128], index: 3, kind: output, shape index: {}]  }
   0x1   :  { %v460_v0 = vld [vmem:[%s624_s1 + $0x40] sm:$0xff]   ;;  %v464_v4 = vld [vmem:[%s624_s1 + $0x48] sm:$0xff]   ;;  %v468_v8 = vld [vmem:[%s624_s1 + $0x50] sm:$0xff]  }
   0x2   :  { %v461_v1 = vld [vmem:[%s624_s1 + $0xc0] sm:$0xff]   ;;  %416 = vmatprep.subr.bf16.mxu0 %v460_v0  ;;  %v465_v5 = vld [vmem:[%s624_s1 + $0xc8] sm:$0xff]   ;;  %v469_v9 = vld [vmem:[%s624_s1 + $0xd0] sm:$0xff]  }
   0x3   :  { %v462_v2 = vld [vmem:[%s624_s1] sm:$0xff]   ;;  %438 = vmatprep.subr.bf16.mxu1 %v461_v1  ;;  %v466_v6 = vld [vmem:[%s624_s1 + $0x8] sm:$0xff]   ;;  %v470_v10 = vld [vmem:[%s624_s1 + $0x10] sm:$0xff]  }
   0x4   :  { %v463_v3 = vld [vmem:[%s624_s1 + $0x80] sm:$0xff]   ;;  %417 = vmatpush3.bf16.msra.mxu0 %v462_v2  ;;  %v467_v7 = vld [vmem:[%s624_s1 + $0x88] sm:$0xff]   ;;  %v471_v11 = vld [vmem:[%s624_s1 + $0x90] sm:$0xff]  }
   0x5   :  { %439 = vmatpush3.bf16.msra.mxu1 %v463_v3  ;;  %418 = vmatprep.subr.bf16.mxu0 %v464_v4  ;;  %v472_v12 = vld [vmem:[%s624_s1 + $0x58] sm:$0xff]   ;;  %v476_v16 = vld [vmem:[%s624_s1 + $0x60] sm:$0xff]   ;;  %v480_v20 = vld [vmem:[%s624_s1 + $0x68] sm:$0xff]  }
   0x6   :  { %440 = vmatprep.subr.bf16.mxu1 %v465_v5  ;;  %v473_v13 = vld [vmem:[%s624_s1 + $0xd8] sm:$0xff]   ;;  %v477_v17 = vld [vmem:[%s624_s1 + $0xe0] sm:$0xff]   ;;  %v481_v21 = vld [vmem:[%s624_s1 + $0xe8] sm:$0xff]  }
   0x7   :  { %v474_v14 = vld [vmem:[%s624_s1 + $0x18] sm:$0xff]   ;;  %v478_v18 = vld [vmem:[%s624_s1 + $0x20] sm:$0xff]   ;;  %v482_v22 = vld [vmem:[%s624_s1 + $0x28] sm:$0xff]  }
   0x8   :  { %419 = vmatpush3.bf16.msra.mxu0 %v466_v6  ;;  %v475_v15 = vld [vmem:[%s624_s1 + $0x98] sm:$0xff]   ;;  %v479_v19 = vld [vmem:[%s624_s1 + $0xa0] sm:$0xff]   ;;  %v483_v23 = vld [vmem:[%s624_s1 + $0xa8] sm:$0xff]  }
   0x9   :  { %441 = vmatpush3.bf16.msra.mxu1 %v467_v7  ;;  %420 = vmatprep.subr.bf16.mxu0 %v468_v8  ;;  %v484_v24 = vld [vmem:[%s624_s1 + $0x70] sm:$0xff]   ;;  %v488_v28 = vld [vmem:[%s624_s1 + $0x78] sm:$0xff]   ;;  %v15_v32 = vld [vmem:[%s625_s0] sm:$0xff] }
   0xa   :  { %442 = vmatprep.subr.bf16.mxu1 %v469_v9  ;;  %v485_v25 = vld [vmem:[%s624_s1 + $0xf0] sm:$0xff]   ;;  %v489_v29 = vld [vmem:[%s624_s1 + $0xf8] sm:$0xff]   ;;  %v16_v33 = vld [vmem:[%s625_s0 + $0x8] sm:$0xff]  ;;  %v380_v34 = vcombine.low %v15_v32, %v15_v32  ;;  %v381_v35 = vcombine.high %v15_v32, %v15_v32 }
   0xb   :  { %v486_v26 = vld [vmem:[%s624_s1 + $0x30] sm:$0xff]   ;;  %v490_v30 = vld [vmem:[%s624_s1 + $0x38] sm:$0xff]   ;;  %v382_v36 = vcombine.low %v16_v33, %v16_v33  ;;  %v383_v37 = vcombine.high %v16_v33, %v16_v33  ;;  %v379_v40 = vld [vmem:[%s626_s2] ss:$0 sm:$0xff] }
   0xc   :  { %421 = vmatpush3.bf16.msra.mxu0 %v470_v10  ;;  %v487_v27 = vld [vmem:[%s624_s1 + $0xb0] sm:$0xff]   ;;  %v491_v31 = vld [vmem:[%s624_s1 + $0xb8] sm:$0xff]   ;;  %326 = vmatprep.mubr.bf16.mxu0 %v381_v35 }
   0xd   :  { %443 = vmatpush3.bf16.msra.mxu1 %v471_v11  ;;  %422 = vmatprep.subr.bf16.mxu0 %v472_v12 }
   0xe   :  { %444 = vmatprep.subr.bf16.mxu1 %v473_v13  ;;  %366 = vmatprep.mubr.bf16.mxu1 %v383_v37 }
  0x10   :  { %423 = vmatpush3.bf16.msra.mxu0 %v474_v14 }
  0x11   :  { %445 = vmatpush3.bf16.msra.mxu1 %v475_v15  ;;  %424 = vmatprep.subr.bf16.mxu0 %v476_v16 }
  0x12   :  { %446 = vmatprep.subr.bf16.mxu1 %v477_v17 }
  0x14   :  { %425 = vmatpush3.bf16.msra.mxu0 %v478_v18 }
  0x15   :  { %447 = vmatpush3.bf16.msra.mxu1 %v479_v19  ;;  %426 = vmatprep.subr.bf16.mxu0 %v480_v20 }
  0x16   :  { %448 = vmatprep.subr.bf16.mxu1 %v481_v21 }
  0x18   :  { %427 = vmatpush3.bf16.msra.mxu0 %v482_v22 }
  0x19   :  { %449 = vmatpush3.bf16.msra.mxu1 %v483_v23  ;;  %428 = vmatprep.subr.bf16.mxu0 %v484_v24 }
  0x1a   :  { %450 = vmatprep.subr.bf16.mxu1 %v485_v25 }
  0x1c   :  { %429 = vmatpush3.bf16.msra.mxu0 %v486_v26 }
  0x1d   :  { %451 = vmatpush3.bf16.msra.mxu1 %v487_v27  ;;  %430 = vmatprep.subr.bf16.mxu0 %v488_v28 }
  0x1e   :  { %452 = vmatprep.subr.bf16.mxu1 %v489_v29 }
  0x20   :  { %431 = vmatpush3.bf16.msra.mxu0 %v490_v30 }
  0x21   :  { %453 = vmatpush3.bf16.msra.mxu1 %v491_v31 }
  0x23   :  { %327 = vmatmul.mubr.bf16.vlgmr.msra.gmra.mrb[0].mxu0 %v380_v34 }
  0x24   :  { %367 = vmatmul.mubr.bf16.vlgmr.msra.gmra.mrb[0].mxu1 %v382_v36 }
  0xf6   :  { %v432_v38 = vpop.f32.mrb[0].mxu0 }
  0xf7   :  { %v454_v39 = vpop.f32.mrb[0].mxu1  ;;  %v433_v41 = vpop.f32.mrb[1].mxu0 }
  0xf8   :  { %v455_v42 = vpop.f32.mrb[1].mxu1  ;;  %v434_v43 = vadd.f32 %v433_v41, %v432_v38  ;;  %v435_v45 = vpop.f32.mrb[2].mxu0 }
  0xf9   :  { %v456_v44 = vadd.f32 %v455_v42, %v454_v39  ;;  %v457_v46 = vpop.f32.mrb[2].mxu1  ;;  %v436_v47 = vpop.f32.mrb[3].mxu0 }
  0xfa   :  { %v458_v48 = vpop.f32.mrb[3].mxu1  ;;  %v329_v49 = vadd.f32 %v434_v43, %v379_v40 }
  0xfc   :  { %v369_v50 = vadd.f32 %v456_v44, %v329_v49 }
  0xfe   :  { %374 = vst [vmem:[%s627_s3] sm:$0xff] %v369_v50 }

</bundles_post_ra>
